<compile_context>
chip_gen: v5e
topology: v5e:2x2
jax: 0.10.0
libtpu: 0.0.40
codegen_flags: <defaults>
</compile_context>

<pallas_src>
import jax
import jax.numpy as jnp
import numpy as np
from jax import lax
from jax.experimental import pallas as pl
from jax.experimental.pallas import tpu as pltpu


def _round_up(x, m):
    return ((x + m - 1) // m) * m


def basic_block_pallas(x_nchw, w1_oihw, bn1, w2_oihw, bn2, eps=1e-5,
                       gemm_dtype=None):
    """BasicBlock.forward (eval-mode BN). NCHW in / NCHW out (PyTorch API).

    # TODO(synk): in a full network keep activations NHWC (and channel-padded)
    #             end-to-end and drop the boundary transposes/pads below.
    """
    N, Cin, H, W = x_nchw.shape
    Cout = w1_oihw.shape[0]
    assert Cin == Cout, "BasicBlock without downsample requires inplanes == planes"
    C = Cout
    dt = x_nchw.dtype
    esize = np.dtype(dt).itemsize
    op_dt = jnp.dtype(gemm_dtype) if gemm_dtype is not None else dt

    # --- lane-dense channel count (review item 1) ---
    Cp = max(128, _round_up(C, 128))

    # --- H row-strip size (review item 5): multiple of 8 for clean sublane
    #     alignment of the dynamic row slice; keep >=2 strips when possible.
    if H % 8 == 0 and H > 8:
        Sh = 8
        while (H % (Sh * 2) == 0 and H // (Sh * 2) >= 2
               and (Sh * 2 + 2) * (W + 2) * 9 * Cp * 4 < (6 << 20)):
            Sh *= 2
    else:
        Sh = H
    n_strips = H // Sh

    # --- fold BN (eval): y = x*s + b, f32; zero-pad to Cp lanes ---
    def fold(bn):
        gamma, beta, mean, var = (jnp.asarray(t, jnp.float32) for t in bn)
        s = gamma * lax.rsqrt(var + eps)
        b = beta - mean * s
        s = jnp.pad(s, (0, Cp - C))
        b = jnp.pad(b, (0, Cp - C))
        return s.reshape(1, Cp), b.reshape(1, Cp)

    s1, b1 = fold(bn1)
    s2, b2 = fold(bn2)

    # --- OIHW -> (9*Cp, Cp) GEMM weights (row = (ky*3+kx)*Cp + ci), padded
    #     channels are zero so they contribute nothing.
    def as_gemm(w_oihw):
        w = jnp.transpose(w_oihw, (2, 3, 1, 0))                 # (ky,kx,ci,co)
        w = jnp.pad(w, ((0, 0), (0, 0), (0, Cp - C), (0, Cp - C)))
        return w.reshape(9 * Cp, Cp).astype(op_dt)

    w1g, w2g = as_gemm(w1_oihw), as_gemm(w2_oihw)

    # --- NCHW -> NHWC, channel pad -> Cp, spatial pad 2 rows/cols of zeros
    #     (2 = conv1 pad + conv2 pad, so strip halos are plain loads).
    x_nhwc = jnp.transpose(x_nchw, (0, 2, 3, 1))
    x_pad = jnp.pad(x_nhwc, ((0, 0), (2, 2), (2, 2), (0, Cp - C)))

    def kernel(x_ref, w1_ref, s1_ref, b1_ref, w2_ref, s2_ref, b2_ref, out_ref):
        # x_ref : (H+4, W+4, Cp)   full padded image of this batch element
        # out_ref: (Sh, W, Cp)     this strip's output
        s = pl.program_id(1)
        r0 = pl.multiple_of(s * Sh, Sh)                 # first output row of strip

        # rows r0-2 .. r0+Sh+1, cols -2 .. W+1 (global coords, zero halo in HBM)
        xs = x_ref[pl.ds(r0, Sh + 4), :, :]             # (Sh+4, W+4, Cp) value

        def im2col(src, oh, ow):
            # 9 shifted slabs concatenated along lanes -> one big-K GEMM operand
            cols = []
            for ky in range(3):
                for kx in range(3):
                    cols.append(src[ky:ky + oh, kx:kx + ow, :].reshape(oh * ow, Cp))
            return jnp.concatenate(cols, axis=-1)        # (oh*ow, 9*Cp)

        # ---- conv1 + BN1 + ReLU over an (Sh+2) x (W+2) window (strip + halo) ----
        col1 = im2col(xs.astype(op_dt), Sh + 2, W + 2)
        acc1 = jnp.dot(col1, w1_ref[...], preferred_element_type=jnp.float32)
        mid = jnp.maximum(acc1 * s1_ref[...] + b1_ref[...], 0.0)
        mid = mid.reshape(Sh + 2, W + 2, Cp)

        # conv2's zero padding lives at the true image border, not the strip
        # border: zero any conv1-output position outside [0,H) x [0,W).
        gy = lax.broadcasted_iota(jnp.int32, (Sh + 2, W + 2, Cp), 0) + (r0 - 1)
        gx = lax.broadcasted_iota(jnp.int32, (Sh + 2, W + 2, Cp), 1) - 1
        valid = (gy >= 0) & (gy < H) & (gx >= 0) & (gx < W)
        mid = jnp.where(valid, mid, 0.0).astype(op_dt)

        # ---- conv2 + BN2 + residual + ReLU over the Sh x W strip ----
        col2 = im2col(mid, Sh, W)
        acc2 = jnp.dot(col2, w2_ref[...], preferred_element_type=jnp.float32)
        out2 = acc2 * s2_ref[...] + b2_ref[...]
        identity = xs[2:2 + Sh, 2:2 + W, :].reshape(Sh * W, Cp).astype(jnp.float32)
        res = jnp.maximum(out2 + identity, 0.0)
        out_ref[...] = res.reshape(Sh, W, Cp).astype(out_ref.dtype)

    # ---- cost estimate: two big-K GEMMs per strip ----
    flops = 2 * N * n_strips * ((Sh + 2) * (W + 2) + Sh * W) * (9 * Cp) * Cp
    bytes_accessed = int(x_pad.size * esize + N * H * W * Cp * esize
                         + 2 * 9 * Cp * Cp * esize + 4 * Cp * 4)

    # ---- VMEM budget from the real footprint (review item 6) ----
    xblk = (H + 4) * (W + 4) * Cp * esize
    oblk = Sh * W * Cp * esize
    wblk = 2 * 9 * Cp * Cp * esize
    bnblk = 4 * Cp * 4
    dbuf = 2 * (xblk + oblk + wblk + bnblk)              # double-buffered blocks
    temps = (((Sh + 2) * (W + 2) + Sh * W) * 9 * Cp      # im2col values
             + 6 * (Sh + 4) * (W + 4) * Cp) * 4          # masks / f32 temps slack
    vmem_bytes = int(min(max(dbuf + temps + (8 << 20), 16 << 20), 48 << 20))

    out_nhwc = pl.pallas_call(
        kernel,
        out_shape=jax.ShapeDtypeStruct((N, H, W, Cp), dt),
        grid=(N, n_strips),
        in_specs=[
            pl.BlockSpec((None, H + 4, W + 4, Cp), lambda n, s: (n, 0, 0, 0)),  # x (per batch, strip-invariant)
            pl.BlockSpec((9 * Cp, Cp), lambda n, s: (0, 0)),                    # w1 (resident)
            pl.BlockSpec((1, Cp), lambda n, s: (0, 0)),                         # s1
            pl.BlockSpec((1, Cp), lambda n, s: (0, 0)),                         # b1
            pl.BlockSpec((9 * Cp, Cp), lambda n, s: (0, 0)),                    # w2 (resident)
            pl.BlockSpec((1, Cp), lambda n, s: (0, 0)),                         # s2
            pl.BlockSpec((1, Cp), lambda n, s: (0, 0)),                         # b2
        ],
        out_specs=pl.BlockSpec((None, Sh, W, Cp), lambda n, s: (n, s, 0, 0)),
        compiler_params=pltpu.CompilerParams(
            dimension_semantics=("parallel", "parallel"),
            vmem_limit_bytes=vmem_bytes),
        cost_estimate=pl.CostEstimate(
            flops=flops, transcendentals=0, bytes_accessed=bytes_accessed),
    )(x_pad, w1g, s1, b1, w2g, s2, b2)

    return jnp.transpose(out_nhwc[:, :, :, :C], (0, 3, 1, 2))


def basic_block_reference(x, w1, bn1, w2, bn2, eps=1e-5):
    """Pure-JAX reference (NCHW), mirrors the PyTorch module in eval mode."""
    def bn_apply(y, bn):
        gamma, beta, mean, var = bn
        s = gamma * lax.rsqrt(var + eps)
        b = beta - mean * s
        return y * s[None, :, None, None] + b[None, :, None, None]

    conv = lambda a, w: lax.conv_general_dilated(
        a, w, window_strides=(1, 1), padding=((1, 1), (1, 1)),
        dimension_numbers=('NCHW', 'OIHW', 'NCHW'))

    out = jnp.maximum(bn_apply(conv(x, w1), bn1), 0.0)
    out = bn_apply(conv(out, w2), bn2)
    return jnp.maximum(out + x, 0.0)


if __name__ == "__main__":
    key = jax.random.PRNGKey(0)
    ks = jax.random.split(key, 12)

    # BasicBlock(inplanes=4, planes=4, stride=1, downsample=None)
    N, C, H, W = 2, 4, 16, 16
    inplanes = planes = C

    x = jax.random.normal(ks[0], (N, C, H, W), jnp.float32)

    # conv weights (OIHW), kaiming-like deterministic init
    std1 = (2.0 / (inplanes * 9)) ** 0.5
    std2 = (2.0 / (planes * 9)) ** 0.5
    w1 = std1 * jax.random.normal(ks[1], (planes, inplanes, 3, 3), jnp.float32)
    w2 = std2 * jax.random.normal(ks[2], (planes, planes, 3, 3), jnp.float32)

    # BN params: (gamma, beta, running_mean, running_var)
    bn1 = (1.0 + 0.1 * jax.random.normal(ks[3], (planes,), jnp.float32),
           0.1 * jax.random.normal(ks[4], (planes,), jnp.float32),
           0.1 * jax.random.normal(ks[5], (planes,), jnp.float32),
           jax.random.uniform(ks[6], (planes,), jnp.float32, 0.5, 1.5))
    bn2 = (1.0 + 0.1 * jax.random.normal(ks[7], (planes,), jnp.float32),
           0.1 * jax.random.normal(ks[8], (planes,), jnp.float32),
           0.1 * jax.random.normal(ks[9], (planes,), jnp.float32),
           jax.random.uniform(ks[10], (planes,), jnp.float32, 0.5, 1.5))

    out = jax.block_until_ready(basic_block_pallas(x, w1, bn1, w2, bn2))
    ref = jax.block_until_ready(basic_block_reference(x, w1, bn1, w2, bn2))

    np.testing.assert_allclose(np.asarray(out), np.asarray(ref),
                               rtol=1e-4, atol=1e-4)
    print("KERNEL_OK")
</pallas_src>

<mosaic_0001>
module attributes {stable_mosaic.version = 11 : i64} {
  func.func @kernel(%arg0: i32, %arg1: i32, %arg2: memref<1x20x20x128xf32, #tpu.memory_space<vmem>>, %arg3: memref<1152x128xf32, #tpu.memory_space<vmem>>, %arg4: memref<1x128xf32, #tpu.memory_space<vmem>>, %arg5: memref<1x128xf32, #tpu.memory_space<vmem>>, %arg6: memref<1152x128xf32, #tpu.memory_space<vmem>>, %arg7: memref<1x128xf32, #tpu.memory_space<vmem>>, %arg8: memref<1x128xf32, #tpu.memory_space<vmem>>, %arg9: memref<1x8x16x128xf32, #tpu.memory_space<vmem>>) attributes {dimension_semantics = [#tpu.dimension_semantics<parallel>, #tpu.dimension_semantics<parallel>], iteration_bounds = array<i64: 2, 2>, scalar_prefetch = 0 : i64, scratch_operands = 0 : i64, tpu.core_type = #tpu.core_type<tc>, window_params = [{transform_indices = @transform_0, window_bounds = array<i64: 1, 20, 20, 128>}, {pipeline_mode = #tpu.pipeline_mode<synchronous>, transform_indices = @transform_1, window_bounds = array<i64: 1152, 128>}, {pipeline_mode = #tpu.pipeline_mode<synchronous>, transform_indices = @transform_2, window_bounds = array<i64: 1, 128>}, {pipeline_mode = #tpu.pipeline_mode<synchronous>, transform_indices = @transform_3, window_bounds = array<i64: 1, 128>}, {pipeline_mode = #tpu.pipeline_mode<synchronous>, transform_indices = @transform_4, window_bounds = array<i64: 1152, 128>}, {pipeline_mode = #tpu.pipeline_mode<synchronous>, transform_indices = @transform_5, window_bounds = array<i64: 1, 128>}, {pipeline_mode = #tpu.pipeline_mode<synchronous>, transform_indices = @transform_6, window_bounds = array<i64: 1, 128>}, {transform_indices = @transform_7, window_bounds = array<i64: 1, 8, 16, 128>}]} {
    %c8_i32 = arith.constant 8 : i32
    %0 = arith.muli %arg1, %c8_i32 : i32
    %1 = tpu.assume_multiple %0, 8 : i32
    %c0 = arith.constant 0 : index
    %2 = arith.index_cast %1 : i32 to index
    %c0_0 = arith.constant 0 : index
    %c0_1 = arith.constant 0 : index
    %3 = vector.load %arg2[%c0, %2, %c0_0, %c0_1] : memref<1x20x20x128xf32, #tpu.memory_space<vmem>>, vector<1x12x20x128xf32>
    %4 = vector.shape_cast %3 : vector<1x12x20x128xf32> to vector<12x20x128xf32>
    %5 = vector.extract_strided_slice %4 {offsets = [0, 0, 0], sizes = [10, 18, 128], strides = [1, 1, 1]} : vector<12x20x128xf32> to vector<10x18x128xf32>
    %6 = vector.shape_cast %5 : vector<10x18x128xf32> to vector<180x128xf32>
    %7 = vector.extract_strided_slice %4 {offsets = [0, 1, 0], sizes = [10, 18, 128], strides = [1, 1, 1]} : vector<12x20x128xf32> to vector<10x18x128xf32>
    %8 = vector.shape_cast %7 : vector<10x18x128xf32> to vector<180x128xf32>
    %9 = vector.extract_strided_slice %4 {offsets = [0, 2, 0], sizes = [10, 18, 128], strides = [1, 1, 1]} : vector<12x20x128xf32> to vector<10x18x128xf32>
    %10 = vector.shape_cast %9 : vector<10x18x128xf32> to vector<180x128xf32>
    %11 = vector.extract_strided_slice %4 {offsets = [1, 0, 0], sizes = [10, 18, 128], strides = [1, 1, 1]} : vector<12x20x128xf32> to vector<10x18x128xf32>
    %12 = vector.shape_cast %11 : vector<10x18x128xf32> to vector<180x128xf32>
    %13 = vector.extract_strided_slice %4 {offsets = [1, 1, 0], sizes = [10, 18, 128], strides = [1, 1, 1]} : vector<12x20x128xf32> to vector<10x18x128xf32>
    %14 = vector.shape_cast %13 : vector<10x18x128xf32> to vector<180x128xf32>
    %15 = vector.extract_strided_slice %4 {offsets = [1, 2, 0], sizes = [10, 18, 128], strides = [1, 1, 1]} : vector<12x20x128xf32> to vector<10x18x128xf32>
    %16 = vector.shape_cast %15 : vector<10x18x128xf32> to vector<180x128xf32>
    %17 = vector.extract_strided_slice %4 {offsets = [2, 0, 0], sizes = [10, 18, 128], strides = [1, 1, 1]} : vector<12x20x128xf32> to vector<10x18x128xf32>
    %18 = vector.shape_cast %17 : vector<10x18x128xf32> to vector<180x128xf32>
    %19 = vector.extract_strided_slice %4 {offsets = [2, 1, 0], sizes = [10, 18, 128], strides = [1, 1, 1]} : vector<12x20x128xf32> to vector<10x18x128xf32>
    %20 = vector.shape_cast %19 : vector<10x18x128xf32> to vector<180x128xf32>
    %21 = vector.extract_strided_slice %4 {offsets = [2, 2, 0], sizes = [10, 18, 128], strides = [1, 1, 1]} : vector<12x20x128xf32> to vector<10x18x128xf32>
    %22 = vector.shape_cast %21 : vector<10x18x128xf32> to vector<180x128xf32>
    %23 = tpu.concatenate %6, %8, %10, %12, %14, %16, %18, %20, %22 in 1 : vector<180x128xf32>, vector<180x128xf32>, vector<180x128xf32>, vector<180x128xf32>, vector<180x128xf32>, vector<180x128xf32>, vector<180x128xf32>, vector<180x128xf32>, vector<180x128xf32> -> vector<180x1152xf32>
    %c0_2 = arith.constant 0 : index
    %c0_3 = arith.constant 0 : index
    %24 = vector.load %arg3[%c0_2, %c0_3] : memref<1152x128xf32, #tpu.memory_space<vmem>>, vector<1152x128xf32>
    %cst = arith.constant dense<0.000000e+00> : vector<180x128xf32>
    %25 = tpu.matmul %23, %24, %cst {dimension_numbers = #tpu.dot_dimension_numbers<[1], [0], [0], [1], [0, 0, 1, 1], [], []>} : vector<180x1152xf32>, vector<1152x128xf32>, vector<180x128xf32> -> vector<180x128xf32>
    %c0_4 = arith.constant 0 : index
    %c0_5 = arith.constant 0 : index
    %26 = vector.load %arg4[%c0_4, %c0_5] : memref<1x128xf32, #tpu.memory_space<vmem>>, vector<1x128xf32>
    %27 = vector.broadcast %26 : vector<1x128xf32> to vector<180x128xf32>
    %28 = arith.mulf %25, %27 : vector<180x128xf32>
    %c0_6 = arith.constant 0 : index
    %c0_7 = arith.constant 0 : index
    %29 = vector.load %arg5[%c0_6, %c0_7] : memref<1x128xf32, #tpu.memory_space<vmem>>, vector<1x128xf32>
    %30 = vector.broadcast %29 : vector<1x128xf32> to vector<180x128xf32>
    %31 = arith.addf %28, %30 : vector<180x128xf32>
    %cst_8 = arith.constant 0.000000e+00 : f32
    %32 = vector.broadcast %cst_8 : f32 to vector<180x128xf32>
    %33 = arith.maximumf %31, %32 : vector<180x128xf32>
    %34 = vector.shape_cast %33 : vector<180x128xf32> to vector<10x18x128xf32>
    %35 = tpu.iota {dimensions = array<i32: 0>} : vector<10x18x128xi32>
    %c1_i32 = arith.constant 1 : i32
    %36 = arith.subi %1, %c1_i32 : i32
    %37 = vector.broadcast %36 : i32 to vector<10x18x128xi32>
    %38 = arith.addi %35, %37 : vector<10x18x128xi32>
    %39 = tpu.iota {dimensions = array<i32: 1>} : vector<10x18x128xi32>
    %c1_i32_9 = arith.constant 1 : i32
    %40 = vector.broadcast %c1_i32_9 : i32 to vector<10x18x128xi32>
    %41 = arith.subi %39, %40 : vector<10x18x128xi32>
    %c0_i32 = arith.constant 0 : i32
    %42 = vector.broadcast %c0_i32 : i32 to vector<10x18x128xi32>
    %43 = arith.cmpi sge, %38, %42 : vector<10x18x128xi32>
    %c16_i32 = arith.constant 16 : i32
    %44 = vector.broadcast %c16_i32 : i32 to vector<10x18x128xi32>
    %45 = arith.cmpi slt, %38, %44 : vector<10x18x128xi32>
    %46 = arith.andi %43, %45 : vector<10x18x128xi1>
    %c0_i32_10 = arith.constant 0 : i32
    %47 = vector.broadcast %c0_i32_10 : i32 to vector<10x18x128xi32>
    %48 = arith.cmpi sge, %41, %47 : vector<10x18x128xi32>
    %49 = arith.andi %46, %48 : vector<10x18x128xi1>
    %c16_i32_11 = arith.constant 16 : i32
    %50 = vector.broadcast %c16_i32_11 : i32 to vector<10x18x128xi32>
    %51 = arith.cmpi slt, %41, %50 : vector<10x18x128xi32>
    %52 = arith.andi %49, %51 : vector<10x18x128xi1>
    %cst_12 = arith.constant 0.000000e+00 : f32
    %53 = vector.broadcast %cst_12 : f32 to vector<10x18x128xf32>
    %54 = arith.select %52, %34, %53 : vector<10x18x128xi1>, vector<10x18x128xf32>
    %55 = vector.extract_strided_slice %54 {offsets = [0, 0, 0], sizes = [8, 16, 128], strides = [1, 1, 1]} : vector<10x18x128xf32> to vector<8x16x128xf32>
    %56 = vector.shape_cast %55 : vector<8x16x128xf32> to vector<128x128xf32>
    %57 = vector.extract_strided_slice %54 {offsets = [0, 1, 0], sizes = [8, 16, 128], strides = [1, 1, 1]} : vector<10x18x128xf32> to vector<8x16x128xf32>
    %58 = vector.shape_cast %57 : vector<8x16x128xf32> to vector<128x128xf32>
    %59 = vector.extract_strided_slice %54 {offsets = [0, 2, 0], sizes = [8, 16, 128], strides = [1, 1, 1]} : vector<10x18x128xf32> to vector<8x16x128xf32>
    %60 = vector.shape_cast %59 : vector<8x16x128xf32> to vector<128x128xf32>
    %61 = vector.extract_strided_slice %54 {offsets = [1, 0, 0], sizes = [8, 16, 128], strides = [1, 1, 1]} : vector<10x18x128xf32> to vector<8x16x128xf32>
    %62 = vector.shape_cast %61 : vector<8x16x128xf32> to vector<128x128xf32>
    %63 = vector.extract_strided_slice %54 {offsets = [1, 1, 0], sizes = [8, 16, 128], strides = [1, 1, 1]} : vector<10x18x128xf32> to vector<8x16x128xf32>
    %64 = vector.shape_cast %63 : vector<8x16x128xf32> to vector<128x128xf32>
    %65 = vector.extract_strided_slice %54 {offsets = [1, 2, 0], sizes = [8, 16, 128], strides = [1, 1, 1]} : vector<10x18x128xf32> to vector<8x16x128xf32>
    %66 = vector.shape_cast %65 : vector<8x16x128xf32> to vector<128x128xf32>
    %67 = vector.extract_strided_slice %54 {offsets = [2, 0, 0], sizes = [8, 16, 128], strides = [1, 1, 1]} : vector<10x18x128xf32> to vector<8x16x128xf32>
    %68 = vector.shape_cast %67 : vector<8x16x128xf32> to vector<128x128xf32>
    %69 = vector.extract_strided_slice %54 {offsets = [2, 1, 0], sizes = [8, 16, 128], strides = [1, 1, 1]} : vector<10x18x128xf32> to vector<8x16x128xf32>
    %70 = vector.shape_cast %69 : vector<8x16x128xf32> to vector<128x128xf32>
    %71 = vector.extract_strided_slice %54 {offsets = [2, 2, 0], sizes = [8, 16, 128], strides = [1, 1, 1]} : vector<10x18x128xf32> to vector<8x16x128xf32>
    %72 = vector.shape_cast %71 : vector<8x16x128xf32> to vector<128x128xf32>
    %73 = tpu.concatenate %56, %58, %60, %62, %64, %66, %68, %70, %72 in 1 : vector<128x128xf32>, vector<128x128xf32>, vector<128x128xf32>, vector<128x128xf32>, vector<128x128xf32>, vector<128x128xf32>, vector<128x128xf32>, vector<128x128xf32>, vector<128x128xf32> -> vector<128x1152xf32>
    %c0_13 = arith.constant 0 : index
    %c0_14 = arith.constant 0 : index
    %74 = vector.load %arg6[%c0_13, %c0_14] : memref<1152x128xf32, #tpu.memory_space<vmem>>, vector<1152x128xf32>
    %cst_15 = arith.constant dense<0.000000e+00> : vector<128x128xf32>
    %75 = tpu.matmul %73, %74, %cst_15 {dimension_numbers = #tpu.dot_dimension_numbers<[1], [0], [0], [1], [0, 0, 1, 1], [], []>} : vector<128x1152xf32>, vector<1152x128xf32>, vector<128x128xf32> -> vector<128x128xf32>
    %c0_16 = arith.constant 0 : index
    %c0_17 = arith.constant 0 : index
    %76 = vector.load %arg7[%c0_16, %c0_17] : memref<1x128xf32, #tpu.memory_space<vmem>>, vector<1x128xf32>
    %77 = vector.broadcast %76 : vector<1x128xf32> to vector<128x128xf32>
    %78 = arith.mulf %75, %77 : vector<128x128xf32>
    %c0_18 = arith.constant 0 : index
    %c0_19 = arith.constant 0 : index
    %79 = vector.load %arg8[%c0_18, %c0_19] : memref<1x128xf32, #tpu.memory_space<vmem>>, vector<1x128xf32>
    %80 = vector.broadcast %79 : vector<1x128xf32> to vector<128x128xf32>
    %81 = arith.addf %78, %80 : vector<128x128xf32>
    %82 = vector.extract_strided_slice %4 {offsets = [2, 2, 0], sizes = [8, 16, 128], strides = [1, 1, 1]} : vector<12x20x128xf32> to vector<8x16x128xf32>
    %83 = vector.shape_cast %82 : vector<8x16x128xf32> to vector<128x128xf32>
    %84 = arith.addf %81, %83 : vector<128x128xf32>
    %cst_20 = arith.constant 0.000000e+00 : f32
    %85 = vector.broadcast %cst_20 : f32 to vector<128x128xf32>
    %86 = arith.maximumf %84, %85 : vector<128x128xf32>
    %87 = vector.shape_cast %86 : vector<128x128xf32> to vector<8x16x128xf32>
    %c0_21 = arith.constant 0 : index
    %c0_22 = arith.constant 0 : index
    %c0_23 = arith.constant 0 : index
    %c0_24 = arith.constant 0 : index
    %88 = vector.load %arg9[%c0_21, %c0_22, %c0_23, %c0_24] : memref<1x8x16x128xf32, #tpu.memory_space<vmem>>, vector<1x8x16x128xf32>
    %89 = vector.shape_cast %88 : vector<1x8x16x128xf32> to vector<8x16x128xf32>
    %90 = vector.shape_cast %87 : vector<8x16x128xf32> to vector<1x8x16x128xf32>
    tpu.vector_store %arg9[%c0_21, %c0_22, %c0_23, %c0_24], %90 {strides = array<i32>} : memref<1x8x16x128xf32, #tpu.memory_space<vmem>>, vector<1x8x16x128xf32>,
    return
  }
  func.func @transform_0(%arg0: i32, %arg1: i32) -> (i32, i32, i32, i32) {
    %c0_i32 = arith.constant 0 : i32
    %c0_i32_0 = arith.constant 0 : i32
    %c0_i32_1 = arith.constant 0 : i32
    %c0_i32_2 = arith.constant 0 : i32
    return %arg0, %c0_i32, %c0_i32_0, %c0_i32_1 : i32, i32, i32, i32
  }
  func.func @transform_1(%arg0: i32, %arg1: i32) -> (i32, i32) {
    %c0_i32 = arith.constant 0 : i32
    %c0_i32_0 = arith.constant 0 : i32
    %c0_i32_1 = arith.constant 0 : i32
    return %c0_i32, %c0_i32_0 : i32, i32
  }
  func.func @transform_2(%arg0: i32, %arg1: i32) -> (i32, i32) {
    %c0_i32 = arith.constant 0 : i32
    %c0_i32_0 = arith.constant 0 : i32
    %c0_i32_1 = arith.constant 0 : i32
    return %c0_i32, %c0_i32_0 : i32, i32
  }
  func.func @transform_3(%arg0: i32, %arg1: i32) -> (i32, i32) {
    %c0_i32 = arith.constant 0 : i32
    %c0_i32_0 = arith.constant 0 : i32
    %c0_i32_1 = arith.constant 0 : i32
    return %c0_i32, %c0_i32_0 : i32, i32
  }
  func.func @transform_4(%arg0: i32, %arg1: i32) -> (i32, i32) {
    %c0_i32 = arith.constant 0 : i32
    %c0_i32_0 = arith.constant 0 : i32
    %c0_i32_1 = arith.constant 0 : i32
    return %c0_i32, %c0_i32_0 : i32, i32
  }
  func.func @transform_5(%arg0: i32, %arg1: i32) -> (i32, i32) {
    %c0_i32 = arith.constant 0 : i32
    %c0_i32_0 = arith.constant 0 : i32
    %c0_i32_1 = arith.constant 0 : i32
    return %c0_i32, %c0_i32_0 : i32, i32
  }
  func.func @transform_6(%arg0: i32, %arg1: i32) -> (i32, i32) {
    %c0_i32 = arith.constant 0 : i32
    %c0_i32_0 = arith.constant 0 : i32
    %c0_i32_1 = arith.constant 0 : i32
    return %c0_i32, %c0_i32_0 : i32, i32
  }
  func.func @transform_7(%arg0: i32, %arg1: i32) -> (i32, i32, i32, i32) {
    %c0_i32 = arith.constant 0 : i32
    %c0_i32_0 = arith.constant 0 : i32
    %c0_i32_1 = arith.constant 0 : i32
    return %arg0, %arg1, %c0_i32, %c0_i32_0 : i32, i32, i32, i32
  }
}

</mosaic_0001>

<bundles_post_ra>
// kernel: tpu_custom_call.1
= control target key start
LH: loop header
LB: loop body
LE: loop exit
PB: predicated region body
PF: predicated region fallthrough
CT: control target
= control target key end

     0   :  { %s10085_s0 = inlined_call_operand.vmem [shape: f32[2,20,20,128], index: 0, kind: input, shape index: {}]   ;;  %s10086_s1 = inlined_call_operand.vmem [shape: f32[1152,128], index: 1, kind: input, shape index: {}]   ;;  %s10087_s2 = inlined_call_operand.vmem [shape: f32[1,128], index: 2, kind: input, shape index: {}]   ;;  %s10088_s3 = inlined_call_operand.vmem [shape: f32[1,128], index: 3, kind: input, shape index: {}]   ;;  %s10089_s4 = inlined_call_operand.hbm [shape: f32[1152,128], index: 4, kind: input, shape index: {}]   ;;  %s10090_s5 = inlined_call_operand.vmem [shape: f32[1,128], index: 5, kind: input, shape index: {}]   ;;  %s10091_s6 = inlined_call_operand.vmem [shape: f32[1,128], index: 6, kind: input, shape index: {}]   ;;  %s10092_s7 = inlined_call_operand.hbm [shape: f32[2,16,16,128], index: 7, kind: output, shape index: {}]  }
   0x1   :  { %10437 = sst [smem:[#allocation425_spill]] %s10089_s4 }
   0x2   :  { %12 = vsyncpa [#allocation3], 0 }
   0x3   :  { %13 = vsyncpa [#allocation4], 0 }
   0x4   :  { %15 = vsyncpa [#allocation4 + $0x1], 0  ;;  %s5398_s24 = smov 0   ;;  %s5400_s25 = smov 0  }
   0x5   :  { %s5402_s26 = smov 0   ;;  %s5404_s27 = smov 0  }
   0x6   :  { %s5406_s28 = smov 0   ;;  %s5408_s29 = smov 0  }
   0x7   :  { %s5410_s30 = smov 0   ;;  %s5412_s8 = smov 0  }
   0x8 LB: > { %s4995_s9 = sadd.s32 4294967295, %s5351_s8   ;;  %s4996_s10 = sadd.s32 4294967294, %s5351_s8   ;;  %s5351_s8 = sphi %s5412_s8, %s21_s8   ;;  %s5347_s30 = sphi %s5410_s30, %s11820_s30   ;;  %s5343_s29 = sphi %s5408_s29, %s11819_s29   ;;  %s5339_s28 = sphi %s5406_s28, %s11818_s28   ;;  %s5335_s27 = sphi %s5404_s27, %s11817_s27   ;;  %s5331_s26 = sphi %s5402_s26, %s11816_s26   ;;  %s5327_s25 = sphi %s5400_s25, %s11815_s25   ;;  %s5323_s24 = sphi %s5398_s24, %s11814_s24  }
   0x9   : > { %s30_s11 = sadd.s32 1, %s5343_s29  ;;  %s33_s12 = sadd.s32 1, %s5347_s30 }
   0xa   : > { %p31_p0 = scmp.ge.s32.totalorder %s30_s11, 2  ;;  %s194_s13 = sadd.s32 1, %s5331_s26 }
   0xb   : > { %p204_p1 = scmp.ne.s32.totalorder %s5331_s26, %s5327_s25  ;;  %p205_p2 = scmp.eq.s32.totalorder %s4995_s9, 3 }
   0xc   : > { %s11822_s11 = smov (%p31_p0, %s30_s11), 0  ;;  %s11824_s12 = smov (!%p31_p0, %s33_s12), %s5347_s30 }
   0xd   : > { %10438 = sst [smem:[#allocation8_spill]] %s11822_s11  ;;  %s190_s14 = ssub.s32 %s5343_s29, %s11822_s11 }
   0xe   : > { %p5450_p3 = por %p205_p2, %p204_p1  ;;  %p35_p4 = scmp.ge.s32.totalorder %s11824_s12, 2 }
   0xf   : > { %p210_p5 = scmp.ne.s32.totalorder %s5327_s25, %s5323_s24  ;;  %p211_p6 = scmp.eq.s32.totalorder %s4996_s10, 3 }
  0x10   : > { %p4997_p7 = scmp.ge.s32.totalorder %s5351_s8, 1  ;;  %s11826_s12 = smov (%p35_p4, %s11824_s12), 0 }
  0x11   : > { %10440 = sst [smem:[#allocation9_spill]] %s11826_s12  ;;  %p5459_p8 = por %p211_p6, %p210_p5 }
  0x12   : > { %p218_p9 = scmp.lt.s32.totalorder %s5351_s8, 5  ;;  %s189_s17 = ssub.s32 %s5347_s30, %s11826_s12 }
  0x13   : > { %s191_s18 = sor.u32 %s190_s14, %s189_s17  ;;  %p5470_p12 = scmp.eq.s32.totalorder %s4995_s9, 0 }
  0x14   : > { %p5466_p10 = pnand %p4997_p7, %p218_p9  ;;  %p192_p11 = scmp.eq.s32.totalorder %s191_s18, 0 }
  0x15   : > { %s10444_s4 = sld [smem:[#allocation425_spill]]  ;;  %s5353_s14 = smov [#allocation2]  }
  0x16   : > { %p5137_p13 = pneg %p5466_p10  ;;  %s240_s17 = sshll.u32 %s5353_s14, 4  ;;  %s241_s17 = int_to_ptr.vmem [resolvable:$true] %s240_s17 }
  0x17   : > { %s5480_s10 = scalar_select %p192_p11, %s5331_s26, %s194_s13  }
  0x18   : > { %p5138_p0 = pnand %p5470_p12, %p5137_p13  ;;  %s5354_s18 = smov 128  }
  0x19   : > { %s5355_s9 = smov 8   ;;  %270 = sbr.rel (%p5466_p10) target bundleno = 2356 (0x934), region = 48 }
  0x1b   : > { %s238_s23 = sshll.u32 %s10444_s4, 4  ;;  %s239_s23 = int_to_ptr.hbm [resolvable:$true] %s238_s23 }
  0x1c   : > { %5140 = dma.hbm_to_vmem [thread:$0]  (!%p5138_p0), %s239_s23, 18432, %s241_s17, [#allocation3], %s5354_s18, %s5354_s18, %s5355_s9  }
  0x1e   : > { %5314 = dma.done.wait (%p5470_p12), [#allocation3], 18432  }
  0x1f   : > { %5316 = vsyncadd (%p5470_p12), [#allocation3], 4294948864  ;;  %p303_p1 = scmp.lt.s32.totalorder %s5339_s28, 1  ;;  %v2494_v0 = vld [vmem:[%s10086_s1 + $0x78] sm:$0xff]  ;;  %v2493_v1 = vld [vmem:[%s10086_s1 + $0x70] sm:$0xff]  ;;  %s5005_s21 = smul.u32 192, %s5335_s27 }
  0x20   : > { %2623 = vmatpush.msra.mxu0 %v2494_v0  ;;  %v2492_v2 = vld [vmem:[%s10086_s1 + $0x68] sm:$0xff]  ;;  %v2491_v3 = vld [vmem:[%s10086_s1 + $0x60] sm:$0xff]  ;;  %v2490_v4 = vld [vmem:[%s10086_s1 + $0x58] sm:$0xff]  ;;  %vm448_vm0 = vcmask 1040384   ;;  %vm449_vm1 = vcmask 1042434   ;;  %vm451_vm3 = vcmask 1044484  }
  0x21   : > { %s304_s13 = scalar_select %p303_p1, %s5339_s28, 1  ;;  %v2489_v5 = vld [vmem:[%s10086_s1 + $0x50] sm:$0xff]  ;;  %v2488_v6 = vld [vmem:[%s10086_s1 + $0x48] sm:$0xff]  ;;  %v2487_v7 = vld [vmem:[%s10086_s1 + $0x40] sm:$0xff]  ;;  %vm453_vm5 = vcmask 1046534   ;;  %vm10424_vm13 = vcmask 1046528  }
  0x22   : > { %2624 = vmatpush.msra.mxu0 %v2493_v1  ;;  %v2486_v9 = vld [vmem:[%s10086_s1 + $0x38] sm:$0xff]  ;;  %v2485_v10 = vld [vmem:[%s10086_s1 + $0x30] sm:$0xff]  ;;  %v2484_v11 = vld [vmem:[%s10086_s1 + $0x28] sm:$0xff]  ;;  %vm10423_vm14 = vcmask 1045504   ;;  %s300_s11 = sand.u32 1, %s5327_s25  }
  0x23   : > { %s5130_s20 = smul.u32 480, %s304_s13  ;;  %v2483_v12 = vld [vmem:[%s10086_s1 + $0x20] sm:$0xff]  ;;  %v2482_v14 = vld [vmem:[%s10086_s1 + $0x18] sm:$0xff]  ;;  %v2481_v18 = vld [vmem:[%s10086_s1 + $0x10] sm:$0xff]  ;;  %s5002_s9 = sshll.u32 %s300_s11, 7 }
  0x24   : > { %2625 = vmatpush.msra.mxu0 %v2492_v2  ;;  %v2480_v19 = vld [vmem:[%s10086_s1 + $0x8] sm:$0xff]  ;;  %v2479_v20 = vld [vmem:[%s10086_s1] sm:$0xff]  ;;  %vm450_vm2 = vmor %vm448_vm0, %vm449_vm1  ;;  %s9909_s22 = scalar_lea.vmem [#allocation5], %s5002_s9  ;;  %s4887_s4 = scalar_lea.sflag [#allocation4], %s300_s11 }
  0x25   : > { %s307_s23 = scalar_lea.vmem %s10085_s0, %s5130_s20  ;;  %vm452_vm4 = vmor %vm450_vm2, %vm451_vm3  ;;  %s4902_s13 = sshll.u32 %s9909_s22, 4  ;;  %s4903_s13 = int_to_ptr.vmem [resolvable:$true] %s4902_s13 }
  0x26   : > { %2626 = vmatpush.msra.mxu0 %v2491_v3  ;;  %s5517_s18 = scalar_lea.vmem %s307_s23, %s5005_s21  ;;  %vm6516_vm6 = vmor %vm452_vm4, %vm453_vm5 }
  0x27   : > { %v5523_v8 = vld [vmem:[%s5517_s18] sm:$0xff]  ;;  %v5539_v13 = vld [vmem:[%s5517_s18 + $0x10] sm:$0xf]  ;;  %v5581_v29 = vld [vmem:[%s5517_s18 + $0x8] sm:$0xff] }
  0x28   : > { %2627 = vmatpush.msra.mxu0 %v2490_v4  ;;  %735 = vst.sshfl [vmem:[#allocation1] sm:$0xff pattern:$0x73625140] %v5523_v8  ;;  %v5561_v21 = vld [vmem:[%s5517_s18 + $0x20] sm:$0xff]  ;;  %v5569_v24 = vld [vmem:[%s5517_s18 + $0x30] sm:$0xff]  ;;  %v5588_v31 = vld [vmem:[%s5517_s18 + $0x18] sm:$0xff] }
  0x29   : > { %736 = vst.sshfl [vmem:[#allocation1 + $0x20] sm:$0xff pattern:$0x73625140] %v5581_v29  ;;  %v5585_v30 = vld [vmem:[%s5517_s18 + $0x40] sm:$0xf]  ;;  %v5607_v39 = vld [vmem:[%s5517_s18 + $0x50] sm:$0xff] }
  0x2a   : > { %2628 = vmatpush.msra.mxu0 %v2489_v5  ;;  %10454 = vst [vmem:[#allocation19_spill] sm:$0xff] %v5585_v30  ;;  %v5610_v40 = vld [vmem:[%s5517_s18 + $0x28] sm:$0xf]  ;;  %v5625_v46 = vld [vmem:[%s5517_s18 + $0x60] sm:$0xff]  ;;  %v5634_v50 = vld [vmem:[%s5517_s18 + $0x38] sm:$0xff] }
  0x2b   : > { %10467 = vst [vmem:[#allocation32_spill] sm:$0xff] %v5625_v46  ;;  %v5645_v54 = vld [vmem:[%s5517_s18 + $0x70] sm:$0xf]  ;;  %v5654_v58 = vld [vmem:[%s5517_s18 + $0x48] sm:$0xff]  ;;  %v5667_v63 = vld [vmem:[%s5517_s18 + $0x80] sm:$0xff] }
  0x2c   : > { %2629 = vmatpush.msra.mxu0 %v2488_v6  ;;  %10474 = vst [vmem:[#allocation39_spill] sm:$0xff] %v5645_v54  ;;  %v5674_v2 = vld [vmem:[%s5517_s18 + $0x58] sm:$0xf]  ;;  %v5685_v6 = vld [vmem:[%s5517_s18 + $0x90] sm:$0xff] }
  0x2d   : > { %10482 = vst [vmem:[#allocation47_spill] sm:$0xff] %v5667_v63 }
  0x2e   : > { %2630 = vmatpush.msra.mxu0 %v2487_v7  ;;  %10485 = vst [vmem:[#allocation50_spill] sm:$0xff] %v5674_v2 }
  0x2f   : > { %v5544_v15 = vld [vmem:[#allocation1 + $0x1] ss:$4 sm:$0xff]  ;;  %v5546_v16 = vld [vmem:[#allocation1 + $0x2] ss:$4 sm:$0xff]  ;;  %v5548_v17 = vld [vmem:[#allocation1 + $0x3] ss:$4 sm:$0xff] }
  0x30   : > { %2631 = vmatpush.msra.mxu0 %v2486_v9  ;;  %10445 = vst [vmem:[#allocation10_spill] sm:$0xff] %v5544_v15  ;;  %v5597_v35 = vld [vmem:[#allocation1 + $0x20] ss:$4 sm:$0xff]  ;;  %v5599_v36 = vld [vmem:[#allocation1 + $0x21] ss:$4 sm:$0xff] }
  0x31   : > { %10446 = vst [vmem:[#allocation11_spill] sm:$0xff] %v5546_v16  ;;  %v5601_v37 = vld [vmem:[#allocation1 + $0x22] ss:$4 sm:$0xff]  ;;  %v5603_v38 = vld [vmem:[#allocation1 + $0x23] ss:$4 sm:$0xff] }
  0x32   : > { %2632 = vmatpush.msra.mxu0 %v2485_v10  ;;  %10447 = vst [vmem:[#allocation12_spill] sm:$0xff] %v5548_v17  ;;  %v2502_v16 = vld [vmem:[%s10086_s1 + $0xb8] sm:$0xff]  ;;  %v2501_v15 = vld [vmem:[%s10086_s1 + $0xb0] sm:$0xff] }
  0x33   : > { %751 = vst.sshfl [vmem:[#allocation1] sm:$0xff pattern:$0x73625140] %v5539_v13 }
  0x34   : > { %2633 = vmatpush.msra.mxu0 %v2484_v11  ;;  %10458 = vst [vmem:[#allocation23_spill] sm:$0xff] %v5597_v35  ;;  %v5694_v11 = vld [vmem:[%s5517_s18 + $0x68] sm:$0xff]  ;;  %v6434_v35 = vrot.slane %v5625_v46, 2 }
  0x35   : > { %10459 = vst [vmem:[#allocation24_spill] sm:$0xff] %v5599_v36  ;;  %v6458_v36 = vrot.slane %v5667_v63, 2 }
  0x36   : > { %2634 = vmatpush.msra.mxu0 %v2483_v12  ;;  %10460 = vst [vmem:[#allocation25_spill] sm:$0xff] %v5601_v37  ;;  %v2499_v37 = vld [vmem:[%s10086_s1 + $0xa0] sm:$0xff] }
  0x37   : > { %10461 = vst [vmem:[#allocation26_spill] sm:$0xff] %v5603_v38  ;;  %v6440_v38 = vrot.slane %v5625_v46, 6 }
  0x38   : > { %2635 = vmatpush.msra.mxu0 %v2482_v14  ;;  %754 = vst.sshfl [vmem:[#allocation1 + $0x20] sm:$0xff pattern:$0x73625140] %v5588_v31 }
  0x39   : > { %10489 = vst [vmem:[#allocation54_spill] sm:$0xff] %v5685_v6 }
  0x3a   : > { %2636 = vmatpush.msra.mxu0 %v2481_v18  ;;  %v5563_v22 = vld [vmem:[#allocation1] ss:$4 sm:$0xff]  ;;  %v5565_v23 = vld [vmem:[#allocation1 + $0x1] ss:$4 sm:$0xff]  ;;  %10493 = vst [vmem:[#allocation58_spill] sm:$0xff] %v5694_v11 }
  0x3b   : > { %10448 = vst [vmem:[#allocation13_spill] sm:$0xff] %v5563_v22 }
  0x3c   : > { %2637 = vmatpush.msra.mxu0 %v2480_v19  ;;  %10449 = vst [vmem:[#allocation14_spill] sm:$0xff] %v5565_v23  ;;  %v5705_v19 = vld [vmem:[%s5517_s18 + $0xa0] sm:$0xf] }
  0x3d   : > { %758 = vst.sshfl [vmem:[#allocation1] sm:$0xff pattern:$0x73625140] %v5561_v21  ;;  %v2503_v23 = vld [vmem:[%s10086_s1 + $0xc0] sm:$0xff] }
  0x3e   : > { %2638 = vmatpush.msra.mxu0 %v2479_v20  ;;  %10497 = vst [vmem:[#allocation62_spill] sm:$0xff] %v5705_v19 }
  0x3f   : > { %v5617_v43 = vld [vmem:[#allocation1 + $0x21] ss:$4 sm:$0xff]  ;;  %v5619_v44 = vld [vmem:[#allocation1 + $0x22] ss:$4 sm:$0xff]  ;;  %v5621_v45 = vld [vmem:[#allocation1 + $0x23] ss:$4 sm:$0xff] }
  0x40   : > { %10464 = vst [vmem:[#allocation29_spill] sm:$0xff] %v5617_v43  ;;  %v6400_v43 = vrot.slane %v5654_v58, 6 }
  0x41   : > { %10465 = vst [vmem:[#allocation30_spill] sm:$0xff] %v5619_v44 }
  0x42   : > { %10466 = vst [vmem:[#allocation31_spill] sm:$0xff] %v5621_v45  ;;  %v2505_v45 = vld [vmem:[%s10086_s1 + $0xd0] sm:$0xff] }
  0x43   : > { %759 = vst.sshfl [vmem:[#allocation1 + $0x20] sm:$0xff pattern:$0x73625140] %v5610_v40 }
  0x44   : > { %v5571_v25 = vld [vmem:[#allocation1] ss:$4 sm:$0xff]  ;;  %v5573_v26 = vld [vmem:[#allocation1 + $0x1] ss:$4 sm:$0xff]  ;;  %v5575_v27 = vld [vmem:[#allocation1 + $0x2] ss:$4 sm:$0xff] }
  0x45   : > { %10450 = vst [vmem:[#allocation15_spill] sm:$0xff] %v5571_v25  ;;  %v5577_v28 = vld [vmem:[#allocation1 + $0x3] ss:$4 sm:$0xff] }
  0x46   : > { %10451 = vst [vmem:[#allocation16_spill] sm:$0xff] %v5573_v26  ;;  %v2506_v25 = vld [vmem:[%s10086_s1 + $0xd8] sm:$0xff]  ;;  %v6394_v26 = vrot.slane %v5654_v58, 4 }
  0x47   : > { %10452 = vst [vmem:[#allocation17_spill] sm:$0xff] %v5575_v27  ;;  %v2508_v27 = vld [vmem:[%s10086_s1 + $0xe8] sm:$0xff] }
  0x48   : > { %10453 = vst [vmem:[#allocation18_spill] sm:$0xff] %v5577_v28  ;;  %v6371_v28 = vrot.slane %v5607_v39, 4 }
  0x49   : > { %766 = vst.sshfl [vmem:[#allocation1] sm:$0xff pattern:$0x73625140] %v5569_v24 }
  0x4a   : > { %v5639_v52 = vld [vmem:[#allocation1 + $0x20] ss:$4 sm:$0xff]  ;;  %v5641_v53 = vld [vmem:[#allocation1 + $0x21] ss:$4 sm:$0xff]  ;;  %10748 = vst [vmem:[#allocation313_spill] sm:$0xff] %v6434_v35 }
  0x4b   : > { %10472 = vst [vmem:[#allocation37_spill] sm:$0xff] %v5639_v52  ;;  %v6360_v52 = vrot.slane %v5634_v50, 2 }
  0x4c   : > { %10473 = vst [vmem:[#allocation38_spill] sm:$0xff] %v5641_v53  ;;  %v6367_v53 = vrot.slane %v5607_v39, 2 }
  0x4d   : > { %767 = vst.sshfl [vmem:[#allocation1 + $0x20] sm:$0xff pattern:$0x73625140] %v5634_v50 }
  0x4e   : > { %10742 = vst [vmem:[#allocation307_spill] sm:$0xff] %v6360_v52 }
  0x4f   : > { %10743 = vst [vmem:[#allocation308_spill] sm:$0xff] %v6367_v53 }
  0x50   : > { %v5590_v32 = vld [vmem:[#allocation1 + $0x1] ss:$4 sm:$0xff]  ;;  %v5592_v33 = vld [vmem:[#allocation1 + $0x2] ss:$4 sm:$0xff]  ;;  %v5594_v34 = vld [vmem:[#allocation1 + $0x3] ss:$4 sm:$0xff] }
  0x51   : > { %10455 = vst [vmem:[#allocation20_spill] sm:$0xff] %v5590_v32 }
  0x52   : > { %10456 = vst [vmem:[#allocation21_spill] sm:$0xff] %v5592_v33  ;;  %v6357_v33 = vrot.slane %v5569_v24, 6 }
  0x53   : > { %10457 = vst [vmem:[#allocation22_spill] sm:$0xff] %v5594_v34  ;;  %v2509_v34 = vld [vmem:[%s10086_s1 + $0xf0] sm:$0xff] }
  0x54   : > { %775 = vst.sshfl [vmem:[#allocation1] sm:$0xff pattern:$0x73625140] %v5585_v30  ;;  %v5657_v59 = vld [vmem:[#allocation1 + $0x20] ss:$4 sm:$0xff] }
  0x55   : > { %10478 = vst [vmem:[#allocation43_spill] sm:$0xff] %v5657_v59  ;;  %v5659_v60 = vld [vmem:[#allocation1 + $0x21] ss:$4 sm:$0xff]  ;;  %v5661_v61 = vld [vmem:[#allocation1 + $0x22] ss:$4 sm:$0xff]  ;;  %v6348_v59 = vrot.slane %v5569_v24, 4 }
  0x56   : > { %10479 = vst [vmem:[#allocation44_spill] sm:$0xff] %v5659_v60  ;;  %v5663_v62 = vld [vmem:[#allocation1 + $0x23] ss:$4 sm:$0xff] }
  0x57   : > { %10480 = vst [vmem:[#allocation45_spill] sm:$0xff] %v5661_v61 }
  0x58   : > { %10481 = vst [vmem:[#allocation46_spill] sm:$0xff] %v5663_v62 }
  0x59   : > { %778 = vst.sshfl [vmem:[#allocation1 + $0x20] sm:$0xff pattern:$0x73625140] %v5654_v58 }
  0x5a   : > { %10750 = vst [vmem:[#allocation315_spill] sm:$0xff] %v6440_v38 }
  0x5b   : > { %v5612_v41 = vld [vmem:[#allocation1] ss:$4 sm:$0xff]  ;;  %v5614_v42 = vld [vmem:[#allocation1 + $0x1] ss:$4 sm:$0xff]  ;;  %10752 = vst [vmem:[#allocation317_spill] sm:$0xff] %v6458_v36 }
  0x5c   : > { %10462 = vst [vmem:[#allocation27_spill] sm:$0xff] %v5612_v41 }
  0x5d   : > { %10463 = vst [vmem:[#allocation28_spill] sm:$0xff] %v5614_v42 }
  0x5e   : > { %782 = vst.sshfl [vmem:[#allocation1] sm:$0xff pattern:$0x73625140] %v5607_v39 }
  0x60   : > { %v5677_v3 = vld [vmem:[#allocation1 + $0x21] ss:$4 sm:$0xff]  ;;  %v5679_v4 = vld [vmem:[#allocation1 + $0x22] ss:$4 sm:$0xff]  ;;  %v5681_v5 = vld [vmem:[#allocation1 + $0x23] ss:$4 sm:$0xff] }
  0x61   : > { %10486 = vst [vmem:[#allocation51_spill] sm:$0xff] %v5677_v3 }
  0x62   : > { %10487 = vst [vmem:[#allocation52_spill] sm:$0xff] %v5679_v4 }
  0x63   : > { %10488 = vst [vmem:[#allocation53_spill] sm:$0xff] %v5681_v5 }
  0x64   : > { %783 = vst.sshfl [vmem:[#allocation1 + $0x20] sm:$0xff pattern:$0x73625140] %v5674_v2 }
  0x65   : > { %v5627_v47 = vld [vmem:[#allocation1] ss:$4 sm:$0xff]  ;;  %v5629_v48 = vld [vmem:[#allocation1 + $0x1] ss:$4 sm:$0xff]  ;;  %v5631_v49 = vld [vmem:[#allocation1 + $0x2] ss:$4 sm:$0xff] }
  0x66   : > { %10468 = vst [vmem:[#allocation33_spill] sm:$0xff] %v5627_v47  ;;  %v5636_v51 = vld [vmem:[#allocation1 + $0x3] ss:$4 sm:$0xff] }
  0x67   : > { %10469 = vst [vmem:[#allocation34_spill] sm:$0xff] %v5629_v48  ;;  %v5794_v48 = vld [vmem:[%s5517_s18 + $0xb8] sm:$0xf] }
  0x68   : > { %10470 = vst [vmem:[#allocation35_spill] sm:$0xff] %v5631_v49 }
  0x69   : > { %10471 = vst [vmem:[#allocation36_spill] sm:$0xff] %v5636_v51  ;;  %v5774_v51 = vld [vmem:[%s5517_s18 + $0xa8] sm:$0xff] }
  0x6a   : > { %790 = vst.sshfl [vmem:[#allocation1] sm:$0xff pattern:$0x73625140] %v5625_v46 }
  0x6b   : > { %v5699_v14 = vld [vmem:[#allocation1 + $0x20] ss:$4 sm:$0xff]  ;;  %v5701_v18 = vld [vmem:[#allocation1 + $0x21] ss:$4 sm:$0xff]  ;;  %10525 = vst [vmem:[#allocation90_spill] sm:$0xff] %v5774_v51 }
  0x6c   : > { %10495 = vst [vmem:[#allocation60_spill] sm:$0xff] %v5699_v14 }
  0x6d   : > { %10496 = vst [vmem:[#allocation61_spill] sm:$0xff] %v5701_v18  ;;  %v5754_v18 = vld [vmem:[%s5517_s18 + $0x98] sm:$0xff] }
  0x6e   : > { %791 = vst.sshfl [vmem:[#allocation1 + $0x20] sm:$0xff pattern:$0x73625140] %v5694_v11 }
  0x6f   : > { %10517 = vst [vmem:[#allocation82_spill] sm:$0xff] %v5754_v18 }
  0x70   : > { %10533 = vst [vmem:[#allocation98_spill] sm:$0xff] %v5794_v48 }
  0x71   : > { %v5647_v55 = vld [vmem:[#allocation1 + $0x1] ss:$4 sm:$0xff]  ;;  %v5649_v56 = vld [vmem:[#allocation1 + $0x2] ss:$4 sm:$0xff]  ;;  %v5651_v57 = vld [vmem:[#allocation1 + $0x3] ss:$4 sm:$0xff] }
  0x72   : > { %10475 = vst [vmem:[#allocation40_spill] sm:$0xff] %v5647_v55 }
  0x73   : > { %10476 = vst [vmem:[#allocation41_spill] sm:$0xff] %v5649_v56  ;;  %v5734_v56 = vld [vmem:[%s5517_s18 + $0x88] sm:$0xf] }
  0x74   : > { %10477 = vst [vmem:[#allocation42_spill] sm:$0xff] %v5651_v57 }
  0x75   : > { %799 = vst.sshfl [vmem:[#allocation1] sm:$0xff pattern:$0x73625140] %v5645_v54  ;;  %v5723_v57 = vld [vmem:[#allocation1 + $0x23] ss:$4 sm:$0xff] }
  0x76   : > { %10505 = vst [vmem:[#allocation70_spill] sm:$0xff] %v5723_v57  ;;  %v5745_v57 = vld [vmem:[%s5517_s18 + $0xc0] sm:$0xff] }
  0x77   : > { %10509 = vst [vmem:[#allocation74_spill] sm:$0xff] %v5734_v56 }
  0x78   : > { %10513 = vst [vmem:[#allocation78_spill] sm:$0xff] %v5745_v57 }
  0x7c   : > { %v5669_v0 = vld [vmem:[#allocation1] ss:$4 sm:$0xff]  ;;  %v5671_v1 = vld [vmem:[#allocation1 + $0x1] ss:$4 sm:$0xff] }
  0x7d   : > { %10483 = vst [vmem:[#allocation48_spill] sm:$0xff] %v5669_v0  ;;  %v5721_v0 = vld [vmem:[#allocation1 + $0x22] ss:$4 sm:$0xff] }
  0x7e   : > { %10484 = vst [vmem:[#allocation49_spill] sm:$0xff] %v5671_v1  ;;  %v5719_v1 = vld [vmem:[#allocation1 + $0x21] ss:$4 sm:$0xff] }
  0x7f   : > { %806 = vst.sshfl [vmem:[#allocation1] sm:$0xff pattern:$0x73625140] %v5667_v63 }
  0x80   : > { %10503 = vst [vmem:[#allocation68_spill] sm:$0xff] %v5719_v1 }
  0x81   : > { %10504 = vst [vmem:[#allocation69_spill] sm:$0xff] %v5721_v0 }
  0x86   : > { %v5687_v7 = vld [vmem:[#allocation1] ss:$4 sm:$0xff]  ;;  %v5689_v9 = vld [vmem:[#allocation1 + $0x1] ss:$4 sm:$0xff]  ;;  %v5691_v10 = vld [vmem:[#allocation1 + $0x2] ss:$4 sm:$0xff] }
  0x87   : > { %10490 = vst [vmem:[#allocation55_spill] sm:$0xff] %v5687_v7  ;;  %v5696_v12 = vld [vmem:[#allocation1 + $0x3] ss:$4 sm:$0xff] }
  0x88   : > { %10491 = vst [vmem:[#allocation56_spill] sm:$0xff] %v5689_v9  ;;  %v5714_v7 = vld [vmem:[%s5517_s18 + $0x78] sm:$0xff] }
  0x89   : > { %10492 = vst [vmem:[#allocation57_spill] sm:$0xff] %v5691_v10 }
  0x8a   : > { %10494 = vst [vmem:[#allocation59_spill] sm:$0xff] %v5696_v12  ;;  %v5717_v12 = vld [vmem:[#allocation1 + $0x20] ss:$4 sm:$0xff] }
  0x8b   : > { %814 = vst.sshfl [vmem:[#allocation1] sm:$0xff pattern:$0x73625140] %v5685_v6 }
  0x8c   : > { %10501 = vst [vmem:[#allocation66_spill] sm:$0xff] %v5714_v7 }
  0x8d   : > { %10502 = vst [vmem:[#allocation67_spill] sm:$0xff] %v5717_v12 }
  0x8e   : > { %802 = vst.sshfl [vmem:[#allocation1 + $0x20] sm:$0xff pattern:$0x73625140] %v5714_v7 }
  0x92   : > { %v5707_v20 = vld [vmem:[#allocation1 + $0x1] ss:$4 sm:$0xff]  ;;  %v5709_v9 = vld [vmem:[#allocation1 + $0x2] ss:$4 sm:$0xff]  ;;  %v5711_v10 = vld [vmem:[#allocation1 + $0x3] ss:$4 sm:$0xff] }
  0x93   : > { %10498 = vst [vmem:[#allocation63_spill] sm:$0xff] %v5707_v20  ;;  %v5727_v20 = vld [vmem:[%s5517_s18 + $0xb0] sm:$0xff] }
  0x94   : > { %10499 = vst [vmem:[#allocation64_spill] sm:$0xff] %v5709_v9 }
  0x95   : > { %10500 = vst [vmem:[#allocation65_spill] sm:$0xff] %v5711_v10  ;;  %v5737_v12 = vld [vmem:[#allocation1 + $0x21] ss:$4 sm:$0xff]  ;;  %v5739_v1 = vld [vmem:[#allocation1 + $0x22] ss:$4 sm:$0xff] }
  0x96   : > { %823 = vst.sshfl [vmem:[#allocation1] sm:$0xff pattern:$0x73625140] %v5705_v19  ;;  %v5741_v0 = vld [vmem:[#allocation1 + $0x23] ss:$4 sm:$0xff] }
  0x97   : > { %10506 = vst [vmem:[#allocation71_spill] sm:$0xff] %v5727_v20 }
  0x98   : > { %10510 = vst [vmem:[#allocation75_spill] sm:$0xff] %v5737_v12  ;;  %v5765_v12 = vld [vmem:[%s5517_s18 + $0xd0] sm:$0xf] }
  0x99   : > { %10511 = vst [vmem:[#allocation76_spill] sm:$0xff] %v5739_v1 }
  0x9a   : > { %10512 = vst [vmem:[#allocation77_spill] sm:$0xff] %v5741_v0 }
  0x9b   : > { %807 = vst.sshfl [vmem:[#allocation1 + $0x20] sm:$0xff pattern:$0x73625140] %v5734_v56 }
  0x9c   : > { %10521 = vst [vmem:[#allocation86_spill] sm:$0xff] %v5765_v12 }
  0x9d   : > { %v5729_v9 = vld [vmem:[#allocation1] ss:$4 sm:$0xff]  ;;  %v5731_v10 = vld [vmem:[#allocation1 + $0x1] ss:$4 sm:$0xff] }
  0x9e   : > { %10507 = vst [vmem:[#allocation72_spill] sm:$0xff] %v5729_v9 }
  0x9f   : > { %10508 = vst [vmem:[#allocation73_spill] sm:$0xff] %v5731_v10 }
  0xa0   : > { %830 = vst.sshfl [vmem:[#allocation1] sm:$0xff pattern:$0x73625140] %v5727_v20 }
  0xa2   : > { %v5759_v1 = vld [vmem:[#allocation1 + $0x20] ss:$4 sm:$0xff]  ;;  %v5761_v0 = vld [vmem:[#allocation1 + $0x21] ss:$4 sm:$0xff] }
  0xa3   : > { %10519 = vst [vmem:[#allocation84_spill] sm:$0xff] %v5759_v1 }
  0xa4   : > { %10520 = vst [vmem:[#allocation85_spill] sm:$0xff] %v5761_v0 }
  0xa5   : > { %815 = vst.sshfl [vmem:[#allocation1 + $0x20] sm:$0xff pattern:$0x73625140] %v5754_v18 }
  0xa7   : > { %v5747_v55 = vld [vmem:[#allocation1] ss:$4 sm:$0xff]  ;;  %v5749_v9 = vld [vmem:[#allocation1 + $0x1] ss:$4 sm:$0xff]  ;;  %v5751_v10 = vld [vmem:[#allocation1 + $0x2] ss:$4 sm:$0xff] }
  0xa8   : > { %10514 = vst [vmem:[#allocation79_spill] sm:$0xff] %v5747_v55  ;;  %v5756_v14 = vld [vmem:[#allocation1 + $0x3] ss:$4 sm:$0xff] }
  0xa9   : > { %10515 = vst [vmem:[#allocation80_spill] sm:$0xff] %v5749_v9 }
  0xaa   : > { %10516 = vst [vmem:[#allocation81_spill] sm:$0xff] %v5751_v10 }
  0xab   : > { %10518 = vst [vmem:[#allocation83_spill] sm:$0xff] %v5756_v14 }
  0xac   : > { %838 = vst.sshfl [vmem:[#allocation1] sm:$0xff pattern:$0x73625140] %v5745_v57  ;;  %v5777_v14 = vld [vmem:[#allocation1 + $0x20] ss:$4 sm:$0xff] }
  0xad   : > { %10526 = vst [vmem:[#allocation91_spill] sm:$0xff] %v5777_v14  ;;  %v5779_v1 = vld [vmem:[#allocation1 + $0x21] ss:$4 sm:$0xff]  ;;  %v5781_v0 = vld [vmem:[#allocation1 + $0x22] ss:$4 sm:$0xff] }
  0xae   : > { %10527 = vst [vmem:[#allocation92_spill] sm:$0xff] %v5779_v1  ;;  %v5783_v49 = vld [vmem:[#allocation1 + $0x23] ss:$4 sm:$0xff] }
  0xaf   : > { %10528 = vst [vmem:[#allocation93_spill] sm:$0xff] %v5781_v0 }
  0xb0   : > { %10529 = vst [vmem:[#allocation94_spill] sm:$0xff] %v5783_v49 }
  0xb1   : > { %826 = vst.sshfl [vmem:[#allocation1 + $0x20] sm:$0xff pattern:$0x73625140] %v5774_v51 }
  0xb3   : > { %v5767_v55 = vld [vmem:[#allocation1 + $0x1] ss:$4 sm:$0xff]  ;;  %v5769_v9 = vld [vmem:[#allocation1 + $0x2] ss:$4 sm:$0xff]  ;;  %v5771_v10 = vld [vmem:[#allocation1 + $0x3] ss:$4 sm:$0xff] }
  0xb4   : > { %10522 = vst [vmem:[#allocation87_spill] sm:$0xff] %v5767_v55  ;;  %v5787_v55 = vld [vmem:[%s5517_s18 + $0xe0] sm:$0xff] }
  0xb5   : > { %10523 = vst [vmem:[#allocation88_spill] sm:$0xff] %v5769_v9 }
  0xb6   : > { %10524 = vst [vmem:[#allocation89_spill] sm:$0xff] %v5771_v10 }
  0xb7   : > { %847 = vst.sshfl [vmem:[#allocation1] sm:$0xff pattern:$0x73625140] %v5765_v12 }
  0xb8   : > { %10530 = vst [vmem:[#allocation95_spill] sm:$0xff] %v5787_v55  ;;  %v5797_v14 = vld [vmem:[#allocation1 + $0x21] ss:$4 sm:$0xff]  ;;  %v5799_v1 = vld [vmem:[#allocation1 + $0x22] ss:$4 sm:$0xff] }
  0xb9   : > { %10534 = vst [vmem:[#allocation99_spill] sm:$0xff] %v5797_v14  ;;  %v5801_v0 = vld [vmem:[#allocation1 + $0x23] ss:$4 sm:$0xff] }
  0xba   : > { %10535 = vst [vmem:[#allocation100_spill] sm:$0xff] %v5799_v1 }
  0xbb   : > { %10536 = vst [vmem:[#allocation101_spill] sm:$0xff] %v5801_v0 }
  0xbc   : > { %831 = vst.sshfl [vmem:[#allocation1 + $0x20] sm:$0xff pattern:$0x73625140] %v5794_v48 }
  0xbe   : > { %v5789_v9 = vld [vmem:[#allocation1] ss:$4 sm:$0xff]  ;;  %v5791_v10 = vld [vmem:[#allocation1 + $0x1] ss:$4 sm:$0xff] }
  0xbf   : > { %10531 = vst [vmem:[#allocation96_spill] sm:$0xff] %v5789_v9 }
  0xc0   : > { %10532 = vst [vmem:[#allocation97_spill] sm:$0xff] %v5791_v10  ;;  %v5811_v10 = vld [vmem:[%s5517_s18 + $0xc8] sm:$0xff] }
  0xc1   : > { %854 = vst.sshfl [vmem:[#allocation1] sm:$0xff pattern:$0x73625140] %v5787_v55 }
  0xc2   : > { %10540 = vst [vmem:[#allocation105_spill] sm:$0xff] %v5811_v10 }
  0xc3   : > { %v5816_v14 = vld [vmem:[#allocation1 + $0x20] ss:$4 sm:$0xff]  ;;  %v5818_v1 = vld [vmem:[#allocation1 + $0x21] ss:$4 sm:$0xff] }
  0xc4   : > { %10542 = vst [vmem:[#allocation107_spill] sm:$0xff] %v5816_v14 }
  0xc5   : > { %10543 = vst [vmem:[#allocation108_spill] sm:$0xff] %v5818_v1 }
  0xc6   : > { %839 = vst.sshfl [vmem:[#allocation1 + $0x20] sm:$0xff pattern:$0x73625140] %v5811_v10 }
  0xc8   : > { %v5804_v49 = vld [vmem:[#allocation1] ss:$4 sm:$0xff]  ;;  %v5806_v47 = vld [vmem:[#allocation1 + $0x1] ss:$4 sm:$0xff]  ;;  %v5808_v9 = vld [vmem:[#allocation1 + $0x2] ss:$4 sm:$0xff] }
  0xc9   : > { %10537 = vst [vmem:[#allocation102_spill] sm:$0xff] %v5804_v49  ;;  %v5813_v5 = vld [vmem:[#allocation1 + $0x3] ss:$4 sm:$0xff] }
  0xca   : > { %10538 = vst [vmem:[#allocation103_spill] sm:$0xff] %v5806_v47 }
  0xcb   : > { %10539 = vst [vmem:[#allocation104_spill] sm:$0xff] %v5808_v9  ;;  %v5828_v9 = vld [vmem:[%s5517_s18 + $0xd8] sm:$0xff] }
  0xcc   : > { %10541 = vst [vmem:[#allocation106_spill] sm:$0xff] %v5813_v5 }
  0xcd   : > { %900 = vst.sshfl [vmem:[#allocation1] sm:$0xff pattern:$0x73625140] %v5588_v31  ;;  %v5831_v5 = vld [vmem:[#allocation1 + $0x20] ss:$4 sm:$0xff] }
  0xce   : > { %10547 = vst [vmem:[#allocation112_spill] sm:$0xff] %v5828_v9  ;;  %v5833_v4 = vld [vmem:[#allocation1 + $0x21] ss:$4 sm:$0xff]  ;;  %v5835_v3 = vld [vmem:[#allocation1 + $0x22] ss:$4 sm:$0xff] }
  0xcf   : > { %10548 = vst [vmem:[#allocation113_spill] sm:$0xff] %v5831_v5  ;;  %v5837_v14 = vld [vmem:[#allocation1 + $0x23] ss:$4 sm:$0xff] }
  0xd0   : > { %10549 = vst [vmem:[#allocation114_spill] sm:$0xff] %v5833_v4 }
  0xd1   : > { %10550 = vst [vmem:[#allocation115_spill] sm:$0xff] %v5835_v3 }
  0xd2   : > { %10551 = vst [vmem:[#allocation116_spill] sm:$0xff] %v5837_v14 }
  0xd3   : > { %850 = vst.sshfl [vmem:[#allocation1 + $0x20] sm:$0xff pattern:$0x73625140] %v5828_v9 }
  0xd4   : > { %v5821_v0 = vld [vmem:[#allocation1 + $0x1] ss:$4 sm:$0xff]  ;;  %v5823_v49 = vld [vmem:[#allocation1 + $0x2] ss:$4 sm:$0xff]  ;;  %v5825_v47 = vld [vmem:[#allocation1 + $0x3] ss:$4 sm:$0xff] }
  0xd5   : > { %10544 = vst [vmem:[#allocation109_spill] sm:$0xff] %v5821_v0 }
  0xd6   : > { %10545 = vst [vmem:[#allocation110_spill] sm:$0xff] %v5823_v49  ;;  %v5845_v49 = vld [vmem:[%s5517_s18 + $0xe8] sm:$0xf] }
  0xd7   : > { %10546 = vst [vmem:[#allocation111_spill] sm:$0xff] %v5825_v47 }
  0xd8   : > { %916 = vst.sshfl [vmem:[#allocation1] sm:$0xff pattern:$0x73625140] %v5610_v40 }
  0xd9   : > { %10554 = vst [vmem:[#allocation119_spill] sm:$0xff] %v5845_v49 }
  0xda   : > { %v5848_v47 = vld [vmem:[#allocation1 + $0x21] ss:$4 sm:$0xff]  ;;  %v5850_v42 = vld [vmem:[#allocation1 + $0x22] ss:$4 sm:$0xff]  ;;  %v5852_v5 = vld [vmem:[#allocation1 + $0x23] ss:$4 sm:$0xff] }
  0xdb   : > { %10555 = vst [vmem:[#allocation120_spill] sm:$0xff] %v5848_v47 }
  0xdc   : > { %10556 = vst [vmem:[#allocation121_spill] sm:$0xff] %v5850_v42 }
  0xdd   : > { %10557 = vst [vmem:[#allocation122_spill] sm:$0xff] %v5852_v5 }
  0xde   : > { %855 = vst.sshfl [vmem:[#allocation1 + $0x20] sm:$0xff pattern:$0x73625140] %v5845_v49 }
  0xdf   : > { %v5840_v1 = vld [vmem:[#allocation1] ss:$4 sm:$0xff]  ;;  %v5842_v0 = vld [vmem:[#allocation1 + $0x1] ss:$4 sm:$0xff] }
  0xe0   : > { %10552 = vst [vmem:[#allocation117_spill] sm:$0xff] %v5840_v1 }
  0xe1   : > { %10553 = vst [vmem:[#allocation118_spill] sm:$0xff] %v5842_v0 }
  0xe2   : > { %923 = vst.sshfl [vmem:[#allocation1] sm:$0xff pattern:$0x73625140] %v5634_v50 }
  0xe5   : > { %v5864_v0 = vld [vmem:[#allocation1 + $0x20] ss:$4 sm:$0xff]  ;;  %v5866_v41 = vld [vmem:[#allocation1 + $0x21] ss:$4 sm:$0xff] }
  0xe6   : > { %10562 = vst [vmem:[#allocation127_spill] sm:$0xff] %v5864_v0 }
  0xe7   : > { %10563 = vst [vmem:[#allocation128_spill] sm:$0xff] %v5866_v41 }
  0xe8   : > { %901 = vst.sshfl [vmem:[#allocation1 + $0x20] sm:$0xff pattern:$0x73625140] %v5561_v21 }
  0xe9   : > { %v5855_v3 = vld [vmem:[#allocation1] ss:$4 sm:$0xff]  ;;  %v5857_v14 = vld [vmem:[#allocation1 + $0x1] ss:$4 sm:$0xff]  ;;  %v5859_v4 = vld [vmem:[#allocation1 + $0x2] ss:$4 sm:$0xff] }
  0xea   : > { %10558 = vst [vmem:[#allocation123_spill] sm:$0xff] %v5855_v3  ;;  %v5861_v1 = vld [vmem:[#allocation1 + $0x3] ss:$4 sm:$0xff] }
  0xeb   : > { %10559 = vst [vmem:[#allocation124_spill] sm:$0xff] %v5857_v14 }
  0xec   : > { %10560 = vst [vmem:[#allocation125_spill] sm:$0xff] %v5859_v4 }
  0xed   : > { %10561 = vst [vmem:[#allocation126_spill] sm:$0xff] %v5861_v1 }
  0xee   : > { %931 = vst.sshfl [vmem:[#allocation1] sm:$0xff pattern:$0x73625140] %v5654_v58 }
  0xef   : > { %v5876_v14 = vld [vmem:[#allocation1 + $0x20] ss:$4 sm:$0xff]  ;;  %v5878_v4 = vld [vmem:[#allocation1 + $0x21] ss:$4 sm:$0xff]  ;;  %v5880_v1 = vld [vmem:[#allocation1 + $0x22] ss:$4 sm:$0xff] }
  0xf0   : > { %10567 = vst [vmem:[#allocation132_spill] sm:$0xff] %v5876_v14  ;;  %v5882_v3 = vld [vmem:[#allocation1 + $0x23] ss:$4 sm:$0xff] }
  0xf1   : > { %10568 = vst [vmem:[#allocation133_spill] sm:$0xff] %v5878_v4 }
  0xf2   : > { %10569 = vst [vmem:[#allocation134_spill] sm:$0xff] %v5880_v1 }
  0xf3   : > { %10570 = vst [vmem:[#allocation135_spill] sm:$0xff] %v5882_v3 }
  0xf4   : > { %919 = vst.sshfl [vmem:[#allocation1 + $0x20] sm:$0xff pattern:$0x73625140] %v5569_v24 }
  0xf5   : > { %v5869_v42 = vld [vmem:[#allocation1 + $0x1] ss:$4 sm:$0xff]  ;;  %v5871_v5 = vld [vmem:[#allocation1 + $0x2] ss:$4 sm:$0xff]  ;;  %v5873_v47 = vld [vmem:[#allocation1 + $0x3] ss:$4 sm:$0xff] }
  0xf6   : > { %10564 = vst [vmem:[#allocation129_spill] sm:$0xff] %v5869_v42 }
  0xf7   : > { %10565 = vst [vmem:[#allocation130_spill] sm:$0xff] %v5871_v5 }
  0xf8   : > { %10566 = vst [vmem:[#allocation131_spill] sm:$0xff] %v5873_v47 }
  0xf9   : > { %940 = vst.sshfl [vmem:[#allocation1] sm:$0xff pattern:$0x73625140] %v5674_v2 }
  0xfb   : > { %v5890_v5 = vld [vmem:[#allocation1 + $0x21] ss:$4 sm:$0xff]  ;;  %v5892_v47 = vld [vmem:[#allocation1 + $0x22] ss:$4 sm:$0xff]  ;;  %v5894_v42 = vld [vmem:[#allocation1 + $0x23] ss:$4 sm:$0xff] }
  0xfc   : > { %10573 = vst [vmem:[#allocation138_spill] sm:$0xff] %v5890_v5 }
  0xfd   : > { %10574 = vst [vmem:[#allocation139_spill] sm:$0xff] %v5892_v47 }
  0xfe   : > { %10575 = vst [vmem:[#allocation140_spill] sm:$0xff] %v5894_v42 }
  0xff   : > { %924 = vst.sshfl [vmem:[#allocation1 + $0x20] sm:$0xff pattern:$0x73625140] %v5585_v30 }
 0x100   : > { %v5885_v41 = vld [vmem:[#allocation1] ss:$4 sm:$0xff]  ;;  %v5887_v0 = vld [vmem:[#allocation1 + $0x1] ss:$4 sm:$0xff] }
 0x101   : > { %10571 = vst [vmem:[#allocation136_spill] sm:$0xff] %v5885_v41 }
 0x102   : > { %10572 = vst [vmem:[#allocation137_spill] sm:$0xff] %v5887_v0 }
 0x103   : > { %947 = vst.sshfl [vmem:[#allocation1] sm:$0xff pattern:$0x73625140] %v5694_v11 }
 0x106   : > { %v5906_v0 = vld [vmem:[#allocation1 + $0x20] ss:$4 sm:$0xff]  ;;  %v5908_v41 = vld [vmem:[#allocation1 + $0x21] ss:$4 sm:$0xff] }
 0x107   : > { %10580 = vst [vmem:[#allocation145_spill] sm:$0xff] %v5906_v0 }
 0x108   : > { %10581 = vst [vmem:[#allocation146_spill] sm:$0xff] %v5908_v41 }
 0x109   : > { %932 = vst.sshfl [vmem:[#allocation1 + $0x20] sm:$0xff pattern:$0x73625140] %v5607_v39 }
 0x10a   : > { %v5897_v14 = vld [vmem:[#allocation1] ss:$4 sm:$0xff]  ;;  %v5899_v1 = vld [vmem:[#allocation1 + $0x1] ss:$4 sm:$0xff]  ;;  %v5901_v3 = vld [vmem:[#allocation1 + $0x2] ss:$4 sm:$0xff] }
 0x10b   : > { %10576 = vst [vmem:[#allocation141_spill] sm:$0xff] %v5897_v14  ;;  %v5903_v4 = vld [vmem:[#allocation1 + $0x3] ss:$4 sm:$0xff] }
 0x10c   : > { %10577 = vst [vmem:[#allocation142_spill] sm:$0xff] %v5899_v1 }
 0x10d   : > { %10578 = vst [vmem:[#allocation143_spill] sm:$0xff] %v5901_v3 }
 0x10e   : > { %10579 = vst [vmem:[#allocation144_spill] sm:$0xff] %v5903_v4 }
 0x10f   : > { %955 = vst.sshfl [vmem:[#allocation1] sm:$0xff pattern:$0x73625140] %v5714_v7 }
 0x110   : > { %v5918_v1 = vld [vmem:[#allocation1 + $0x20] ss:$4 sm:$0xff]  ;;  %v5920_v3 = vld [vmem:[#allocation1 + $0x21] ss:$4 sm:$0xff]  ;;  %v5922_v4 = vld [vmem:[#allocation1 + $0x22] ss:$4 sm:$0xff] }
 0x111   : > { %10585 = vst [vmem:[#allocation150_spill] sm:$0xff] %v5918_v1  ;;  %v5924_v14 = vld [vmem:[#allocation1 + $0x23] ss:$4 sm:$0xff] }
 0x112   : > { %10586 = vst [vmem:[#allocation151_spill] sm:$0xff] %v5920_v3 }
 0x113   : > { %10587 = vst [vmem:[#allocation152_spill] sm:$0xff] %v5922_v4 }
 0x114   : > { %10588 = vst [vmem:[#allocation153_spill] sm:$0xff] %v5924_v14 }
 0x115   : > { %943 = vst.sshfl [vmem:[#allocation1 + $0x20] sm:$0xff pattern:$0x73625140] %v5625_v46 }
 0x116   : > { %v5911_v47 = vld [vmem:[#allocation1 + $0x1] ss:$4 sm:$0xff]  ;;  %v5913_v42 = vld [vmem:[#allocation1 + $0x2] ss:$4 sm:$0xff]  ;;  %v5915_v5 = vld [vmem:[#allocation1 + $0x3] ss:$4 sm:$0xff] }
 0x117   : > { %10582 = vst [vmem:[#allocation147_spill] sm:$0xff] %v5911_v47 }
 0x118   : > { %10583 = vst [vmem:[#allocation148_spill] sm:$0xff] %v5913_v42 }
 0x119   : > { %10584 = vst [vmem:[#allocation149_spill] sm:$0xff] %v5915_v5 }
 0x11a   : > { %964 = vst.sshfl [vmem:[#allocation1] sm:$0xff pattern:$0x73625140] %v5734_v56 }
 0x11c   : > { %v5932_v42 = vld [vmem:[#allocation1 + $0x21] ss:$4 sm:$0xff]  ;;  %v5934_v5 = vld [vmem:[#allocation1 + $0x22] ss:$4 sm:$0xff]  ;;  %v5936_v47 = vld [vmem:[#allocation1 + $0x23] ss:$4 sm:$0xff] }
 0x11d   : > { %10591 = vst [vmem:[#allocation156_spill] sm:$0xff] %v5932_v42 }
 0x11e   : > { %10592 = vst [vmem:[#allocation157_spill] sm:$0xff] %v5934_v5 }
 0x11f   : > { %10593 = vst [vmem:[#allocation158_spill] sm:$0xff] %v5936_v47 }
 0x120   : > { %948 = vst.sshfl [vmem:[#allocation1 + $0x20] sm:$0xff pattern:$0x73625140] %v5645_v54 }
 0x121   : > { %v5927_v41 = vld [vmem:[#allocation1] ss:$4 sm:$0xff]  ;;  %v5929_v0 = vld [vmem:[#allocation1 + $0x1] ss:$4 sm:$0xff] }
 0x122   : > { %10589 = vst [vmem:[#allocation154_spill] sm:$0xff] %v5927_v41 }
 0x123   : > { %10590 = vst [vmem:[#allocation155_spill] sm:$0xff] %v5929_v0 }
 0x124   : > { %971 = vst.sshfl [vmem:[#allocation1] sm:$0xff pattern:$0x73625140] %v5754_v18 }
 0x127   : > { %v5948_v0 = vld [vmem:[#allocation1 + $0x20] ss:$4 sm:$0xff]  ;;  %v5950_v41 = vld [vmem:[#allocation1 + $0x21] ss:$4 sm:$0xff] }
 0x128   : > { %10598 = vst [vmem:[#allocation163_spill] sm:$0xff] %v5948_v0 }
 0x129   : > { %10599 = vst [vmem:[#allocation164_spill] sm:$0xff] %v5950_v41 }
 0x12a   : > { %956 = vst.sshfl [vmem:[#allocation1 + $0x20] sm:$0xff pattern:$0x73625140] %v5667_v63 }
 0x12b   : > { %v5939_v3 = vld [vmem:[#allocation1] ss:$4 sm:$0xff]  ;;  %v5941_v4 = vld [vmem:[#allocation1 + $0x1] ss:$4 sm:$0xff]  ;;  %v5943_v14 = vld [vmem:[#allocation1 + $0x2] ss:$4 sm:$0xff] }
 0x12c   : > { %10594 = vst [vmem:[#allocation159_spill] sm:$0xff] %v5939_v3  ;;  %v5945_v1 = vld [vmem:[#allocation1 + $0x3] ss:$4 sm:$0xff] }
 0x12d   : > { %10595 = vst [vmem:[#allocation160_spill] sm:$0xff] %v5941_v4 }
 0x12e   : > { %10596 = vst [vmem:[#allocation161_spill] sm:$0xff] %v5943_v14 }
 0x12f   : > { %10597 = vst [vmem:[#allocation162_spill] sm:$0xff] %v5945_v1 }
 0x130   : > { %979 = vst.sshfl [vmem:[#allocation1] sm:$0xff pattern:$0x73625140] %v5774_v51 }
 0x131   : > { %v5960_v4 = vld [vmem:[#allocation1 + $0x20] ss:$4 sm:$0xff]  ;;  %v5962_v14 = vld [vmem:[#allocation1 + $0x21] ss:$4 sm:$0xff]  ;;  %v5964_v1 = vld [vmem:[#allocation1 + $0x22] ss:$4 sm:$0xff] }
 0x132   : > { %10603 = vst [vmem:[#allocation168_spill] sm:$0xff] %v5960_v4  ;;  %v5966_v3 = vld [vmem:[#allocation1 + $0x23] ss:$4 sm:$0xff] }
 0x133   : > { %10604 = vst [vmem:[#allocation169_spill] sm:$0xff] %v5962_v14 }
 0x134   : > { %10605 = vst [vmem:[#allocation170_spill] sm:$0xff] %v5964_v1 }
 0x135   : > { %10606 = vst [vmem:[#allocation171_spill] sm:$0xff] %v5966_v3 }
 0x136   : > { %967 = vst.sshfl [vmem:[#allocation1 + $0x20] sm:$0xff pattern:$0x73625140] %v5685_v6 }
 0x137   : > { %v5953_v5 = vld [vmem:[#allocation1 + $0x1] ss:$4 sm:$0xff]  ;;  %v5955_v47 = vld [vmem:[#allocation1 + $0x2] ss:$4 sm:$0xff]  ;;  %v5957_v42 = vld [vmem:[#allocation1 + $0x3] ss:$4 sm:$0xff] }
 0x138   : > { %10600 = vst [vmem:[#allocation165_spill] sm:$0xff] %v5953_v5 }
 0x139   : > { %10601 = vst [vmem:[#allocation166_spill] sm:$0xff] %v5955_v47 }
 0x13a   : > { %10602 = vst [vmem:[#allocation167_spill] sm:$0xff] %v5957_v42 }
 0x13b   : > { %988 = vst.sshfl [vmem:[#allocation1] sm:$0xff pattern:$0x73625140] %v5794_v48 }
 0x13d   : > { %v5974_v47 = vld [vmem:[#allocation1 + $0x21] ss:$4 sm:$0xff]  ;;  %v5976_v42 = vld [vmem:[#allocation1 + $0x22] ss:$4 sm:$0xff]  ;;  %v5978_v5 = vld [vmem:[#allocation1 + $0x23] ss:$4 sm:$0xff] }
 0x13e   : > { %10609 = vst [vmem:[#allocation174_spill] sm:$0xff] %v5974_v47 }
 0x13f   : > { %10610 = vst [vmem:[#allocation175_spill] sm:$0xff] %v5976_v42 }
 0x140   : > { %10611 = vst [vmem:[#allocation176_spill] sm:$0xff] %v5978_v5 }
 0x141   : > { %972 = vst.sshfl [vmem:[#allocation1 + $0x20] sm:$0xff pattern:$0x73625140] %v5705_v19 }
 0x142   : > { %v5969_v41 = vld [vmem:[#allocation1] ss:$4 sm:$0xff]  ;;  %v5971_v0 = vld [vmem:[#allocation1 + $0x1] ss:$4 sm:$0xff] }
 0x143   : > { %10607 = vst [vmem:[#allocation172_spill] sm:$0xff] %v5969_v41 }
 0x144   : > { %10608 = vst [vmem:[#allocation173_spill] sm:$0xff] %v5971_v0 }
 0x145   : > { %995 = vst.sshfl [vmem:[#allocation1] sm:$0xff pattern:$0x73625140] %v5811_v10 }
 0x148   : > { %v5990_v0 = vld [vmem:[#allocation1 + $0x20] ss:$4 sm:$0xff]  ;;  %v5992_v47 = vld [vmem:[#allocation1 + $0x21] ss:$4 sm:$0xff] }
 0x149   : > { %10616 = vst [vmem:[#allocation181_spill] sm:$0xff] %v5990_v0 }
 0x14a   : > { %10617 = vst [vmem:[#allocation182_spill] sm:$0xff] %v5992_v47  ;;  %v6012_v47 = vld [vmem:[%s5517_s18 + $0xf8] sm:$0xff] }
 0x14b   : > { %980 = vst.sshfl [vmem:[#allocation1 + $0x20] sm:$0xff pattern:$0x73625140] %v5727_v20 }
 0x14c   : > { %v5981_v14 = vld [vmem:[#allocation1] ss:$4 sm:$0xff]  ;;  %v5983_v1 = vld [vmem:[#allocation1 + $0x1] ss:$4 sm:$0xff]  ;;  %v5985_v3 = vld [vmem:[#allocation1 + $0x2] ss:$4 sm:$0xff] }
 0x14d   : > { %10612 = vst [vmem:[#allocation177_spill] sm:$0xff] %v5981_v14  ;;  %v5987_v41 = vld [vmem:[#allocation1 + $0x3] ss:$4 sm:$0xff] }
 0x14e   : > { %10613 = vst [vmem:[#allocation178_spill] sm:$0xff] %v5983_v1 }
 0x14f   : > { %10614 = vst [vmem:[#allocation179_spill] sm:$0xff] %v5985_v3 }
 0x150   : > { %10615 = vst [vmem:[#allocation180_spill] sm:$0xff] %v5987_v41 }
 0x151   : > { %1003 = vst.sshfl [vmem:[#allocation1] sm:$0xff pattern:$0x73625140] %v5828_v9 }
 0x152   : > { %v6002_v1 = vld [vmem:[#allocation1 + $0x20] ss:$4 sm:$0xff]  ;;  %v6004_v3 = vld [vmem:[#allocation1 + $0x21] ss:$4 sm:$0xff]  ;;  %v6006_v41 = vld [vmem:[#allocation1 + $0x22] ss:$4 sm:$0xff] }
 0x153   : > { %10621 = vst [vmem:[#allocation186_spill] sm:$0xff] %v6002_v1  ;;  %v6008_v4 = vld [vmem:[#allocation1 + $0x23] ss:$4 sm:$0xff] }
 0x154   : > { %10622 = vst [vmem:[#allocation187_spill] sm:$0xff] %v6004_v3 }
 0x155   : > { %10623 = vst [vmem:[#allocation188_spill] sm:$0xff] %v6006_v41 }
 0x156   : > { %10624 = vst [vmem:[#allocation189_spill] sm:$0xff] %v6008_v4 }
 0x157   : > { %991 = vst.sshfl [vmem:[#allocation1 + $0x20] sm:$0xff pattern:$0x73625140] %v5745_v57 }
 0x158   : > { %v5995_v5 = vld [vmem:[#allocation1 + $0x1] ss:$4 sm:$0xff]  ;;  %v5997_v42 = vld [vmem:[#allocation1 + $0x2] ss:$4 sm:$0xff]  ;;  %v5999_v14 = vld [vmem:[#allocation1 + $0x3] ss:$4 sm:$0xff] }
 0x159   : > { %10618 = vst [vmem:[#allocation183_spill] sm:$0xff] %v5995_v5 }
 0x15a   : > { %10619 = vst [vmem:[#allocation184_spill] sm:$0xff] %v5997_v42 }
 0x15b   : > { %10620 = vst [vmem:[#allocation185_spill] sm:$0xff] %v5999_v14 }
 0x15c   : > { %1012 = vst.sshfl [vmem:[#allocation1] sm:$0xff pattern:$0x73625140] %v5845_v49 }
 0x15d   : > { %10625 = vst [vmem:[#allocation190_spill] sm:$0xff] %v6012_v47 }
 0x15e   : > { %v6019_v14 = vld [vmem:[#allocation1 + $0x21] ss:$4 sm:$0xff]  ;;  %v6021_v42 = vld [vmem:[#allocation1 + $0x22] ss:$4 sm:$0xff]  ;;  %v6023_v3 = vld [vmem:[#allocation1 + $0x23] ss:$4 sm:$0xff] }
 0x15f   : > { %10628 = vst [vmem:[#allocation193_spill] sm:$0xff] %v6019_v14 }
 0x160   : > { %10629 = vst [vmem:[#allocation194_spill] sm:$0xff] %v6021_v42 }
 0x161   : > { %10630 = vst [vmem:[#allocation195_spill] sm:$0xff] %v6023_v3 }
 0x162   : > { %996 = vst.sshfl [vmem:[#allocation1 + $0x20] sm:$0xff pattern:$0x73625140] %v5765_v12 }
 0x163   : > { %v6014_v0 = vld [vmem:[#allocation1] ss:$4 sm:$0xff]  ;;  %v6016_v5 = vld [vmem:[#allocation1 + $0x1] ss:$4 sm:$0xff] }
 0x164   : > { %10626 = vst [vmem:[#allocation191_spill] sm:$0xff] %v6014_v0 }
 0x165   : > { %10627 = vst [vmem:[#allocation192_spill] sm:$0xff] %v6016_v5 }
 0x166   : > { %1019 = vst.sshfl [vmem:[#allocation1] sm:$0xff pattern:$0x73625140] %v6012_v47 }
 0x169   : > { %v6035_v5 = vld [vmem:[#allocation1 + $0x20] ss:$4 sm:$0xff]  ;;  %v6037_v14 = vld [vmem:[#allocation1 + $0x21] ss:$4 sm:$0xff] }
 0x16a   : > { %10635 = vst [vmem:[#allocation200_spill] sm:$0xff] %v6035_v5 }
 0x16b   : > { %10636 = vst [vmem:[#allocation201_spill] sm:$0xff] %v6037_v14 }
 0x16c   : > { %1004 = vst.sshfl [vmem:[#allocation1 + $0x20] sm:$0xff pattern:$0x73625140] %v5787_v55 }
 0x16d   : > { %v6026_v4 = vld [vmem:[#allocation1] ss:$4 sm:$0xff]  ;;  %v6028_v41 = vld [vmem:[#allocation1 + $0x1] ss:$4 sm:$0xff]  ;;  %v6030_v1 = vld [vmem:[#allocation1 + $0x2] ss:$4 sm:$0xff] }
 0x16e   : > { %10631 = vst [vmem:[#allocation196_spill] sm:$0xff] %v6026_v4  ;;  %v6032_v0 = vld [vmem:[#allocation1 + $0x3] ss:$4 sm:$0xff] }
 0x16f   : > { %10632 = vst [vmem:[#allocation197_spill] sm:$0xff] %v6028_v41  ;;  %v6047_v41 = vld [vmem:[%s5517_s18 + $0xf0] sm:$0xff] }
 0x170   : > { %10633 = vst [vmem:[#allocation198_spill] sm:$0xff] %v6030_v1 }
 0x171   : > { %10634 = vst [vmem:[#allocation199_spill] sm:$0xff] %v6032_v0 }
 0x172   : > { %1065 = vst.sshfl [vmem:[#allocation1] sm:$0xff pattern:$0x73625140] %v5569_v24 }
 0x173   : > { %10640 = vst [vmem:[#allocation205_spill] sm:$0xff] %v6047_v41  ;;  %v6050_v0 = vld [vmem:[#allocation1 + $0x20] ss:$4 sm:$0xff]  ;;  %v6052_v1 = vld [vmem:[#allocation1 + $0x21] ss:$4 sm:$0xff] }
 0x174   : > { %10641 = vst [vmem:[#allocation206_spill] sm:$0xff] %v6050_v0  ;;  %v6054_v62 = vld [vmem:[#allocation1 + $0x22] ss:$4 sm:$0xff]  ;;  %v6056_v5 = vld [vmem:[#allocation1 + $0x23] ss:$4 sm:$0xff] }
 0x175   : > { %10642 = vst [vmem:[#allocation207_spill] sm:$0xff] %v6052_v1 }
 0x176   : > { %10643 = vst [vmem:[#allocation208_spill] sm:$0xff] %v6054_v62 }
 0x177   : > { %10644 = vst [vmem:[#allocation209_spill] sm:$0xff] %v6056_v5 }
 0x178   : > { %1015 = vst.sshfl [vmem:[#allocation1 + $0x20] sm:$0xff pattern:$0x73625140] %v6047_v41 }
 0x179   : > { %v6040_v3 = vld [vmem:[#allocation1 + $0x1] ss:$4 sm:$0xff]  ;;  %v6042_v42 = vld [vmem:[#allocation1 + $0x2] ss:$4 sm:$0xff]  ;;  %v6044_v4 = vld [vmem:[#allocation1 + $0x3] ss:$4 sm:$0xff] }
 0x17a   : > { %10637 = vst [vmem:[#allocation202_spill] sm:$0xff] %v6040_v3 }
 0x17b   : > { %10638 = vst [vmem:[#allocation203_spill] sm:$0xff] %v6042_v42  ;;  %v6064_v42 = vld [vmem:[%s5517_s18 + $0x100] sm:$0xf] }
 0x17c   : > { %10639 = vst [vmem:[#allocation204_spill] sm:$0xff] %v6044_v4 }
 0x17d   : > { %1081 = vst.sshfl [vmem:[#allocation1] sm:$0xff pattern:$0x73625140] %v5585_v30 }
 0x17e   : > { %10647 = vst [vmem:[#allocation212_spill] sm:$0xff] %v6064_v42 }
 0x17f   : > { %v6067_v4 = vld [vmem:[#allocation1 + $0x21] ss:$4 sm:$0xff]  ;;  %v6069_v61 = vld [vmem:[#allocation1 + $0x22] ss:$4 sm:$0xff]  ;;  %v6071_v0 = vld [vmem:[#allocation1 + $0x23] ss:$4 sm:$0xff] }
 0x180   : > { %10648 = vst [vmem:[#allocation213_spill] sm:$0xff] %v6067_v4 }
 0x181   : > { %10649 = vst [vmem:[#allocation214_spill] sm:$0xff] %v6069_v61 }
 0x182   : > { %10650 = vst [vmem:[#allocation215_spill] sm:$0xff] %v6071_v0 }
 0x183   : > { %1020 = vst.sshfl [vmem:[#allocation1 + $0x20] sm:$0xff pattern:$0x73625140] %v6064_v42 }
 0x184   : > { %v6059_v14 = vld [vmem:[#allocation1] ss:$4 sm:$0xff]  ;;  %v6061_v3 = vld [vmem:[#allocation1 + $0x1] ss:$4 sm:$0xff] }
 0x185   : > { %10645 = vst [vmem:[#allocation210_spill] sm:$0xff] %v6059_v14 }
 0x186   : > { %10646 = vst [vmem:[#allocation211_spill] sm:$0xff] %v6061_v3 }
 0x187   : > { %1088 = vst.sshfl [vmem:[#allocation1] sm:$0xff pattern:$0x73625140] %v5607_v39 }
 0x18a   : > { %v6083_v3 = vld [vmem:[#allocation1 + $0x20] ss:$4 sm:$0xff]  ;;  %v6085_v60 = vld [vmem:[#allocation1 + $0x21] ss:$4 sm:$0xff] }
 0x18b   : > { %10655 = vst [vmem:[#allocation220_spill] sm:$0xff] %v6083_v3 }
 0x18c   : > { %10656 = vst [vmem:[#allocation221_spill] sm:$0xff] %v6085_v60 }
 0x18d   : > { %1066 = vst.sshfl [vmem:[#allocation1 + $0x20] sm:$0xff pattern:$0x73625140] %v5634_v50 }
 0x18e   : > { %v6074_v62 = vld [vmem:[#allocation1] ss:$4 sm:$0xff]  ;;  %v6076_v5 = vld [vmem:[#allocation1 + $0x1] ss:$4 sm:$0xff]  ;;  %v6078_v1 = vld [vmem:[#allocation1 + $0x2] ss:$4 sm:$0xff] }
 0x18f   : > { %10651 = vst [vmem:[#allocation216_spill] sm:$0xff] %v6074_v62  ;;  %v6080_v14 = vld [vmem:[#allocation1 + $0x3] ss:$4 sm:$0xff] }
 0x190   : > { %10652 = vst [vmem:[#allocation217_spill] sm:$0xff] %v6076_v5 }
 0x191   : > { %10653 = vst [vmem:[#allocation218_spill] sm:$0xff] %v6078_v1 }
 0x192   : > { %10654 = vst [vmem:[#allocation219_spill] sm:$0xff] %v6080_v14 }
 0x193   : > { %1096 = vst.sshfl [vmem:[#allocation1] sm:$0xff pattern:$0x73625140] %v5625_v46 }
 0x194   : > { %v6095_v5 = vld [vmem:[#allocation1 + $0x20] ss:$4 sm:$0xff]  ;;  %v6097_v1 = vld [vmem:[#allocation1 + $0x21] ss:$4 sm:$0xff]  ;;  %v6099_v14 = vld [vmem:[#allocation1 + $0x22] ss:$4 sm:$0xff] }
 0x195   : > { %10660 = vst [vmem:[#allocation225_spill] sm:$0xff] %v6095_v5  ;;  %v6101_v62 = vld [vmem:[#allocation1 + $0x23] ss:$4 sm:$0xff] }
 0x196   : > { %10661 = vst [vmem:[#allocation226_spill] sm:$0xff] %v6097_v1 }
 0x197   : > { %10662 = vst [vmem:[#allocation227_spill] sm:$0xff] %v6099_v14 }
 0x198   : > { %10663 = vst [vmem:[#allocation228_spill] sm:$0xff] %v6101_v62 }
 0x199   : > { %1084 = vst.sshfl [vmem:[#allocation1 + $0x20] sm:$0xff pattern:$0x73625140] %v5654_v58 }
 0x19a   : > { %v6088_v61 = vld [vmem:[#allocation1 + $0x1] ss:$4 sm:$0xff]  ;;  %v6090_v0 = vld [vmem:[#allocation1 + $0x2] ss:$4 sm:$0xff]  ;;  %v6092_v4 = vld [vmem:[#allocation1 + $0x3] ss:$4 sm:$0xff] }
 0x19b   : > { %10657 = vst [vmem:[#allocation222_spill] sm:$0xff] %v6088_v61 }
 0x19c   : > { %10658 = vst [vmem:[#allocation223_spill] sm:$0xff] %v6090_v0 }
 0x19d   : > { %10659 = vst [vmem:[#allocation224_spill] sm:$0xff] %v6092_v4 }
 0x19e   : > { %1105 = vst.sshfl [vmem:[#allocation1] sm:$0xff pattern:$0x73625140] %v5645_v54 }
 0x1a0   : > { %v6109_v0 = vld [vmem:[#allocation1 + $0x21] ss:$4 sm:$0xff]  ;;  %v6111_v61 = vld [vmem:[#allocation1 + $0x22] ss:$4 sm:$0xff]  ;;  %v6113_v4 = vld [vmem:[#allocation1 + $0x23] ss:$4 sm:$0xff] }
 0x1a1   : > { %10666 = vst [vmem:[#allocation231_spill] sm:$0xff] %v6109_v0 }
 0x1a2   : > { %10667 = vst [vmem:[#allocation232_spill] sm:$0xff] %v6111_v61 }
 0x1a3   : > { %10668 = vst [vmem:[#allocation233_spill] sm:$0xff] %v6113_v4 }
 0x1a4   : > { %1089 = vst.sshfl [vmem:[#allocation1 + $0x20] sm:$0xff pattern:$0x73625140] %v5674_v2 }
 0x1a5   : > { %v6104_v60 = vld [vmem:[#allocation1] ss:$4 sm:$0xff]  ;;  %v6106_v3 = vld [vmem:[#allocation1 + $0x1] ss:$4 sm:$0xff] }
 0x1a6   : > { %10664 = vst [vmem:[#allocation229_spill] sm:$0xff] %v6104_v60 }
 0x1a7   : > { %10665 = vst [vmem:[#allocation230_spill] sm:$0xff] %v6106_v3 }
 0x1a8   : > { %1112 = vst.sshfl [vmem:[#allocation1] sm:$0xff pattern:$0x73625140] %v5667_v63 }
 0x1ab   : > { %v6125_v3 = vld [vmem:[#allocation1 + $0x20] ss:$4 sm:$0xff]  ;;  %v6127_v60 = vld [vmem:[#allocation1 + $0x21] ss:$4 sm:$0xff] }
 0x1ac   : > { %10673 = vst [vmem:[#allocation238_spill] sm:$0xff] %v6125_v3 }
 0x1ad   : > { %10674 = vst [vmem:[#allocation239_spill] sm:$0xff] %v6127_v60 }
 0x1ae   : > { %1097 = vst.sshfl [vmem:[#allocation1 + $0x20] sm:$0xff pattern:$0x73625140] %v5694_v11 }
 0x1af   : > { %v6116_v5 = vld [vmem:[#allocation1] ss:$4 sm:$0xff]  ;;  %v6118_v14 = vld [vmem:[#allocation1 + $0x1] ss:$4 sm:$0xff]  ;;  %v6120_v62 = vld [vmem:[#allocation1 + $0x2] ss:$4 sm:$0xff] }
 0x1b0   : > { %10669 = vst [vmem:[#allocation234_spill] sm:$0xff] %v6116_v5  ;;  %v6122_v1 = vld [vmem:[#allocation1 + $0x3] ss:$4 sm:$0xff] }
 0x1b1   : > { %10670 = vst [vmem:[#allocation235_spill] sm:$0xff] %v6118_v14 }
 0x1b2   : > { %10671 = vst [vmem:[#allocation236_spill] sm:$0xff] %v6120_v62 }
 0x1b3   : > { %10672 = vst [vmem:[#allocation237_spill] sm:$0xff] %v6122_v1 }
 0x1b4   : > { %1120 = vst.sshfl [vmem:[#allocation1] sm:$0xff pattern:$0x73625140] %v5685_v6 }
 0x1b5   : > { %v6137_v14 = vld [vmem:[#allocation1 + $0x20] ss:$4 sm:$0xff]  ;;  %v6139_v62 = vld [vmem:[#allocation1 + $0x21] ss:$4 sm:$0xff]  ;;  %v6141_v1 = vld [vmem:[#allocation1 + $0x22] ss:$4 sm:$0xff] }
 0x1b6   : > { %10678 = vst [vmem:[#allocation243_spill] sm:$0xff] %v6137_v14  ;;  %v6143_v5 = vld [vmem:[#allocation1 + $0x23] ss:$4 sm:$0xff] }
 0x1b7   : > { %10679 = vst [vmem:[#allocation244_spill] sm:$0xff] %v6139_v62 }
 0x1b8   : > { %10680 = vst [vmem:[#allocation245_spill] sm:$0xff] %v6141_v1 }
 0x1b9   : > { %10681 = vst [vmem:[#allocation246_spill] sm:$0xff] %v6143_v5 }
 0x1ba   : > { %1108 = vst.sshfl [vmem:[#allocation1 + $0x20] sm:$0xff pattern:$0x73625140] %v5714_v7 }
 0x1bb   : > { %v6130_v61 = vld [vmem:[#allocation1 + $0x1] ss:$4 sm:$0xff]  ;;  %v6132_v4 = vld [vmem:[#allocation1 + $0x2] ss:$4 sm:$0xff]  ;;  %v6134_v0 = vld [vmem:[#allocation1 + $0x3] ss:$4 sm:$0xff] }
 0x1bc   : > { %10675 = vst [vmem:[#allocation240_spill] sm:$0xff] %v6130_v61 }
 0x1bd   : > { %10676 = vst [vmem:[#allocation241_spill] sm:$0xff] %v6132_v4 }
 0x1be   : > { %10677 = vst [vmem:[#allocation242_spill] sm:$0xff] %v6134_v0 }
 0x1bf   : > { %1129 = vst.sshfl [vmem:[#allocation1] sm:$0xff pattern:$0x73625140] %v5705_v19 }
 0x1c1   : > { %v6151_v4 = vld [vmem:[#allocation1 + $0x21] ss:$4 sm:$0xff]  ;;  %v6153_v0 = vld [vmem:[#allocation1 + $0x22] ss:$4 sm:$0xff]  ;;  %v6155_v61 = vld [vmem:[#allocation1 + $0x23] ss:$4 sm:$0xff] }
 0x1c2   : > { %10684 = vst [vmem:[#allocation249_spill] sm:$0xff] %v6151_v4 }
 0x1c3   : > { %10685 = vst [vmem:[#allocation250_spill] sm:$0xff] %v6153_v0 }
 0x1c4   : > { %10686 = vst [vmem:[#allocation251_spill] sm:$0xff] %v6155_v61 }
 0x1c5   : > { %1113 = vst.sshfl [vmem:[#allocation1 + $0x20] sm:$0xff pattern:$0x73625140] %v5734_v56 }
 0x1c6   : > { %v6146_v60 = vld [vmem:[#allocation1] ss:$4 sm:$0xff]  ;;  %v6148_v3 = vld [vmem:[#allocation1 + $0x1] ss:$4 sm:$0xff] }
 0x1c7   : > { %10682 = vst [vmem:[#allocation247_spill] sm:$0xff] %v6146_v60 }
 0x1c8   : > { %10683 = vst [vmem:[#allocation248_spill] sm:$0xff] %v6148_v3 }
 0x1c9   : > { %1136 = vst.sshfl [vmem:[#allocation1] sm:$0xff pattern:$0x73625140] %v5727_v20 }
 0x1cc   : > { %v6167_v60 = vld [vmem:[#allocation1 + $0x20] ss:$4 sm:$0xff]  ;;  %v6169_v3 = vld [vmem:[#allocation1 + $0x21] ss:$4 sm:$0xff] }
 0x1cd   : > { %10691 = vst [vmem:[#allocation256_spill] sm:$0xff] %v6167_v60 }
 0x1ce   : > { %10692 = vst [vmem:[#allocation257_spill] sm:$0xff] %v6169_v3 }
 0x1cf   : > { %1121 = vst.sshfl [vmem:[#allocation1 + $0x20] sm:$0xff pattern:$0x73625140] %v5754_v18 }
 0x1d0   : > { %v6158_v62 = vld [vmem:[#allocation1] ss:$4 sm:$0xff]  ;;  %v6160_v1 = vld [vmem:[#allocation1 + $0x1] ss:$4 sm:$0xff]  ;;  %v6162_v5 = vld [vmem:[#allocation1 + $0x2] ss:$4 sm:$0xff] }
 0x1d1   : > { %10687 = vst [vmem:[#allocation252_spill] sm:$0xff] %v6158_v62  ;;  %v6164_v14 = vld [vmem:[#allocation1 + $0x3] ss:$4 sm:$0xff] }
 0x1d2   : > { %10688 = vst [vmem:[#allocation253_spill] sm:$0xff] %v6160_v1 }
 0x1d3   : > { %10689 = vst [vmem:[#allocation254_spill] sm:$0xff] %v6162_v5 }
 0x1d4   : > { %10690 = vst [vmem:[#allocation255_spill] sm:$0xff] %v6164_v14 }
 0x1d5   : > { %1144 = vst.sshfl [vmem:[#allocation1] sm:$0xff pattern:$0x73625140] %v5745_v57 }
 0x1d6   : > { %v6179_v1 = vld [vmem:[#allocation1 + $0x20] ss:$4 sm:$0xff]  ;;  %v6181_v5 = vld [vmem:[#allocation1 + $0x21] ss:$4 sm:$0xff]  ;;  %v6183_v14 = vld [vmem:[#allocation1 + $0x22] ss:$4 sm:$0xff] }
 0x1d7   : > { %10696 = vst [vmem:[#allocation261_spill] sm:$0xff] %v6179_v1  ;;  %v6185_v62 = vld [vmem:[#allocation1 + $0x23] ss:$4 sm:$0xff] }
 0x1d8   : > { %10697 = vst [vmem:[#allocation262_spill] sm:$0xff] %v6181_v5 }
 0x1d9   : > { %10698 = vst [vmem:[#allocation263_spill] sm:$0xff] %v6183_v14 }
 0x1da   : > { %10699 = vst [vmem:[#allocation264_spill] sm:$0xff] %v6185_v62 }
 0x1db   : > { %1132 = vst.sshfl [vmem:[#allocation1 + $0x20] sm:$0xff pattern:$0x73625140] %v5774_v51 }
 0x1dc   : > { %v6172_v4 = vld [vmem:[#allocation1 + $0x1] ss:$4 sm:$0xff]  ;;  %v6174_v61 = vld [vmem:[#allocation1 + $0x2] ss:$4 sm:$0xff]  ;;  %v6176_v0 = vld [vmem:[#allocation1 + $0x3] ss:$4 sm:$0xff] }
 0x1dd   : > { %10693 = vst [vmem:[#allocation258_spill] sm:$0xff] %v6172_v4 }
 0x1de   : > { %10694 = vst [vmem:[#allocation259_spill] sm:$0xff] %v6174_v61 }
 0x1df   : > { %10695 = vst [vmem:[#allocation260_spill] sm:$0xff] %v6176_v0 }
 0x1e0   : > { %1153 = vst.sshfl [vmem:[#allocation1] sm:$0xff pattern:$0x73625140] %v5765_v12 }
 0x1e2   : > { %v6193_v61 = vld [vmem:[#allocation1 + $0x21] ss:$4 sm:$0xff]  ;;  %v6195_v0 = vld [vmem:[#allocation1 + $0x22] ss:$4 sm:$0xff]  ;;  %v6197_v4 = vld [vmem:[#allocation1 + $0x23] ss:$4 sm:$0xff] }
 0x1e3   : > { %10702 = vst [vmem:[#allocation267_spill] sm:$0xff] %v6193_v61 }
 0x1e4   : > { %10703 = vst [vmem:[#allocation268_spill] sm:$0xff] %v6195_v0 }
 0x1e5   : > { %10704 = vst [vmem:[#allocation269_spill] sm:$0xff] %v6197_v4 }
 0x1e6   : > { %1137 = vst.sshfl [vmem:[#allocation1 + $0x20] sm:$0xff pattern:$0x73625140] %v5794_v48 }
 0x1e7   : > { %v6188_v3 = vld [vmem:[#allocation1] ss:$4 sm:$0xff]  ;;  %v6190_v60 = vld [vmem:[#allocation1 + $0x1] ss:$4 sm:$0xff] }
 0x1e8   : > { %10700 = vst [vmem:[#allocation265_spill] sm:$0xff] %v6188_v3 }
 0x1e9   : > { %10701 = vst [vmem:[#allocation266_spill] sm:$0xff] %v6190_v60 }
 0x1ea   : > { %1160 = vst.sshfl [vmem:[#allocation1] sm:$0xff pattern:$0x73625140] %v5787_v55 }
 0x1ed   : > { %v6209_v60 = vld [vmem:[#allocation1 + $0x20] ss:$4 sm:$0xff]  ;;  %v6211_v61 = vld [vmem:[#allocation1 + $0x21] ss:$4 sm:$0xff] }
 0x1ee   : > { %10709 = vst [vmem:[#allocation274_spill] sm:$0xff] %v6209_v60 }
 0x1ef   : > { %10710 = vst [vmem:[#allocation275_spill] sm:$0xff] %v6211_v61  ;;  %v6231_v61 = vld [vmem:[%s5517_s18 + $0x110] sm:$0xff] }
 0x1f0   : > { %1145 = vst.sshfl [vmem:[#allocation1 + $0x20] sm:$0xff pattern:$0x73625140] %v5811_v10 }
 0x1f1   : > { %v6200_v5 = vld [vmem:[#allocation1] ss:$4 sm:$0xff]  ;;  %v6202_v14 = vld [vmem:[#allocation1 + $0x1] ss:$4 sm:$0xff]  ;;  %v6204_v62 = vld [vmem:[#allocation1 + $0x2] ss:$4 sm:$0xff] }
 0x1f2   : > { %10705 = vst [vmem:[#allocation270_spill] sm:$0xff] %v6200_v5  ;;  %v6206_v3 = vld [vmem:[#allocation1 + $0x3] ss:$4 sm:$0xff] }
 0x1f3   : > { %10706 = vst [vmem:[#allocation271_spill] sm:$0xff] %v6202_v14 }
 0x1f4   : > { %10707 = vst [vmem:[#allocation272_spill] sm:$0xff] %v6204_v62 }
 0x1f5   : > { %10708 = vst [vmem:[#allocation273_spill] sm:$0xff] %v6206_v3 }
 0x1f6   : > { %1168 = vst.sshfl [vmem:[#allocation1] sm:$0xff pattern:$0x73625140] %v6047_v41  ;;  %v6332_v41 = vrot.slane %v5561_v21, 2 }
 0x1f7   : > { %v6221_v14 = vld [vmem:[#allocation1 + $0x20] ss:$4 sm:$0xff]  ;;  %v6223_v62 = vld [vmem:[#allocation1 + $0x21] ss:$4 sm:$0xff]  ;;  %v6225_v3 = vld [vmem:[#allocation1 + $0x22] ss:$4 sm:$0xff] }
 0x1f8   : > { %10714 = vst [vmem:[#allocation279_spill] sm:$0xff] %v6221_v14  ;;  %v6227_v1 = vld [vmem:[#allocation1 + $0x23] ss:$4 sm:$0xff] }
 0x1f9   : > { %10715 = vst [vmem:[#allocation280_spill] sm:$0xff] %v6223_v62  ;;  %v10098_v62 = vrot.slane %v5523_v8, 4 }
 0x1fa   : > { %10716 = vst [vmem:[#allocation281_spill] sm:$0xff] %v6225_v3  ;;  %v10097_v3 = vrot.slane %v5523_v8, 2 }
 0x1fb   : > { %10717 = vst [vmem:[#allocation282_spill] sm:$0xff] %v6227_v1  ;;  %v10099_v1 = vrot.slane %v5523_v8, 6 }
 0x1fc   : > { %1156 = vst.sshfl [vmem:[#allocation1 + $0x20] sm:$0xff pattern:$0x73625140] %v5828_v9 }
 0x1fd   : > { %v6214_v4 = vld [vmem:[#allocation1 + $0x1] ss:$4 sm:$0xff]  ;;  %v6216_v0 = vld [vmem:[#allocation1 + $0x2] ss:$4 sm:$0xff]  ;;  %v6218_v5 = vld [vmem:[#allocation1 + $0x3] ss:$4 sm:$0xff] }
 0x1fe   : > { %10711 = vst [vmem:[#allocation276_spill] sm:$0xff] %v6214_v4 }
 0x1ff   : > { %10712 = vst [vmem:[#allocation277_spill] sm:$0xff] %v6216_v0 }
 0x200   : > { %10713 = vst [vmem:[#allocation278_spill] sm:$0xff] %v6218_v5 }
 0x201   : > { %1177 = vst.sshfl [vmem:[#allocation1] sm:$0xff pattern:$0x73625140] %v6064_v42 }
 0x202   : > { %10718 = vst [vmem:[#allocation283_spill] sm:$0xff] %v6231_v61 }
 0x203   : > { %v6238_v5 = vld [vmem:[#allocation1 + $0x21] ss:$4 sm:$0xff]  ;;  %v6240_v0 = vld [vmem:[#allocation1 + $0x22] ss:$4 sm:$0xff]  ;;  %v6242_v14 = vld [vmem:[#allocation1 + $0x23] ss:$4 sm:$0xff] }
 0x204   : > { %10721 = vst [vmem:[#allocation286_spill] sm:$0xff] %v6238_v5 }
 0x205   : > { %10722 = vst [vmem:[#allocation287_spill] sm:$0xff] %v6240_v0 }
 0x206   : > { %10723 = vst [vmem:[#allocation288_spill] sm:$0xff] %v6242_v14 }
 0x207   : > { %1161 = vst.sshfl [vmem:[#allocation1 + $0x20] sm:$0xff pattern:$0x73625140] %v5845_v49 }
 0x208   : > { %v6233_v60 = vld [vmem:[#allocation1] ss:$4 sm:$0xff]  ;;  %v6235_v4 = vld [vmem:[#allocation1 + $0x1] ss:$4 sm:$0xff] }
 0x209   : > { %10719 = vst [vmem:[#allocation284_spill] sm:$0xff] %v6233_v60 }
 0x20a   : > { %10720 = vst [vmem:[#allocation285_spill] sm:$0xff] %v6235_v4 }
 0x20b   : > { %1184 = vst.sshfl [vmem:[#allocation1] sm:$0xff pattern:$0x73625140] %v6231_v61 }
 0x20e   : > { %v6261_v14 = vld [vmem:[#allocation1 + $0x20] ss:$4 sm:$0xff]  ;;  %v6263_v0 = vld [vmem:[#allocation1 + $0x21] ss:$4 sm:$0xff] }
 0x20f   : > { %10728 = vst [vmem:[#allocation293_spill] sm:$0xff] %v6261_v14  ;;  %v6291_v14 = vld [vmem:[%s5517_s18 + $0x118] sm:$0xf] }
 0x210   : > { %10729 = vst [vmem:[#allocation294_spill] sm:$0xff] %v6263_v0 }
 0x211   : > { %1169 = vst.sshfl [vmem:[#allocation1 + $0x20] sm:$0xff pattern:$0x73625140] %v6012_v47 }
 0x212   : > { %v6248_v60 = vld [vmem:[#allocation1] ss:$4 sm:$0xff]  ;;  %v6250_v4 = vld [vmem:[#allocation1 + $0x1] ss:$4 sm:$0xff]  ;;  %v6252_v61 = vld [vmem:[#allocation1 + $0x2] ss:$4 sm:$0xff] }
 0x213   : > { %10724 = vst [vmem:[#allocation289_spill] sm:$0xff] %v6248_v60  ;;  %v6254_v5 = vld [vmem:[#allocation1 + $0x3] ss:$4 sm:$0xff] }
 0x214   : > { %10725 = vst [vmem:[#allocation290_spill] sm:$0xff] %v6250_v4  ;;  %v6272_v4 = vrot.slane %v5588_v31, 2 }
 0x215   : > { %10726 = vst [vmem:[#allocation291_spill] sm:$0xff] %v6252_v61 }
 0x216   : > { %10727 = vst [vmem:[#allocation292_spill] sm:$0xff] %v6254_v5  ;;  %v6269_v5 = vld [vmem:[%s5517_s18 + $0x108] sm:$0xff]  ;;  %s5004_s18 = sshll.u32 %s5335_s27, 3 }
 0x217   : > { %1192 = vst [vmem:[#allocation1] ss:$4 sm:$0xff] %v5523_v8  ;;  %s5022_s21 = sadd.s32 4294967295, %s5004_s18  ;;  %s5081_s18 = sshll.u32 %s5335_s27, 4 }
 0x218   : > { %1194 = vst [vmem:[#allocation1 + $0x1] ss:$4 sm:$0xff] %v10097_v3  ;;  %v6275_v3 = vrot.slane %v5588_v31, 4  ;;  %v6280_v60 = vld [vmem:[#allocation1 + $0x21] ss:$4 sm:$0xff] }
 0x219   : > { %1196 = vst [vmem:[#allocation1 + $0x2] ss:$4 sm:$0xff] %v10098_v62  ;;  %v6278_v62 = vld [vmem:[#allocation1 + $0x20] ss:$4 sm:$0xff]  ;;  %v6285_v0 = vld [vmem:[#allocation1 + $0x23] ss:$4 sm:$0xff] }
 0x21a   : > { %1198 = vst [vmem:[#allocation1 + $0x3] ss:$4 sm:$0xff] %v10099_v1  ;;  %v6283_v1 = vld [vmem:[#allocation1 + $0x22] ss:$4 sm:$0xff] }
 0x21b   : > { %10730 = vst [vmem:[#allocation295_spill] sm:$0xff] %v6269_v5 }
 0x21c   : > { %10731 = vst [vmem:[#allocation296_spill] sm:$0xff] %v6278_v62  ;;  %v10107_v62 = vrot.slane %v5581_v29, 6 }
 0x21d   : > { %10732 = vst [vmem:[#allocation297_spill] sm:$0xff] %v6280_v60 }
 0x21e   : > { %10733 = vst [vmem:[#allocation298_spill] sm:$0xff] %v6283_v1  ;;  %v6305_v1 = vrot.slane %v5561_v21, 6 }
 0x21f   : > { %10734 = vst [vmem:[#allocation299_spill] sm:$0xff] %v6285_v0 }
 0x220   : > { %1180 = vst.sshfl [vmem:[#allocation1 + $0x20] sm:$0xff pattern:$0x73625140] %v6269_v5  ;;  %v6310_v5 = vrot.slane %v5569_v24, 2 }
 0x221   : > { %v1207_v61 = vld.sshfl [vmem:[#allocation1] sm:$0xff pattern:$0x73625140]  ;;  %10735 = vst [vmem:[#allocation300_spill] sm:$0xff] %v6291_v14 }
 0x222   : > { %2639 = vmatmul.f32.vlgmr.msra.gmra.mxu0 %v1207_v61  ;;  %1209 = vst [vmem:[#allocation1] ss:$4 sm:$0xff] %v5539_v13  ;;  %v10106_v61 = vrot.slane %v5581_v29, 4 }
 0x223   : > { %1210 = vst [vmem:[#allocation1 + $0x1] ss:$4 sm:$0xff] %v5588_v31 }
 0x224   : > { %1211 = vst [vmem:[#allocation1 + $0x2] ss:$4 sm:$0xff] %v6272_v4 }
 0x225   : > { %1212 = vst [vmem:[#allocation1 + $0x3] ss:$4 sm:$0xff] %v6275_v3 }
 0x226   : > { %10739 = vst [vmem:[#allocation304_spill] sm:$0xff] %v6310_v5 }
 0x227   : > { %v6295_v42 = vld [vmem:[#allocation1 + $0x21] ss:$4 sm:$0xff]  ;;  %v6297_v60 = vld [vmem:[#allocation1 + $0x22] ss:$4 sm:$0xff]  ;;  %v6299_v47 = vld [vmem:[#allocation1 + $0x23] ss:$4 sm:$0xff] }
 0x228   : > { %10736 = vst [vmem:[#allocation301_spill] sm:$0xff] %v6295_v42 }
 0x229   : > { %10737 = vst [vmem:[#allocation302_spill] sm:$0xff] %v6297_v60 }
 0x22a   : > { %10738 = vst [vmem:[#allocation303_spill] sm:$0xff] %v6299_v47  ;;  %v10112_v47 = vrot.slane %v5581_v29, 2 }
 0x22b   : > { %1185 = vst.sshfl [vmem:[#allocation1 + $0x20] sm:$0xff pattern:$0x73625140] %v6291_v14  ;;  %v6328_v14 = vrot.slane %v5588_v31, 6 }
 0x22c   : > { %1204 = vst [vmem:[#allocation1 + $0x22] ss:$4 sm:$0xff] %v10106_v61  ;;  %v1217_v0 = vld.sshfl [vmem:[#allocation1] sm:$0xff pattern:$0x73625140] }
 0x22d   : > { %1206 = vst [vmem:[#allocation1 + $0x23] ss:$4 sm:$0xff] %v10107_v62  ;;  %v6325_v62 = vrot.slane %v5634_v50, 4 }
 0x22e   : > { %1220 = vst [vmem:[#allocation1 + $0x1] ss:$4 sm:$0xff] %v5610_v40 }
 0x22f   : > { %1221 = vst [vmem:[#allocation1 + $0x2] ss:$4 sm:$0xff] %v5569_v24 }
 0x230   : > { %1219 = vst [vmem:[#allocation1] ss:$4 sm:$0xff] %v6305_v1 }
 0x231   : > { %1222 = vst [vmem:[#allocation1 + $0x3] ss:$4 sm:$0xff] %v6310_v5 }
 0x232   : > { %v6317_v61 = vld [vmem:[#allocation1 + $0x20] ss:$4 sm:$0xff]  ;;  %v6319_v60 = vld [vmem:[#allocation1 + $0x21] ss:$4 sm:$0xff] }
 0x233   : > { %10740 = vst [vmem:[#allocation305_spill] sm:$0xff] %v6317_v61  ;;  %v6336_v61 = vrot.slane %v5561_v21, 4 }
 0x234   : > { %10741 = vst [vmem:[#allocation306_spill] sm:$0xff] %v6319_v60 }
 0x235   : > { %1200 = vst [vmem:[#allocation1 + $0x20] ss:$4 sm:$0xff] %v5581_v29 }
 0x236   : > { %1202 = vst [vmem:[#allocation1 + $0x21] ss:$4 sm:$0xff] %v10112_v47  ;;  %v6341_v47 = vrot.slane %v5634_v50, 6 }
 0x238   : > { %v1227_v42 = vld.sshfl [vmem:[#allocation1] sm:$0xff pattern:$0x73625140] }
 0x239   : > { %1231 = vst [vmem:[#allocation1 + $0x2] ss:$4 sm:$0xff] %v5585_v30 }
 0x23a   : > { %1232 = vst [vmem:[#allocation1 + $0x3] ss:$4 sm:$0xff] %v5654_v58 }
 0x23b   : > { %1229 = vst [vmem:[#allocation1] ss:$4 sm:$0xff] %v6325_v62 }
 0x23c   : > { %1230 = vst [vmem:[#allocation1 + $0x1] ss:$4 sm:$0xff] %v6341_v47 }
 0x23d   : > { %v1208_v60 = vld.sshfl [vmem:[#allocation1 + $0x20] sm:$0xff pattern:$0x73625140] }
 0x23e   : > { %2642 = vmatmul.f32.gmra.mxu0 %v1208_v60  ;;  %1214 = vst [vmem:[#allocation1 + $0x21] ss:$4 sm:$0xff] %v5561_v21  ;;  %v2510_v60 = vld [vmem:[%s10086_s1 + $0xf8] sm:$0xff] }
 0x23f   : > { %1213 = vst [vmem:[#allocation1 + $0x20] ss:$4 sm:$0xff] %v6328_v14  ;;  %5083 = vmatpush.msra.mxu3 %v2510_v60  ;;  %5082 = vmatpush.msra.mxu1 %v2510_v60 }
 0x240   : > { %1215 = vst [vmem:[#allocation1 + $0x22] ss:$4 sm:$0xff] %v6332_v41  ;;  %2709 = vmatpush.msrb.mxu0 %v2510_v60  ;;  %v6375_v60 = vrot.slane %v5607_v39, 6 }
 0x241   : > { %1216 = vst [vmem:[#allocation1 + $0x23] ss:$4 sm:$0xff] %v6336_v61  ;;  %5085 = vmatpush.msra.mxu3 %v2509_v34  ;;  %5084 = vmatpush.msra.mxu1 %v2509_v34 }
 0x242   : > { %2710 = vmatpush.msrb.mxu0 %v2509_v34  ;;  %v2507_v34 = vld [vmem:[%s10086_s1 + $0xe0] sm:$0xff] }
 0x243   : > { %5087 = vmatpush.msra.mxu3 %v2508_v27  ;;  %5086 = vmatpush.msra.mxu1 %v2508_v27 }
 0x244   : > { %2711 = vmatpush.msrb.mxu0 %v2508_v27  ;;  %v6405_v27 = vrot.slane %v5694_v11, 2 }
 0x245   : > { %5089 = vmatpush.msra.mxu3 %v2507_v34  ;;  %5088 = vmatpush.msra.mxu1 %v2507_v34 }
 0x246   : > { %2645 = vmatmul.f32.gmra.mxu0 %v1217_v0  ;;  %v6364_v0 = vld.sshfl [vmem:[#allocation1] sm:$0xff pattern:$0x73625140]  ;;  %10745 = vst [vmem:[#allocation310_spill] sm:$0xff] %v6405_v27 }
 0x247   : > { %1242 = vst [vmem:[#allocation1 + $0x3] ss:$4 sm:$0xff] %v5674_v2  ;;  %2712 = vmatpush.msrb.mxu0 %v2507_v34  ;;  %5091 = vmatpush.msra.mxu3 %v2506_v25  ;;  %v2504_v34 = vld [vmem:[%s10086_s1 + $0xc8] sm:$0xff] }
 0x248   : > { %v1218_v32 = vld.sshfl [vmem:[#allocation1 + $0x20] sm:$0xff pattern:$0x73625140]  ;;  %1239 = vst [vmem:[#allocation1] ss:$4 sm:$0xff] %v6367_v53  ;;  %5090 = vmatpush.msra.mxu1 %v2506_v25 }
 0x249   : > { %1225 = vst [vmem:[#allocation1 + $0x22] ss:$4 sm:$0xff] %v5634_v50  ;;  %2713 = vmatpush.msrb.mxu0 %v2506_v25  ;;  %5093 = vmatpush.msra.mxu3 %v2505_v45  ;;  %v6415_v25 = vrot.slane %v5694_v11, 4 }
 0x24a   : > { %1223 = vst [vmem:[#allocation1 + $0x20] ss:$4 sm:$0xff] %v6348_v59  ;;  %5092 = vmatpush.msra.mxu1 %v2505_v45 }
 0x24b   : > { %1224 = vst [vmem:[#allocation1 + $0x21] ss:$4 sm:$0xff] %v6357_v33  ;;  %5095 = vmatpush.msra.mxu3 %v2504_v34  ;;  %2714 = vmatpush.msrb.mxu0 %v2505_v45  ;;  %v6437_v45 = vrot.slane %v5625_v46, 4 }
 0x24c   : > { %1226 = vst [vmem:[#allocation1 + $0x23] ss:$4 sm:$0xff] %v6360_v52  ;;  %5094 = vmatpush.msra.mxu1 %v2504_v34 }
 0x24d   : > { %1240 = vst [vmem:[#allocation1 + $0x1] ss:$4 sm:$0xff] %v6371_v28  ;;  %5097 = vmatpush.msra.mxu3 %v2503_v23  ;;  %2715 = vmatpush.msrb.mxu0 %v2504_v34  ;;  %v2500_v34 = vld [vmem:[%s10086_s1 + $0xa8] sm:$0xff] }
 0x24e   : > { %2648 = vmatmul.f32.gmra.mxu0 %v1218_v32  ;;  %1241 = vst [vmem:[#allocation1 + $0x2] ss:$4 sm:$0xff] %v6375_v60  ;;  %v6391_v32 = vrot.slane %v5654_v58, 2  ;;  %5096 = vmatpush.msra.mxu1 %v2503_v23 }
 0x24f   : > { %10746 = vst [vmem:[#allocation311_spill] sm:$0xff] %v6415_v25  ;;  %5099 = vmatpush.msra.mxu3 %v2502_v16  ;;  %2716 = vmatpush.msrb.mxu0 %v2503_v23  ;;  %v2498_v23 = vld [vmem:[%s10086_s1 + $0x98] sm:$0xff] }
 0x250   : > { %10744 = vst [vmem:[#allocation309_spill] sm:$0xff] %v6391_v32  ;;  %5098 = vmatpush.msra.mxu1 %v2502_v16 }
 0x251   : > { %5101 = vmatpush.msra.mxu3 %v2501_v15  ;;  %10749 = vst [vmem:[#allocation314_spill] sm:$0xff] %v6437_v45  ;;  %2717 = vmatpush.msrb.mxu0 %v2502_v16  ;;  %v6468_v16 = vrot.slane %v5667_v63, 4 }
 0x252   : > { %5100 = vmatpush.msra.mxu1 %v2501_v15 }
 0x253   : > { %v1228_v44 = vld.sshfl [vmem:[#allocation1 + $0x20] sm:$0xff pattern:$0x73625140]  ;;  %5103 = vmatpush.msra.mxu3 %v2500_v34  ;;  %2718 = vmatpush.msrb.mxu0 %v2501_v15  ;;  %10753 = vst [vmem:[#allocation318_spill] sm:$0xff] %v6468_v16  ;;  %v2496_v15 = vld [vmem:[%s10086_s1 + $0x88] sm:$0xff] }
 0x254   : > { %1236 = vst [vmem:[#allocation1 + $0x23] ss:$4 sm:$0xff] %v5607_v39  ;;  %5102 = vmatpush.msra.mxu1 %v2500_v34 }
 0x255   : > { %1233 = vst [vmem:[#allocation1 + $0x20] ss:$4 sm:$0xff] %v6391_v32  ;;  %v6418_v22 = vld.sshfl [vmem:[#allocation1] sm:$0xff pattern:$0x73625140]  ;;  %5105 = vmatpush.msra.mxu3 %v2499_v37  ;;  %2719 = vmatpush.msrb.mxu0 %v2500_v34  ;;  %v6481_v34 = vrot.slane %v5714_v7, 2 }
 0x256   : > { %2651 = vmatmul.f32.gmra.mxu0 %v1227_v42  ;;  %1234 = vst [vmem:[#allocation1 + $0x21] ss:$4 sm:$0xff] %v6394_v26  ;;  %v6421_v42 = vrot.slane %v5694_v11, 6  ;;  %5104 = vmatpush.msra.mxu1 %v2499_v37 }
 0x257   : > { %1235 = vst [vmem:[#allocation1 + $0x22] ss:$4 sm:$0xff] %v6400_v43  ;;  %5107 = vmatpush.msra.mxu3 %v2498_v23  ;;  %2720 = vmatpush.msrb.mxu0 %v2499_v37  ;;  %v6493_v37 = vrot.slane %v5685_v6, 6 }
 0x258   : > { %10747 = vst [vmem:[#allocation312_spill] sm:$0xff] %v6421_v42  ;;  %5106 = vmatpush.msra.mxu1 %v2498_v23 }
 0x259   : > { %1249 = vst [vmem:[#allocation1] ss:$4 sm:$0xff] %v5694_v11  ;;  %2721 = vmatpush.msrb.mxu0 %v2498_v23  ;;  %v10759_v23 = vrot.slane %v5581_v29, 4 }
 0x25a   : > { %1250 = vst [vmem:[#allocation1 + $0x1] ss:$4 sm:$0xff] %v6405_v27  ;;  %v2495_v27 = vld [vmem:[%s10086_s1 + $0x80] sm:$0xff] }
 0x25b   : > { %1251 = vst [vmem:[#allocation1 + $0x2] ss:$4 sm:$0xff] %v6415_v25 }
 0x25c   : > { %1252 = vst [vmem:[#allocation1 + $0x3] ss:$4 sm:$0xff] %v6421_v42  ;;  %v2497_v42 = vld [vmem:[%s10086_s1 + $0x90] sm:$0xff] }
 0x25d   : > { %5109 = vmatpush.msra.mxu3 %v2497_v42  ;;  %5108 = vmatpush.msra.mxu1 %v2497_v42  ;;  %10754 = vst [vmem:[#allocation319_spill] sm:$0xff] %v6481_v34 }
 0x25e   : > { %2654 = vmatmul.f32.gmra.mxu0 %v1228_v44  ;;  %v1238_v17 = vld.sshfl [vmem:[#allocation1 + $0x20] sm:$0xff pattern:$0x73625140]  ;;  %v6454_v44 = vrot.slane %v5714_v7, 6  ;;  %10757 = vst [vmem:[#allocation322_spill] sm:$0xff] %v6493_v37 }
 0x25f   : > { %1243 = vst [vmem:[#allocation1 + $0x20] ss:$4 sm:$0xff] %v5625_v46  ;;  %5111 = vmatpush.msra.mxu3 %v2496_v15  ;;  %5110 = vmatpush.msra.mxu1 %v2496_v15 }
 0x260   : > { %1244 = vst [vmem:[#allocation1 + $0x21] ss:$4 sm:$0xff] %v6434_v35  ;;  %2722 = vmatpush.msrb.mxu0 %v2497_v42 }
 0x261   : > { %10751 = vst [vmem:[#allocation316_spill] sm:$0xff] %v6454_v44  ;;  %5113 = vmatpush.msra.mxu3 %v2495_v27  ;;  %5112 = vmatpush.msra.mxu1 %v2495_v27 }
 0x262   : > { %1245 = vst [vmem:[#allocation1 + $0x22] ss:$4 sm:$0xff] %v6437_v45  ;;  %2723 = vmatpush.msrb.mxu0 %v2496_v15 }
 0x263   : > { %1246 = vst [vmem:[#allocation1 + $0x23] ss:$4 sm:$0xff] %v6440_v38  ;;  %v6464_v25 = vld.sshfl [vmem:[#allocation1] sm:$0xff pattern:$0x73625140] }
 0x264   : > { %1260 = vst [vmem:[#allocation1 + $0x1] ss:$4 sm:$0xff] %v5667_v63  ;;  %2724 = vmatpush.msrb.mxu0 %v2495_v27  ;;  %v6547_v27 = vrot.slane %v5774_v51, 6 }
 0x265   : > { %1259 = vst [vmem:[#allocation1] ss:$4 sm:$0xff] %v6454_v44  ;;  %v10758_v44 = vrot.slane %v5581_v29, 2 }
 0x266   : > { %1261 = vst [vmem:[#allocation1 + $0x2] ss:$4 sm:$0xff] %v6458_v36  ;;  %2657 = vmatmul.f32.gmra.mxu0 %v6364_v0  ;;  %v6484_v0 = vrot.slane %v5714_v7, 4 }
 0x267   : > { %1262 = vst [vmem:[#allocation1 + $0x3] ss:$4 sm:$0xff] %v6468_v16  ;;  %v6489_v16 = vrot.slane %v5685_v6, 4  ;;  %v6497_v11 = vrot.slane %v10758_v44, 7  ;;  %v10761_v44 = vrot.slane %v5581_v29, 6 }
 0x268   : > { %10755 = vst [vmem:[#allocation320_spill] sm:$0xff] %v6484_v0 }
 0x269   : > { %10756 = vst [vmem:[#allocation321_spill] sm:$0xff] %v6489_v16  ;;  %v471_v42 = vrot.slane %v6497_v11, 2  ;;  %v6510_v38 = vrot.slane %v10761_v44, 7 }
 0x26a   : > { %v1248_v36 = vld.sshfl [vmem:[#allocation1 + $0x20] sm:$0xff pattern:$0x73625140]  ;;  %10768 = vst [vmem:[#allocation328_spill] sm:$0xff] %v6547_v27 }
 0x26b   : > { %1253 = vst [vmem:[#allocation1 + $0x20] ss:$4 sm:$0xff] %v5645_v54  ;;  %v6503_v54 = vrot.slane %v5754_v18, 2 }
 0x26c   : > { %1254 = vst [vmem:[#allocation1 + $0x21] ss:$4 sm:$0xff] %v5714_v7  ;;  %v472_v7 = vrot.slane %v10759_v23, 7 }
 0x26d   : > { %1255 = vst [vmem:[#allocation1 + $0x22] ss:$4 sm:$0xff] %v6481_v34 }
 0x26e   : > { %1256 = vst [vmem:[#allocation1 + $0x23] ss:$4 sm:$0xff] %v6484_v0  ;;  %2660 = vmatmul.f32.gmra.mxu0 %v1238_v17  ;;  %v6505_v34 = vld.sshfl [vmem:[#allocation1] sm:$0xff pattern:$0x73625140]  ;;  %v474_v46 = vrot.slane %v472_v7, 2  ;;  %v6523_v15 = vsel %vm6516_vm6, %v471_v42, %v472_v7 }
 0x26f   : > { %10760 = vst [vmem:[#allocation323_spill] sm:$0xff] %v6503_v54  ;;  %v6514_v17 = vrot.slane %v5667_v63, 6  ;;  %v6539_v7 = vrot.slane %v5774_v51, 2 }
 0x270   : > { %1269 = vst [vmem:[#allocation1] ss:$4 sm:$0xff] %v6489_v16  ;;  %v6528_v44 = vsel %vm6516_vm6, %v474_v46, %v6510_v38  ;;  %v6533_v16 = vrot.slane %v5685_v6, 2  ;;  %v6543_v46 = vrot.slane %v5774_v51, 4 }
 0x271   : > { %10762 = vst [vmem:[#allocation324_spill] sm:$0xff] %v6514_v17 }
 0x272   : > { %1270 = vst [vmem:[#allocation1 + $0x1] ss:$4 sm:$0xff] %v6493_v37 }
 0x273   : > { %1271 = vst [vmem:[#allocation1 + $0x2] ss:$4 sm:$0xff] %v5754_v18 }
 0x274   : > { %1272 = vst [vmem:[#allocation1 + $0x3] ss:$4 sm:$0xff] %v6503_v54  ;;  %v6557_v54 = vrot.slane %v5754_v18, 6 }
 0x275   : > { %10765 = vst [vmem:[#allocation325_spill] sm:$0xff] %v6533_v16  ;;  %v1258_v63 = vld.sshfl [vmem:[#allocation1 + $0x20] sm:$0xff pattern:$0x73625140] }
 0x276   : > { %1263 = vst [vmem:[#allocation1 + $0x20] ss:$4 sm:$0xff] %v6514_v17  ;;  %2663 = vmatmul.f32.gmra.mxu0 %v6418_v22  ;;  %v6553_v22 = vrot.slane %v5754_v18, 4 }
 0x277   : > { %1264 = vst [vmem:[#allocation1 + $0x21] ss:$4 sm:$0xff] %v5734_v56 }
 0x278   : > { %10766 = vst [vmem:[#allocation326_spill] sm:$0xff] %v6539_v7 }
 0x279   : > { %1265 = vst [vmem:[#allocation1 + $0x22] ss:$4 sm:$0xff] %v5685_v6 }
 0x27a   : > { %10767 = vst [vmem:[#allocation327_spill] sm:$0xff] %v6543_v46 }
 0x27b   : > { %1266 = vst [vmem:[#allocation1 + $0x23] ss:$4 sm:$0xff] %v6533_v16  ;;  %v6549_v42 = vld.sshfl [vmem:[#allocation1] sm:$0xff pattern:$0x73625140] }
 0x27c   : > { %1279 = vst [vmem:[#allocation1] ss:$4 sm:$0xff] %v6539_v7  ;;  %v6565_v7 = vrot.slane %v5745_v57, 2 }
 0x27d   : > { %10769 = vst [vmem:[#allocation329_spill] sm:$0xff] %v6553_v22 }
 0x27e   : > { %1280 = vst [vmem:[#allocation1 + $0x1] ss:$4 sm:$0xff] %v6543_v46  ;;  %2666 = vmatmul.f32.gmra.mxu0 %v1248_v36  ;;  %v6569_v46 = vrot.slane %v5745_v57, 4 }
 0x27f   : > { %10770 = vst [vmem:[#allocation330_spill] sm:$0xff] %v6557_v54 }
 0x280   : > { %1281 = vst [vmem:[#allocation1 + $0x2] ss:$4 sm:$0xff] %v6547_v27  ;;  %v6572_v27 = vrot.slane %v5745_v57, 6 }
 0x281   : > { %1282 = vst [vmem:[#allocation1 + $0x3] ss:$4 sm:$0xff] %v5727_v20 }
 0x282   : > { %v1268_v37 = vld.sshfl [vmem:[#allocation1 + $0x20] sm:$0xff pattern:$0x73625140]  ;;  %10771 = vst [vmem:[#allocation331_spill] sm:$0xff] %v6565_v7 }
 0x283   : > { %1273 = vst [vmem:[#allocation1 + $0x20] ss:$4 sm:$0xff] %v6553_v22 }
 0x284   : > { %1274 = vst [vmem:[#allocation1 + $0x21] ss:$4 sm:$0xff] %v6557_v54  ;;  %v6588_v54 = vrot.slane %v5727_v20, 6 }
 0x285   : > { %1275 = vst [vmem:[#allocation1 + $0x22] ss:$4 sm:$0xff] %v5705_v19  ;;  %v6580_v19 = vrot.slane %v5727_v20, 2 }
 0x286   : > { %1276 = vst [vmem:[#allocation1 + $0x23] ss:$4 sm:$0xff] %v5774_v51  ;;  %2669 = vmatmul.f32.gmra.mxu0 %v6464_v25  ;;  %v6584_v51 = vrot.slane %v5727_v20, 4  ;;  %v6596_v25 = vrot.slane %v5828_v9, 2 }
 0x287   : > { %10772 = vst [vmem:[#allocation332_spill] sm:$0xff] %v6569_v46 }
 0x288   : > { %10773 = vst [vmem:[#allocation333_spill] sm:$0xff] %v6572_v27  ;;  %v6574_v36 = vld.sshfl [vmem:[#allocation1] sm:$0xff pattern:$0x73625140] }
 0x289   : > { %1289 = vst [vmem:[#allocation1] ss:$4 sm:$0xff] %v5745_v57  ;;  %v6600_v57 = vrot.slane %v5828_v9, 4 }
 0x28a   : > { %1290 = vst [vmem:[#allocation1 + $0x1] ss:$4 sm:$0xff] %v6565_v7  ;;  %v6615_v7 = vrot.slane %v5811_v10, 6 }
 0x28b   : > { %10774 = vst [vmem:[#allocation334_spill] sm:$0xff] %v6580_v19 }
 0x28c   : > { %1291 = vst [vmem:[#allocation1 + $0x2] ss:$4 sm:$0xff] %v6569_v46  ;;  %v6608_v46 = vrot.slane %v5811_v10, 2 }
 0x28d   : > { %10775 = vst [vmem:[#allocation335_spill] sm:$0xff] %v6584_v51  ;;  %v6590_v22 = vld.sshfl [vmem:[#allocation1 + $0x20] sm:$0xff pattern:$0x73625140] }
 0x28e   : > { %1292 = vst [vmem:[#allocation1 + $0x3] ss:$4 sm:$0xff] %v6572_v27  ;;  %2672 = vmatmul.f32.gmra.mxu0 %v1258_v63  ;;  %v6612_v63 = vrot.slane %v5811_v10, 4 }
 0x28f   : > { %10776 = vst [vmem:[#allocation336_spill] sm:$0xff] %v6588_v54 }
 0x290   : > { %1283 = vst [vmem:[#allocation1 + $0x20] ss:$4 sm:$0xff] %v6580_v19  ;;  %v6645_v19 = vrot.slane %v5787_v55, 4 }
 0x291   : > { %1284 = vst [vmem:[#allocation1 + $0x21] ss:$4 sm:$0xff] %v6584_v51 }
 0x292   : > { %1285 = vst [vmem:[#allocation1 + $0x22] ss:$4 sm:$0xff] %v6588_v54 }
 0x293   : > { %10777 = vst [vmem:[#allocation337_spill] sm:$0xff] %v6596_v25 }
 0x294   : > { %1286 = vst [vmem:[#allocation1 + $0x23] ss:$4 sm:$0xff] %v5794_v48 }
 0x295   : > { %10778 = vst [vmem:[#allocation338_spill] sm:$0xff] %v6600_v57  ;;  %v6602_v27 = vld.sshfl [vmem:[#allocation1] sm:$0xff pattern:$0x73625140] }
 0x296   : > { %1299 = vst [vmem:[#allocation1] ss:$4 sm:$0xff] %v5765_v12  ;;  %2675 = vmatmul.f32.gmra.mxu0 %v6505_v34  ;;  %v6622_v12 = vrot.slane %v5787_v55, 6  ;;  %v6634_v34 = vrot.slane %v5828_v9, 6 }
 0x297   : > { %1300 = vst [vmem:[#allocation1 + $0x1] ss:$4 sm:$0xff] %v5828_v9 }
 0x298   : > { %1301 = vst [vmem:[#allocation1 + $0x2] ss:$4 sm:$0xff] %v6596_v25  ;;  %v10783_v25 = vrot.slane %v5523_v8, 2 }
 0x299   : > { %10779 = vst [vmem:[#allocation339_spill] sm:$0xff] %v6608_v46 }
 0x29a   : > { %1302 = vst [vmem:[#allocation1 + $0x3] ss:$4 sm:$0xff] %v6600_v57  ;;  %v457_v54 = vrot.slane %v10783_v25, 7 }
 0x29b   : > { %10780 = vst [vmem:[#allocation340_spill] sm:$0xff] %v6612_v63  ;;  %v6617_v48 = vld.sshfl [vmem:[#allocation1 + $0x20] sm:$0xff pattern:$0x73625140] }
 0x29c   : > { %10781 = vst [vmem:[#allocation341_spill] sm:$0xff] %v6615_v7  ;;  %v459_v25 = vrot.slane %v457_v54, 2 }
 0x29d   : > { %1293 = vst [vmem:[#allocation1 + $0x20] ss:$4 sm:$0xff] %v5811_v10  ;;  %v10785_v10 = vrot.slane %v5523_v8, 4 }
 0x29e   : > { %10782 = vst [vmem:[#allocation342_spill] sm:$0xff] %v6622_v12  ;;  %2678 = vmatmul.f32.gmra.mxu0 %v1268_v37 }
 0x29f   : > { %1294 = vst [vmem:[#allocation1 + $0x21] ss:$4 sm:$0xff] %v6608_v46  ;;  %v460_v51 = vrot.slane %v10785_v10, 7  ;;  %v466_v10 = vrot.slane %v5581_v29, 7 }
 0x2a0   : > { %1295 = vst [vmem:[#allocation1 + $0x22] ss:$4 sm:$0xff] %v6612_v63  ;;  %v10786_v63 = vrot.slane %v5523_v8, 6 }
 0x2a1   : > { %1296 = vst [vmem:[#allocation1 + $0x23] ss:$4 sm:$0xff] %v6615_v7  ;;  %v6627_v57 = vld.sshfl [vmem:[#allocation1] sm:$0xff pattern:$0x73625140]  ;;  %v6641_v7 = vrot.slane %v5787_v55, 2 }
 0x2a2   : > { %1309 = vst [vmem:[#allocation1] ss:$4 sm:$0xff] %v6622_v12  ;;  %v463_v46 = vrot.slane %v10786_v63, 7  ;;  %v5006_v12 = vrot.slane %v5523_v8, 9  ;;  %v462_v9 = vrot.slane %v460_v51, 2  ;;  %v461_v8 = vsel %vm6516_vm6, %v459_v25, %v460_v51 }
 0x2a3   : > { %1310 = vst [vmem:[#allocation1 + $0x1] ss:$4 sm:$0xff] %v5845_v49  ;;  %v468_v18 = vrot.slane %v466_v10, 2  ;;  %v485_v51 = vrot.slane %v6272_v4, 7  ;;  %v5007_v25 = vrot.slane %v5539_v13, 9 }
 0x2a4   : > { %10784 = vst [vmem:[#allocation343_spill] sm:$0xff] %v6634_v34  ;;  %v465_v20 = vrot.slane %v463_v46, 2  ;;  %v458_v37 = vsel %vm6516_vm6, %v5006_v12, %v457_v54  ;;  %v464_v63 = vsel %vm6516_vm6, %v462_v9, %v463_v46  ;;  %v478_v54 = vrot.slane %v5539_v13, 7 }
 0x2a5   : > { %10787 = vst [vmem:[#allocation344_spill] sm:$0xff] %v6641_v7  ;;  %v477_v12 = vrot.slane %v6510_v38, 2  ;;  %v470_v9 = vsel %vm6516_vm6, %v468_v18, %v6497_v11  ;;  %v488_v46 = vrot.slane %v6275_v3, 7  ;;  %v494_v11 = vrot.slane %v5561_v21, 7 }
 0x2a6   : > { %10788 = vst [vmem:[#allocation345_spill] sm:$0xff] %v6645_v19  ;;  %2681 = vmatmul.f32.gmra.mxu0 %v6549_v42  ;;  %v467_v29 = vsel %vm6516_vm6, %v465_v20, %v466_v10  ;;  %v480_v42 = vrot.slane %v478_v54, 2  ;;  %v5008_v20 = vrot.slane %v5588_v31, 9  ;;  %v497_v18 = vrot.slane %v6332_v41, 7 }
 0x2a7   : > { %v479_v38 = vsel %vm6516_vm6, %v477_v12, %v478_v54  ;;  %v500_v54 = vrot.slane %v6336_v61, 7 }
 0x2a8   : > { %v6647_v49 = vld.sshfl [vmem:[#allocation1 + $0x20] sm:$0xff pattern:$0x73625140]  ;;  %v482_v13 = vsel %vm6516_vm6, %v480_v42, %v5007_v25  ;;  %v496_v42 = vrot.slane %v494_v11, 2  ;;  %v506_v25 = vrot.slane %v5610_v40, 7 }
 0x2a9   : > { %1303 = vst [vmem:[#allocation1 + $0x20] ss:$4 sm:$0xff] %v6634_v34 }
 0x2aa   : > { %1304 = vst [vmem:[#allocation1 + $0x21] ss:$4 sm:$0xff] %v5787_v55  ;;  %v6660_v34 = vld.sshfl [vmem:[#allocation1] sm:$0xff pattern:$0x73625140] }
 0x2ab   : > { %1305 = vst [vmem:[#allocation1 + $0x22] ss:$4 sm:$0xff] %v6641_v7 }
 0x2ac   : > { %1306 = vst [vmem:[#allocation1 + $0x23] ss:$4 sm:$0xff] %v6645_v19 }
 0x2ad   : > { %1335 = vst [vmem:[#allocation1] ss:$4 sm:$0xff] %v458_v37  ;;  %v487_v37 = vrot.slane %v485_v51, 2 }
 0x2ae   : > { %1337 = vst [vmem:[#allocation1 + $0x1] ss:$4 sm:$0xff] %v461_v8  ;;  %v490_v8 = vrot.slane %v488_v46, 2  ;;  %2684 = vmatmul.f32.gmra.mxu0 %v6590_v22 }
 0x2af   : > { %1339 = vst [vmem:[#allocation1 + $0x2] ss:$4 sm:$0xff] %v464_v63  ;;  %v491_v63 = vrot.slane %v6328_v14, 7  ;;  %v6693_v12 = vsel %vm6516_vm6, %v487_v37, %v488_v46  ;;  %v6713_v37 = vsel %vm6516_vm6, %v496_v42, %v497_v18  ;;  %v519_v42 = vrot.slane %v6357_v33, 7 }
 0x2b0   : > { %1341 = vst [vmem:[#allocation1 + $0x3] ss:$4 sm:$0xff] %v467_v29  ;;  %v6688_v29 = vsel %vm6516_vm6, %v5008_v20, %v485_v51  ;;  %v499_v51 = vrot.slane %v497_v18, 2  ;;  %v502_v20 = vrot.slane %v500_v54, 2 }
 0x2b1   : > { %10789 = vst [vmem:[#allocation346_spill] sm:$0xff] %v6688_v29 }
 0x2b2   : > { %10790 = vst [vmem:[#allocation347_spill] sm:$0xff] %v6693_v12 }
 0x2b3   : > { %v6674_v10 = vld.sshfl [vmem:[#allocation1 + $0x20] sm:$0xff pattern:$0x73625140]  ;;  %10793 = vst [vmem:[#allocation350_spill] sm:$0xff] %v6713_v37 }
 0x2b4   : > { %1343 = vst [vmem:[#allocation1 + $0x20] ss:$4 sm:$0xff] %v470_v9  ;;  %v6699_v9 = vsel %vm6516_vm6, %v490_v8, %v491_v63 }
 0x2b5   : > { %1345 = vst [vmem:[#allocation1 + $0x21] ss:$4 sm:$0xff] %v6523_v15  ;;  %v493_v15 = vrot.slane %v491_v63, 2  ;;  %v6718_v63 = vsel %vm6516_vm6, %v499_v51, %v500_v54  ;;  %v522_v51 = vrot.slane %v5634_v50, 7 }
 0x2b6   : > { %1347 = vst [vmem:[#allocation1 + $0x22] ss:$4 sm:$0xff] %v6528_v44  ;;  %v503_v44 = vrot.slane %v6305_v1, 7  ;;  %2687 = vmatmul.f32.gmra.mxu0 %v6574_v36  ;;  %v516_v36 = vrot.slane %v6348_v59, 7 }
 0x2b7   : > { %1349 = vst [vmem:[#allocation1 + $0x23] ss:$4 sm:$0xff] %v479_v38  ;;  %v6695_v22 = vld.sshfl [vmem:[#allocation1] sm:$0xff pattern:$0x73625140]  ;;  %v6707_v46 = vsel %vm6516_vm6, %v493_v15, %v494_v11  ;;  %v513_v38 = vrot.slane %v6310_v5, 7 }
 0x2b8   : > { %10791 = vst [vmem:[#allocation348_spill] sm:$0xff] %v6699_v9  ;;  %v505_v8 = vrot.slane %v503_v44, 2  ;;  %v6725_v15 = vsel %vm6516_vm6, %v502_v20, %v503_v44  ;;  %v525_v20 = vrot.slane %v6360_v52, 7 }
 0x2b9   : > { %1352 = vst [vmem:[#allocation1] ss:$4 sm:$0xff] %v482_v13  ;;  %v508_v13 = vrot.slane %v506_v25, 2  ;;  %v515_v18 = vrot.slane %v513_v38, 2 }
 0x2ba   : > { %1353 = vst [vmem:[#allocation1 + $0x1] ss:$4 sm:$0xff] %v6688_v29  ;;  %v6734_v54 = vsel %vm6516_vm6, %v505_v8, %v506_v25  ;;  %v521_v8 = vrot.slane %v519_v42, 2 }
 0x2bb   : > { %1354 = vst [vmem:[#allocation1 + $0x2] ss:$4 sm:$0xff] %v6693_v12  ;;  %v5009_v12 = vrot.slane %v5610_v40, 9  ;;  %v6750_v25 = vsel %vm6516_vm6, %v515_v18, %v516_v36 }
 0x2bc   : > { %10792 = vst [vmem:[#allocation349_spill] sm:$0xff] %v6707_v46 }
 0x2bd   : > { %1355 = vst [vmem:[#allocation1 + $0x3] ss:$4 sm:$0xff] %v6699_v9  ;;  %v5010_v9 = vrot.slane %v5569_v24, 9  ;;  %v6740_v44 = vsel %vm6516_vm6, %v508_v13, %v5009_v12  ;;  %v524_v12 = vrot.slane %v522_v51, 2  ;;  %v531_v13 = vrot.slane %v6341_v47, 7 }
 0x2be   : > { %10794 = vst [vmem:[#allocation351_spill] sm:$0xff] %v6718_v63  ;;  %v6721_v11 = vld.sshfl [vmem:[#allocation1 + $0x20] sm:$0xff pattern:$0x73625140]  ;;  %2690 = vmatmul.f32.gmra.mxu0 %v6617_v48 }
 0x2bf   : > { %10795 = vst [vmem:[#allocation352_spill] sm:$0xff] %v6725_v15  ;;  %v6771_v48 = vsel %vm6516_vm6, %v524_v12, %v525_v20 }
 0x2c0   : > { %1356 = vst [vmem:[#allocation1 + $0x20] ss:$4 sm:$0xff] %v6707_v46  ;;  %v6746_v46 = vsel %vm6516_vm6, %v5010_v9, %v513_v38  ;;  %v527_v38 = vrot.slane %v525_v20, 2  ;;  %v533_v9 = vrot.slane %v531_v13, 2 }
 0x2c1   : > { %1357 = vst [vmem:[#allocation1 + $0x21] ss:$4 sm:$0xff] %v6713_v37  ;;  %v518_v37 = vrot.slane %v516_v36, 2 }
 0x2c2   : > { %10796 = vst [vmem:[#allocation353_spill] sm:$0xff] %v6734_v54 }
 0x2c3   : > { %1358 = vst [vmem:[#allocation1 + $0x22] ss:$4 sm:$0xff] %v6718_v63  ;;  %v528_v63 = vrot.slane %v6325_v62, 7  ;;  %v6762_v18 = vsel %vm6516_vm6, %v518_v37, %v519_v42  ;;  %v10804_v37 = vrot.slane %v5585_v30, 2 }
 0x2c4   : > { %10797 = vst [vmem:[#allocation354_spill] sm:$0xff] %v6740_v44  ;;  %v1360_v29 = vld.sshfl [vmem:[#allocation1] sm:$0xff pattern:$0x73625140] }
 0x2c5   : > { %1359 = vst [vmem:[#allocation1 + $0x23] ss:$4 sm:$0xff] %v6725_v15  ;;  %2731 = vmatmul.f32.vlgmr.msra.gmra.mxu1 %v1360_v29  ;;  %v534_v15 = vrot.slane %v5585_v30, 7  ;;  %v6767_v29 = vsel %vm6516_vm6, %v521_v8, %v522_v51  ;;  %v530_v36 = vrot.slane %v528_v63, 2  ;;  %v537_v42 = vrot.slane %v10804_v37, 7 }
 0x2c6   : > { %10798 = vst [vmem:[#allocation355_spill] sm:$0xff] %v6746_v46  ;;  %v5011_v51 = vrot.slane %v5654_v58, 9  ;;  %v541_v8 = vrot.slane %v6391_v32, 7  ;;  %2693 = vmatmul.f32.gmra.mxu0 %v6602_v27 }
 0x2c7   : > { %10799 = vst [vmem:[#allocation356_spill] sm:$0xff] %v6750_v25  ;;  %v6786_v20 = vsel %vm6516_vm6, %v530_v36, %v531_v13  ;;  %v6792_v12 = vsel %vm6516_vm6, %v533_v9, %v534_v15 }
 0x2c8   : > { %1362 = vst [vmem:[#allocation1] ss:$4 sm:$0xff] %v6734_v54  ;;  %v536_v54 = vrot.slane %v534_v15, 2  ;;  %v543_v13 = vrot.slane %v541_v8, 2  ;;  %v553_v15 = vrot.slane %v6367_v53, 7 }
 0x2c9   : > { %1363 = vst [vmem:[#allocation1 + $0x1] ss:$4 sm:$0xff] %v6740_v44 }
 0x2ca   : > { %1364 = vst [vmem:[#allocation1 + $0x2] ss:$4 sm:$0xff] %v6746_v46  ;;  %v6775_v46 = vsel %vm6516_vm6, %v527_v38, %v528_v63  ;;  %v547_v63 = vrot.slane %v6400_v43, 7  ;;  %v550_v38 = vrot.slane %v5607_v39, 7  ;;  %v6799_v37 = vsel %vm6516_vm6, %v536_v54, %v537_v42 }
 0x2cb   : > { %10800 = vst [vmem:[#allocation357_spill] sm:$0xff] %v6762_v18  ;;  %v559_v54 = vrot.slane %v6375_v60, 7 }
 0x2cc   : > { %1365 = vst [vmem:[#allocation1 + $0x3] ss:$4 sm:$0xff] %v6750_v25  ;;  %v1361_v44 = vld.sshfl [vmem:[#allocation1 + $0x20] sm:$0xff pattern:$0x73625140]  ;;  %v544_v25 = vrot.slane %v6394_v26, 7 }
 0x2cd   : > { %10801 = vst [vmem:[#allocation358_spill] sm:$0xff] %v6767_v29  ;;  %2734 = vmatmul.f32.gmra.mxu1 %v1361_v44  ;;  %v549_v9 = vrot.slane %v547_v63, 2  ;;  %v552_v27 = vrot.slane %v550_v38, 2 }
 0x2ce   : > { %10802 = vst [vmem:[#allocation359_spill] sm:$0xff] %v6771_v48  ;;  %v546_v44 = vrot.slane %v544_v25, 2  ;;  %2696 = vmatmul.f32.gmra.mxu0 %v6647_v49  ;;  %v10816_v49 = vld [vmem:[#allocation315_spill] sm:$0xff] }
 0x2cf   : > { %10803 = vst [vmem:[#allocation360_spill] sm:$0xff] %v6775_v46 }
 0x2d0   : > { %1366 = vst [vmem:[#allocation1 + $0x20] ss:$4 sm:$0xff] %v6762_v18 }
 0x2d1   : > { %1367 = vst [vmem:[#allocation1 + $0x21] ss:$4 sm:$0xff] %v6767_v29  ;;  %v6824_v29 = vsel %vm6516_vm6, %v549_v9, %v550_v38  ;;  %v575_v9 = vrot.slane %v10816_v49, 7 }
 0x2d2   : > { %10805 = vst [vmem:[#allocation361_spill] sm:$0xff] %v6786_v20 }
 0x2d3   : > { %1368 = vst [vmem:[#allocation1 + $0x22] ss:$4 sm:$0xff] %v6771_v48  ;;  %v1370_v36 = vld.sshfl [vmem:[#allocation1] sm:$0xff pattern:$0x73625140]  ;;  %v6803_v48 = vsel %vm6516_vm6, %v5011_v51, %v541_v8  ;;  %v6814_v51 = vsel %vm6516_vm6, %v543_v13, %v544_v25  ;;  %v562_v8 = vrot.slane %v5674_v2, 7  ;;  %v6828_v25 = vsel %vm6516_vm6, %v552_v27, %v553_v15 }
 0x2d4   : > { %10806 = vst [vmem:[#allocation362_spill] sm:$0xff] %v6792_v12  ;;  %v561_v13 = vrot.slane %v559_v54, 2 }
 0x2d5   : > { %1369 = vst [vmem:[#allocation1 + $0x23] ss:$4 sm:$0xff] %v6775_v46  ;;  %v556_v46 = vrot.slane %v6371_v28, 7  ;;  %2737 = vmatmul.f32.gmra.mxu1 %v1370_v36  ;;  %v564_v42 = vrot.slane %v562_v8, 2  ;;  %v572_v36 = vrot.slane %v6437_v45, 7 }
 0x2d6   : > { %10807 = vst [vmem:[#allocation363_spill] sm:$0xff] %v6799_v37  ;;  %v6850_v27 = vsel %vm6516_vm6, %v561_v13, %v562_v8  ;;  %v10822_v8 = vld [vmem:[#allocation311_spill] sm:$0xff]  ;;  %2699 = vmatmul.f32.gmra.mxu0 %v6627_v57 }
 0x2d7   : > { %10808 = vst [vmem:[#allocation364_spill] sm:$0xff] %v6803_v48  ;;  %v584_v13 = vrot.slane %v10822_v8, 7  ;;  %v10827_v8 = vld [vmem:[#allocation39_spill] sm:$0xff] }
 0x2d8   : > { %1372 = vst [vmem:[#allocation1] ss:$4 sm:$0xff] %v6786_v20  ;;  %v6820_v20 = vsel %vm6516_vm6, %v546_v44, %v547_v63  ;;  %v10813_v63 = vrot.slane %v5674_v2, 2 }
 0x2d9   : > { %1373 = vst [vmem:[#allocation1 + $0x1] ss:$4 sm:$0xff] %v6792_v12  ;;  %v555_v12 = vrot.slane %v553_v15, 2 }
 0x2da   : > { %1374 = vst [vmem:[#allocation1 + $0x2] ss:$4 sm:$0xff] %v6799_v37  ;;  %v558_v37 = vrot.slane %v556_v46, 2  ;;  %v565_v44 = vrot.slane %v10813_v63, 7  ;;  %v10818_v63 = vld [vmem:[#allocation32_spill] sm:$0xff] }
 0x2db   : > { %10809 = vst [vmem:[#allocation365_spill] sm:$0xff] %v6814_v51  ;;  %v6838_v38 = vsel %vm6516_vm6, %v555_v12, %v556_v46 }
 0x2dc   : > { %1375 = vst [vmem:[#allocation1 + $0x3] ss:$4 sm:$0xff] %v6803_v48  ;;  %v1371_v18 = vld.sshfl [vmem:[#allocation1 + $0x20] sm:$0xff pattern:$0x73625140]  ;;  %v569_v48 = vrot.slane %v6434_v35, 7  ;;  %v6844_v15 = vsel %vm6516_vm6, %v558_v37, %v559_v54  ;;  %v6855_v12 = vsel %vm6516_vm6, %v564_v42, %v565_v44 }
 0x2dd   : > { %10810 = vst [vmem:[#allocation366_spill] sm:$0xff] %v6820_v20  ;;  %v574_v37 = vrot.slane %v572_v36, 2  ;;  %v10821_v54 = vld [vmem:[#allocation310_spill] sm:$0xff]  ;;  %2740 = vmatmul.f32.gmra.mxu1 %v1371_v18  ;;  %v10824_v44 = vld [vmem:[#allocation312_spill] sm:$0xff] }
 0x2de   : > { %10811 = vst [vmem:[#allocation367_spill] sm:$0xff] %v6824_v29  ;;  %v581_v49 = vrot.slane %v10821_v54, 7  ;;  %v587_v35 = vrot.slane %v10824_v44, 7  ;;  %2702 = vmatmul.f32.gmra.mxu0 %v6674_v10 }
 0x2df   : > { %10812 = vst [vmem:[#allocation368_spill] sm:$0xff] %v6828_v25 }
 0x2e0   : > { %1376 = vst [vmem:[#allocation1 + $0x20] ss:$4 sm:$0xff] %v6814_v51  ;;  %v10820_v51 = vld [vmem:[#allocation58_spill] sm:$0xff]  ;;  %v583_v18 = vrot.slane %v581_v49, 2  ;;  %v589_v57 = vrot.slane %v587_v35, 2 }
 0x2e1   : > { %1377 = vst [vmem:[#allocation1 + $0x21] ss:$4 sm:$0xff] %v6820_v20  ;;  %v5012_v20 = vrot.slane %v10818_v63, 9  ;;  %v578_v45 = vrot.slane %v10820_v51, 7  ;;  %v6876_v51 = vsel %vm6516_vm6, %v574_v37, %v575_v9 }
 0x2e2   : > { %10814 = vst [vmem:[#allocation369_spill] sm:$0xff] %v6838_v38 }
 0x2e3   : > { %1378 = vst [vmem:[#allocation1 + $0x22] ss:$4 sm:$0xff] %v6824_v29  ;;  %v1380_v46 = vld.sshfl [vmem:[#allocation1] sm:$0xff pattern:$0x73625140]  ;;  %v571_v29 = vrot.slane %v569_v48, 2  ;;  %v6865_v42 = vsel %vm6516_vm6, %v5012_v20, %v569_v48 }
 0x2e4   : > { %10815 = vst [vmem:[#allocation370_spill] sm:$0xff] %v6844_v15 }
 0x2e5   : > { %1379 = vst [vmem:[#allocation1 + $0x23] ss:$4 sm:$0xff] %v6828_v25  ;;  %v577_v25 = vrot.slane %v575_v9, 2  ;;  %v10830_v9 = vld [vmem:[#allocation319_spill] sm:$0xff]  ;;  %2743 = vmatmul.f32.gmra.mxu1 %v1380_v46 }
 0x2e6   : > { %10817 = vst [vmem:[#allocation371_spill] sm:$0xff] %v6850_v27  ;;  %v597_v37 = vrot.slane %v10830_v9, 7  ;;  %v10836_v9 = vld [vmem:[#allocation316_spill] sm:$0xff]  ;;  %2705 = vmatmul.f32.gmra.mxu0 %v6660_v34 }
 0x2e7   : > { %10819 = vst [vmem:[#allocation32_spill] sm:$0xff] %v6855_v12  ;;  %v6881_v20 = vsel %vm6516_vm6, %v577_v25, %v578_v45  ;;  %v600_v25 = vrot.slane %v6484_v0, 7  ;;  %v603_v0 = vrot.slane %v10836_v9, 7 }
 0x2e8   : > { %1382 = vst [vmem:[#allocation1] ss:$4 sm:$0xff] %v6838_v38  ;;  %v6872_v38 = vsel %vm6516_vm6, %v571_v29, %v572_v36  ;;  %v590_v29 = vrot.slane %v10827_v8, 7 }
 0x2e9   : > { %1383 = vst [vmem:[#allocation1 + $0x1] ss:$4 sm:$0xff] %v6844_v15  ;;  %v580_v15 = vrot.slane %v578_v45, 2  ;;  %v6894_v45 = vsel %vm6516_vm6, %v583_v18, %v584_v13 }
 0x2ea   : > { %1384 = vst [vmem:[#allocation1 + $0x2] ss:$4 sm:$0xff] %v6850_v27 }
 0x2eb   : > { %10823 = vst [vmem:[#allocation372_spill] sm:$0xff] %v6865_v42  ;;  %v6888_v36 = vsel %vm6516_vm6, %v580_v15, %v581_v49  ;;  %v10833_v15 = vrot.slane %v10827_v8, 2  ;;  %v10838_v8 = vld [vmem:[#allocation317_spill] sm:$0xff] }
 0x2ec   : > { %1385 = vst [vmem:[#allocation1 + $0x3] ss:$4 sm:$0xff] %v6855_v12  ;;  %v1381_v27 = vld.sshfl [vmem:[#allocation1 + $0x20] sm:$0xff pattern:$0x73625140]  ;;  %v586_v12 = vrot.slane %v584_v13, 2 }
 0x2ed   : > { %10825 = vst [vmem:[#allocation373_spill] sm:$0xff] %v6872_v38  ;;  %v593_v49 = vrot.slane %v10833_v15, 7  ;;  %v10835_v13 = vld [vmem:[#allocation66_spill] sm:$0xff]  ;;  %v602_v15 = vrot.slane %v600_v25, 2  ;;  %v609_v46 = vrot.slane %v10838_v8, 7  ;;  %2746 = vmatmul.f32.gmra.mxu1 %v1381_v27 }
 0x2ee   : > { %10826 = vst [vmem:[#allocation374_spill] sm:$0xff] %v6876_v51  ;;  %v6900_v48 = vsel %vm6516_vm6, %v586_v12, %v587_v35  ;;  %v5013_v18 = vrot.slane %v10835_v13, 9  ;;  %v599_v35 = vrot.slane %v597_v37, 2  ;;  %v10837_v12 = vld [vmem:[#allocation47_spill] sm:$0xff]  ;;  %2725 = vmatmul.f32.vlgmr.msrb.gmra.mxu0 %v6695_v22 }
 0x2ef   : > { %10828 = vst [vmem:[#allocation375_spill] sm:$0xff] %v6881_v20 }
 0x2f0   : > { %1386 = vst [vmem:[#allocation1 + $0x20] ss:$4 sm:$0xff] %v6865_v42  ;;  %v6924_v10 = vsel %vm6516_vm6, %v5013_v18, %v597_v37  ;;  %v615_v37 = vrot.slane %v6514_v17, 7  ;;  %v618_v18 = vrot.slane %v5734_v56, 7 }
 0x2f1   : > { %1387 = vst [vmem:[#allocation1 + $0x21] ss:$4 sm:$0xff] %v6872_v38  ;;  %v592_v38 = vrot.slane %v590_v29, 2 }
 0x2f2   : > { %10829 = vst [vmem:[#allocation376_spill] sm:$0xff] %v6888_v36  ;;  %v617_v27 = vrot.slane %v615_v37, 2  ;;  %v620_v34 = vrot.slane %v618_v18, 2 }
 0x2f3   : > { %1388 = vst [vmem:[#allocation1 + $0x22] ss:$4 sm:$0xff] %v6876_v51  ;;  %v1390_v42 = vld.sshfl [vmem:[#allocation1] sm:$0xff pattern:$0x73625140]  ;;  %v6906_v51 = vsel %vm6516_vm6, %v589_v57, %v590_v29  ;;  %v6918_v57 = vsel %vm6516_vm6, %v592_v38, %v593_v49  ;;  %v10840_v29 = vld [vmem:[#allocation318_spill] sm:$0xff]  ;;  %v6934_v38 = vsel %vm6516_vm6, %v602_v15, %v603_v0 }
 0x2f4   : > { %10831 = vst [vmem:[#allocation377_spill] sm:$0xff] %v6894_v45  ;;  %v612_v9 = vrot.slane %v10840_v29, 7  ;;  %v611_v49 = vrot.slane %v609_v46, 2 }
 0x2f5   : > { %1389 = vst [vmem:[#allocation1 + $0x23] ss:$4 sm:$0xff] %v6881_v20  ;;  %v606_v20 = vrot.slane %v10837_v12, 7  ;;  %2749 = vmatmul.f32.gmra.mxu1 %v1390_v42  ;;  %v10858_v42 = vld [vmem:[#allocation330_spill] sm:$0xff] }
 0x2f6   : > { %10832 = vst [vmem:[#allocation378_spill] sm:$0xff] %v6900_v48  ;;  %v6955_v15 = vsel %vm6516_vm6, %v611_v49, %v612_v9 }
 0x2f7   : > { %10834 = vst [vmem:[#allocation379_spill] sm:$0xff] %v6906_v51  ;;  %v608_v13 = vrot.slane %v606_v20, 2 }
 0x2f8   : > { %1392 = vst [vmem:[#allocation1] ss:$4 sm:$0xff] %v6888_v36  ;;  %v605_v36 = vrot.slane %v603_v0, 2 }
 0x2f9   : > { %1393 = vst [vmem:[#allocation1 + $0x1] ss:$4 sm:$0xff] %v6894_v45  ;;  %v6928_v45 = vsel %vm6516_vm6, %v599_v35, %v600_v25  ;;  %v6949_v0 = vsel %vm6516_vm6, %v608_v13, %v609_v46  ;;  %v625_v35 = vrot.slane %v6533_v16, 7  ;;  %v10849_v46 = vld [vmem:[#allocation321_spill] sm:$0xff] }
 0x2fa   : > { %1394 = vst [vmem:[#allocation1 + $0x2] ss:$4 sm:$0xff] %v6900_v48  ;;  %v614_v48 = vrot.slane %v612_v9, 2  ;;  %v6943_v25 = vsel %vm6516_vm6, %v605_v36, %v606_v20  ;;  %v10848_v36 = vrot.slane %v5734_v56, 2 }
 0x2fb   : > { %10839 = vst [vmem:[#allocation47_spill] sm:$0xff] %v6918_v57  ;;  %v627_v49 = vrot.slane %v625_v35, 2 }
 0x2fc   : > { %1395 = vst [vmem:[#allocation1 + $0x3] ss:$4 sm:$0xff] %v6906_v51  ;;  %v6930_v8 = vld.sshfl [vmem:[#allocation1 + $0x20] sm:$0xff pattern:$0x73625140]  ;;  %v6961_v20 = vsel %vm6516_vm6, %v614_v48, %v615_v37  ;;  %v621_v13 = vrot.slane %v10848_v36, 7  ;;  %v6974_v48 = vsel %vm6516_vm6, %v617_v27, %v618_v18 }
 0x2fd   : > { %10841 = vst [vmem:[#allocation380_spill] sm:$0xff] %v6924_v10  ;;  %v10853_v37 = vld [vmem:[#allocation323_spill] sm:$0xff]  ;;  %2752 = vmatmul.f32.gmra.mxu1 %v6930_v8 }
 0x2fe   : > { %10842 = vst [vmem:[#allocation381_spill] sm:$0xff] %v6928_v45  ;;  %v637_v36 = vrot.slane %v10853_v37, 7 }
 0x2ff   : > { %10843 = vst [vmem:[#allocation382_spill] sm:$0xff] %v6934_v38 }
 0x300   : > { %1396 = vst [vmem:[#allocation1 + $0x20] ss:$4 sm:$0xff] %v6918_v57  ;;  %v10851_v57 = vld [vmem:[#allocation82_spill] sm:$0xff] }
 0x301   : > { %1397 = vst [vmem:[#allocation1 + $0x21] ss:$4 sm:$0xff] %v6924_v10  ;;  %v10850_v10 = vld [vmem:[#allocation322_spill] sm:$0xff]  ;;  %v634_v16 = vrot.slane %v10851_v57, 7  ;;  %v10868_v57 = vld [vmem:[#allocation328_spill] sm:$0xff] }
 0x302   : > { %10844 = vst [vmem:[#allocation383_spill] sm:$0xff] %v6943_v25  ;;  %v631_v9 = vrot.slane %v10850_v10, 7  ;;  %v2520_v10 = vld [vmem:[%s10086_s1 + $0x148] sm:$0xff] }
 0x303   : > { %1398 = vst [vmem:[#allocation1 + $0x22] ss:$4 sm:$0xff] %v6928_v45  ;;  %v6957_v51 = vld.sshfl [vmem:[#allocation1] sm:$0xff pattern:$0x73625140]  ;;  %v628_v45 = vrot.slane %v10849_v46, 7 }
 0x304   : > { %10845 = vst [vmem:[#allocation384_spill] sm:$0xff] %v6949_v0  ;;  %v633_v56 = vrot.slane %v631_v9, 2  ;;  %v636_v27 = vrot.slane %v634_v16, 2 }
 0x305   : > { %1399 = vst [vmem:[#allocation1 + $0x23] ss:$4 sm:$0xff] %v6934_v38  ;;  %v5014_v38 = vrot.slane %v5685_v6, 9  ;;  %v630_v46 = vrot.slane %v628_v45, 2  ;;  %v6991_v18 = vsel %vm6516_vm6, %v627_v49, %v628_v45  ;;  %v643_v6 = vrot.slane %v10858_v42, 7  ;;  %v10866_v42 = vld [vmem:[#allocation327_spill] sm:$0xff]  ;;  %2755 = vmatmul.f32.gmra.mxu1 %v6957_v51 }
 0x306   : > { %10846 = vst [vmem:[#allocation385_spill] sm:$0xff] %v6955_v15  ;;  %v7006_v45 = vsel %vm6516_vm6, %v633_v56, %v634_v16  ;;  %v7011_v49 = vsel %vm6516_vm6, %v636_v27, %v637_v36  ;;  %v2525_v51 = vld [vmem:[%s10086_s1 + $0x170] sm:$0xff] }
 0x307   : > { %10847 = vst [vmem:[#allocation386_spill] sm:$0xff] %v6961_v20  ;;  %v7000_v37 = vsel %vm6516_vm6, %v630_v46, %v631_v9  ;;  %v645_v9 = vrot.slane %v643_v6, 2 }
 0x308   : > { %1402 = vst [vmem:[#allocation1] ss:$4 sm:$0xff] %v6943_v25  ;;  %v6980_v25 = vsel %vm6516_vm6, %v620_v34, %v621_v13  ;;  %v639_v34 = vrot.slane %v637_v36, 2  ;;  %v10857_v13 = vld [vmem:[#allocation329_spill] sm:$0xff]  ;;  %v10867_v36 = vld [vmem:[#allocation90_spill] sm:$0xff] }
 0x309   : > { %1403 = vst [vmem:[#allocation1 + $0x1] ss:$4 sm:$0xff] %v6949_v0  ;;  %v6984_v0 = vsel %vm6516_vm6, %v5014_v38, %v625_v35  ;;  %v10859_v38 = vld [vmem:[#allocation62_spill] sm:$0xff]  ;;  %v5015_v27 = vrot.slane %v10867_v36, 9 }
 0x30a   : > { %1404 = vst [vmem:[#allocation1 + $0x2] ss:$4 sm:$0xff] %v6955_v15  ;;  %v646_v22 = vrot.slane %v10859_v38, 7  ;;  %v10865_v16 = vrot.slane %v10859_v38, 2 }
 0x30b   : > { %10852 = vst [vmem:[#allocation387_spill] sm:$0xff] %v6974_v48 }
 0x30c   : > { %1405 = vst [vmem:[#allocation1 + $0x3] ss:$4 sm:$0xff] %v6961_v20  ;;  %v6986_v15 = vld.sshfl [vmem:[#allocation1 + $0x20] sm:$0xff pattern:$0x73625140]  ;;  %v640_v20 = vrot.slane %v10857_v13, 7 }
 0x30d   : > { %10854 = vst [vmem:[#allocation388_spill] sm:$0xff] %v6980_v25  ;;  %v648_v56 = vrot.slane %v646_v22, 2  ;;  %v656_v13 = vrot.slane %v10866_v42, 7  ;;  %2758 = vmatmul.f32.gmra.mxu1 %v6986_v15 }
 0x30e   : > { %10855 = vst [vmem:[#allocation389_spill] sm:$0xff] %v6984_v0  ;;  %v7017_v46 = vsel %vm6516_vm6, %v639_v34, %v640_v20 }
 0x30f   : > { %10856 = vst [vmem:[#allocation390_spill] sm:$0xff] %v6991_v18  ;;  %v658_v36 = vrot.slane %v656_v13, 2 }
 0x310   : > { %1406 = vst [vmem:[#allocation1 + $0x20] ss:$4 sm:$0xff] %v6974_v48  ;;  %v10864_v48 = vld [vmem:[#allocation326_spill] sm:$0xff] }
 0x311   : > { %1407 = vst [vmem:[#allocation1 + $0x21] ss:$4 sm:$0xff] %v6980_v25  ;;  %v642_v25 = vrot.slane %v640_v20, 2  ;;  %v659_v20 = vrot.slane %v10868_v57, 7 }
 0x312   : > { %10860 = vst [vmem:[#allocation391_spill] sm:$0xff] %v7000_v37 }
 0x313   : > { %1408 = vst [vmem:[#allocation1 + $0x22] ss:$4 sm:$0xff] %v6984_v0  ;;  %v7013_v35 = vld.sshfl [vmem:[#allocation1] sm:$0xff pattern:$0x73625140]  ;;  %v653_v0 = vrot.slane %v10864_v48, 7  ;;  %v7031_v34 = vsel %vm6516_vm6, %v642_v25, %v643_v6 }
 0x314   : > { %10861 = vst [vmem:[#allocation392_spill] sm:$0xff] %v7006_v45  ;;  %v661_v25 = vrot.slane %v659_v20, 2 }
 0x315   : > { %1409 = vst [vmem:[#allocation1 + $0x23] ss:$4 sm:$0xff] %v6991_v18  ;;  %v649_v18 = vrot.slane %v10865_v16, 7  ;;  %v7037_v16 = vsel %vm6516_vm6, %v645_v9, %v646_v22  ;;  %v7047_v6 = vsel %vm6516_vm6, %v5015_v27, %v653_v0  ;;  %v10875_v22 = vld [vmem:[#allocation335_spill] sm:$0xff]  ;;  %2761 = vmatmul.f32.gmra.mxu1 %v7013_v35  ;;  %v2519_v35 = vld [vmem:[%s10086_s1 + $0x140] sm:$0xff] }
 0x316   : > { %10862 = vst [vmem:[#allocation393_spill] sm:$0xff] %v7011_v49  ;;  %v668_v9 = vrot.slane %v10875_v22, 7  ;;  %v2524_v22 = vld [vmem:[%s10086_s1 + $0x168] sm:$0xff] }
 0x317   : > { %10863 = vst [vmem:[#allocation394_spill] sm:$0xff] %v7017_v46  ;;  %v7041_v8 = vsel %vm6516_vm6, %v648_v56, %v649_v18  ;;  %v10877_v56 = vld [vmem:[#allocation336_spill] sm:$0xff] }
 0x318   : > { %1412 = vst [vmem:[#allocation1] ss:$4 sm:$0xff] %v7000_v37  ;;  %v10870_v37 = vld [vmem:[#allocation71_spill] sm:$0xff]  ;;  %v671_v57 = vrot.slane %v10877_v56, 7 }
 0x319   : > { %1413 = vst [vmem:[#allocation1 + $0x1] ss:$4 sm:$0xff] %v7006_v45  ;;  %v662_v48 = vrot.slane %v10870_v37, 7  ;;  %v655_v45 = vrot.slane %v653_v0, 2  ;;  %v10878_v0 = vld [vmem:[#allocation98_spill] sm:$0xff] }
 0x31a   : > { %1414 = vst [vmem:[#allocation1 + $0x2] ss:$4 sm:$0xff] %v7011_v49  ;;  %v10874_v49 = vld [vmem:[#allocation334_spill] sm:$0xff] }
 0x31b   : > { %10869 = vst [vmem:[#allocation395_spill] sm:$0xff] %v7031_v34  ;;  %v665_v37 = vrot.slane %v10874_v49, 7  ;;  %v7055_v18 = vsel %vm6516_vm6, %v655_v45, %v656_v13  ;;  %v674_v49 = vrot.slane %v10878_v0, 7  ;;  %v7069_v13 = vsel %vm6516_vm6, %v661_v25, %v662_v48 }
 0x31c   : > { %1415 = vst [vmem:[#allocation1 + $0x3] ss:$4 sm:$0xff] %v7017_v46  ;;  %v7043_v38 = vld.sshfl [vmem:[#allocation1 + $0x20] sm:$0xff pattern:$0x73625140]  ;;  %v664_v46 = vrot.slane %v662_v48, 2 }
 0x31d   : > { %10871 = vst [vmem:[#allocation396_spill] sm:$0xff] %v7037_v16  ;;  %v667_v45 = vrot.slane %v665_v37, 2  ;;  %v673_v48 = vrot.slane %v671_v57, 2  ;;  %2764 = vmatmul.f32.gmra.mxu1 %v7043_v38 }
 0x31e   : > { %10872 = vst [vmem:[#allocation397_spill] sm:$0xff] %v7041_v8  ;;  %v7075_v27 = vsel %vm6516_vm6, %v664_v46, %v665_v37  ;;  %v676_v37 = vrot.slane %v674_v49, 2  ;;  %v10883_v46 = vrot.slane %v10878_v0, 2  ;;  %v2523_v0 = vld [vmem:[%s10086_s1 + $0x160] sm:$0xff] }
 0x31f   : > { %10873 = vst [vmem:[#allocation398_spill] sm:$0xff] %v7047_v6  ;;  %v7095_v42 = vsel %vm6516_vm6, %v667_v45, %v668_v9 }
 0x320   : > { %1416 = vst [vmem:[#allocation1 + $0x20] ss:$4 sm:$0xff] %v7031_v34  ;;  %v7062_v34 = vsel %vm6516_vm6, %v658_v36, %v659_v20  ;;  %v2526_v36 = vld [vmem:[%s10086_s1 + $0x178] sm:$0xff]  ;;  %v10882_v20 = vld [vmem:[#allocation331_spill] sm:$0xff] }
 0x321   : > { %1417 = vst [vmem:[#allocation1 + $0x21] ss:$4 sm:$0xff] %v7037_v16  ;;  %v681_v25 = vrot.slane %v10882_v20, 7  ;;  %5114 = vmatpush.msrb.mxu3 %v2526_v36  ;;  %2795 = vmatpush.msra.mxu2 %v2526_v36  ;;  %v10886_v20 = vld [vmem:[#allocation333_spill] sm:$0xff] }
 0x322   : > { %10876 = vst [vmem:[#allocation399_spill] sm:$0xff] %v7055_v18 }
 0x323   : > { %1418 = vst [vmem:[#allocation1 + $0x22] ss:$4 sm:$0xff] %v7041_v8  ;;  %v7071_v16 = vld.sshfl [vmem:[#allocation1] sm:$0xff pattern:$0x73625140]  ;;  %v670_v8 = vrot.slane %v668_v9, 2  ;;  %5115 = vmatpush.msrb.mxu3 %v2525_v51  ;;  %2796 = vmatpush.msra.mxu2 %v2525_v51  ;;  %v7109_v9 = vsel %vm6516_vm6, %v673_v48, %v674_v49 }
 0x324   : > { %10879 = vst [vmem:[#allocation400_spill] sm:$0xff] %v7062_v34  ;;  %v683_v45 = vrot.slane %v681_v25, 2 }
 0x325   : > { %1419 = vst [vmem:[#allocation1 + $0x23] ss:$4 sm:$0xff] %v7047_v6  ;;  %v677_v6 = vrot.slane %v10883_v46, 7  ;;  %v7101_v36 = vsel %vm6516_vm6, %v670_v8, %v671_v57  ;;  %v10888_v46 = vld [vmem:[#allocation78_spill] sm:$0xff]  ;;  %5116 = vmatpush.msrb.mxu3 %v2524_v22  ;;  %2797 = vmatpush.msra.mxu2 %v2524_v22 }
 0x326   : > { %10880 = vst [vmem:[#allocation401_spill] sm:$0xff] %v7069_v13  ;;  %2767 = vmatmul.f32.gmra.mxu1 %v7071_v16  ;;  %v2516_v16 = vld [vmem:[%s10086_s1 + $0x128] sm:$0xff] }
 0x327   : > { %10881 = vst [vmem:[#allocation402_spill] sm:$0xff] %v7075_v27  ;;  %v7115_v51 = vsel %vm6516_vm6, %v676_v37, %v677_v6  ;;  %5117 = vmatpush.msrb.mxu3 %v2523_v0  ;;  %2798 = vmatpush.msra.mxu2 %v2523_v0  ;;  %v10894_v6 = vld [vmem:[#allocation340_spill] sm:$0xff]  ;;  %v10896_v37 = vld [vmem:[#allocation341_spill] sm:$0xff] }
 0x328   : > { %1422 = vst [vmem:[#allocation1] ss:$4 sm:$0xff] %v7055_v18  ;;  %v10884_v18 = vld [vmem:[#allocation332_spill] sm:$0xff]  ;;  %v696_v48 = vrot.slane %v10894_v6, 7 }
 0x329   : > { %1423 = vst [vmem:[#allocation1 + $0x1] ss:$4 sm:$0xff] %v7062_v34  ;;  %v684_v56 = vrot.slane %v10884_v18, 7  ;;  %v687_v34 = vrot.slane %v10886_v20, 7  ;;  %v10892_v18 = vld [vmem:[#allocation339_spill] sm:$0xff] }
 0x32a   : > { %1424 = vst [vmem:[#allocation1 + $0x2] ss:$4 sm:$0xff] %v7069_v13  ;;  %v5016_v13 = vrot.slane %v10888_v46, 9  ;;  %v693_v49 = vrot.slane %v10892_v18, 7 }
 0x32b   : > { %10885 = vst [vmem:[#allocation403_spill] sm:$0xff] %v7095_v42  ;;  %v686_v57 = vrot.slane %v684_v56, 2  ;;  %v689_v8 = vrot.slane %v687_v34, 2  ;;  %v7130_v15 = vsel %vm6516_vm6, %v683_v45, %v684_v56  ;;  %v698_v45 = vrot.slane %v696_v48, 2 }
 0x32c   : > { %1425 = vst [vmem:[#allocation1 + $0x3] ss:$4 sm:$0xff] %v7075_v27  ;;  %v7111_v20 = vld.sshfl [vmem:[#allocation1 + $0x20] sm:$0xff pattern:$0x73625140]  ;;  %v7124_v22 = vsel %vm6516_vm6, %v5016_v13, %v681_v25  ;;  %v10898_v13 = vld [vmem:[#allocation86_spill] sm:$0xff] }
 0x32d   : > { %10887 = vst [vmem:[#allocation404_spill] sm:$0xff] %v7101_v36  ;;  %v10891_v27 = vld [vmem:[#allocation105_spill] sm:$0xff]  ;;  %v695_v6 = vrot.slane %v693_v49, 2  ;;  %v702_v56 = vrot.slane %v10898_v13, 7  ;;  %v2522_v25 = vld [vmem:[%s10086_s1 + $0x158] sm:$0xff] }
 0x32e   : > { %10889 = vst [vmem:[#allocation405_spill] sm:$0xff] %v7109_v9  ;;  %v690_v46 = vrot.slane %v10891_v27, 7  ;;  %5118 = vmatpush.msrb.mxu3 %v2522_v25  ;;  %2799 = vmatpush.msra.mxu2 %v2522_v25 }
 0x32f   : > { %10890 = vst [vmem:[#allocation406_spill] sm:$0xff] %v7115_v51  ;;  %2770 = vmatmul.f32.gmra.mxu1 %v7111_v20  ;;  %v10927_v20 = vld [vmem:[#allocation10_spill] sm:$0xff] }
 0x330   : > { %1426 = vst [vmem:[#allocation1 + $0x20] ss:$4 sm:$0xff] %v7095_v42  ;;  %v699_v42 = vrot.slane %v10896_v37, 7  ;;  %v692_v0 = vrot.slane %v690_v46, 2 }
 0x331   : > { %1427 = vst [vmem:[#allocation1 + $0x21] ss:$4 sm:$0xff] %v7101_v36  ;;  %v7136_v36 = vsel %vm6516_vm6, %v686_v57, %v687_v34  ;;  %v10900_v34 = vld [vmem:[#allocation337_spill] sm:$0xff] }
 0x332   : > { %10893 = vst [vmem:[#allocation407_spill] sm:$0xff] %v7124_v22  ;;  %v709_v57 = vrot.slane %v10900_v34, 7  ;;  %v10904_v34 = vrot.slane %v10898_v13, 2  ;;  %v718_v13 = vrot.slane %v5787_v55, 7 }
 0x333   : > { %1428 = vst [vmem:[#allocation1 + $0x22] ss:$4 sm:$0xff] %v7109_v9  ;;  %v7138_v18 = vld.sshfl [vmem:[#allocation1] sm:$0xff pattern:$0x73625140]  ;;  %v7143_v9 = vsel %vm6516_vm6, %v689_v8, %v690_v46  ;;  %v2521_v46 = vld [vmem:[%s10086_s1 + $0x150] sm:$0xff]  ;;  %v7158_v8 = vsel %vm6516_vm6, %v692_v0, %v693_v49  ;;  %v7174_v49 = vsel %vm6516_vm6, %v698_v45, %v699_v42 }
 0x334   : > { %10895 = vst [vmem:[#allocation408_spill] sm:$0xff] %v7130_v15  ;;  %v705_v27 = vrot.slane %v10904_v34, 7  ;;  %v10906_v0 = vld [vmem:[#allocation112_spill] sm:$0xff]  ;;  %5119 = vmatpush.msrb.mxu3 %v2521_v46  ;;  %2800 = vmatpush.msra.mxu2 %v2521_v46 }
 0x335   : > { %1429 = vst [vmem:[#allocation1 + $0x23] ss:$4 sm:$0xff] %v7115_v51  ;;  %v701_v51 = vrot.slane %v699_v42, 2  ;;  %v5017_v25 = vrot.slane %v10906_v0, 9  ;;  %v10908_v42 = vld [vmem:[#allocation343_spill] sm:$0xff] }
 0x336   : > { %10897 = vst [vmem:[#allocation409_spill] sm:$0xff] %v7136_v36  ;;  %v715_v45 = vrot.slane %v10908_v42, 7  ;;  %5120 = vmatpush.msrb.mxu3 %v2520_v10  ;;  %2801 = vmatpush.msra.mxu2 %v2520_v10 }
 0x337   : > { %10899 = vst [vmem:[#allocation410_spill] sm:$0xff] %v7143_v9  ;;  %v7198_v46 = vsel %vm6516_vm6, %v5017_v25, %v709_v57  ;;  %2773 = vmatmul.f32.gmra.mxu1 %v7138_v18  ;;  %v10933_v18 = vld [vmem:[#allocation31_spill] sm:$0xff] }
 0x338   : > { %1432 = vst [vmem:[#allocation1] ss:$4 sm:$0xff] %v7124_v22  ;;  %v10902_v22 = vld [vmem:[#allocation338_spill] sm:$0xff]  ;;  %5121 = vmatpush.msrb.mxu3 %v2519_v35  ;;  %2802 = vmatpush.msra.mxu2 %v2519_v35 }
 0x339   : > { %1433 = vst [vmem:[#allocation1 + $0x1] ss:$4 sm:$0xff] %v7130_v15  ;;  %v712_v37 = vrot.slane %v10902_v22, 7  ;;  %v704_v15 = vrot.slane %v702_v56, 2 }
 0x33a   : > { %1434 = vst [vmem:[#allocation1 + $0x2] ss:$4 sm:$0xff] %v7136_v36  ;;  %v7164_v36 = vsel %vm6516_vm6, %v695_v6, %v696_v48  ;;  %v7181_v6 = vsel %vm6516_vm6, %v701_v51, %v702_v56  ;;  %v711_v48 = vrot.slane %v709_v57, 2  ;;  %v721_v56 = vrot.slane %v6641_v7, 7  ;;  %v10913_v57 = vld [vmem:[#allocation342_spill] sm:$0xff] }
 0x33b   : > { %10901 = vst [vmem:[#allocation411_spill] sm:$0xff] %v7158_v8  ;;  %v714_v34 = vrot.slane %v712_v37, 2  ;;  %v7192_v51 = vsel %vm6516_vm6, %v704_v15, %v705_v27  ;;  %v717_v15 = vrot.slane %v715_v45, 2  ;;  %v727_v25 = vrot.slane %v10913_v57, 7 }
 0x33c   : > { %1435 = vst [vmem:[#allocation1 + $0x3] ss:$4 sm:$0xff] %v7143_v9  ;;  %v7177_v9 = vld.sshfl [vmem:[#allocation1 + $0x20] sm:$0xff pattern:$0x73625140]  ;;  %v7204_v10 = vsel %vm6516_vm6, %v711_v48, %v712_v37  ;;  %v723_v37 = vrot.slane %v721_v56, 2 }
 0x33d   : > { %10903 = vst [vmem:[#allocation412_spill] sm:$0xff] %v7164_v36 }
 0x33e   : > { %10905 = vst [vmem:[#allocation413_spill] sm:$0xff] %v7174_v49 }
 0x33f   : > { %10907 = vst [vmem:[#allocation414_spill] sm:$0xff] %v7181_v6  ;;  %2776 = vmatmul.f32.gmra.mxu1 %v7177_v9  ;;  %v10941_v9 = vld [vmem:[#allocation21_spill] sm:$0xff] }
 0x340   : > { %1436 = vst [vmem:[#allocation1 + $0x20] ss:$4 sm:$0xff] %v7158_v8  ;;  %v10914_v8 = vld [vmem:[#allocation119_spill] sm:$0xff] }
 0x341   : > { %1437 = vst [vmem:[#allocation1 + $0x21] ss:$4 sm:$0xff] %v7164_v36  ;;  %v724_v36 = vrot.slane %v6645_v19, 7  ;;  %v730_v19 = vrot.slane %v10914_v8, 7  ;;  %v10917_v57 = vrot.slane %v10914_v8, 2 }
 0x342   : > { %10909 = vst [vmem:[#allocation415_spill] sm:$0xff] %v7192_v51 }
 0x343   : > { %1438 = vst [vmem:[#allocation1 + $0x22] ss:$4 sm:$0xff] %v7174_v49  ;;  %v7206_v27 = vld.sshfl [vmem:[#allocation1] sm:$0xff pattern:$0x73625140]  ;;  %v7210_v49 = vsel %vm6516_vm6, %v714_v34, %v715_v45  ;;  %v726_v48 = vrot.slane %v724_v36, 2  ;;  %v7222_v34 = vsel %vm6516_vm6, %v717_v15, %v718_v13  ;;  %v7232_v38 = vsel %vm6516_vm6, %v723_v37, %v724_v36 }
 0x344   : > { %10910 = vst [vmem:[#allocation416_spill] sm:$0xff] %v7198_v46  ;;  %v729_v45 = vrot.slane %v727_v25, 2  ;;  %v733_v7 = vrot.slane %v10917_v57, 7  ;;  %v10923_v15 = vld [vmem:[#allocation25_spill] sm:$0xff]  ;;  %v10925_v37 = vld [vmem:[#allocation12_spill] sm:$0xff] }
 0x345   : > { %1439 = vst [vmem:[#allocation1 + $0x23] ss:$4 sm:$0xff] %v7181_v6  ;;  %v720_v6 = vrot.slane %v718_v13, 2  ;;  %v2515_v57 = vld [vmem:[%s10086_s1 + $0x120] sm:$0xff] }
 0x346   : > { %10911 = vst [vmem:[#allocation417_spill] sm:$0xff] %v7204_v10  ;;  %v7242_v13 = vsel %vm6516_vm6, %v729_v45, %v730_v19  ;;  %v10926_v45 = vld [vmem:[#allocation23_spill] sm:$0xff] }
 0x347   : > { %10912 = vst [vmem:[#allocation418_spill] sm:$0xff] %v7210_v49  ;;  %2779 = vmatmul.f32.gmra.mxu1 %v7206_v27  ;;  %v10946_v27 = vld [vmem:[#allocation46_spill] sm:$0xff] }
 0x348   : > { %1442 = vst [vmem:[#allocation1] ss:$4 sm:$0xff] %v7192_v51  ;;  %v732_v51 = vrot.slane %v730_v19, 2  ;;  %v2518_v19 = vld [vmem:[%s10086_s1 + $0x138] sm:$0xff] }
 0x349   : > { %1443 = vst [vmem:[#allocation1 + $0x1] ss:$4 sm:$0xff] %v7198_v46  ;;  %v7226_v46 = vsel %vm6516_vm6, %v720_v6, %v721_v56  ;;  %v2517_v56 = vld [vmem:[%s10086_s1 + $0x130] sm:$0xff]  ;;  %2803 = vmatpush.msra.mxu2 %v2518_v19  ;;  %5122 = vmatpush.msrb.mxu3 %v2518_v19 }
 0x34a   : > { %1444 = vst [vmem:[#allocation1 + $0x2] ss:$4 sm:$0xff] %v7204_v10  ;;  %v7247_v6 = vsel %vm6516_vm6, %v732_v51, %v733_v7  ;;  %v10922_v51 = vld [vmem:[#allocation24_spill] sm:$0xff]  ;;  %v10928_v19 = vld [vmem:[#allocation11_spill] sm:$0xff] }
 0x34b   : > { %1445 = vst [vmem:[#allocation1 + $0x3] ss:$4 sm:$0xff] %v7210_v49  ;;  %v7236_v49 = vsel %vm6516_vm6, %v726_v48, %v727_v25  ;;  %2804 = vmatpush.msra.mxu2 %v2517_v56  ;;  %5123 = vmatpush.msrb.mxu3 %v2517_v56  ;;  %v2514_v48 = vld [vmem:[%s10086_s1 + $0x118] sm:$0xff]  ;;  %v10929_v56 = vld [vmem:[#allocation13_spill] sm:$0xff] }
 0x34c   : > { %10915 = vst [vmem:[#allocation419_spill] sm:$0xff] %v7222_v34  ;;  %v1441_v35 = vld.sshfl [vmem:[#allocation1 + $0x20] sm:$0xff pattern:$0x73625140] }
 0x34d   : > { %10916 = vst [vmem:[#allocation420_spill] sm:$0xff] %v7226_v46  ;;  %2782 = vmatmul.f32.vlgmr.msra.gmra.mxu3 %v1441_v35  ;;  %2805 = vmatpush.msra.mxu2 %v2516_v16  ;;  %v10924_v35 = vld [vmem:[#allocation26_spill] sm:$0xff] }
 0x34e   : > { %10918 = vst [vmem:[#allocation421_spill] sm:$0xff] %v7232_v38  ;;  %5124 = vmatpush.msrb.mxu3 %v2516_v16  ;;  %v2512_v16 = vld [vmem:[%s10086_s1 + $0x108] sm:$0xff] }
 0x34f   : > { %10919 = vst [vmem:[#allocation422_spill] sm:$0xff] %v7236_v49  ;;  %2806 = vmatpush.msra.mxu2 %v2515_v57 }
 0x350   : > { %1446 = vst [vmem:[#allocation1 + $0x20] ss:$4 sm:$0xff] %v7222_v34  ;;  %5125 = vmatpush.msrb.mxu3 %v2515_v57 }
 0x351   : > { %1447 = vst [vmem:[#allocation1 + $0x21] ss:$4 sm:$0xff] %v7226_v46  ;;  %2807 = vmatpush.msra.mxu2 %v2514_v48 }
 0x352   : > { %10920 = vst [vmem:[#allocation423_spill] sm:$0xff] %v7242_v13  ;;  %v1450_v36 = vld.sshfl [vmem:[#allocation1] sm:$0xff pattern:$0x73625140]  ;;  %5126 = vmatpush.msrb.mxu3 %v2514_v48  ;;  %v10934_v48 = vld [vmem:[#allocation16_spill] sm:$0xff] }
 0x353   : > { %1448 = vst [vmem:[#allocation1 + $0x22] ss:$4 sm:$0xff] %v7232_v38 }
 0x354   : > { %10921 = vst [vmem:[#allocation424_spill] sm:$0xff] %v7247_v6 }
 0x355   : > { %1449 = vst [vmem:[#allocation1 + $0x23] ss:$4 sm:$0xff] %v7236_v49  ;;  %2785 = vmatmul.f32.gmra.mxu3 %v1450_v36  ;;  %v2513_v36 = vld [vmem:[%s10086_s1 + $0x110] sm:$0xff] }
 0x356   : > { %1452 = vst [vmem:[#allocation1] ss:$4 sm:$0xff] %v7242_v13  ;;  %2808 = vmatpush.msra.mxu2 %v2513_v36  ;;  %5127 = vmatpush.msrb.mxu3 %v2513_v36  ;;  %v10937_v36 = vld [vmem:[#allocation18_spill] sm:$0xff] }
 0x357   : > { %1453 = vst [vmem:[#allocation1 + $0x1] ss:$4 sm:$0xff] %v7247_v6 }
 0x358   : > { %2809 = vmatpush.msra.mxu2 %v2512_v16  ;;  %5128 = vmatpush.msrb.mxu3 %v2512_v16  ;;  %v10940_v16 = vld [vmem:[#allocation20_spill] sm:$0xff] }
 0x35c   : > { %v1451_v7 = vld.sshfl [vmem:[#allocation1 + $0x20] sm:$0xff pattern:$0x73625140] }
 0x35d   : > { %1486 = vst [vmem:[#allocation1 + $0x20] ss:$4 sm:$0xff] %v10922_v51  ;;  %2788 = vmatmul.f32.gmra.mxu3 %v1451_v7  ;;  %v2511_v7 = vld [vmem:[%s10086_s1 + $0x100] sm:$0xff] }
 0x35e   : > { %1488 = vst [vmem:[#allocation1 + $0x21] ss:$4 sm:$0xff] %v10923_v15  ;;  %v1454_v25 = vld.sshfl [vmem:[#allocation1] sm:$0xff pattern:$0x73625140]  ;;  %2810 = vmatpush.msra.mxu2 %v2511_v7  ;;  %5129 = vmatpush.msrb.mxu3 %v2511_v7  ;;  %v10930_v15 = vld [vmem:[#allocation14_spill] sm:$0xff] }
 0x35f   : > { %1490 = vst [vmem:[#allocation1 + $0x22] ss:$4 sm:$0xff] %v10924_v35  ;;  %v10931_v35 = vld [vmem:[#allocation29_spill] sm:$0xff] }
 0x360   : > { %1482 = vst [vmem:[#allocation1 + $0x2] ss:$4 sm:$0xff] %v10925_v37  ;;  %v10932_v37 = vld [vmem:[#allocation30_spill] sm:$0xff] }
 0x361   : > { %1484 = vst [vmem:[#allocation1 + $0x3] ss:$4 sm:$0xff] %v10926_v45  ;;  %v10935_v45 = vld [vmem:[#allocation15_spill] sm:$0xff] }
 0x362   : > { %1478 = vst [vmem:[#allocation1] ss:$4 sm:$0xff] %v10927_v20  ;;  %v10936_v20 = vld [vmem:[#allocation17_spill] sm:$0xff] }
 0x363   : > { %1480 = vst [vmem:[#allocation1 + $0x1] ss:$4 sm:$0xff] %v10928_v19  ;;  %v10938_v19 = vld [vmem:[#allocation38_spill] sm:$0xff] }
 0x364   : > { %1492 = vst [vmem:[#allocation1 + $0x23] ss:$4 sm:$0xff] %v10929_v56  ;;  %v10939_v56 = vld [vmem:[#allocation37_spill] sm:$0xff] }
 0x365   : > { %2791 = vmatmul.f32.gmra.mxu3 %v1454_v25 }
 0x36a   : > { %v1493_v51 = vld.sshfl [vmem:[#allocation1] sm:$0xff pattern:$0x73625140] }
 0x36b   : > { %1495 = vst [vmem:[#allocation1] ss:$4 sm:$0xff] %v10930_v15  ;;  %2811 = vmatmul.f32.vlgmr.msra.gmra.mxu2 %v1493_v51  ;;  %v1494_v57 = vld.sshfl [vmem:[#allocation1 + $0x20] sm:$0xff pattern:$0x73625140]  ;;  %v10942_v51 = vld [vmem:[#allocation22_spill] sm:$0xff] }
 0x36c   : > { %1496 = vst [vmem:[#allocation1 + $0x1] ss:$4 sm:$0xff] %v10931_v35  ;;  %v10943_v15 = vld [vmem:[#allocation43_spill] sm:$0xff]  ;;  %v10944_v35 = vld [vmem:[#allocation44_spill] sm:$0xff] }
 0x36d   : > { %1497 = vst [vmem:[#allocation1 + $0x2] ss:$4 sm:$0xff] %v10932_v37 }
 0x36e   : > { %1498 = vst [vmem:[#allocation1 + $0x3] ss:$4 sm:$0xff] %v10933_v18  ;;  %v10947_v18 = vld [vmem:[#allocation27_spill] sm:$0xff] }
 0x36f   : > { %1500 = vst [vmem:[#allocation1 + $0x21] ss:$4 sm:$0xff] %v10934_v48  ;;  %v10948_v48 = vld [vmem:[#allocation28_spill] sm:$0xff] }
 0x370   : > { %1499 = vst [vmem:[#allocation1 + $0x20] ss:$4 sm:$0xff] %v10935_v45 }
 0x371   : > { %1501 = vst [vmem:[#allocation1 + $0x22] ss:$4 sm:$0xff] %v10936_v20  ;;  %v10949_v20 = vld [vmem:[#allocation51_spill] sm:$0xff] }
 0x372   : > { %1502 = vst [vmem:[#allocation1 + $0x23] ss:$4 sm:$0xff] %v10937_v36  ;;  %v10950_v36 = vld [vmem:[#allocation52_spill] sm:$0xff] }
 0x373   : > { %2814 = vmatmul.f32.gmra.mxu2 %v1494_v57  ;;  %v10945_v57 = vld [vmem:[#allocation45_spill] sm:$0xff] }
 0x375   : > { %v1503_v25 = vld.sshfl [vmem:[#allocation1] sm:$0xff pattern:$0x73625140] }
 0x376   : > { %1506 = vst [vmem:[#allocation1 + $0x1] ss:$4 sm:$0xff] %v10938_v19  ;;  %v10951_v19 = vld [vmem:[#allocation53_spill] sm:$0xff] }
 0x377   : > { %1505 = vst [vmem:[#allocation1] ss:$4 sm:$0xff] %v10939_v56  ;;  %v10953_v56 = vld [vmem:[#allocation34_spill] sm:$0xff] }
 0x378   : > { %1507 = vst [vmem:[#allocation1 + $0x2] ss:$4 sm:$0xff] %v10940_v16 }
 0x379   : > { %1508 = vst [vmem:[#allocation1 + $0x3] ss:$4 sm:$0xff] %v10941_v9  ;;  %v1504_v7 = vld.sshfl [vmem:[#allocation1 + $0x20] sm:$0xff pattern:$0x73625140]  ;;  %v10954_v9 = vld [vmem:[#allocation35_spill] sm:$0xff] }
 0x37a   : > { %1509 = vst [vmem:[#allocation1 + $0x20] ss:$4 sm:$0xff] %v10942_v51  ;;  %v10955_v51 = vld [vmem:[#allocation36_spill] sm:$0xff] }
 0x37b   : > { %1510 = vst [vmem:[#allocation1 + $0x21] ss:$4 sm:$0xff] %v10943_v15  ;;  %2817 = vmatmul.f32.gmra.mxu2 %v1503_v25  ;;  %v10952_v25 = vld [vmem:[#allocation33_spill] sm:$0xff]  ;;  %v10956_v15 = vld [vmem:[#allocation60_spill] sm:$0xff] }
 0x37c   : > { %1511 = vst [vmem:[#allocation1 + $0x22] ss:$4 sm:$0xff] %v10944_v35  ;;  %v10957_v35 = vld [vmem:[#allocation61_spill] sm:$0xff] }
 0x37d   : > { %1512 = vst [vmem:[#allocation1 + $0x23] ss:$4 sm:$0xff] %v10945_v57  ;;  %v10958_v57 = vld [vmem:[#allocation40_spill] sm:$0xff] }
 0x380   : > { %v1513_v37 = vld.sshfl [vmem:[#allocation1] sm:$0xff pattern:$0x73625140] }
 0x381   : > { %1515 = vst [vmem:[#allocation1] ss:$4 sm:$0xff] %v10946_v27  ;;  %v10959_v27 = vld [vmem:[#allocation41_spill] sm:$0xff] }
 0x382   : > { %1516 = vst [vmem:[#allocation1 + $0x1] ss:$4 sm:$0xff] %v10947_v18  ;;  %v10960_v18 = vld [vmem:[#allocation42_spill] sm:$0xff] }
 0x383   : > { %1517 = vst [vmem:[#allocation1 + $0x2] ss:$4 sm:$0xff] %v10948_v48  ;;  %2820 = vmatmul.f32.gmra.mxu2 %v1504_v7  ;;  %v10961_v48 = vld [vmem:[#allocation67_spill] sm:$0xff] }
 0x384   : > { %v1514_v45 = vld.sshfl [vmem:[#allocation1 + $0x20] sm:$0xff pattern:$0x73625140]  ;;  %1518 = vst [vmem:[#allocation1 + $0x3] ss:$4 sm:$0xff] %v10949_v20 }
 0x385   : > { %1519 = vst [vmem:[#allocation1 + $0x20] ss:$4 sm:$0xff] %v10950_v36  ;;  %v10963_v36 = vld [vmem:[#allocation69_spill] sm:$0xff] }
 0x386   : > { %1520 = vst [vmem:[#allocation1 + $0x21] ss:$4 sm:$0xff] %v10951_v19  ;;  %v10964_v19 = vld [vmem:[#allocation70_spill] sm:$0xff] }
 0x387   : > { %1521 = vst [vmem:[#allocation1 + $0x22] ss:$4 sm:$0xff] %v10952_v25 }
 0x388   : > { %1522 = vst [vmem:[#allocation1 + $0x23] ss:$4 sm:$0xff] %v10953_v56  ;;  %v10965_v56 = vld [vmem:[#allocation48_spill] sm:$0xff] }
 0x38b   : > { %v1523_v16 = vld.sshfl [vmem:[#allocation1] sm:$0xff pattern:$0x73625140]  ;;  %2823 = vmatmul.f32.gmra.mxu2 %v1513_v37  ;;  %v10962_v37 = vld [vmem:[#allocation68_spill] sm:$0xff] }
 0x38c   : > { %1525 = vst [vmem:[#allocation1] ss:$4 sm:$0xff] %v10954_v9  ;;  %v10966_v9 = vld [vmem:[#allocation49_spill] sm:$0xff] }
 0x38d   : > { %1526 = vst [vmem:[#allocation1 + $0x1] ss:$4 sm:$0xff] %v10955_v51  ;;  %v10967_v51 = vld [vmem:[#allocation75_spill] sm:$0xff] }
 0x38e   : > { %1527 = vst [vmem:[#allocation1 + $0x2] ss:$4 sm:$0xff] %v10956_v15  ;;  %v10968_v15 = vld [vmem:[#allocation76_spill] sm:$0xff] }
 0x38f   : > { %v1524_v7 = vld.sshfl [vmem:[#allocation1 + $0x20] sm:$0xff pattern:$0x73625140]  ;;  %1528 = vst [vmem:[#allocation1 + $0x3] ss:$4 sm:$0xff] %v10957_v35 }
 0x390   : > { %1529 = vst [vmem:[#allocation1 + $0x20] ss:$4 sm:$0xff] %v10958_v57  ;;  %v10969_v35 = vld [vmem:[#allocation77_spill] sm:$0xff]  ;;  %v10970_v57 = vld [vmem:[#allocation55_spill] sm:$0xff] }
 0x391   : > { %1530 = vst [vmem:[#allocation1 + $0x21] ss:$4 sm:$0xff] %v10959_v27  ;;  %v10971_v27 = vld [vmem:[#allocation56_spill] sm:$0xff] }
 0x392   : > { %1531 = vst [vmem:[#allocation1 + $0x22] ss:$4 sm:$0xff] %v10960_v18  ;;  %v10972_v18 = vld [vmem:[#allocation57_spill] sm:$0xff] }
 0x393   : > { %1532 = vst [vmem:[#allocation1 + $0x23] ss:$4 sm:$0xff] %v10961_v48  ;;  %2826 = vmatmul.f32.gmra.mxu2 %v1514_v45 }
 0x396   : > { %v1533_v20 = vld.sshfl [vmem:[#allocation1] sm:$0xff pattern:$0x73625140] }
 0x397   : > { %1535 = vst [vmem:[#allocation1] ss:$4 sm:$0xff] %v10962_v37  ;;  %v10973_v37 = vld [vmem:[#allocation59_spill] sm:$0xff] }
 0x398   : > { %1536 = vst [vmem:[#allocation1 + $0x1] ss:$4 sm:$0xff] %v10963_v36  ;;  %v10974_v36 = vld [vmem:[#allocation84_spill] sm:$0xff] }
 0x399   : > { %1537 = vst [vmem:[#allocation1 + $0x2] ss:$4 sm:$0xff] %v10964_v19  ;;  %v10976_v19 = vld [vmem:[#allocation63_spill] sm:$0xff] }
 0x39a   : > { %v1534_v25 = vld.sshfl [vmem:[#allocation1 + $0x20] sm:$0xff pattern:$0x73625140]  ;;  %1538 = vst [vmem:[#allocation1 + $0x3] ss:$4 sm:$0xff] %v10965_v56  ;;  %v10977_v56 = vld [vmem:[#allocation64_spill] sm:$0xff] }
 0x39b   : > { %1539 = vst [vmem:[#allocation1 + $0x20] ss:$4 sm:$0xff] %v10966_v9  ;;  %2829 = vmatmul.f32.gmra.mxu2 %v1523_v16  ;;  %v10975_v16 = vld [vmem:[#allocation85_spill] sm:$0xff] }
 0x39c   : > { %1540 = vst [vmem:[#allocation1 + $0x21] ss:$4 sm:$0xff] %v10967_v51  ;;  %v10978_v51 = vld [vmem:[#allocation65_spill] sm:$0xff] }
 0x39d   : > { %1541 = vst [vmem:[#allocation1 + $0x22] ss:$4 sm:$0xff] %v10968_v15  ;;  %v10979_v15 = vld [vmem:[#allocation91_spill] sm:$0xff] }
 0x39e   : > { %1542 = vst [vmem:[#allocation1 + $0x23] ss:$4 sm:$0xff] %v10969_v35 }
 0x3a1   : > { %v1543_v45 = vld.sshfl [vmem:[#allocation1] sm:$0xff pattern:$0x73625140] }
 0x3a2   : > { %1545 = vst [vmem:[#allocation1] ss:$4 sm:$0xff] %v10970_v57  ;;  %v10981_v57 = vld [vmem:[#allocation93_spill] sm:$0xff] }
 0x3a3   : > { %1546 = vst [vmem:[#allocation1 + $0x1] ss:$4 sm:$0xff] %v10971_v27  ;;  %2832 = vmatmul.f32.gmra.mxu2 %v1524_v7  ;;  %v10980_v7 = vld [vmem:[#allocation92_spill] sm:$0xff]  ;;  %v10982_v27 = vld [vmem:[#allocation94_spill] sm:$0xff] }
 0x3a4   : > { %1547 = vst [vmem:[#allocation1 + $0x2] ss:$4 sm:$0xff] %v10972_v18  ;;  %v7344_v18 = vpop.f32.mrf.mxu0  ;;  %2728 = vmatmul.f32.gmra.mxu0 %v6721_v11  ;;  %v10988_v11 = vld [vmem:[#allocation101_spill] sm:$0xff] }
 0x3a5   : > { %v1544_v48 = vld.sshfl [vmem:[#allocation1 + $0x20] sm:$0xff pattern:$0x73625140]  ;;  %1548 = vst [vmem:[#allocation1 + $0x3] ss:$4 sm:$0xff] %v10973_v37  ;;  %v10984_v37 = vld [vmem:[#allocation72_spill] sm:$0xff] }
 0x3a6   : > { %1549 = vst [vmem:[#allocation1 + $0x20] ss:$4 sm:$0xff] %v10974_v36  ;;  %v10986_v36 = vld [vmem:[#allocation99_spill] sm:$0xff] }
 0x3a7   : > { %1550 = vst [vmem:[#allocation1 + $0x21] ss:$4 sm:$0xff] %v10975_v16 }
 0x3a8   : > { %1551 = vst [vmem:[#allocation1 + $0x22] ss:$4 sm:$0xff] %v10976_v19  ;;  %v2542_v19 = vld [vmem:[%s10086_s1 + $0x1f8] sm:$0xff] }
 0x3a9   : > { %1552 = vst [vmem:[#allocation1 + $0x23] ss:$4 sm:$0xff] %v10977_v56  ;;  %v2541_v56 = vld [vmem:[%s10086_s1 + $0x1f0] sm:$0xff]  ;;  %2881 = vmatpush.msra.mxu3 %v2542_v19  ;;  %v10994_v19 = vld [vmem:[#allocation108_spill] sm:$0xff] }
 0x3aa   : > { %10983 = vst [vmem:[#allocation24_spill] sm:$0xff] %v7344_v18  ;;  %v11033_v18 = vld [vmem:[#allocation328_spill] sm:$0xff] }
 0x3ab   : > { %2835 = vmatmul.f32.gmra.mxu2 %v1533_v20  ;;  %v10985_v20 = vld [vmem:[#allocation73_spill] sm:$0xff]  ;;  %2882 = vmatpush.msra.mxu3 %v2541_v56  ;;  %v2538_v56 = vld [vmem:[%s10086_s1 + $0x1d8] sm:$0xff] }
 0x3ac   : > { %v1553_v9 = vld.sshfl [vmem:[#allocation1] sm:$0xff pattern:$0x73625140] }
 0x3ad   : > { %1555 = vst [vmem:[#allocation1] ss:$4 sm:$0xff] %v10978_v51  ;;  %v10987_v51 = vld [vmem:[#allocation100_spill] sm:$0xff] }
 0x3ae   : > { %1556 = vst [vmem:[#allocation1 + $0x1] ss:$4 sm:$0xff] %v10979_v15  ;;  %v10989_v15 = vld [vmem:[#allocation79_spill] sm:$0xff] }
 0x3af   : > { %1557 = vst [vmem:[#allocation1 + $0x2] ss:$4 sm:$0xff] %v10980_v7 }
 0x3b0   : > { %v7340_v35 = vld.sshfl [vmem:[#allocation1 + $0x20] sm:$0xff pattern:$0x73625140]  ;;  %1558 = vst [vmem:[#allocation1 + $0x3] ss:$4 sm:$0xff] %v10981_v57  ;;  %v10990_v57 = vld [vmem:[#allocation80_spill] sm:$0xff] }
 0x3b1   : > { %1559 = vst [vmem:[#allocation1 + $0x20] ss:$4 sm:$0xff] %v10982_v27  ;;  %v2539_v27 = vld [vmem:[%s10086_s1 + $0x1e0] sm:$0xff] }
 0x3b2   : > { %1560 = vst [vmem:[#allocation1 + $0x21] ss:$4 sm:$0xff] %v10984_v37  ;;  %v10991_v37 = vld [vmem:[#allocation81_spill] sm:$0xff] }
 0x3b3   : > { %1561 = vst [vmem:[#allocation1 + $0x22] ss:$4 sm:$0xff] %v10985_v20  ;;  %2838 = vmatmul.f32.gmra.mxu2 %v1534_v25  ;;  %v2540_v25 = vld [vmem:[%s10086_s1 + $0x1e8] sm:$0xff]  ;;  %v10992_v20 = vld [vmem:[#allocation83_spill] sm:$0xff] }
 0x3b4   : > { %1562 = vst [vmem:[#allocation1 + $0x23] ss:$4 sm:$0xff] %v10986_v36  ;;  %2883 = vmatpush.msra.mxu3 %v2540_v25  ;;  %v10993_v36 = vld [vmem:[#allocation107_spill] sm:$0xff] }
 0x3b5   : > { %v10995_v25 = vld [vmem:[#allocation87_spill] sm:$0xff] }
 0x3b6   : > { %2884 = vmatpush.msra.mxu3 %v2539_v27  ;;  %v10997_v27 = vld [vmem:[#allocation89_spill] sm:$0xff] }
 0x3b7   : > { %v7350_v16 = vld.sshfl [vmem:[#allocation1] sm:$0xff pattern:$0x73625140] }
 0x3b8   : > { %1565 = vst [vmem:[#allocation1] ss:$4 sm:$0xff] %v10987_v51  ;;  %v2537_v51 = vld [vmem:[%s10086_s1 + $0x1d0] sm:$0xff]  ;;  %2885 = vmatpush.msra.mxu3 %v2538_v56 }
 0x3b9   : > { %1566 = vst [vmem:[#allocation1 + $0x1] ss:$4 sm:$0xff] %v10988_v11  ;;  %v11000_v56 = vld [vmem:[#allocation115_spill] sm:$0xff] }
 0x3ba   : > { %1567 = vst [vmem:[#allocation1 + $0x2] ss:$4 sm:$0xff] %v10989_v15  ;;  %2886 = vmatpush.msra.mxu3 %v2537_v51  ;;  %v2535_v15 = vld [vmem:[%s10086_s1 + $0x1c0] sm:$0xff]  ;;  %v11001_v51 = vld [vmem:[#allocation116_spill] sm:$0xff] }
 0x3bb   : > { %v7364_v7 = vld.sshfl [vmem:[#allocation1 + $0x20] sm:$0xff pattern:$0x73625140]  ;;  %1568 = vst [vmem:[#allocation1 + $0x3] ss:$4 sm:$0xff] %v10990_v57  ;;  %2841 = vmatmul.f32.gmra.mxu2 %v1543_v45  ;;  %v2536_v45 = vld [vmem:[%s10086_s1 + $0x1c8] sm:$0xff] }
 0x3bc   : > { %1569 = vst [vmem:[#allocation1 + $0x20] ss:$4 sm:$0xff] %v10991_v37  ;;  %v10996_v57 = vld [vmem:[#allocation88_spill] sm:$0xff]  ;;  %2887 = vmatpush.msra.mxu3 %v2536_v45  ;;  %v2532_v45 = vld [vmem:[%s10086_s1 + $0x1a8] sm:$0xff] }
 0x3bd   : > { %1570 = vst [vmem:[#allocation1 + $0x21] ss:$4 sm:$0xff] %v10992_v20  ;;  %v10998_v20 = vld [vmem:[#allocation113_spill] sm:$0xff] }
 0x3be   : > { %1571 = vst [vmem:[#allocation1 + $0x22] ss:$4 sm:$0xff] %v10993_v36  ;;  %2888 = vmatpush.msra.mxu3 %v2535_v15  ;;  %v10999_v36 = vld [vmem:[#allocation114_spill] sm:$0xff]  ;;  %v2531_v15 = vld [vmem:[%s10086_s1 + $0x1a0] sm:$0xff] }
 0x3bf   : > { %1572 = vst [vmem:[#allocation1 + $0x23] ss:$4 sm:$0xff] %v10994_v19  ;;  %v2534_v19 = vld [vmem:[%s10086_s1 + $0x1b8] sm:$0xff] }
 0x3c0   : > { %2889 = vmatpush.msra.mxu3 %v2534_v19  ;;  %v11005_v19 = vld [vmem:[#allocation121_spill] sm:$0xff] }
 0x3c2   : > { %v7383_v11 = vld.sshfl [vmem:[#allocation1] sm:$0xff pattern:$0x73625140] }
 0x3c3   : > { %1575 = vst [vmem:[#allocation1] ss:$4 sm:$0xff] %v10995_v25  ;;  %2844 = vmatmul.f32.gmra.mxu2 %v1544_v48  ;;  %v2533_v48 = vld [vmem:[%s10086_s1 + $0x1b0] sm:$0xff]  ;;  %v11002_v25 = vld [vmem:[#allocation96_spill] sm:$0xff] }
 0x3c4   : > { %1576 = vst [vmem:[#allocation1 + $0x1] ss:$4 sm:$0xff] %v10996_v57  ;;  %2890 = vmatpush.msra.mxu3 %v2533_v48 }
 0x3c5   : > { %1577 = vst [vmem:[#allocation1 + $0x2] ss:$4 sm:$0xff] %v10997_v27  ;;  %v11003_v27 = vld [vmem:[#allocation97_spill] sm:$0xff] }
 0x3c6   : > { %v1574_v37 = vld.sshfl [vmem:[#allocation1 + $0x20] sm:$0xff pattern:$0x73625140]  ;;  %1578 = vst [vmem:[#allocation1 + $0x3] ss:$4 sm:$0xff] %v10998_v20  ;;  %2891 = vmatpush.msra.mxu3 %v2532_v45  ;;  %v2530_v20 = vld [vmem:[%s10086_s1 + $0x198] sm:$0xff] }
 0x3c7   : > { %2862 = vmatmul.f32.vlgmr.msrb.gmra.mxu3 %v1574_v37  ;;  %1579 = vst [vmem:[#allocation1 + $0x20] ss:$4 sm:$0xff] %v10999_v36  ;;  %v11004_v37 = vld [vmem:[#allocation120_spill] sm:$0xff]  ;;  %v2529_v36 = vld [vmem:[%s10086_s1 + $0x190] sm:$0xff] }
 0x3c8   : > { %1580 = vst [vmem:[#allocation1 + $0x21] ss:$4 sm:$0xff] %v11000_v56  ;;  %2892 = vmatpush.msra.mxu3 %v2531_v15  ;;  %v2528_v56 = vld [vmem:[%s10086_s1 + $0x188] sm:$0xff]  ;;  %v11008_v45 = vld [vmem:[#allocation103_spill] sm:$0xff]  ;;  %v11009_v15 = vld [vmem:[#allocation104_spill] sm:$0xff] }
 0x3c9   : > { %1581 = vst [vmem:[#allocation1 + $0x22] ss:$4 sm:$0xff] %v11001_v51  ;;  %v11007_v51 = vld [vmem:[#allocation102_spill] sm:$0xff] }
 0x3ca   : > { %1582 = vst [vmem:[#allocation1 + $0x23] ss:$4 sm:$0xff] %v11002_v25  ;;  %2893 = vmatpush.msra.mxu3 %v2530_v20  ;;  %v2527_v25 = vld [vmem:[%s10086_s1 + $0x180] sm:$0xff] }
 0x3cb   : > { %2847 = vmatmul.f32.gmra.mxu2 %v1553_v9  ;;  %v11006_v9 = vld [vmem:[#allocation122_spill] sm:$0xff] }
 0x3cc   : > { %2894 = vmatpush.msra.mxu3 %v2529_v36  ;;  %v11011_v36 = vld [vmem:[#allocation127_spill] sm:$0xff] }
 0x3cd   : > { %v1583_v57 = vld.sshfl [vmem:[#allocation1] sm:$0xff pattern:$0x73625140] }
 0x3ce   : > { %1585 = vst [vmem:[#allocation1] ss:$4 sm:$0xff] %v11003_v27  ;;  %2895 = vmatpush.msra.mxu3 %v2528_v56  ;;  %v2558_v27 = vld [vmem:[%s10086_s1 + $0x278] sm:$0xff]  ;;  %v2547_v56 = vld [vmem:[%s10086_s1 + $0x220] sm:$0xff] }
 0x3cf   : > { %2865 = vmatmul.f32.gmra.mxu3 %v1583_v57  ;;  %1586 = vst [vmem:[#allocation1 + $0x1] ss:$4 sm:$0xff] %v11004_v37  ;;  %v11010_v57 = vld [vmem:[#allocation106_spill] sm:$0xff]  ;;  %v2557_v37 = vld [vmem:[%s10086_s1 + $0x270] sm:$0xff]  ;;  %2967 = vmatpush.msra.mxu0 %v2558_v27 }
 0x3d0   : > { %1587 = vst [vmem:[#allocation1 + $0x2] ss:$4 sm:$0xff] %v11005_v19  ;;  %2896 = vmatpush.msra.mxu3 %v2527_v25  ;;  %v2544_v25 = vld [vmem:[%s10086_s1 + $0x208] sm:$0xff] }
 0x3d1   : > { %1588 = vst [vmem:[#allocation1 + $0x3] ss:$4 sm:$0xff] %v11006_v9  ;;  %v1584_v48 = vld.sshfl [vmem:[#allocation1 + $0x20] sm:$0xff pattern:$0x73625140]  ;;  %2968 = vmatpush.msra.mxu0 %v2557_v37  ;;  %v2556_v9 = vld [vmem:[%s10086_s1 + $0x268] sm:$0xff] }
 0x3d2   : > { %1589 = vst [vmem:[#allocation1 + $0x20] ss:$4 sm:$0xff] %v11007_v51  ;;  %v2545_v51 = vld [vmem:[%s10086_s1 + $0x210] sm:$0xff] }
 0x3d3   : > { %1590 = vst [vmem:[#allocation1 + $0x21] ss:$4 sm:$0xff] %v11008_v45  ;;  %2850 = vmatmul.f32.gmra.mxu2 %v7340_v35  ;;  %v11012_v35 = vld [vmem:[#allocation128_spill] sm:$0xff]  ;;  %2969 = vmatpush.msra.mxu0 %v2556_v9  ;;  %v11013_v37 = vld [vmem:[#allocation311_spill] sm:$0xff] }
 0x3d4   : > { %1591 = vst [vmem:[#allocation1 + $0x22] ss:$4 sm:$0xff] %v11009_v15  ;;  %v2543_v15 = vld [vmem:[%s10086_s1 + $0x200] sm:$0xff]  ;;  %v11017_v9 = vld [vmem:[#allocation315_spill] sm:$0xff] }
 0x3d5   : > { %1592 = vst [vmem:[#allocation1 + $0x23] ss:$4 sm:$0xff] %v11010_v57 }
 0x3d7   : > { %2868 = vmatmul.f32.gmra.mxu3 %v1584_v48  ;;  %v2555_v48 = vld [vmem:[%s10086_s1 + $0x260] sm:$0xff] }
 0x3d8   : > { %v1593_v20 = vld.sshfl [vmem:[#allocation1] sm:$0xff pattern:$0x73625140]  ;;  %2970 = vmatpush.msra.mxu0 %v2555_v48  ;;  %v11018_v48 = vld [vmem:[#allocation58_spill] sm:$0xff] }
 0x3d9   : > { %1595 = vst [vmem:[#allocation1] ss:$4 sm:$0xff] %v11011_v36 }
 0x3da   : > { %1596 = vst [vmem:[#allocation1 + $0x1] ss:$4 sm:$0xff] %v11012_v35  ;;  %v11015_v35 = vld [vmem:[#allocation313_spill] sm:$0xff] }
 0x3db   : > { %2853 = vmatmul.f32.gmra.mxu2 %v7350_v16 }
 0x3dc   : > { %v1594_v19 = vld.sshfl [vmem:[#allocation1 + $0x20] sm:$0xff pattern:$0x73625140] }
 0x3dd   : > { %1629 = vst [vmem:[#allocation1 + $0x20] ss:$4 sm:$0xff] %v5561_v21  ;;  %v2554_v21 = vld [vmem:[%s10086_s1 + $0x258] sm:$0xff] }
 0x3de   : > { %1631 = vst [vmem:[#allocation1 + $0x21] ss:$4 sm:$0xff] %v6332_v41  ;;  %v2553_v41 = vld [vmem:[%s10086_s1 + $0x250] sm:$0xff]  ;;  %2971 = vmatpush.msra.mxu0 %v2554_v21  ;;  %v11019_v21 = vld [vmem:[#allocation317_spill] sm:$0xff] }
 0x3df   : > { %2871 = vmatmul.f32.gmra.mxu3 %v1593_v20  ;;  %1633 = vst [vmem:[#allocation1 + $0x22] ss:$4 sm:$0xff] %v6336_v61  ;;  %v11014_v20 = vld [vmem:[#allocation39_spill] sm:$0xff] }
 0x3e0   : > { %1635 = vst [vmem:[#allocation1 + $0x23] ss:$4 sm:$0xff] %v6305_v1  ;;  %2972 = vmatpush.msra.mxu0 %v2553_v41 }
 0x3e1   : > { %v1597_v16 = vld.sshfl [vmem:[#allocation1] sm:$0xff pattern:$0x73625140] }
 0x3e2   : > { %1621 = vst [vmem:[#allocation1] ss:$4 sm:$0xff] %v5588_v31  ;;  %v2552_v31 = vld [vmem:[%s10086_s1 + $0x248] sm:$0xff] }
 0x3e3   : > { %1623 = vst [vmem:[#allocation1 + $0x1] ss:$4 sm:$0xff] %v6272_v4  ;;  %2856 = vmatmul.f32.gmra.mxu2 %v7364_v7  ;;  %v2551_v4 = vld [vmem:[%s10086_s1 + $0x240] sm:$0xff]  ;;  %2973 = vmatpush.msra.mxu0 %v2552_v31  ;;  %v2548_v7 = vld [vmem:[%s10086_s1 + $0x228] sm:$0xff]  ;;  %v11021_v31 = vld [vmem:[#allocation319_spill] sm:$0xff] }
 0x3e4   : > { %1625 = vst [vmem:[#allocation1 + $0x2] ss:$4 sm:$0xff] %v6275_v3  ;;  %v2550_v3 = vld [vmem:[%s10086_s1 + $0x238] sm:$0xff] }
 0x3e5   : > { %1627 = vst [vmem:[#allocation1 + $0x3] ss:$4 sm:$0xff] %v6328_v14  ;;  %2974 = vmatpush.msra.mxu0 %v2551_v4  ;;  %v2549_v14 = vld [vmem:[%s10086_s1 + $0x230] sm:$0xff]  ;;  %v11022_v4 = vld [vmem:[#allocation320_spill] sm:$0xff] }
 0x3e7   : > { %2874 = vmatmul.f32.gmra.mxu3 %v1594_v19  ;;  %v1637_v1 = vld.sshfl [vmem:[#allocation1 + $0x20] sm:$0xff pattern:$0x73625140]  ;;  %2975 = vmatpush.msra.mxu0 %v2550_v3  ;;  %v11016_v19 = vld [vmem:[#allocation314_spill] sm:$0xff]  ;;  %v11023_v3 = vld [vmem:[#allocation316_spill] sm:$0xff] }
 0x3e8   : > { %1642 = vst [vmem:[#allocation1 + $0x20] ss:$4 sm:$0xff] %v6357_v33 }
 0x3e9   : > { %1643 = vst [vmem:[#allocation1 + $0x21] ss:$4 sm:$0xff] %v5634_v50  ;;  %2976 = vmatpush.msra.mxu0 %v2549_v14 }
 0x3ea   : > { %1644 = vst [vmem:[#allocation1 + $0x22] ss:$4 sm:$0xff] %v6360_v52 }
 0x3eb   : > { %1645 = vst [vmem:[#allocation1 + $0x23] ss:$4 sm:$0xff] %v6325_v62  ;;  %2859 = vmatmul.f32.gmra.mxu2 %v7383_v11  ;;  %2977 = vmatpush.msra.mxu0 %v2548_v7  ;;  %v11025_v7 = vld [vmem:[#allocation82_spill] sm:$0xff] }
 0x3ec   : > { %v1636_v61 = vld.sshfl [vmem:[#allocation1] sm:$0xff pattern:$0x73625140] }
 0x3ed   : > { %1638 = vst [vmem:[#allocation1] ss:$4 sm:$0xff] %v5610_v40  ;;  %v2546_v40 = vld [vmem:[%s10086_s1 + $0x218] sm:$0xff]  ;;  %2978 = vmatpush.msra.mxu0 %v2547_v56  ;;  %v11026_v56 = vld [vmem:[#allocation323_spill] sm:$0xff] }
 0x3ee   : > { %1639 = vst [vmem:[#allocation1 + $0x1] ss:$4 sm:$0xff] %v5569_v24 }
 0x3ef   : > { %2877 = vmatmul.f32.gmra.mxu3 %v1597_v16  ;;  %1640 = vst [vmem:[#allocation1 + $0x2] ss:$4 sm:$0xff] %v6310_v5  ;;  %2979 = vmatpush.msra.mxu0 %v2546_v40  ;;  %v11027_v40 = vld [vmem:[#allocation329_spill] sm:$0xff] }
 0x3f0   : > { %1641 = vst [vmem:[#allocation1 + $0x3] ss:$4 sm:$0xff] %v6348_v59 }
 0x3f1   : > { %2980 = vmatpush.msra.mxu0 %v2545_v51  ;;  %v11028_v51 = vld [vmem:[#allocation54_spill] sm:$0xff] }
 0x3f2   : > { %v1647_v11 = vld.sshfl [vmem:[#allocation1 + $0x20] sm:$0xff pattern:$0x73625140] }
 0x3f3   : > { %1652 = vst [vmem:[#allocation1 + $0x20] ss:$4 sm:$0xff] %v6394_v26  ;;  %2981 = vmatpush.msra.mxu0 %v2544_v25  ;;  %v11030_v25 = vld [vmem:[#allocation325_spill] sm:$0xff] }
 0x3f4   : > { %1653 = vst [vmem:[#allocation1 + $0x21] ss:$4 sm:$0xff] %v6400_v43 }
 0x3f5   : > { %1654 = vst [vmem:[#allocation1 + $0x22] ss:$4 sm:$0xff] %v5607_v39  ;;  %2982 = vmatpush.msra.mxu0 %v2543_v15  ;;  %v11031_v15 = vld [vmem:[#allocation321_spill] sm:$0xff] }
 0x3f6   : > { %1655 = vst [vmem:[#allocation1 + $0x23] ss:$4 sm:$0xff] %v6367_v53 }
 0x3f7   : > { %2897 = vmatmul.f32.vlgmr.msra.gmra.mxu3 %v1636_v61  ;;  %v1646_v45 = vld.sshfl [vmem:[#allocation1] sm:$0xff pattern:$0x73625140]  ;;  %v11024_v61 = vld [vmem:[#allocation322_spill] sm:$0xff] }
 0x3f8   : > { %1648 = vst [vmem:[#allocation1] ss:$4 sm:$0xff] %v6341_v47 }
 0x3f9   : > { %1649 = vst [vmem:[#allocation1 + $0x1] ss:$4 sm:$0xff] %v5585_v30 }
 0x3fa   : > { %1650 = vst [vmem:[#allocation1 + $0x2] ss:$4 sm:$0xff] %v5654_v58 }
 0x3fb   : > { %1651 = vst [vmem:[#allocation1 + $0x3] ss:$4 sm:$0xff] %v6391_v32 }
 0x3fd   : > { %v1657_v36 = vld.sshfl [vmem:[#allocation1 + $0x20] sm:$0xff pattern:$0x73625140] }
 0x3fe   : > { %1662 = vst [vmem:[#allocation1 + $0x20] ss:$4 sm:$0xff] %v11015_v35 }
 0x3ff   : > { %2900 = vmatmul.f32.gmra.mxu3 %v1637_v1  ;;  %1663 = vst [vmem:[#allocation1 + $0x21] ss:$4 sm:$0xff] %v11016_v19  ;;  %v11020_v1 = vld [vmem:[#allocation66_spill] sm:$0xff] }
 0x400   : > { %1664 = vst [vmem:[#allocation1 + $0x22] ss:$4 sm:$0xff] %v11017_v9 }
 0x401   : > { %1665 = vst [vmem:[#allocation1 + $0x23] ss:$4 sm:$0xff] %v11018_v48 }
 0x402   : > { %v1656_v57 = vld.sshfl [vmem:[#allocation1] sm:$0xff pattern:$0x73625140] }
 0x403   : > { %1658 = vst [vmem:[#allocation1] ss:$4 sm:$0xff] %v6371_v28 }
 0x404   : > { %1659 = vst [vmem:[#allocation1 + $0x1] ss:$4 sm:$0xff] %v6375_v60 }
 0x405   : > { %1660 = vst [vmem:[#allocation1 + $0x2] ss:$4 sm:$0xff] %v5674_v2 }
 0x406   : > { %1661 = vst [vmem:[#allocation1 + $0x3] ss:$4 sm:$0xff] %v10818_v63 }
 0x407   : > { %2903 = vmatmul.f32.gmra.mxu3 %v1646_v45  ;;  %v11029_v45 = vld [vmem:[#allocation74_spill] sm:$0xff] }
 0x408   : > { %v1667_v41 = vld.sshfl [vmem:[#allocation1 + $0x20] sm:$0xff pattern:$0x73625140] }
 0x409   : > { %1672 = vst [vmem:[#allocation1 + $0x20] ss:$4 sm:$0xff] %v11020_v1 }
 0x40a   : > { %1673 = vst [vmem:[#allocation1 + $0x21] ss:$4 sm:$0xff] %v11021_v31 }
 0x40b   : > { %1674 = vst [vmem:[#allocation1 + $0x22] ss:$4 sm:$0xff] %v11022_v4 }
 0x40c   : > { %1675 = vst [vmem:[#allocation1 + $0x23] ss:$4 sm:$0xff] %v11023_v3 }
 0x40d   : > { %v1666_v27 = vld.sshfl [vmem:[#allocation1] sm:$0xff pattern:$0x73625140] }
 0x40e   : > { %1668 = vst [vmem:[#allocation1] ss:$4 sm:$0xff] %v10821_v54 }
 0x40f   : > { %2906 = vmatmul.f32.gmra.mxu3 %v1647_v11  ;;  %1669 = vst [vmem:[#allocation1 + $0x1] ss:$4 sm:$0xff] %v11013_v37  ;;  %v11074_v37 = vld [vmem:[#allocation353_spill] sm:$0xff] }
 0x410   : > { %1670 = vst [vmem:[#allocation1 + $0x2] ss:$4 sm:$0xff] %v10824_v44  ;;  %v11073_v44 = vld [vmem:[#allocation352_spill] sm:$0xff] }
 0x411   : > { %1671 = vst [vmem:[#allocation1 + $0x3] ss:$4 sm:$0xff] %v11014_v20  ;;  %v11072_v20 = vld [vmem:[#allocation351_spill] sm:$0xff] }
 0x413   : > { %v1677_v11 = vld.sshfl [vmem:[#allocation1 + $0x20] sm:$0xff pattern:$0x73625140] }
 0x414   : > { %1683 = vst [vmem:[#allocation1 + $0x21] ss:$4 sm:$0xff] %v11028_v51 }
 0x415   : > { %1682 = vst [vmem:[#allocation1 + $0x20] ss:$4 sm:$0xff] %v11029_v45  ;;  %v11038_v45 = vld [vmem:[#allocation90_spill] sm:$0xff] }
 0x416   : > { %1684 = vst [vmem:[#allocation1 + $0x22] ss:$4 sm:$0xff] %v11030_v25  ;;  %v11067_v25 = vld [vmem:[#allocation348_spill] sm:$0xff] }
 0x417   : > { %2909 = vmatmul.f32.gmra.mxu3 %v1656_v57  ;;  %1685 = vst [vmem:[#allocation1 + $0x23] ss:$4 sm:$0xff] %v11031_v15  ;;  %v11066_v15 = vld [vmem:[#allocation347_spill] sm:$0xff] }
 0x418   : > { %v1676_v16 = vld.sshfl [vmem:[#allocation1] sm:$0xff pattern:$0x73625140] }
 0x419   : > { %1678 = vst [vmem:[#allocation1] ss:$4 sm:$0xff] %v10837_v12 }
 0x41a   : > { %1679 = vst [vmem:[#allocation1 + $0x1] ss:$4 sm:$0xff] %v11019_v21 }
 0x41b   : > { %1680 = vst [vmem:[#allocation1 + $0x2] ss:$4 sm:$0xff] %v10840_v29  ;;  %v11039_v29 = vld [vmem:[#allocation326_spill] sm:$0xff] }
 0x41c   : > { %1681 = vst [vmem:[#allocation1 + $0x3] ss:$4 sm:$0xff] %v6514_v17  ;;  %v11037_v17 = vld [vmem:[#allocation62_spill] sm:$0xff] }
 0x41f   : > { %2912 = vmatmul.f32.gmra.mxu3 %v1657_v36  ;;  %v11032_v36 = vld [vmem:[#allocation327_spill] sm:$0xff] }
 0x423   : > { %v1686_v14 = vld.sshfl [vmem:[#allocation1] sm:$0xff pattern:$0x73625140] }
 0x424   : > { %1688 = vst [vmem:[#allocation1] ss:$4 sm:$0xff] %v11024_v61  ;;  %v11040_v61 = vld [vmem:[#allocation331_spill] sm:$0xff] }
 0x425   : > { %1689 = vst [vmem:[#allocation1 + $0x1] ss:$4 sm:$0xff] %v11025_v7  ;;  %v11034_v7 = vld [vmem:[#allocation71_spill] sm:$0xff] }
 0x426   : > { %1690 = vst [vmem:[#allocation1 + $0x2] ss:$4 sm:$0xff] %v11026_v56  ;;  %v11035_v56 = vld [vmem:[#allocation334_spill] sm:$0xff] }
 0x427   : > { %1691 = vst [vmem:[#allocation1 + $0x3] ss:$4 sm:$0xff] %v11027_v40  ;;  %2915 = vmatmul.f32.gmra.mxu3 %v1666_v27  ;;  %v1687_v40 = vld.sshfl [vmem:[#allocation1 + $0x20] sm:$0xff pattern:$0x73625140]  ;;  %v11036_v27 = vld [vmem:[#allocation330_spill] sm:$0xff] }
 0x428   : > { %1692 = vst [vmem:[#allocation1 + $0x20] ss:$4 sm:$0xff] %v11036_v27  ;;  %v11045_v27 = vld [vmem:[#allocation336_spill] sm:$0xff] }
 0x429   : > { %1693 = vst [vmem:[#allocation1 + $0x21] ss:$4 sm:$0xff] %v11037_v17  ;;  %v11046_v17 = vld [vmem:[#allocation98_spill] sm:$0xff] }
 0x42a   : > { %1694 = vst [vmem:[#allocation1 + $0x22] ss:$4 sm:$0xff] %v11038_v45  ;;  %v11047_v45 = vld [vmem:[#allocation78_spill] sm:$0xff] }
 0x42b   : > { %1695 = vst [vmem:[#allocation1 + $0x23] ss:$4 sm:$0xff] %v11039_v29 }
 0x42e   : > { %v1696_v57 = vld.sshfl [vmem:[#allocation1] sm:$0xff pattern:$0x73625140] }
 0x42f   : > { %1698 = vst [vmem:[#allocation1] ss:$4 sm:$0xff] %v11032_v36  ;;  %2918 = vmatmul.f32.gmra.mxu3 %v1667_v41  ;;  %v11041_v41 = vld [vmem:[#allocation332_spill] sm:$0xff]  ;;  %v11044_v36 = vld [vmem:[#allocation335_spill] sm:$0xff] }
 0x430   : > { %1699 = vst [vmem:[#allocation1 + $0x1] ss:$4 sm:$0xff] %v11033_v18  ;;  %v11042_v18 = vld [vmem:[#allocation333_spill] sm:$0xff] }
 0x431   : > { %1700 = vst [vmem:[#allocation1 + $0x2] ss:$4 sm:$0xff] %v11034_v7  ;;  %v11043_v7 = vld [vmem:[#allocation105_spill] sm:$0xff] }
 0x432   : > { %1701 = vst [vmem:[#allocation1 + $0x3] ss:$4 sm:$0xff] %v11035_v56  ;;  %v1697_v56 = vld.sshfl [vmem:[#allocation1 + $0x20] sm:$0xff pattern:$0x73625140] }
 0x433   : > { %1702 = vst [vmem:[#allocation1 + $0x20] ss:$4 sm:$0xff] %v11044_v36  ;;  %v11052_v36 = vld [vmem:[#allocation341_spill] sm:$0xff] }
 0x434   : > { %1703 = vst [vmem:[#allocation1 + $0x21] ss:$4 sm:$0xff] %v11045_v27  ;;  %v11065_v27 = vld [vmem:[#allocation346_spill] sm:$0xff] }
 0x435   : > { %1704 = vst [vmem:[#allocation1 + $0x22] ss:$4 sm:$0xff] %v11046_v17  ;;  %v11062_v17 = vld [vmem:[#allocation212_spill] sm:$0xff] }
 0x436   : > { %1705 = vst [vmem:[#allocation1 + $0x23] ss:$4 sm:$0xff] %v11047_v45  ;;  %v11055_v45 = vld [vmem:[#allocation205_spill] sm:$0xff] }
 0x437   : > { %2921 = vmatmul.f32.gmra.mxu3 %v1676_v16  ;;  %v7550_v16 = vpop.f32.mrf.mxu0 }
 0x438   : > { %11048 = vst [vmem:[#allocation25_spill] sm:$0xff] %v7550_v16  ;;  %v11054_v16 = vld [vmem:[#allocation86_spill] sm:$0xff] }
 0x439   : > { %v1706_v21 = vld.sshfl [vmem:[#allocation1] sm:$0xff pattern:$0x73625140] }
 0x43a   : > { %1708 = vst [vmem:[#allocation1] ss:$4 sm:$0xff] %v11040_v61 }
 0x43b   : > { %1709 = vst [vmem:[#allocation1 + $0x1] ss:$4 sm:$0xff] %v11041_v41  ;;  %v11049_v41 = vld [vmem:[#allocation337_spill] sm:$0xff] }
 0x43c   : > { %1710 = vst [vmem:[#allocation1 + $0x2] ss:$4 sm:$0xff] %v11042_v18  ;;  %v11050_v18 = vld [vmem:[#allocation339_spill] sm:$0xff] }
 0x43d   : > { %1711 = vst [vmem:[#allocation1 + $0x3] ss:$4 sm:$0xff] %v11043_v7  ;;  %v1707_v7 = vld.sshfl [vmem:[#allocation1 + $0x20] sm:$0xff pattern:$0x73625140] }
 0x43e   : > { %1712 = vst [vmem:[#allocation1 + $0x20] ss:$4 sm:$0xff] %v11050_v18 }
 0x43f   : > { %2924 = vmatmul.f32.gmra.mxu3 %v1677_v11  ;;  %v11051_v11 = vld [vmem:[#allocation340_spill] sm:$0xff]  ;;  %1714 = vst [vmem:[#allocation1 + $0x22] ss:$4 sm:$0xff] %v11052_v36  ;;  %v7561_v61 = vpop.f32.mrf.mxu0 }
 0x440   : > { %1713 = vst [vmem:[#allocation1 + $0x21] ss:$4 sm:$0xff] %v11051_v11  ;;  %v11059_v11 = vld [vmem:[#allocation345_spill] sm:$0xff] }
 0x441   : > { %11053 = vst [vmem:[#allocation26_spill] sm:$0xff] %v7561_v61 }
 0x442   : > { %1715 = vst [vmem:[#allocation1 + $0x23] ss:$4 sm:$0xff] %v11054_v16  ;;  %v11058_v16 = vld [vmem:[#allocation190_spill] sm:$0xff] }
 0x443   : > { %v7581_v36 = vrot.slane %v11058_v16, 6 }
 0x444   : > { %v7552_v29 = vld.sshfl [vmem:[#allocation1] sm:$0xff pattern:$0x73625140] }
 0x445   : > { %1718 = vst [vmem:[#allocation1] ss:$4 sm:$0xff] %v10906_v0  ;;  %v7565_v0 = vrot.slane %v11055_v45, 2 }
 0x446   : > { %1719 = vst [vmem:[#allocation1 + $0x1] ss:$4 sm:$0xff] %v11049_v41  ;;  %v7568_v41 = vrot.slane %v11055_v45, 4 }
 0x447   : > { %1720 = vst [vmem:[#allocation1 + $0x2] ss:$4 sm:$0xff] %v10902_v22  ;;  %2927 = vmatmul.f32.gmra.mxu3 %v1686_v14  ;;  %v7578_v22 = vpop.f32.mrf.mxu0 }
 0x448   : > { %1721 = vst [vmem:[#allocation1 + $0x3] ss:$4 sm:$0xff] %v10908_v42  ;;  %v11056_v42 = vld [vmem:[#allocation344_spill] sm:$0xff] }
 0x449   : > { %v1717_v61 = vld.sshfl [vmem:[#allocation1 + $0x20] sm:$0xff pattern:$0x73625140]  ;;  %11057 = vst [vmem:[#allocation12_spill] sm:$0xff] %v7578_v22  ;;  %v7595_v22 = vrot.slane %v11058_v16, 2 }
 0x44a   : > { %1722 = vst [vmem:[#allocation1 + $0x20] ss:$4 sm:$0xff] %v5787_v55  ;;  %v7598_v55 = vrot.slane %v11058_v16, 4 }
 0x44b   : > { %1723 = vst [vmem:[#allocation1 + $0x21] ss:$4 sm:$0xff] %v11056_v42  ;;  %v7592_v42 = vrot.slane %v11055_v45, 6 }
 0x44c   : > { %1724 = vst [vmem:[#allocation1 + $0x22] ss:$4 sm:$0xff] %v11059_v11 }
 0x44f   : > { %v7570_v14 = vld.sshfl [vmem:[#allocation1] sm:$0xff pattern:$0x73625140]  ;;  %2930 = vmatmul.f32.gmra.mxu3 %v1687_v40  ;;  %v11060_v40 = vld [vmem:[#allocation342_spill] sm:$0xff] }
 0x450   : > { %1728 = vst [vmem:[#allocation1] ss:$4 sm:$0xff] %v10914_v8  ;;  %v7585_v8 = vpop.f32.mrf.mxu3 }
 0x451   : > { %1729 = vst [vmem:[#allocation1 + $0x1] ss:$4 sm:$0xff] %v11055_v45 }
 0x452   : > { %1730 = vst [vmem:[#allocation1 + $0x2] ss:$4 sm:$0xff] %v7565_v0 }
 0x453   : > { %1731 = vst [vmem:[#allocation1 + $0x3] ss:$4 sm:$0xff] %v7568_v41 }
 0x454   : > { %1725 = vst [vmem:[#allocation1 + $0x23] ss:$4 sm:$0xff] %v11060_v40 }
 0x455   : > { %11061 = vst [vmem:[#allocation23_spill] sm:$0xff] %v7585_v8  ;;  %v7603_v8 = vpop.f32.mrf.mxu0 }
 0x456   : > { %11063 = vst [vmem:[#allocation10_spill] sm:$0xff] %v7603_v8 }
 0x457   : > { %2933 = vmatmul.f32.gmra.mxu3 %v1696_v57 }
 0x458   : > { %v7606_v40 = vpop.f32.mrf.mxu3 }
 0x459   : > { %11064 = vst [vmem:[#allocation11_spill] sm:$0xff] %v7606_v40  ;;  %v11070_v40 = vld [vmem:[#allocation350_spill] sm:$0xff] }
 0x45a   : > { %v7587_v18 = vld.sshfl [vmem:[#allocation1] sm:$0xff pattern:$0x73625140] }
 0x45b   : > { %1738 = vst [vmem:[#allocation1] ss:$4 sm:$0xff] %v7581_v36  ;;  %v7600_v57 = vld.sshfl [vmem:[#allocation1 + $0x20] sm:$0xff pattern:$0x73625140] }
 0x45c   : > { %1739 = vst [vmem:[#allocation1 + $0x1] ss:$4 sm:$0xff] %v11062_v17 }
 0x45d   : > { %1732 = vst [vmem:[#allocation1 + $0x20] ss:$4 sm:$0xff] %v7592_v42  ;;  %v7618_v51 = vpop.f32.mrf.mxu0 }
 0x45e   : > { %1733 = vst [vmem:[#allocation1 + $0x21] ss:$4 sm:$0xff] %v11058_v16 }
 0x45f   : > { %2936 = vmatmul.f32.gmra.mxu3 %v1697_v56  ;;  %1734 = vst [vmem:[#allocation1 + $0x22] ss:$4 sm:$0xff] %v7595_v22  ;;  %v11068_v56 = vld [vmem:[#allocation349_spill] sm:$0xff] }
 0x460   : > { %1735 = vst [vmem:[#allocation1 + $0x23] ss:$4 sm:$0xff] %v7598_v55  ;;  %v7621_v1 = vpop.f32.mrf.mxu3 }
 0x461   : > { %11069 = vst [vmem:[#allocation13_spill] sm:$0xff] %v7618_v51 }
 0x462   : > { %11071 = vst [vmem:[#allocation14_spill] sm:$0xff] %v7621_v1 }
 0x463   : > { %v7609_v11 = vld.sshfl [vmem:[#allocation1] sm:$0xff pattern:$0x73625140] }
 0x464   : > { %1764 = vst [vmem:[#allocation1] ss:$4 sm:$0xff] %v11065_v27 }
 0x465   : > { %1766 = vst [vmem:[#allocation1 + $0x1] ss:$4 sm:$0xff] %v11066_v15  ;;  %v11077_v15 = vld [vmem:[#allocation356_spill] sm:$0xff] }
 0x466   : > { %1768 = vst [vmem:[#allocation1 + $0x2] ss:$4 sm:$0xff] %v11067_v25  ;;  %v11075_v25 = vld [vmem:[#allocation354_spill] sm:$0xff] }
 0x467   : > { %1770 = vst [vmem:[#allocation1 + $0x3] ss:$4 sm:$0xff] %v11068_v56  ;;  %2939 = vmatmul.f32.gmra.mxu3 %v1706_v21  ;;  %v7616_v8 = vld.sshfl [vmem:[#allocation1 + $0x20] sm:$0xff pattern:$0x73625140]  ;;  %v11076_v21 = vld [vmem:[#allocation355_spill] sm:$0xff] }
 0x468   : > { %1772 = vst [vmem:[#allocation1 + $0x20] ss:$4 sm:$0xff] %v11070_v40  ;;  %v11078_v56 = vld [vmem:[#allocation357_spill] sm:$0xff]  ;;  %v7630_v40 = vpop.f32.mrf.mxu0  ;;  %v7632_v51 = vpop.f32.mrf.mxu3 }
 0x469   : > { %1774 = vst [vmem:[#allocation1 + $0x21] ss:$4 sm:$0xff] %v11072_v20  ;;  %v11081_v20 = vld [vmem:[#allocation358_spill] sm:$0xff] }
 0x46a   : > { %1776 = vst [vmem:[#allocation1 + $0x22] ss:$4 sm:$0xff] %v11073_v44  ;;  %v11082_v44 = vld [vmem:[#allocation359_spill] sm:$0xff] }
 0x46b   : > { %1778 = vst [vmem:[#allocation1 + $0x23] ss:$4 sm:$0xff] %v11074_v37  ;;  %v11083_v37 = vld [vmem:[#allocation360_spill] sm:$0xff] }
 0x46c   : > { %11079 = vst [vmem:[#allocation29_spill] sm:$0xff] %v7630_v40  ;;  %v11087_v40 = vld [vmem:[#allocation364_spill] sm:$0xff] }
 0x46d   : > { %11080 = vst [vmem:[#allocation30_spill] sm:$0xff] %v7632_v51 }
 0x46e   : > { %v1779_v27 = vld.sshfl [vmem:[#allocation1] sm:$0xff pattern:$0x73625140] }
 0x46f   : > { %2983 = vmatmul.f32.vlgmr.msra.gmra.mxu0 %v1779_v27  ;;  %1781 = vst [vmem:[#allocation1] ss:$4 sm:$0xff] %v11075_v25  ;;  %2942 = vmatmul.f32.gmra.mxu3 %v1707_v7  ;;  %v11084_v7 = vld [vmem:[#allocation361_spill] sm:$0xff]  ;;  %v11085_v25 = vld [vmem:[#allocation362_spill] sm:$0xff] }
 0x470   : > { %1782 = vst [vmem:[#allocation1 + $0x1] ss:$4 sm:$0xff] %v11076_v21  ;;  %v7643_v51 = vpop.f32.mrf.mxu0  ;;  %v11092_v21 = vld [vmem:[#allocation367_spill] sm:$0xff] }
 0x471   : > { %1783 = vst [vmem:[#allocation1 + $0x2] ss:$4 sm:$0xff] %v11077_v15  ;;  %v11088_v15 = vld [vmem:[#allocation365_spill] sm:$0xff] }
 0x472   : > { %1784 = vst [vmem:[#allocation1 + $0x3] ss:$4 sm:$0xff] %v11078_v56  ;;  %v1780_v1 = vld.sshfl [vmem:[#allocation1 + $0x20] sm:$0xff pattern:$0x73625140]  ;;  %v11086_v56 = vld [vmem:[#allocation363_spill] sm:$0xff] }
 0x473   : > { %1785 = vst [vmem:[#allocation1 + $0x20] ss:$4 sm:$0xff] %v11081_v20  ;;  %v11091_v20 = vld [vmem:[#allocation366_spill] sm:$0xff] }
 0x474   : > { %1786 = vst [vmem:[#allocation1 + $0x21] ss:$4 sm:$0xff] %v11082_v44 }
 0x475   : > { %1787 = vst [vmem:[#allocation1 + $0x22] ss:$4 sm:$0xff] %v11083_v37  ;;  %v11095_v37 = vld [vmem:[#allocation370_spill] sm:$0xff] }
 0x476   : > { %1788 = vst [vmem:[#allocation1 + $0x23] ss:$4 sm:$0xff] %v11084_v7  ;;  %v11093_v7 = vld [vmem:[#allocation368_spill] sm:$0xff] }
 0x477   : > { %2986 = vmatmul.f32.gmra.mxu0 %v1780_v1  ;;  %2945 = vmatmul.f32.gmra.mxu3 %v7552_v29  ;;  %11089 = vst [vmem:[#allocation31_spill] sm:$0xff] %v7643_v51  ;;  %v7645_v1 = vpop.f32.mrf.mxu3  ;;  %v11097_v51 = vld [vmem:[#allocation32_spill] sm:$0xff] }
 0x478   : > { %11090 = vst [vmem:[#allocation16_spill] sm:$0xff] %v7645_v1 }
 0x479   : > { %v1789_v27 = vld.sshfl [vmem:[#allocation1] sm:$0xff pattern:$0x73625140] }
 0x47a   : > { %1791 = vst [vmem:[#allocation1] ss:$4 sm:$0xff] %v11085_v25  ;;  %v11094_v25 = vld [vmem:[#allocation369_spill] sm:$0xff] }
 0x47b   : > { %1792 = vst [vmem:[#allocation1 + $0x1] ss:$4 sm:$0xff] %v11086_v56 }
 0x47c   : > { %1793 = vst [vmem:[#allocation1 + $0x2] ss:$4 sm:$0xff] %v11087_v40  ;;  %v11096_v40 = vld [vmem:[#allocation371_spill] sm:$0xff] }
 0x47d   : > { %1794 = vst [vmem:[#allocation1 + $0x3] ss:$4 sm:$0xff] %v11088_v15  ;;  %v1790_v29 = vld.sshfl [vmem:[#allocation1 + $0x20] sm:$0xff pattern:$0x73625140] }
 0x47e   : > { %1795 = vst [vmem:[#allocation1 + $0x20] ss:$4 sm:$0xff] %v11091_v20  ;;  %v11101_v15 = vld [vmem:[#allocation373_spill] sm:$0xff] }
 0x47f   : > { %2989 = vmatmul.f32.gmra.mxu0 %v1789_v27  ;;  %2948 = vmatmul.f32.gmra.mxu3 %v1717_v61  ;;  %1796 = vst [vmem:[#allocation1 + $0x21] ss:$4 sm:$0xff] %v11092_v21  ;;  %v11098_v61 = vld [vmem:[#allocation372_spill] sm:$0xff]  ;;  %v7656_v27 = vpop.f32.mrf.mxu0  ;;  %v7658_v1 = vpop.f32.mrf.mxu3 }
 0x480   : > { %1797 = vst [vmem:[#allocation1 + $0x22] ss:$4 sm:$0xff] %v11093_v7  ;;  %v11103_v7 = vld [vmem:[#allocation375_spill] sm:$0xff] }
 0x481   : > { %1798 = vst [vmem:[#allocation1 + $0x23] ss:$4 sm:$0xff] %v11094_v25  ;;  %v11102_v25 = vld [vmem:[#allocation374_spill] sm:$0xff] }
 0x482   : > { %11099 = vst [vmem:[#allocation15_spill] sm:$0xff] %v7656_v27  ;;  %v11105_v27 = vld [vmem:[#allocation377_spill] sm:$0xff] }
 0x483   : > { %11100 = vst [vmem:[#allocation17_spill] sm:$0xff] %v7658_v1  ;;  %v2573_v1 = vld [vmem:[%s10086_s1 + $0x2f0] sm:$0xff] }
 0x484   : > { %v1799_v56 = vld.sshfl [vmem:[#allocation1] sm:$0xff pattern:$0x73625140] }
 0x485   : > { %1801 = vst [vmem:[#allocation1] ss:$4 sm:$0xff] %v11095_v37 }
 0x486   : > { %1802 = vst [vmem:[#allocation1 + $0x1] ss:$4 sm:$0xff] %v11096_v40  ;;  %v11104_v40 = vld [vmem:[#allocation376_spill] sm:$0xff] }
 0x487   : > { %2992 = vmatmul.f32.gmra.mxu0 %v1790_v29  ;;  %1803 = vst [vmem:[#allocation1 + $0x2] ss:$4 sm:$0xff] %v11097_v51  ;;  %2951 = vmatmul.f32.gmra.mxu3 %v7570_v14  ;;  %v2574_v14 = vld [vmem:[%s10086_s1 + $0x2f8] sm:$0xff]  ;;  %v7677_v51 = vpop.f32.mrf.mxu0 }
 0x488   : > { %1804 = vst [vmem:[#allocation1 + $0x3] ss:$4 sm:$0xff] %v11098_v61  ;;  %v1800_v20 = vld.sshfl [vmem:[#allocation1 + $0x20] sm:$0xff pattern:$0x73625140]  ;;  %3053 = vmatpush.msrb.mxu1 %v2574_v14  ;;  %v11107_v61 = vld [vmem:[#allocation379_spill] sm:$0xff] }
 0x489   : > { %1805 = vst [vmem:[#allocation1 + $0x20] ss:$4 sm:$0xff] %v11101_v15  ;;  %v11106_v15 = vld [vmem:[#allocation378_spill] sm:$0xff]  ;;  %v2571_v14 = vld [vmem:[%s10086_s1 + $0x2e0] sm:$0xff] }
 0x48a   : > { %1806 = vst [vmem:[#allocation1 + $0x21] ss:$4 sm:$0xff] %v11102_v25  ;;  %3054 = vmatpush.msrb.mxu1 %v2573_v1  ;;  %v2570_v1 = vld [vmem:[%s10086_s1 + $0x2d8] sm:$0xff] }
 0x48b   : > { %1807 = vst [vmem:[#allocation1 + $0x22] ss:$4 sm:$0xff] %v11103_v7  ;;  %v11120_v7 = vld [vmem:[#allocation387_spill] sm:$0xff] }
 0x48c   : > { %1808 = vst [vmem:[#allocation1 + $0x23] ss:$4 sm:$0xff] %v11104_v40  ;;  %v11109_v40 = vld [vmem:[#allocation47_spill] sm:$0xff] }
 0x48d   : > { %11108 = vst [vmem:[#allocation18_spill] sm:$0xff] %v7677_v51  ;;  %v2569_v51 = vld [vmem:[%s10086_s1 + $0x2d0] sm:$0xff] }
 0x48f   : > { %2995 = vmatmul.f32.gmra.mxu0 %v1799_v56  ;;  %v1809_v29 = vld.sshfl [vmem:[#allocation1] sm:$0xff pattern:$0x73625140]  ;;  %2954 = vmatmul.f32.gmra.mxu3 %v7600_v57  ;;  %v2572_v56 = vld [vmem:[%s10086_s1 + $0x2e8] sm:$0xff]  ;;  %v7680_v57 = vpop.f32.mrf.mxu3 }
 0x490   : > { %1811 = vst [vmem:[#allocation1] ss:$4 sm:$0xff] %v11105_v27  ;;  %3055 = vmatpush.msrb.mxu1 %v2572_v56  ;;  %v11114_v56 = vld [vmem:[#allocation383_spill] sm:$0xff] }
 0x491   : > { %1812 = vst [vmem:[#allocation1 + $0x1] ss:$4 sm:$0xff] %v11106_v15  ;;  %v11111_v15 = vld [vmem:[#allocation380_spill] sm:$0xff] }
 0x492   : > { %1813 = vst [vmem:[#allocation1 + $0x2] ss:$4 sm:$0xff] %v11107_v61  ;;  %3056 = vmatpush.msrb.mxu1 %v2571_v14  ;;  %v2567_v61 = vld [vmem:[%s10086_s1 + $0x2c0] sm:$0xff] }
 0x493   : > { %1814 = vst [vmem:[#allocation1 + $0x3] ss:$4 sm:$0xff] %v11109_v40  ;;  %v1810_v27 = vld.sshfl [vmem:[#allocation1 + $0x20] sm:$0xff pattern:$0x73625140]  ;;  %v11113_v40 = vld [vmem:[#allocation382_spill] sm:$0xff] }
 0x494   : > { %11110 = vst [vmem:[#allocation38_spill] sm:$0xff] %v7680_v57  ;;  %v11112_v57 = vld [vmem:[#allocation381_spill] sm:$0xff]  ;;  %3057 = vmatpush.msrb.mxu1 %v2570_v1  ;;  %v7704_v1 = vpop.f32.mrf.mxu0 }
 0x495   : > { %1815 = vst [vmem:[#allocation1 + $0x20] ss:$4 sm:$0xff] %v11111_v15  ;;  %v11115_v15 = vld [vmem:[#allocation384_spill] sm:$0xff] }
 0x496   : > { %1816 = vst [vmem:[#allocation1 + $0x21] ss:$4 sm:$0xff] %v11112_v57  ;;  %3058 = vmatpush.msrb.mxu1 %v2569_v51  ;;  %v2566_v51 = vld [vmem:[%s10086_s1 + $0x2b8] sm:$0xff] }
 0x497   : > { %2998 = vmatmul.f32.gmra.mxu0 %v1800_v20  ;;  %2957 = vmatmul.f32.gmra.mxu3 %v7587_v18  ;;  %1817 = vst [vmem:[#allocation1 + $0x22] ss:$4 sm:$0xff] %v11113_v40  ;;  %v2568_v20 = vld [vmem:[%s10086_s1 + $0x2c8] sm:$0xff]  ;;  %v11116_v18 = vld [vmem:[#allocation385_spill] sm:$0xff]  ;;  %v7707_v57 = vpop.f32.mrf.mxu3 }
 0x498   : > { %1818 = vst [vmem:[#allocation1 + $0x23] ss:$4 sm:$0xff] %v11114_v56  ;;  %3059 = vmatpush.msrb.mxu1 %v2568_v20  ;;  %v11118_v40 = vld [vmem:[#allocation386_spill] sm:$0xff] }
 0x499   : > { %11117 = vst [vmem:[#allocation37_spill] sm:$0xff] %v7704_v1  ;;  %v11121_v1 = vld [vmem:[#allocation388_spill] sm:$0xff]  ;;  %v11138_v56 = vld [vmem:[#allocation402_spill] sm:$0xff] }
 0x49a   : > { %v1819_v14 = vld.sshfl [vmem:[#allocation1] sm:$0xff pattern:$0x73625140]  ;;  %11119 = vst [vmem:[#allocation20_spill] sm:$0xff] %v7707_v57  ;;  %3060 = vmatpush.msrb.mxu1 %v2567_v61  ;;  %v2564_v57 = vld [vmem:[%s10086_s1 + $0x2a8] sm:$0xff] }
 0x49b   : > { %1821 = vst [vmem:[#allocation1] ss:$4 sm:$0xff] %v11115_v15  ;;  %v2565_v15 = vld [vmem:[%s10086_s1 + $0x2b0] sm:$0xff]  ;;  %v11122_v61 = vld [vmem:[#allocation389_spill] sm:$0xff] }
 0x49c   : > { %1822 = vst [vmem:[#allocation1 + $0x1] ss:$4 sm:$0xff] %v11116_v18  ;;  %3061 = vmatpush.msrb.mxu1 %v2566_v51  ;;  %v11125_v51 = vld [vmem:[#allocation392_spill] sm:$0xff]  ;;  %v7728_v18 = vpop.f32.mrf.mxu0 }
 0x49d   : > { %1823 = vst [vmem:[#allocation1 + $0x2] ss:$4 sm:$0xff] %v11118_v40  ;;  %v11124_v40 = vld [vmem:[#allocation391_spill] sm:$0xff] }
 0x49e   : > { %1824 = vst [vmem:[#allocation1 + $0x3] ss:$4 sm:$0xff] %v11120_v7  ;;  %3062 = vmatpush.msrb.mxu1 %v2565_v15  ;;  %v11123_v7 = vld [vmem:[#allocation390_spill] sm:$0xff]  ;;  %v11128_v15 = vld [vmem:[#allocation393_spill] sm:$0xff] }
 0x49f   : > { %3001 = vmatmul.f32.gmra.mxu0 %v1809_v29  ;;  %2960 = vmatmul.f32.gmra.mxu3 %v7616_v8  ;;  %v1820_v20 = vld.sshfl [vmem:[#allocation1 + $0x20] sm:$0xff pattern:$0x73625140]  ;;  %11126 = vst [vmem:[#allocation21_spill] sm:$0xff] %v7728_v18 }
 0x4a0   : > { %1825 = vst [vmem:[#allocation1 + $0x20] ss:$4 sm:$0xff] %v11121_v1  ;;  %v2563_v29 = vld [vmem:[%s10086_s1 + $0x2a0] sm:$0xff]  ;;  %3063 = vmatpush.msrb.mxu1 %v2564_v57  ;;  %v7730_v1 = vpop.f32.mrf.mxu3  ;;  %v2561_v57 = vld [vmem:[%s10086_s1 + $0x290] sm:$0xff] }
 0x4a1   : > { %1826 = vst [vmem:[#allocation1 + $0x21] ss:$4 sm:$0xff] %v11122_v61  ;;  %v2562_v61 = vld [vmem:[%s10086_s1 + $0x298] sm:$0xff] }
 0x4a2   : > { %1827 = vst [vmem:[#allocation1 + $0x22] ss:$4 sm:$0xff] %v11123_v7  ;;  %3064 = vmatpush.msrb.mxu1 %v2563_v29  ;;  %v11130_v29 = vld [vmem:[#allocation395_spill] sm:$0xff]  ;;  %v11137_v7 = vld [vmem:[#allocation401_spill] sm:$0xff] }
 0x4a3   : > { %1828 = vst [vmem:[#allocation1 + $0x23] ss:$4 sm:$0xff] %v11124_v40  ;;  %v11129_v40 = vld [vmem:[#allocation394_spill] sm:$0xff] }
 0x4a4   : > { %11127 = vst [vmem:[#allocation22_spill] sm:$0xff] %v7730_v1  ;;  %3065 = vmatpush.msrb.mxu1 %v2562_v61  ;;  %v2559_v1 = vld [vmem:[%s10086_s1 + $0x280] sm:$0xff]  ;;  %v11134_v61 = vld [vmem:[#allocation399_spill] sm:$0xff] }
 0x4a5   : > { %v1829_v8 = vld.sshfl [vmem:[#allocation1] sm:$0xff pattern:$0x73625140] }
 0x4a6   : > { %1831 = vst [vmem:[#allocation1] ss:$4 sm:$0xff] %v11125_v51  ;;  %3066 = vmatpush.msrb.mxu1 %v2561_v57  ;;  %v11132_v51 = vld [vmem:[#allocation397_spill] sm:$0xff]  ;;  %v11136_v57 = vld [vmem:[#allocation400_spill] sm:$0xff] }
 0x4a7   : > { %3004 = vmatmul.f32.gmra.mxu0 %v1810_v27  ;;  %1832 = vst [vmem:[#allocation1 + $0x1] ss:$4 sm:$0xff] %v11128_v15  ;;  %2963 = vmatmul.f32.gmra.mxu3 %v7609_v11  ;;  %v2560_v27 = vld [vmem:[%s10086_s1 + $0x288] sm:$0xff]  ;;  %v11131_v15 = vld [vmem:[#allocation396_spill] sm:$0xff] }
 0x4a8   : > { %1833 = vst [vmem:[#allocation1 + $0x2] ss:$4 sm:$0xff] %v11129_v40  ;;  %3067 = vmatpush.msrb.mxu1 %v2560_v27  ;;  %v11133_v11 = vld [vmem:[#allocation398_spill] sm:$0xff]  ;;  %v7752_v40 = vpop.f32.mrf.mxu0  ;;  %v11139_v27 = vld [vmem:[#allocation403_spill] sm:$0xff] }
 0x4a9   : > { %1834 = vst [vmem:[#allocation1 + $0x3] ss:$4 sm:$0xff] %v11130_v29 }
 0x4aa   : > { %v1830_v18 = vld.sshfl [vmem:[#allocation1 + $0x20] sm:$0xff pattern:$0x73625140]  ;;  %3068 = vmatpush.msrb.mxu1 %v2559_v1  ;;  %11135 = vst [vmem:[#allocation43_spill] sm:$0xff] %v7752_v40  ;;  %v11142_v1 = vld [vmem:[#allocation406_spill] sm:$0xff]  ;;  %v11144_v40 = vld [vmem:[#allocation407_spill] sm:$0xff] }
 0x4ab   : > { %1835 = vst [vmem:[#allocation1 + $0x20] ss:$4 sm:$0xff] %v11131_v15 }
 0x4ac   : > { %1836 = vst [vmem:[#allocation1 + $0x21] ss:$4 sm:$0xff] %v11132_v51  ;;  %v11140_v51 = vld [vmem:[#allocation404_spill] sm:$0xff] }
 0x4ad   : > { %1837 = vst [vmem:[#allocation1 + $0x22] ss:$4 sm:$0xff] %v11133_v11 }
 0x4ae   : > { %1838 = vst [vmem:[#allocation1 + $0x23] ss:$4 sm:$0xff] %v11134_v61 }
 0x4af   : > { %3007 = vmatmul.f32.gmra.mxu0 %v1819_v14  ;;  %v11141_v14 = vld [vmem:[#allocation405_spill] sm:$0xff] }
 0x4b0   : > { %v1839_v29 = vld.sshfl [vmem:[#allocation1] sm:$0xff pattern:$0x73625140]  ;;  %v7761_v61 = vpop.f32.mrf.mxu0 }
 0x4b1   : > { %1841 = vst [vmem:[#allocation1] ss:$4 sm:$0xff] %v11136_v57  ;;  %v11145_v57 = vld [vmem:[#allocation408_spill] sm:$0xff] }
 0x4b2   : > { %1842 = vst [vmem:[#allocation1 + $0x1] ss:$4 sm:$0xff] %v11137_v7  ;;  %v11146_v7 = vld [vmem:[#allocation409_spill] sm:$0xff] }
 0x4b3   : > { %1843 = vst [vmem:[#allocation1 + $0x2] ss:$4 sm:$0xff] %v11138_v56  ;;  %v11147_v56 = vld [vmem:[#allocation410_spill] sm:$0xff] }
 0x4b4   : > { %1844 = vst [vmem:[#allocation1 + $0x3] ss:$4 sm:$0xff] %v11139_v27  ;;  %v11149_v27 = vld [vmem:[#allocation413_spill] sm:$0xff] }
 0x4b5   : > { %v1840_v15 = vld.sshfl [vmem:[#allocation1 + $0x20] sm:$0xff pattern:$0x73625140]  ;;  %11143 = vst [vmem:[#allocation44_spill] sm:$0xff] %v7761_v61 }
 0x4b6   : > { %1845 = vst [vmem:[#allocation1 + $0x20] ss:$4 sm:$0xff] %v11140_v51 }
 0x4b7   : > { %3010 = vmatmul.f32.gmra.mxu0 %v1820_v20  ;;  %1846 = vst [vmem:[#allocation1 + $0x21] ss:$4 sm:$0xff] %v11141_v14  ;;  %v11148_v20 = vld [vmem:[#allocation411_spill] sm:$0xff]  ;;  %v11152_v14 = vld [vmem:[#allocation414_spill] sm:$0xff] }
 0x4b8   : > { %1847 = vst [vmem:[#allocation1 + $0x22] ss:$4 sm:$0xff] %v11142_v1  ;;  %v11150_v1 = vld [vmem:[#allocation412_spill] sm:$0xff]  ;;  %v7774_v61 = vpop.f32.mrf.mxu0 }
 0x4b9   : > { %1848 = vst [vmem:[#allocation1 + $0x23] ss:$4 sm:$0xff] %v11144_v40 }
 0x4ba   : > { %11151 = vst [vmem:[#allocation45_spill] sm:$0xff] %v7774_v61  ;;  %v5018_v61 = vrot.slane %v11055_v45, 9 }
 0x4bb   : > { %v7763_v11 = vld.sshfl [vmem:[#allocation1] sm:$0xff pattern:$0x73625140] }
 0x4bc   : > { %1851 = vst [vmem:[#allocation1] ss:$4 sm:$0xff] %v11145_v57  ;;  %v11153_v57 = vld [vmem:[#allocation415_spill] sm:$0xff] }
 0x4bd   : > { %1852 = vst [vmem:[#allocation1 + $0x1] ss:$4 sm:$0xff] %v11146_v7  ;;  %v11154_v7 = vld [vmem:[#allocation416_spill] sm:$0xff] }
 0x4be   : > { %1853 = vst [vmem:[#allocation1 + $0x2] ss:$4 sm:$0xff] %v11147_v56 }
 0x4bf   : > { %3013 = vmatmul.f32.gmra.mxu0 %v1829_v8  ;;  %1854 = vst [vmem:[#allocation1 + $0x3] ss:$4 sm:$0xff] %v11148_v20  ;;  %v874_v8 = vrot.slane %v7565_v0, 7  ;;  %v11155_v20 = vld [vmem:[#allocation418_spill] sm:$0xff] }
 0x4c0   : > { %v7770_v51 = vld.sshfl [vmem:[#allocation1 + $0x20] sm:$0xff pattern:$0x73625140] }
 0x4c1   : > { %1856 = vst [vmem:[#allocation1 + $0x21] ss:$4 sm:$0xff] %v11149_v27  ;;  %v877_v27 = vrot.slane %v7568_v41, 7 }
 0x4c2   : > { %1855 = vst [vmem:[#allocation1 + $0x20] ss:$4 sm:$0xff] %v11150_v1 }
 0x4c3   : > { %1857 = vst [vmem:[#allocation1 + $0x22] ss:$4 sm:$0xff] %v11152_v14  ;;  %v876_v14 = vrot.slane %v874_v8, 2  ;;  %v879_v56 = vrot.slane %v877_v27, 2 }
 0x4c4   : > { %1858 = vst [vmem:[#allocation1 + $0x23] ss:$4 sm:$0xff] %v11153_v57 }
 0x4c5   : > { %v7803_v57 = vsel %vm6516_vm6, %v876_v14, %v877_v27 }
 0x4c6   : > { %v7777_v40 = vld.sshfl [vmem:[#allocation1] sm:$0xff pattern:$0x73625140]  ;;  %11158 = vst [vmem:[#allocation28_spill] sm:$0xff] %v7803_v57 }
 0x4c7   : > { %3016 = vmatmul.f32.gmra.mxu0 %v1830_v18  ;;  %1861 = vst [vmem:[#allocation1] ss:$4 sm:$0xff] %v11154_v7  ;;  %v880_v18 = vrot.slane %v7592_v42, 7  ;;  %v7791_v7 = vpop.f32.mrf.mxu0 }
 0x4c8   : > { %1862 = vst [vmem:[#allocation1 + $0x1] ss:$4 sm:$0xff] %v7204_v10  ;;  %v883_v10 = vrot.slane %v11058_v16, 7 }
 0x4c9   : > { %1863 = vst [vmem:[#allocation1 + $0x2] ss:$4 sm:$0xff] %v11155_v20  ;;  %v886_v20 = vrot.slane %v7595_v22, 7 }
 0x4ca   : > { %1864 = vst [vmem:[#allocation1 + $0x3] ss:$4 sm:$0xff] %v7222_v34  ;;  %v7797_v34 = vsel %vm6516_vm6, %v5018_v61, %v874_v8  ;;  %v892_v61 = vrot.slane %v7581_v36, 7  ;;  %v882_v8 = vrot.slane %v880_v18, 2  ;;  %v885_v27 = vrot.slane %v883_v10, 2 }
 0x4cb   : > { %v7787_v1 = vld.sshfl [vmem:[#allocation1 + $0x20] sm:$0xff pattern:$0x73625140]  ;;  %11156 = vst [vmem:[#allocation46_spill] sm:$0xff] %v7791_v7  ;;  %v7811_v7 = vsel %vm6516_vm6, %v879_v56, %v880_v18  ;;  %v888_v14 = vrot.slane %v886_v20, 2 }
 0x4cc   : > { %1865 = vst [vmem:[#allocation1 + $0x20] ss:$4 sm:$0xff] %v7226_v46  ;;  %v7821_v56 = vsel %vm6516_vm6, %v882_v8, %v883_v10  ;;  %v7826_v18 = vsel %vm6516_vm6, %v885_v27, %v886_v20  ;;  %v11166_v8 = vld [vmem:[#allocation111_spill] sm:$0xff]  ;;  %v11167_v27 = vld [vmem:[#allocation132_spill] sm:$0xff] }
 0x4cd   : > { %1866 = vst [vmem:[#allocation1 + $0x21] ss:$4 sm:$0xff] %v7232_v38  ;;  %v894_v38 = vrot.slane %v892_v61, 2 }
 0x4ce   : > { %11157 = vst [vmem:[#allocation27_spill] sm:$0xff] %v7797_v34 }
 0x4cf   : > { %3019 = vmatmul.f32.gmra.mxu0 %v1839_v29  ;;  %1867 = vst [vmem:[#allocation1 + $0x22] ss:$4 sm:$0xff] %v7236_v49  ;;  %v889_v29 = vrot.slane %v7598_v55, 7  ;;  %v895_v49 = vrot.slane %v11062_v17, 7 }
 0x4d0   : > { %1868 = vst [vmem:[#allocation1 + $0x23] ss:$4 sm:$0xff] %v7242_v13 }
 0x4d1   : > { %v7805_v46 = vld.sshfl [vmem:[#allocation1] sm:$0xff pattern:$0x73625140]  ;;  %11159 = vst [vmem:[#allocation51_spill] sm:$0xff] %v7811_v7  ;;  %v891_v13 = vrot.slane %v889_v29, 2  ;;  %v897_v25 = vrot.slane %v895_v49, 2  ;;  %v7841_v10 = vsel %vm6516_vm6, %v894_v38, %v895_v49 }
 0x4d2   : > { %1871 = vst [vmem:[#allocation1] ss:$4 sm:$0xff] %v7247_v6  ;;  %v5019_v6 = vrot.slane %v11062_v17, 9  ;;  %v11162_v38 = vld [vmem:[#allocation133_spill] sm:$0xff] }
 0x4d3   : > { %1872 = vst [vmem:[#allocation1 + $0x1] ss:$4 sm:$0xff] %v7797_v34  ;;  %v7836_v37 = vsel %vm6516_vm6, %v891_v13, %v892_v61  ;;  %v11165_v61 = vld [vmem:[#allocation110_spill] sm:$0xff] }
 0x4d4   : > { %1873 = vst [vmem:[#allocation1 + $0x2] ss:$4 sm:$0xff] %v7803_v57  ;;  %v7830_v57 = vsel %vm6516_vm6, %v888_v14, %v889_v29  ;;  %v11169_v14 = vld [vmem:[#allocation117_spill] sm:$0xff] }
 0x4d5   : > { %1874 = vst [vmem:[#allocation1 + $0x3] ss:$4 sm:$0xff] %v7811_v7  ;;  %v7832_v7 = vpop.f32.mrf.mxu0 }
 0x4d6   : > { %11160 = vst [vmem:[#allocation52_spill] sm:$0xff] %v7832_v7  ;;  %v11224_v7 = vld [vmem:[#allocation165_spill] sm:$0xff] }
 0x4d7   : > { %3022 = vmatmul.f32.gmra.mxu0 %v1840_v15  ;;  %v1870_v34 = vld.sshfl [vmem:[#allocation1 + $0x20] sm:$0xff pattern:$0x73625140]  ;;  %v7846_v15 = vsel %vm6516_vm6, %v897_v25, %v5019_v6  ;;  %v11163_v6 = vld [vmem:[#allocation134_spill] sm:$0xff] }
 0x4d8   : > { %1875 = vst [vmem:[#allocation1 + $0x20] ss:$4 sm:$0xff] %v7821_v56  ;;  %v11164_v25 = vld [vmem:[#allocation109_spill] sm:$0xff] }
 0x4d9   : > { %1876 = vst [vmem:[#allocation1 + $0x21] ss:$4 sm:$0xff] %v7826_v18 }
 0x4da   : > { %1877 = vst [vmem:[#allocation1 + $0x22] ss:$4 sm:$0xff] %v7830_v57 }
 0x4db   : > { %1878 = vst [vmem:[#allocation1 + $0x23] ss:$4 sm:$0xff] %v7836_v37 }
 0x4dc   : > { %v1879_v20 = vld.sshfl [vmem:[#allocation1] sm:$0xff pattern:$0x73625140] }
 0x4dd   : > { %1881 = vst [vmem:[#allocation1] ss:$4 sm:$0xff] %v7841_v10  ;;  %v7853_v13 = vpop.f32.mrf.mxu0 }
 0x4de   : > { %1882 = vst [vmem:[#allocation1 + $0x1] ss:$4 sm:$0xff] %v7846_v15 }
 0x4df   : > { %3025 = vmatmul.f32.gmra.mxu0 %v7763_v11  ;;  %11161 = vst [vmem:[#allocation53_spill] sm:$0xff] %v7853_v13  ;;  %v11168_v11 = vld [vmem:[#allocation135_spill] sm:$0xff] }
 0x4e2   : > { %v7855_v49 = vld.sshfl [vmem:[#allocation1 + $0x20] sm:$0xff pattern:$0x73625140] }
 0x4e3   : > { %1915 = vst [vmem:[#allocation1 + $0x20] ss:$4 sm:$0xff] %v11162_v38 }
 0x4e4   : > { %1917 = vst [vmem:[#allocation1 + $0x21] ss:$4 sm:$0xff] %v11163_v6  ;;  %v11171_v6 = vld [vmem:[#allocation118_spill] sm:$0xff] }
 0x4e5   : > { %v7858_v29 = vld.sshfl [vmem:[#allocation1] sm:$0xff pattern:$0x73625140]  ;;  %1919 = vst [vmem:[#allocation1 + $0x22] ss:$4 sm:$0xff] %v11168_v11  ;;  %v7868_v13 = vpop.f32.mrf.mxu0  ;;  %v11176_v11 = vld [vmem:[#allocation124_spill] sm:$0xff] }
 0x4e6   : > { %1907 = vst [vmem:[#allocation1] ss:$4 sm:$0xff] %v11164_v25  ;;  %v11172_v25 = vld [vmem:[#allocation138_spill] sm:$0xff] }
 0x4e7   : > { %1909 = vst [vmem:[#allocation1 + $0x1] ss:$4 sm:$0xff] %v11165_v61  ;;  %3028 = vmatmul.f32.gmra.mxu0 %v7770_v51  ;;  %v11173_v61 = vld [vmem:[#allocation139_spill] sm:$0xff]  ;;  %v11174_v51 = vld [vmem:[#allocation140_spill] sm:$0xff] }
 0x4e8   : > { %1911 = vst [vmem:[#allocation1 + $0x2] ss:$4 sm:$0xff] %v11166_v8 }
 0x4e9   : > { %1913 = vst [vmem:[#allocation1 + $0x3] ss:$4 sm:$0xff] %v11167_v27  ;;  %v11175_v27 = vld [vmem:[#allocation123_spill] sm:$0xff] }
 0x4ea   : > { %1921 = vst [vmem:[#allocation1 + $0x23] ss:$4 sm:$0xff] %v11169_v14 }
 0x4eb   : > { %11170 = vst [vmem:[#allocation33_spill] sm:$0xff] %v7868_v13  ;;  %v11178_v13 = vld [vmem:[#allocation125_spill] sm:$0xff] }
 0x4ed   : > { %v7877_v14 = vpop.f32.mrf.mxu0 }
 0x4ee   : > { %11177 = vst [vmem:[#allocation34_spill] sm:$0xff] %v7877_v14  ;;  %v2575_v14 = vld [vmem:[%s10086_s1 + $0x300] sm:$0xff] }
 0x4ef   : > { %3031 = vmatmul.f32.gmra.mxu0 %v7777_v40  ;;  %v11179_v40 = vld [vmem:[#allocation126_spill] sm:$0xff] }
 0x4f0   : > { %v1922_v38 = vld.sshfl [vmem:[#allocation1] sm:$0xff pattern:$0x73625140] }
 0x4f1   : > { %3069 = vmatmul.f32.vlgmr.msrb.gmra.mxu1 %v1922_v38  ;;  %1924 = vst [vmem:[#allocation1] ss:$4 sm:$0xff] %v11171_v6  ;;  %v1923_v8 = vld.sshfl [vmem:[#allocation1 + $0x20] sm:$0xff pattern:$0x73625140] }
 0x4f2   : > { %1925 = vst [vmem:[#allocation1 + $0x1] ss:$4 sm:$0xff] %v11172_v25  ;;  %v11180_v6 = vld [vmem:[#allocation145_spill] sm:$0xff]  ;;  %v11181_v25 = vld [vmem:[#allocation146_spill] sm:$0xff] }
 0x4f3   : > { %1926 = vst [vmem:[#allocation1 + $0x2] ss:$4 sm:$0xff] %v11173_v61  ;;  %v11182_v61 = vld [vmem:[#allocation129_spill] sm:$0xff] }
 0x4f4   : > { %1927 = vst [vmem:[#allocation1 + $0x3] ss:$4 sm:$0xff] %v11174_v51  ;;  %v11183_v51 = vld [vmem:[#allocation130_spill] sm:$0xff] }
 0x4f5   : > { %1928 = vst [vmem:[#allocation1 + $0x20] ss:$4 sm:$0xff] %v11175_v27 }
 0x4f6   : > { %1929 = vst [vmem:[#allocation1 + $0x21] ss:$4 sm:$0xff] %v11176_v11  ;;  %v11184_v11 = vld [vmem:[#allocation131_spill] sm:$0xff] }
 0x4f7   : > { %1930 = vst [vmem:[#allocation1 + $0x22] ss:$4 sm:$0xff] %v11178_v13  ;;  %3034 = vmatmul.f32.gmra.mxu0 %v7787_v1  ;;  %v7888_v13 = vpop.f32.mrf.mxu0  ;;  %v11186_v1 = vld [vmem:[#allocation150_spill] sm:$0xff] }
 0x4f8   : > { %1931 = vst [vmem:[#allocation1 + $0x23] ss:$4 sm:$0xff] %v11179_v40  ;;  %v11188_v40 = vld [vmem:[#allocation152_spill] sm:$0xff] }
 0x4f9   : > { %3072 = vmatmul.f32.gmra.mxu1 %v1923_v8  ;;  %11185 = vst [vmem:[#allocation35_spill] sm:$0xff] %v7888_v13  ;;  %v11187_v8 = vld [vmem:[#allocation151_spill] sm:$0xff]  ;;  %v7897_v13 = vpop.f32.mrf.mxu1 }
 0x4fb   : > { %v1932_v38 = vld.sshfl [vmem:[#allocation1] sm:$0xff pattern:$0x73625140] }
 0x4fc   : > { %1934 = vst [vmem:[#allocation1] ss:$4 sm:$0xff] %v11180_v6 }
 0x4fd   : > { %1935 = vst [vmem:[#allocation1 + $0x1] ss:$4 sm:$0xff] %v11181_v25  ;;  %v11189_v25 = vld [vmem:[#allocation153_spill] sm:$0xff] }
 0x4fe   : > { %1936 = vst [vmem:[#allocation1 + $0x2] ss:$4 sm:$0xff] %v11182_v61  ;;  %v11190_v61 = vld [vmem:[#allocation136_spill] sm:$0xff] }
 0x4ff   : > { %1937 = vst [vmem:[#allocation1 + $0x3] ss:$4 sm:$0xff] %v11183_v51  ;;  %v1933_v27 = vld.sshfl [vmem:[#allocation1 + $0x20] sm:$0xff pattern:$0x73625140]  ;;  %3037 = vmatmul.f32.gmra.mxu0 %v7805_v46  ;;  %v11192_v46 = vld [vmem:[#allocation156_spill] sm:$0xff] }
 0x500   : > { %1938 = vst [vmem:[#allocation1 + $0x20] ss:$4 sm:$0xff] %v11184_v11  ;;  %v11191_v51 = vld [vmem:[#allocation137_spill] sm:$0xff] }
 0x501   : > { %3075 = vmatmul.f32.gmra.mxu1 %v1932_v38  ;;  %1939 = vst [vmem:[#allocation1 + $0x21] ss:$4 sm:$0xff] %v11186_v1  ;;  %v7899_v38 = vpop.f32.mrf.mxu0  ;;  %v11194_v1 = vld [vmem:[#allocation157_spill] sm:$0xff] }
 0x502   : > { %1940 = vst [vmem:[#allocation1 + $0x22] ss:$4 sm:$0xff] %v11187_v8  ;;  %v11195_v8 = vld [vmem:[#allocation158_spill] sm:$0xff] }
 0x503   : > { %1941 = vst [vmem:[#allocation1 + $0x23] ss:$4 sm:$0xff] %v11188_v40  ;;  %v11196_v40 = vld [vmem:[#allocation141_spill] sm:$0xff] }
 0x504   : > { %11193 = vst [vmem:[#allocation36_spill] sm:$0xff] %v7899_v38  ;;  %v11214_v38 = vld [vmem:[#allocation174_spill] sm:$0xff] }
 0x506   : > { %v1942_v6 = vld.sshfl [vmem:[#allocation1] sm:$0xff pattern:$0x73625140] }
 0x507   : > { %1944 = vst [vmem:[#allocation1] ss:$4 sm:$0xff] %v11189_v25  ;;  %3040 = vmatmul.f32.gmra.mxu0 %v1870_v34  ;;  %v11197_v25 = vld [vmem:[#allocation142_spill] sm:$0xff] }
 0x508   : > { %1945 = vst [vmem:[#allocation1 + $0x1] ss:$4 sm:$0xff] %v11190_v61  ;;  %v2589_v61 = vld [vmem:[%s10086_s1 + $0x370] sm:$0xff] }
 0x509   : > { %3078 = vmatmul.f32.gmra.mxu1 %v1933_v27  ;;  %1946 = vst [vmem:[#allocation1 + $0x2] ss:$4 sm:$0xff] %v11191_v51  ;;  %v2590_v27 = vld [vmem:[%s10086_s1 + $0x378] sm:$0xff]  ;;  %v11198_v51 = vld [vmem:[#allocation143_spill] sm:$0xff] }
 0x50a   : > { %1947 = vst [vmem:[#allocation1 + $0x3] ss:$4 sm:$0xff] %v11192_v46  ;;  %v1943_v11 = vld.sshfl [vmem:[#allocation1 + $0x20] sm:$0xff pattern:$0x73625140]  ;;  %3139 = vmatpush.msrb.mxu2 %v2590_v27  ;;  %v11199_v46 = vld [vmem:[#allocation144_spill] sm:$0xff] }
 0x50b   : > { %1948 = vst [vmem:[#allocation1 + $0x20] ss:$4 sm:$0xff] %v11194_v1  ;;  %v2588_v1 = vld [vmem:[%s10086_s1 + $0x368] sm:$0xff]  ;;  %v2587_v27 = vld [vmem:[%s10086_s1 + $0x360] sm:$0xff] }
 0x50c   : > { %1949 = vst [vmem:[#allocation1 + $0x21] ss:$4 sm:$0xff] %v11195_v8  ;;  %3140 = vmatpush.msrb.mxu2 %v2589_v61  ;;  %v7919_v8 = vpop.f32.mrf.mxu0  ;;  %v11207_v61 = vld [vmem:[#allocation168_spill] sm:$0xff] }
 0x50d   : > { %1950 = vst [vmem:[#allocation1 + $0x22] ss:$4 sm:$0xff] %v11196_v40  ;;  %v11203_v40 = vld [vmem:[#allocation164_spill] sm:$0xff] }
 0x50e   : > { %1951 = vst [vmem:[#allocation1 + $0x23] ss:$4 sm:$0xff] %v11197_v25  ;;  %3141 = vmatpush.msrb.mxu2 %v2588_v1  ;;  %v2584_v1 = vld [vmem:[%s10086_s1 + $0x348] sm:$0xff] }
 0x50f   : > { %3043 = vmatmul.f32.gmra.mxu0 %v1879_v20  ;;  %v11200_v20 = vld [vmem:[#allocation163_spill] sm:$0xff]  ;;  %11202 = vst [vmem:[#allocation61_spill] sm:$0xff] %v7919_v8 }
 0x510   : > { %3142 = vmatpush.msrb.mxu2 %v2587_v27  ;;  %v2585_v8 = vld [vmem:[%s10086_s1 + $0x350] sm:$0xff]  ;;  %v11209_v27 = vld [vmem:[#allocation170_spill] sm:$0xff] }
 0x511   : > { %3081 = vmatmul.f32.gmra.mxu1 %v1942_v6  ;;  %v1952_v34 = vld.sshfl [vmem:[#allocation1] sm:$0xff pattern:$0x73625140]  ;;  %v7917_v6 = vpop.f32.mrf.mxu1 }
 0x512   : > { %1954 = vst [vmem:[#allocation1] ss:$4 sm:$0xff] %v11198_v51  ;;  %v11204_v51 = vld [vmem:[#allocation147_spill] sm:$0xff] }
 0x513   : > { %1955 = vst [vmem:[#allocation1 + $0x1] ss:$4 sm:$0xff] %v11199_v46  ;;  %v11205_v46 = vld [vmem:[#allocation148_spill] sm:$0xff] }
 0x514   : > { %1956 = vst [vmem:[#allocation1 + $0x2] ss:$4 sm:$0xff] %v11200_v20  ;;  %v11206_v20 = vld [vmem:[#allocation149_spill] sm:$0xff] }
 0x515   : > { %11201 = vst [vmem:[#allocation60_spill] sm:$0xff] %v7917_v6  ;;  %v1953_v25 = vld.sshfl [vmem:[#allocation1 + $0x20] sm:$0xff pattern:$0x73625140] }
 0x516   : > { %1957 = vst [vmem:[#allocation1 + $0x3] ss:$4 sm:$0xff] %v11203_v40  ;;  %v2586_v40 = vld [vmem:[%s10086_s1 + $0x358] sm:$0xff]  ;;  %v11231_v6 = vld [vmem:[#allocation189_spill] sm:$0xff] }
 0x517   : > { %1958 = vst [vmem:[#allocation1 + $0x20] ss:$4 sm:$0xff] %v11204_v51  ;;  %3046 = vmatmul.f32.gmra.mxu0 %v7855_v49  ;;  %3143 = vmatpush.msrb.mxu2 %v2586_v40  ;;  %v11208_v51 = vld [vmem:[#allocation169_spill] sm:$0xff]  ;;  %v11212_v40 = vld [vmem:[#allocation154_spill] sm:$0xff] }
 0x518   : > { %1959 = vst [vmem:[#allocation1 + $0x21] ss:$4 sm:$0xff] %v11205_v46 }
 0x519   : > { %1960 = vst [vmem:[#allocation1 + $0x22] ss:$4 sm:$0xff] %v11206_v20  ;;  %3084 = vmatmul.f32.gmra.mxu1 %v1943_v11  ;;  %3144 = vmatpush.msrb.mxu2 %v2585_v8  ;;  %v2583_v11 = vld [vmem:[%s10086_s1 + $0x340] sm:$0xff]  ;;  %v7944_v46 = vpop.f32.mrf.mxu1  ;;  %v7946_v20 = vpop.f32.mrf.mxu0 }
 0x51a   : > { %1961 = vst [vmem:[#allocation1 + $0x23] ss:$4 sm:$0xff] %v11207_v61  ;;  %v11211_v61 = vld [vmem:[#allocation171_spill] sm:$0xff] }
 0x51b   : > { %3145 = vmatpush.msrb.mxu2 %v2584_v1  ;;  %11210 = vst [vmem:[#allocation40_spill] sm:$0xff] %v7944_v46  ;;  %v2581_v1 = vld [vmem:[%s10086_s1 + $0x330] sm:$0xff] }
 0x51d   : > { %v1962_v49 = vld.sshfl [vmem:[#allocation1] sm:$0xff pattern:$0x73625140]  ;;  %3146 = vmatpush.msrb.mxu2 %v2583_v11 }
 0x51e   : > { %1964 = vst [vmem:[#allocation1] ss:$4 sm:$0xff] %v11208_v51  ;;  %v11213_v51 = vld [vmem:[#allocation155_spill] sm:$0xff]  ;;  %v2579_v11 = vld [vmem:[%s10086_s1 + $0x320] sm:$0xff] }
 0x51f   : > { %1965 = vst [vmem:[#allocation1 + $0x1] ss:$4 sm:$0xff] %v11209_v27  ;;  %3049 = vmatmul.f32.gmra.mxu0 %v7858_v29  ;;  %v2582_v27 = vld [vmem:[%s10086_s1 + $0x338] sm:$0xff]  ;;  %v2580_v29 = vld [vmem:[%s10086_s1 + $0x328] sm:$0xff] }
 0x520   : > { %1966 = vst [vmem:[#allocation1 + $0x2] ss:$4 sm:$0xff] %v11211_v61  ;;  %3147 = vmatpush.msrb.mxu2 %v2582_v27  ;;  %v11215_v61 = vld [vmem:[#allocation175_spill] sm:$0xff]  ;;  %v11219_v27 = vld [vmem:[#allocation160_spill] sm:$0xff] }
 0x521   : > { %1967 = vst [vmem:[#allocation1 + $0x3] ss:$4 sm:$0xff] %v11212_v40  ;;  %v1963_v8 = vld.sshfl [vmem:[#allocation1 + $0x20] sm:$0xff pattern:$0x73625140]  ;;  %3087 = vmatmul.f32.gmra.mxu1 %v1952_v34  ;;  %v11216_v34 = vld [vmem:[#allocation176_spill] sm:$0xff] }
 0x522   : > { %1968 = vst [vmem:[#allocation1 + $0x20] ss:$4 sm:$0xff] %v11213_v51  ;;  %3148 = vmatpush.msrb.mxu2 %v2581_v1  ;;  %v11217_v51 = vld [vmem:[#allocation159_spill] sm:$0xff] }
 0x523   : > { %1969 = vst [vmem:[#allocation1 + $0x21] ss:$4 sm:$0xff] %v11214_v38  ;;  %v7968_v38 = vpop.f32.mrf.mxu1  ;;  %v2577_v1 = vld [vmem:[%s10086_s1 + $0x310] sm:$0xff] }
 0x524   : > { %1970 = vst [vmem:[#allocation1 + $0x22] ss:$4 sm:$0xff] %v11215_v61  ;;  %3149 = vmatpush.msrb.mxu2 %v2580_v29  ;;  %v2578_v61 = vld [vmem:[%s10086_s1 + $0x318] sm:$0xff]  ;;  %v11221_v29 = vld [vmem:[#allocation162_spill] sm:$0xff] }
 0x525   : > { %1971 = vst [vmem:[#allocation1 + $0x23] ss:$4 sm:$0xff] %v11216_v34  ;;  %v11220_v34 = vld [vmem:[#allocation161_spill] sm:$0xff] }
 0x526   : > { %3150 = vmatpush.msrb.mxu2 %v2579_v11  ;;  %11218 = vst [vmem:[#allocation41_spill] sm:$0xff] %v7968_v38  ;;  %v11222_v11 = vld [vmem:[#allocation181_spill] sm:$0xff]  ;;  %v11227_v38 = vld [vmem:[#allocation167_spill] sm:$0xff] }
 0x528   : > { %v1972_v40 = vld.sshfl [vmem:[#allocation1] sm:$0xff pattern:$0x73625140]  ;;  %3151 = vmatpush.msrb.mxu2 %v2578_v61  ;;  %v11225_v61 = vld [vmem:[#allocation166_spill] sm:$0xff] }
 0x529   : > { %1974 = vst [vmem:[#allocation1] ss:$4 sm:$0xff] %v11217_v51  ;;  %3090 = vmatmul.f32.gmra.mxu1 %v1953_v25  ;;  %v2576_v25 = vld [vmem:[%s10086_s1 + $0x308] sm:$0xff] }
 0x52a   : > { %1975 = vst [vmem:[#allocation1 + $0x1] ss:$4 sm:$0xff] %v11219_v27  ;;  %3152 = vmatpush.msrb.mxu2 %v2577_v1  ;;  %v11223_v27 = vld [vmem:[#allocation182_spill] sm:$0xff]  ;;  %v11229_v1 = vld [vmem:[#allocation187_spill] sm:$0xff] }
 0x52b   : > { %1976 = vst [vmem:[#allocation1 + $0x2] ss:$4 sm:$0xff] %v11220_v34 }
 0x52c   : > { %1977 = vst [vmem:[#allocation1 + $0x3] ss:$4 sm:$0xff] %v11221_v29  ;;  %v1973_v51 = vld.sshfl [vmem:[#allocation1 + $0x20] sm:$0xff pattern:$0x73625140]  ;;  %3153 = vmatpush.msrb.mxu2 %v2576_v25  ;;  %v7989_v29 = vpop.f32.mrf.mxu1 }
 0x52d   : > { %1978 = vst [vmem:[#allocation1 + $0x20] ss:$4 sm:$0xff] %v11222_v11  ;;  %v11228_v11 = vld [vmem:[#allocation186_spill] sm:$0xff]  ;;  %v11233_v25 = vld [vmem:[#allocation173_spill] sm:$0xff] }
 0x52e   : > { %1979 = vst [vmem:[#allocation1 + $0x21] ss:$4 sm:$0xff] %v11223_v27  ;;  %3154 = vmatpush.msrb.mxu2 %v2575_v14  ;;  %v11230_v27 = vld [vmem:[#allocation188_spill] sm:$0xff]  ;;  %v11234_v14 = vld [vmem:[#allocation193_spill] sm:$0xff] }
 0x52f   : > { %1980 = vst [vmem:[#allocation1 + $0x22] ss:$4 sm:$0xff] %v11224_v7  ;;  %v11232_v7 = vld [vmem:[#allocation172_spill] sm:$0xff] }
 0x530   : > { %1981 = vst [vmem:[#allocation1 + $0x23] ss:$4 sm:$0xff] %v11225_v61 }
 0x531   : > { %3093 = vmatmul.f32.gmra.mxu1 %v1962_v49  ;;  %11226 = vst [vmem:[#allocation42_spill] sm:$0xff] %v7989_v29  ;;  %v11240_v29 = vld [vmem:[#allocation179_spill] sm:$0xff] }
 0x533   : > { %v1982_v34 = vld.sshfl [vmem:[#allocation1] sm:$0xff pattern:$0x73625140] }
 0x534   : > { %1984 = vst [vmem:[#allocation1] ss:$4 sm:$0xff] %v11227_v38  ;;  %v7999_v49 = vpop.f32.mrf.mxu1  ;;  %v11236_v38 = vld [vmem:[#allocation194_spill] sm:$0xff] }
 0x535   : > { %1985 = vst [vmem:[#allocation1 + $0x1] ss:$4 sm:$0xff] %v11228_v11  ;;  %v11237_v11 = vld [vmem:[#allocation195_spill] sm:$0xff] }
 0x536   : > { %1986 = vst [vmem:[#allocation1 + $0x2] ss:$4 sm:$0xff] %v11229_v1  ;;  %v11238_v1 = vld [vmem:[#allocation177_spill] sm:$0xff] }
 0x537   : > { %1987 = vst [vmem:[#allocation1 + $0x3] ss:$4 sm:$0xff] %v11230_v27  ;;  %v1983_v46 = vld.sshfl [vmem:[#allocation1 + $0x20] sm:$0xff pattern:$0x73625140]  ;;  %v11239_v27 = vld [vmem:[#allocation178_spill] sm:$0xff] }
 0x538   : > { %1988 = vst [vmem:[#allocation1 + $0x20] ss:$4 sm:$0xff] %v11231_v6 }
 0x539   : > { %1989 = vst [vmem:[#allocation1 + $0x21] ss:$4 sm:$0xff] %v11232_v7  ;;  %3096 = vmatmul.f32.gmra.mxu1 %v1963_v8  ;;  %v11241_v8 = vld [vmem:[#allocation180_spill] sm:$0xff] }
 0x53a   : > { %1990 = vst [vmem:[#allocation1 + $0x22] ss:$4 sm:$0xff] %v11233_v25  ;;  %v11242_v7 = vld [vmem:[#allocation200_spill] sm:$0xff]  ;;  %v11243_v25 = vld [vmem:[#allocation201_spill] sm:$0xff] }
 0x53b   : > { %1991 = vst [vmem:[#allocation1 + $0x23] ss:$4 sm:$0xff] %v11234_v14 }
 0x53c   : > { %11235 = vst [vmem:[#allocation67_spill] sm:$0xff] %v7999_v49  ;;  %v8009_v14 = vpop.f32.mrf.mxu1 }
 0x53d   : > { %11244 = vst [vmem:[#allocation68_spill] sm:$0xff] %v8009_v14 }
 0x53e   : > { %v1992_v61 = vld.sshfl [vmem:[#allocation1] sm:$0xff pattern:$0x73625140] }
 0x53f   : > { %1994 = vst [vmem:[#allocation1] ss:$4 sm:$0xff] %v11236_v38  ;;  %v11245_v38 = vld [vmem:[#allocation183_spill] sm:$0xff] }
 0x540   : > { %1995 = vst [vmem:[#allocation1 + $0x1] ss:$4 sm:$0xff] %v11237_v11  ;;  %v11246_v11 = vld [vmem:[#allocation184_spill] sm:$0xff] }
 0x541   : > { %1996 = vst [vmem:[#allocation1 + $0x2] ss:$4 sm:$0xff] %v11238_v1  ;;  %3099 = vmatmul.f32.gmra.mxu1 %v1972_v40  ;;  %v11247_v40 = vld [vmem:[#allocation185_spill] sm:$0xff]  ;;  %v11248_v1 = vld [vmem:[#allocation206_spill] sm:$0xff] }
 0x542   : > { %1997 = vst [vmem:[#allocation1 + $0x3] ss:$4 sm:$0xff] %v11239_v27  ;;  %v1993_v6 = vld.sshfl [vmem:[#allocation1 + $0x20] sm:$0xff pattern:$0x73625140] }
 0x543   : > { %1998 = vst [vmem:[#allocation1 + $0x20] ss:$4 sm:$0xff] %v11240_v29  ;;  %v11249_v29 = vld [vmem:[#allocation207_spill] sm:$0xff] }
 0x544   : > { %1999 = vst [vmem:[#allocation1 + $0x21] ss:$4 sm:$0xff] %v11241_v8  ;;  %v11250_v8 = vld [vmem:[#allocation208_spill] sm:$0xff]  ;;  %v8021_v14 = vpop.f32.mrf.mxu1 }
 0x545   : > { %2000 = vst [vmem:[#allocation1 + $0x22] ss:$4 sm:$0xff] %v11242_v7  ;;  %v11251_v7 = vld [vmem:[#allocation209_spill] sm:$0xff] }
 0x546   : > { %2001 = vst [vmem:[#allocation1 + $0x23] ss:$4 sm:$0xff] %v11243_v25  ;;  %v11252_v25 = vld [vmem:[#allocation191_spill] sm:$0xff] }
 0x547   : > { %11253 = vst [vmem:[#allocation69_spill] sm:$0xff] %v8021_v14  ;;  %v4075_v14 = vld [vmem:[#allocation2 + $0x130] sm:$0xff] }
 0x549   : > { %v2002_v49 = vld.sshfl [vmem:[#allocation1] sm:$0xff pattern:$0x73625140]  ;;  %3102 = vmatmul.f32.gmra.mxu1 %v1973_v51 }
 0x54a   : > { %2004 = vst [vmem:[#allocation1] ss:$4 sm:$0xff] %v11245_v38  ;;  %v11254_v38 = vld [vmem:[#allocation192_spill] sm:$0xff] }
 0x54b   : > { %2005 = vst [vmem:[#allocation1 + $0x1] ss:$4 sm:$0xff] %v11246_v11  ;;  %v11255_v11 = vld [vmem:[#allocation213_spill] sm:$0xff] }
 0x54c   : > { %2006 = vst [vmem:[#allocation1 + $0x2] ss:$4 sm:$0xff] %v11247_v40  ;;  %v11256_v40 = vld [vmem:[#allocation214_spill] sm:$0xff] }
 0x54d   : > { %2007 = vst [vmem:[#allocation1 + $0x3] ss:$4 sm:$0xff] %v11248_v1  ;;  %v8015_v27 = vld.sshfl [vmem:[#allocation1 + $0x20] sm:$0xff pattern:$0x73625140]  ;;  %v2606_v1 = vld [vmem:[%s10086_s1 + $0x3f8] sm:$0xff] }
 0x54e   : > { %2008 = vst [vmem:[#allocation1 + $0x20] ss:$4 sm:$0xff] %v11249_v29  ;;  %v11257_v29 = vld [vmem:[#allocation215_spill] sm:$0xff]  ;;  %3225 = vmatpush.msrb.mxu3 %v2606_v1 }
 0x54f   : > { %2009 = vst [vmem:[#allocation1 + $0x21] ss:$4 sm:$0xff] %v11250_v8  ;;  %v2605_v1 = vld [vmem:[%s10086_s1 + $0x3f0] sm:$0xff] }
 0x550   : > { %2010 = vst [vmem:[#allocation1 + $0x22] ss:$4 sm:$0xff] %v11251_v7  ;;  %v11258_v7 = vld [vmem:[#allocation196_spill] sm:$0xff]  ;;  %3226 = vmatpush.msrb.mxu3 %v2605_v1 }
 0x551   : > { %2011 = vst [vmem:[#allocation1 + $0x23] ss:$4 sm:$0xff] %v11252_v25  ;;  %3105 = vmatmul.f32.gmra.mxu1 %v1982_v34  ;;  %v11259_v34 = vld [vmem:[#allocation197_spill] sm:$0xff]  ;;  %v11260_v25 = vld [vmem:[#allocation198_spill] sm:$0xff] }
 0x554   : > { %v8023_v51 = vld.sshfl [vmem:[#allocation1] sm:$0xff pattern:$0x73625140] }
 0x555   : > { %2014 = vst [vmem:[#allocation1] ss:$4 sm:$0xff] %v11254_v38  ;;  %v8037_v38 = vpop.f32.mrf.mxu1 }
 0x556   : > { %2015 = vst [vmem:[#allocation1 + $0x1] ss:$4 sm:$0xff] %v11255_v11  ;;  %v11262_v11 = vld [vmem:[#allocation199_spill] sm:$0xff] }
 0x557   : > { %2016 = vst [vmem:[#allocation1 + $0x2] ss:$4 sm:$0xff] %v11256_v40  ;;  %v2622_v40 = vld [vmem:[%s10086_s1 + $0x478] sm:$0xff] }
 0x558   : > { %2017 = vst [vmem:[#allocation1 + $0x3] ss:$4 sm:$0xff] %v11257_v29  ;;  %v8032_v8 = vld.sshfl [vmem:[#allocation1 + $0x20] sm:$0xff pattern:$0x73625140]  ;;  %3311 = vmatpush.msrb.mxu0 %v2622_v40 }
 0x559   : > { %2018 = vst [vmem:[#allocation1 + $0x20] ss:$4 sm:$0xff] %v11258_v7  ;;  %3108 = vmatmul.f32.gmra.mxu1 %v1983_v46  ;;  %v11263_v46 = vld [vmem:[#allocation220_spill] sm:$0xff]  ;;  %v11264_v7 = vld [vmem:[#allocation221_spill] sm:$0xff] }
 0x55a   : > { %2019 = vst [vmem:[#allocation1 + $0x21] ss:$4 sm:$0xff] %v11259_v34 }
 0x55b   : > { %2020 = vst [vmem:[#allocation1 + $0x22] ss:$4 sm:$0xff] %v11260_v25  ;;  %v2621_v25 = vld [vmem:[%s10086_s1 + $0x470] sm:$0xff] }
 0x55c   : > { %11261 = vst [vmem:[#allocation70_spill] sm:$0xff] %v8037_v38  ;;  %3312 = vmatpush.msrb.mxu0 %v2621_v25  ;;  %v2617_v25 = vld [vmem:[%s10086_s1 + $0x450] sm:$0xff] }
 0x55d   : > { %2021 = vst [vmem:[#allocation1 + $0x23] ss:$4 sm:$0xff] %v11262_v11  ;;  %v2604_v11 = vld [vmem:[%s10086_s1 + $0x3e8] sm:$0xff]  ;;  %v8060_v40 = vpop.f32.mrf.mxu1  ;;  %v11519_v38 = vld [vmem:[#allocation303_spill] sm:$0xff] }
 0x55e   : > { %3227 = vmatpush.msrb.mxu3 %v2604_v11  ;;  %11265 = vst [vmem:[#allocation48_spill] sm:$0xff] %v8060_v40  ;;  %v2600_v11 = vld [vmem:[%s10086_s1 + $0x3c8] sm:$0xff] }
 0x55f   : > { %v8046_v29 = vld.sshfl [vmem:[#allocation1] sm:$0xff pattern:$0x73625140] }
 0x560   : > { %2024 = vst [vmem:[#allocation1] ss:$4 sm:$0xff] %v11263_v46  ;;  %v11277_v46 = vld [vmem:[#allocation322_spill] sm:$0xff] }
 0x561   : > { %2025 = vst [vmem:[#allocation1 + $0x1] ss:$4 sm:$0xff] %v11264_v7  ;;  %3111 = vmatmul.f32.gmra.mxu1 %v1992_v61 }
 0x564   : > { %v8050_v34 = vld.sshfl [vmem:[#allocation1 + $0x20] sm:$0xff pattern:$0x73625140] }
 0x565   : > { %2058 = vst [vmem:[#allocation1 + $0x20] ss:$4 sm:$0xff] %v5634_v50  ;;  %v2620_v50 = vld [vmem:[%s10086_s1 + $0x468] sm:$0xff] }
 0x566   : > { %2060 = vst [vmem:[#allocation1 + $0x21] ss:$4 sm:$0xff] %v6360_v52  ;;  %3313 = vmatpush.msrb.mxu0 %v2620_v50  ;;  %v11278_v50 = vld [vmem:[#allocation317_spill] sm:$0xff]  ;;  %v11377_v52 = vld [vmem:[#allocation408_spill] sm:$0xff] }
 0x567   : > { %2062 = vst [vmem:[#allocation1 + $0x22] ss:$4 sm:$0xff] %v6325_v62 }
 0x568   : > { %2064 = vst [vmem:[#allocation1 + $0x23] ss:$4 sm:$0xff] %v6341_v47  ;;  %v8064_v61 = vld.sshfl [vmem:[#allocation1] sm:$0xff pattern:$0x73625140]  ;;  %v8074_v47 = vpop.f32.mrf.mxu1 }
 0x569   : > { %2050 = vst [vmem:[#allocation1] ss:$4 sm:$0xff] %v5569_v24  ;;  %3114 = vmatmul.f32.gmra.mxu1 %v1993_v6  ;;  %v11272_v6 = vld [vmem:[#allocation66_spill] sm:$0xff] }
 0x56a   : > { %2052 = vst [vmem:[#allocation1 + $0x1] ss:$4 sm:$0xff] %v6310_v5 }
 0x56b   : > { %2054 = vst [vmem:[#allocation1 + $0x2] ss:$4 sm:$0xff] %v6348_v59 }
 0x56c   : > { %2056 = vst [vmem:[#allocation1 + $0x3] ss:$4 sm:$0xff] %v6357_v33  ;;  %v2603_v33 = vld [vmem:[%s10086_s1 + $0x3e0] sm:$0xff] }
 0x56d   : > { %11266 = vst [vmem:[#allocation49_spill] sm:$0xff] %v8074_v47  ;;  %3228 = vmatpush.msrb.mxu3 %v2603_v33 }
 0x56f   : > { %v2066_v1 = vld.sshfl [vmem:[#allocation1 + $0x20] sm:$0xff pattern:$0x73625140] }
 0x570   : > { %2071 = vst [vmem:[#allocation1 + $0x20] ss:$4 sm:$0xff] %v6400_v43  ;;  %v8086_v43 = vpop.f32.mrf.mxu1 }
 0x571   : > { %2072 = vst [vmem:[#allocation1 + $0x21] ss:$4 sm:$0xff] %v5607_v39  ;;  %3117 = vmatmul.f32.gmra.mxu1 %v2002_v49  ;;  %v2601_v49 = vld [vmem:[%s10086_s1 + $0x3d0] sm:$0xff] }
 0x572   : > { %2073 = vst [vmem:[#allocation1 + $0x22] ss:$4 sm:$0xff] %v6367_v53 }
 0x573   : > { %2074 = vst [vmem:[#allocation1 + $0x23] ss:$4 sm:$0xff] %v6371_v28  ;;  %v2065_v24 = vld.sshfl [vmem:[#allocation1] sm:$0xff pattern:$0x73625140] }
 0x574   : > { %3155 = vmatmul.f32.vlgmr.msrb.gmra.mxu2 %v2065_v24  ;;  %2067 = vst [vmem:[#allocation1] ss:$4 sm:$0xff] %v5585_v30  ;;  %v2619_v28 = vld [vmem:[%s10086_s1 + $0x460] sm:$0xff]  ;;  %v11280_v24 = vld [vmem:[#allocation324_spill] sm:$0xff]  ;;  %v11369_v30 = vld [vmem:[#allocation394_spill] sm:$0xff] }
 0x575   : > { %2068 = vst [vmem:[#allocation1 + $0x1] ss:$4 sm:$0xff] %v5654_v58  ;;  %3314 = vmatpush.msrb.mxu0 %v2619_v28 }
 0x576   : > { %2069 = vst [vmem:[#allocation1 + $0x2] ss:$4 sm:$0xff] %v6391_v32 }
 0x577   : > { %2070 = vst [vmem:[#allocation1 + $0x3] ss:$4 sm:$0xff] %v6394_v26  ;;  %v2602_v26 = vld [vmem:[%s10086_s1 + $0x3d8] sm:$0xff] }
 0x578   : > { %11267 = vst [vmem:[#allocation75_spill] sm:$0xff] %v8086_v43  ;;  %3229 = vmatpush.msrb.mxu3 %v2602_v26  ;;  %v8104_v59 = vpop.f32.mrf.mxu1  ;;  %v11283_v26 = vld [vmem:[#allocation62_spill] sm:$0xff]  ;;  %v11405_v43 = vld [vmem:[#allocation51_spill] sm:$0xff] }
 0x579   : > { %3120 = vmatmul.f32.gmra.mxu1 %v8015_v27  ;;  %11268 = vst [vmem:[#allocation76_spill] sm:$0xff] %v8104_v59  ;;  %v11274_v27 = vld [vmem:[#allocation54_spill] sm:$0xff]  ;;  %v11400_v59 = vld [vmem:[#allocation424_spill] sm:$0xff] }
 0x57a   : > { %v2076_v39 = vld.sshfl [vmem:[#allocation1 + $0x20] sm:$0xff pattern:$0x73625140]  ;;  %3230 = vmatpush.msrb.mxu3 %v2601_v49  ;;  %v11287_v49 = vld [vmem:[#allocation82_spill] sm:$0xff] }
 0x57b   : > { %2081 = vst [vmem:[#allocation1 + $0x20] ss:$4 sm:$0xff] %v11016_v19  ;;  %v2618_v19 = vld [vmem:[%s10086_s1 + $0x458] sm:$0xff] }
 0x57c   : > { %2082 = vst [vmem:[#allocation1 + $0x21] ss:$4 sm:$0xff] %v11017_v9  ;;  %3158 = vmatmul.f32.gmra.mxu2 %v2066_v1  ;;  %3315 = vmatpush.msrb.mxu0 %v2618_v19  ;;  %v11270_v9 = vld [vmem:[#allocation312_spill] sm:$0xff]  ;;  %v11279_v1 = vld [vmem:[#allocation318_spill] sm:$0xff] }
 0x57d   : > { %2083 = vst [vmem:[#allocation1 + $0x22] ss:$4 sm:$0xff] %v11018_v48  ;;  %v11271_v48 = vld [vmem:[#allocation39_spill] sm:$0xff]  ;;  %3231 = vmatpush.msrb.mxu3 %v2600_v11  ;;  %v2616_v19 = vld [vmem:[%s10086_s1 + $0x448] sm:$0xff] }
 0x57e   : > { %2084 = vst [vmem:[#allocation1 + $0x23] ss:$4 sm:$0xff] %v10821_v54  ;;  %v2075_v58 = vld.sshfl [vmem:[#allocation1] sm:$0xff pattern:$0x73625140]  ;;  %3316 = vmatpush.msrb.mxu0 %v2617_v25  ;;  %v2598_v25 = vld [vmem:[%s10086_s1 + $0x3b8] sm:$0xff] }
 0x57f   : > { %2077 = vst [vmem:[#allocation1] ss:$4 sm:$0xff] %v6375_v60  ;;  %v2597_v11 = vld [vmem:[%s10086_s1 + $0x3b0] sm:$0xff]  ;;  %v11358_v54 = vld [vmem:[#allocation392_spill] sm:$0xff] }
 0x580   : > { %2078 = vst [vmem:[#allocation1 + $0x1] ss:$4 sm:$0xff] %v5674_v2  ;;  %3317 = vmatpush.msrb.mxu0 %v2616_v19  ;;  %v11294_v19 = vld [vmem:[#allocation78_spill] sm:$0xff]  ;;  %v11361_v2 = vld [vmem:[#allocation387_spill] sm:$0xff] }
 0x581   : > { %2079 = vst [vmem:[#allocation1 + $0x2] ss:$4 sm:$0xff] %v10818_v63  ;;  %3123 = vmatmul.f32.gmra.mxu1 %v8023_v51  ;;  %v11269_v63 = vld [vmem:[#allocation311_spill] sm:$0xff]  ;;  %v11275_v51 = vld [vmem:[#allocation325_spill] sm:$0xff] }
 0x582   : > { %2080 = vst [vmem:[#allocation1 + $0x3] ss:$4 sm:$0xff] %v11015_v35  ;;  %v11352_v35 = vld [vmem:[#allocation47_spill] sm:$0xff] }
 0x584   : > { %3161 = vmatmul.f32.gmra.mxu2 %v2075_v58  ;;  %v11284_v58 = vld [vmem:[#allocation90_spill] sm:$0xff] }
 0x585   : > { %v2086_v62 = vld.sshfl [vmem:[#allocation1 + $0x20] sm:$0xff pattern:$0x73625140] }
 0x586   : > { %2091 = vst [vmem:[#allocation1 + $0x20] ss:$4 sm:$0xff] %v11021_v31  ;;  %v11334_v31 = vld [vmem:[#allocation365_spill] sm:$0xff] }
 0x587   : > { %2092 = vst [vmem:[#allocation1 + $0x21] ss:$4 sm:$0xff] %v11022_v4  ;;  %v8121_v4 = vpop.f32.mrf.mxu2 }
 0x588   : > { %2093 = vst [vmem:[#allocation1 + $0x22] ss:$4 sm:$0xff] %v11023_v3 }
 0x589   : > { %2094 = vst [vmem:[#allocation1 + $0x23] ss:$4 sm:$0xff] %v10837_v12  ;;  %v2085_v60 = vld.sshfl [vmem:[#allocation1] sm:$0xff pattern:$0x73625140]  ;;  %3126 = vmatmul.f32.gmra.mxu1 %v8032_v8  ;;  %v8123_v12 = vpop.f32.mrf.mxu1 }
 0x58a   : > { %2087 = vst [vmem:[#allocation1] ss:$4 sm:$0xff] %v11269_v63  ;;  %v11276_v8 = vld [vmem:[#allocation321_spill] sm:$0xff]  ;;  %v11285_v63 = vld [vmem:[#allocation326_spill] sm:$0xff] }
 0x58b   : > { %2088 = vst [vmem:[#allocation1 + $0x1] ss:$4 sm:$0xff] %v11270_v9  ;;  %v11286_v9 = vld [vmem:[#allocation327_spill] sm:$0xff] }
 0x58c   : > { %3164 = vmatmul.f32.gmra.mxu2 %v2076_v39  ;;  %2089 = vst [vmem:[#allocation1 + $0x2] ss:$4 sm:$0xff] %v11271_v48  ;;  %v11282_v39 = vld [vmem:[#allocation74_spill] sm:$0xff]  ;;  %v11344_v48 = vld [vmem:[#allocation373_spill] sm:$0xff] }
 0x58d   : > { %2090 = vst [vmem:[#allocation1 + $0x3] ss:$4 sm:$0xff] %v11272_v6 }
 0x58e   : > { %11273 = vst [vmem:[#allocation77_spill] sm:$0xff] %v8123_v12 }
 0x590   : > { %v2096_v3 = vld.sshfl [vmem:[#allocation1 + $0x20] sm:$0xff pattern:$0x73625140] }
 0x591   : > { %2101 = vst [vmem:[#allocation1 + $0x20] ss:$4 sm:$0xff] %v11274_v27  ;;  %3129 = vmatmul.f32.gmra.mxu1 %v8046_v29  ;;  %v8139_v29 = vpop.f32.mrf.mxu2  ;;  %v8141_v33 = vpop.f32.mrf.mxu1 }
 0x592   : > { %2102 = vst [vmem:[#allocation1 + $0x21] ss:$4 sm:$0xff] %v11275_v51 }
 0x593   : > { %2103 = vst [vmem:[#allocation1 + $0x22] ss:$4 sm:$0xff] %v11276_v8  ;;  %v11290_v8 = vld [vmem:[#allocation329_spill] sm:$0xff] }
 0x594   : > { %2104 = vst [vmem:[#allocation1 + $0x23] ss:$4 sm:$0xff] %v11277_v46  ;;  %3167 = vmatmul.f32.gmra.mxu2 %v2085_v60  ;;  %v2095_v7 = vld.sshfl [vmem:[#allocation1] sm:$0xff pattern:$0x73625140]  ;;  %v11291_v46 = vld [vmem:[#allocation330_spill] sm:$0xff] }
 0x595   : > { %2097 = vst [vmem:[#allocation1] ss:$4 sm:$0xff] %v11278_v50  ;;  %v2599_v60 = vld [vmem:[%s10086_s1 + $0x3c0] sm:$0xff]  ;;  %v11343_v50 = vld [vmem:[#allocation372_spill] sm:$0xff] }
 0x596   : > { %2098 = vst [vmem:[#allocation1 + $0x1] ss:$4 sm:$0xff] %v11279_v1  ;;  %3232 = vmatpush.msrb.mxu3 %v2599_v60  ;;  %v11295_v60 = vld [vmem:[#allocation331_spill] sm:$0xff] }
 0x597   : > { %2099 = vst [vmem:[#allocation1 + $0x2] ss:$4 sm:$0xff] %v11280_v24  ;;  %v2596_v24 = vld [vmem:[%s10086_s1 + $0x3a8] sm:$0xff] }
 0x598   : > { %11281 = vst [vmem:[#allocation55_spill] sm:$0xff] %v8141_v33  ;;  %3233 = vmatpush.msrb.mxu3 %v2598_v25  ;;  %v2594_v25 = vld [vmem:[%s10086_s1 + $0x398] sm:$0xff]  ;;  %v11385_v33 = vld [vmem:[#allocation410_spill] sm:$0xff] }
 0x599   : > { %2100 = vst [vmem:[#allocation1 + $0x3] ss:$4 sm:$0xff] %v11282_v39  ;;  %3132 = vmatmul.f32.gmra.mxu1 %v8050_v34  ;;  %v8157_v6 = vpop.f32.mrf.mxu2  ;;  %v8159_v27 = vpop.f32.mrf.mxu1 }
 0x59a   : > { %11289 = vst [vmem:[#allocation56_spill] sm:$0xff] %v8159_v27  ;;  %3234 = vmatpush.msrb.mxu3 %v2597_v11  ;;  %v2615_v11 = vld [vmem:[%s10086_s1 + $0x440] sm:$0xff] }
 0x59b   : > { %v2106_v28 = vld.sshfl [vmem:[#allocation1 + $0x20] sm:$0xff pattern:$0x73625140]  ;;  %3318 = vmatpush.msrb.mxu0 %v2615_v11 }
 0x59c   : > { %2111 = vst [vmem:[#allocation1 + $0x20] ss:$4 sm:$0xff] %v11283_v26  ;;  %3170 = vmatmul.f32.gmra.mxu2 %v2086_v62  ;;  %v11288_v62 = vld [vmem:[#allocation323_spill] sm:$0xff]  ;;  %3235 = vmatpush.msrb.mxu3 %v2596_v24  ;;  %v11302_v11 = vld [vmem:[#allocation105_spill] sm:$0xff]  ;;  %v11312_v26 = vld [vmem:[#allocation344_spill] sm:$0xff] }
 0x59d   : > { %2112 = vst [vmem:[#allocation1 + $0x21] ss:$4 sm:$0xff] %v11284_v58  ;;  %v11292_v58 = vld [vmem:[#allocation336_spill] sm:$0xff]  ;;  %v2593_v24 = vld [vmem:[%s10086_s1 + $0x390] sm:$0xff]  ;;  %v4052_v27 = vld [vmem:[#allocation2 + $0x78] sm:$0xff] }
 0x59e   : > { %2113 = vst [vmem:[#allocation1 + $0x22] ss:$4 sm:$0xff] %v11285_v63  ;;  %v11305_v63 = vld [vmem:[#allocation341_spill] sm:$0xff]  ;;  %4181 = vmatpush.msra.mxu1 %v4052_v27  ;;  %v11389_v27 = vld [vmem:[#allocation414_spill] sm:$0xff] }
 0x59f   : > { %2114 = vst [vmem:[#allocation1 + $0x23] ss:$4 sm:$0xff] %v11286_v9 }
 0x5a0   : > { %v2105_v34 = vld.sshfl [vmem:[#allocation1] sm:$0xff pattern:$0x73625140] }
 0x5a1   : > { %2107 = vst [vmem:[#allocation1] ss:$4 sm:$0xff] %v11287_v49  ;;  %3135 = vmatmul.f32.gmra.mxu1 %v8064_v61  ;;  %v11293_v61 = vld [vmem:[#allocation98_spill] sm:$0xff]  ;;  %v11296_v49 = vld [vmem:[#allocation328_spill] sm:$0xff] }
 0x5a2   : > { %2108 = vst [vmem:[#allocation1 + $0x1] ss:$4 sm:$0xff] %v11288_v62  ;;  %v11326_v62 = vld [vmem:[#allocation357_spill] sm:$0xff] }
 0x5a3   : > { %2109 = vst [vmem:[#allocation1 + $0x2] ss:$4 sm:$0xff] %v11290_v8  ;;  %v8181_v8 = vpop.f32.mrf.mxu2 }
 0x5a4   : > { %2110 = vst [vmem:[#allocation1 + $0x3] ss:$4 sm:$0xff] %v11291_v46  ;;  %3173 = vmatmul.f32.gmra.mxu2 %v2095_v7  ;;  %v2595_v7 = vld [vmem:[%s10086_s1 + $0x3a0] sm:$0xff]  ;;  %v11297_v46 = vld [vmem:[#allocation71_spill] sm:$0xff] }
 0x5a5   : > { %3236 = vmatpush.msrb.mxu3 %v2595_v7  ;;  %v11299_v7 = vld [vmem:[#allocation335_spill] sm:$0xff] }
 0x5a6   : > { %v2116_v1 = vld.sshfl [vmem:[#allocation1 + $0x20] sm:$0xff pattern:$0x73625140] }
 0x5a7   : > { %2121 = vst [vmem:[#allocation1 + $0x20] ss:$4 sm:$0xff] %v11292_v58  ;;  %v11298_v58 = vld [vmem:[#allocation334_spill] sm:$0xff]  ;;  %3237 = vmatpush.msrb.mxu3 %v2594_v25  ;;  %v11301_v25 = vld [vmem:[#allocation333_spill] sm:$0xff] }
 0x5a8   : > { %2122 = vst [vmem:[#allocation1 + $0x21] ss:$4 sm:$0xff] %v11293_v61  ;;  %v11303_v61 = vld [vmem:[#allocation339_spill] sm:$0xff] }
 0x5a9   : > { %2123 = vst [vmem:[#allocation1 + $0x22] ss:$4 sm:$0xff] %v11294_v19  ;;  %3238 = vmatpush.msrb.mxu3 %v2593_v24  ;;  %v2591_v19 = vld [vmem:[%s10086_s1 + $0x380] sm:$0xff]  ;;  %v11304_v24 = vld [vmem:[#allocation340_spill] sm:$0xff] }
 0x5aa   : > { %2124 = vst [vmem:[#allocation1 + $0x23] ss:$4 sm:$0xff] %v11295_v60  ;;  %v11300_v60 = vld [vmem:[#allocation332_spill] sm:$0xff] }
 0x5ab   : > { %v2115_v9 = vld.sshfl [vmem:[#allocation1] sm:$0xff pattern:$0x73625140] }
 0x5ac   : > { %2117 = vst [vmem:[#allocation1] ss:$4 sm:$0xff] %v11296_v49  ;;  %3176 = vmatmul.f32.gmra.mxu2 %v2096_v3  ;;  %v2592_v3 = vld [vmem:[%s10086_s1 + $0x388] sm:$0xff] }
 0x5ad   : > { %2118 = vst [vmem:[#allocation1 + $0x1] ss:$4 sm:$0xff] %v11297_v46  ;;  %3239 = vmatpush.msrb.mxu3 %v2592_v3  ;;  %v8201_v46 = vpop.f32.mrf.mxu2  ;;  %v11306_v3 = vld [vmem:[#allocation86_spill] sm:$0xff] }
 0x5ae   : > { %2119 = vst [vmem:[#allocation1 + $0x2] ss:$4 sm:$0xff] %v11298_v58 }
 0x5af   : > { %2120 = vst [vmem:[#allocation1 + $0x3] ss:$4 sm:$0xff] %v11299_v7  ;;  %3240 = vmatpush.msrb.mxu3 %v2591_v19 }
 0x5b1   : > { %v2126_v7 = vld.sshfl [vmem:[#allocation1 + $0x20] sm:$0xff pattern:$0x73625140] }
 0x5b2   : > { %2131 = vst [vmem:[#allocation1 + $0x20] ss:$4 sm:$0xff] %v11304_v24 }
 0x5b3   : > { %2132 = vst [vmem:[#allocation1 + $0x21] ss:$4 sm:$0xff] %v11305_v63  ;;  %v11314_v63 = vld [vmem:[#allocation342_spill] sm:$0xff] }
 0x5b4   : > { %3179 = vmatmul.f32.gmra.mxu2 %v2105_v34  ;;  %2133 = vst [vmem:[#allocation1 + $0x22] ss:$4 sm:$0xff] %v11306_v3  ;;  %v11307_v34 = vld [vmem:[#allocation112_spill] sm:$0xff]  ;;  %v8221_v3 = vpop.f32.mrf.mxu3 }
 0x5b5   : > { %2134 = vst [vmem:[#allocation1 + $0x23] ss:$4 sm:$0xff] %v11307_v34  ;;  %v8211_v19 = vpop.f32.mrf.mxu2  ;;  %v11315_v34 = vld [vmem:[#allocation119_spill] sm:$0xff] }
 0x5b6   : > { %v2125_v49 = vld.sshfl [vmem:[#allocation1] sm:$0xff pattern:$0x73625140]  ;;  %11316 = vst [vmem:[#allocation57_spill] sm:$0xff] %v8221_v3 }
 0x5b7   : > { %2127 = vst [vmem:[#allocation1] ss:$4 sm:$0xff] %v11300_v60  ;;  %v11308_v60 = vld [vmem:[#allocation337_spill] sm:$0xff] }
 0x5b8   : > { %2128 = vst [vmem:[#allocation1 + $0x1] ss:$4 sm:$0xff] %v11301_v25  ;;  %v11309_v25 = vld [vmem:[#allocation338_spill] sm:$0xff]  ;;  %v11378_v3 = vld [vmem:[#allocation401_spill] sm:$0xff] }
 0x5b9   : > { %2129 = vst [vmem:[#allocation1 + $0x2] ss:$4 sm:$0xff] %v11302_v11  ;;  %v11310_v11 = vld [vmem:[#allocation343_spill] sm:$0xff] }
 0x5ba   : > { %2130 = vst [vmem:[#allocation1 + $0x3] ss:$4 sm:$0xff] %v11303_v61  ;;  %v11311_v61 = vld [vmem:[#allocation95_spill] sm:$0xff] }
 0x5bc   : > { %3182 = vmatmul.f32.gmra.mxu2 %v2106_v28  ;;  %v2136_v24 = vld.sshfl [vmem:[#allocation1 + $0x20] sm:$0xff pattern:$0x73625140] }
 0x5bd   : > { %2141 = vst [vmem:[#allocation1 + $0x20] ss:$4 sm:$0xff] %v11312_v26  ;;  %v11313_v28 = vld [vmem:[#allocation345_spill] sm:$0xff]  ;;  %v8223_v51 = vpop.f32.mrf.mxu2  ;;  %v11325_v26 = vld [vmem:[#allocation356_spill] sm:$0xff] }
 0x5be   : > { %2142 = vst [vmem:[#allocation1 + $0x21] ss:$4 sm:$0xff] %v11313_v28 }
 0x5bf   : > { %2143 = vst [vmem:[#allocation1 + $0x22] ss:$4 sm:$0xff] %v11314_v63 }
 0x5c0   : > { %2144 = vst [vmem:[#allocation1 + $0x23] ss:$4 sm:$0xff] %v11315_v34  ;;  %v11324_v34 = vld [vmem:[#allocation355_spill] sm:$0xff] }
 0x5c1   : > { %v2135_v58 = vld.sshfl [vmem:[#allocation1] sm:$0xff pattern:$0x73625140] }
 0x5c2   : > { %2137 = vst [vmem:[#allocation1] ss:$4 sm:$0xff] %v11308_v60 }
 0x5c3   : > { %2138 = vst [vmem:[#allocation1 + $0x1] ss:$4 sm:$0xff] %v11309_v25 }
 0x5c4   : > { %2139 = vst [vmem:[#allocation1 + $0x2] ss:$4 sm:$0xff] %v11310_v11  ;;  %3185 = vmatmul.f32.gmra.mxu2 %v2115_v9  ;;  %v8234_v9 = vpop.f32.mrf.mxu3 }
 0x5c5   : > { %2140 = vst [vmem:[#allocation1 + $0x3] ss:$4 sm:$0xff] %v11311_v61  ;;  %v8236_v25 = vpop.f32.mrf.mxu2 }
 0x5c7   : > { %v8229_v61 = vld.sshfl [vmem:[#allocation1 + $0x20] sm:$0xff pattern:$0x73625140] }
 0x5c8   : > { %2151 = vst [vmem:[#allocation1 + $0x20] ss:$4 sm:$0xff] %v11058_v16 }
 0x5c9   : > { %2152 = vst [vmem:[#allocation1 + $0x21] ss:$4 sm:$0xff] %v7595_v22 }
 0x5ca   : > { %2153 = vst [vmem:[#allocation1 + $0x22] ss:$4 sm:$0xff] %v7598_v55  ;;  %v2614_v55 = vld [vmem:[%s10086_s1 + $0x438] sm:$0xff] }
 0x5cb   : > { %2154 = vst [vmem:[#allocation1 + $0x23] ss:$4 sm:$0xff] %v7581_v36  ;;  %3319 = vmatpush.msrb.mxu0 %v2614_v55  ;;  %v11318_v36 = vld [vmem:[#allocation283_spill] sm:$0xff] }
 0x5cc   : > { %v2145_v60 = vld.sshfl [vmem:[#allocation1] sm:$0xff pattern:$0x73625140]  ;;  %3188 = vmatmul.f32.gmra.mxu2 %v2116_v1  ;;  %v10379_v16 = vrot.slane %v11318_v36, 2  ;;  %v10380_v1 = vrot.slane %v11318_v36, 4  ;;  %v10383_v28 = vrot.slane %v11318_v36, 6 }
 0x5cd   : > { %2147 = vst [vmem:[#allocation1] ss:$4 sm:$0xff] %v11055_v45  ;;  %v8262_v11 = vpop.f32.mrf.mxu2 }
 0x5ce   : > { %2148 = vst [vmem:[#allocation1 + $0x1] ss:$4 sm:$0xff] %v7565_v0  ;;  %v11317_v0 = vld [vmem:[#allocation295_spill] sm:$0xff] }
 0x5cf   : > { %2149 = vst [vmem:[#allocation1 + $0x2] ss:$4 sm:$0xff] %v7568_v41  ;;  %v10382_v45 = vrot.slane %v11317_v0, 2  ;;  %v10381_v41 = vrot.slane %v11317_v0, 4  ;;  %v10378_v22 = vrot.slane %v11317_v0, 6 }
 0x5d0   : > { %2150 = vst [vmem:[#allocation1 + $0x3] ss:$4 sm:$0xff] %v7592_v42 }
 0x5d4   : > { %3191 = vmatmul.f32.gmra.mxu2 %v2125_v49  ;;  %v8260_v49 = vpop.f32.mrf.mxu3 }
 0x5d7   : > { %v8241_v42 = vld.sshfl [vmem:[#allocation1] sm:$0xff pattern:$0x73625140] }
 0x5d8   : > { %2157 = vst [vmem:[#allocation1] ss:$4 sm:$0xff] %v11062_v17  ;;  %v8255_v17 = vld.sshfl [vmem:[#allocation1 + $0x20] sm:$0xff pattern:$0x73625140] }
 0x5d9   : > { %2158 = vst [vmem:[#allocation1 + $0x1] ss:$4 sm:$0xff] %v11317_v0 }
 0x5da   : > { %2159 = vst [vmem:[#allocation1 + $0x2] ss:$4 sm:$0xff] %v10382_v45  ;;  %v11322_v45 = vld [vmem:[#allocation361_spill] sm:$0xff] }
 0x5db   : > { %2160 = vst [vmem:[#allocation1 + $0x3] ss:$4 sm:$0xff] %v10381_v41  ;;  %v11321_v41 = vld [vmem:[#allocation360_spill] sm:$0xff] }
 0x5dc   : > { %3194 = vmatmul.f32.gmra.mxu2 %v2126_v7  ;;  %2161 = vst [vmem:[#allocation1 + $0x20] ss:$4 sm:$0xff] %v10378_v22  ;;  %v11319_v7 = vld [vmem:[#allocation300_spill] sm:$0xff]  ;;  %v2613_v22 = vld [vmem:[%s10086_s1 + $0x430] sm:$0xff] }
 0x5dd   : > { %2162 = vst [vmem:[#allocation1 + $0x21] ss:$4 sm:$0xff] %v11318_v36  ;;  %3320 = vmatpush.msrb.mxu0 %v2613_v22  ;;  %v2612_v22 = vld [vmem:[%s10086_s1 + $0x428] sm:$0xff] }
 0x5de   : > { %2163 = vst [vmem:[#allocation1 + $0x22] ss:$4 sm:$0xff] %v10379_v16  ;;  %v8280_v16 = vpop.f32.mrf.mxu3 }
 0x5df   : > { %2164 = vst [vmem:[#allocation1 + $0x23] ss:$4 sm:$0xff] %v10380_v1  ;;  %v8282_v1 = vpop.f32.mrf.mxu2  ;;  %3321 = vmatpush.msrb.mxu0 %v2612_v22  ;;  %v11333_v22 = vld [vmem:[#allocation364_spill] sm:$0xff] }
 0x5e0   : > { %11320 = vst [vmem:[#allocation59_spill] sm:$0xff] %v8282_v1  ;;  %v4076_v1 = vld [vmem:[#allocation2 + $0x138] sm:$0xff] }
 0x5e2   : > { %v8269_v63 = vld.sshfl [vmem:[#allocation1] sm:$0xff pattern:$0x73625140] }
 0x5e3   : > { %2167 = vst [vmem:[#allocation1] ss:$4 sm:$0xff] %v10383_v28 }
 0x5e4   : > { %2168 = vst [vmem:[#allocation1 + $0x1] ss:$4 sm:$0xff] %v11319_v7  ;;  %3197 = vmatmul.f32.gmra.mxu2 %v2135_v58  ;;  %v11323_v58 = vld [vmem:[#allocation362_spill] sm:$0xff] }
 0x5e6   : > { %v8274_v55 = vld.sshfl [vmem:[#allocation1 + $0x20] sm:$0xff pattern:$0x73625140] }
 0x5e7   : > { %2201 = vst [vmem:[#allocation1 + $0x20] ss:$4 sm:$0xff] %v11082_v44  ;;  %v11327_v44 = vld [vmem:[#allocation358_spill] sm:$0xff]  ;;  %v8298_v39 = vpop.f32.mrf.mxu2 }
 0x5e8   : > { %2203 = vst [vmem:[#allocation1 + $0x21] ss:$4 sm:$0xff] %v11321_v41 }
 0x5e9   : > { %2205 = vst [vmem:[#allocation1 + $0x22] ss:$4 sm:$0xff] %v11322_v45  ;;  %v8296_v45 = vpop.f32.mrf.mxu3 }
 0x5ea   : > { %2207 = vst [vmem:[#allocation1 + $0x23] ss:$4 sm:$0xff] %v11323_v58  ;;  %v11332_v58 = vld [vmem:[#allocation363_spill] sm:$0xff] }
 0x5eb   : > { %v8286_v28 = vld.sshfl [vmem:[#allocation1] sm:$0xff pattern:$0x73625140]  ;;  %11328 = vst [vmem:[#allocation84_spill] sm:$0xff] %v8298_v39 }
 0x5ec   : > { %2193 = vst [vmem:[#allocation1] ss:$4 sm:$0xff] %v11324_v34  ;;  %3200 = vmatmul.f32.gmra.mxu2 %v2136_v24  ;;  %v11329_v34 = vld [vmem:[#allocation368_spill] sm:$0xff]  ;;  %v11331_v24 = vld [vmem:[#allocation370_spill] sm:$0xff]  ;;  %v11517_v39 = vld [vmem:[#allocation301_spill] sm:$0xff] }
 0x5ed   : > { %2195 = vst [vmem:[#allocation1 + $0x1] ss:$4 sm:$0xff] %v11325_v26  ;;  %v11330_v26 = vld [vmem:[#allocation369_spill] sm:$0xff] }
 0x5ee   : > { %2197 = vst [vmem:[#allocation1 + $0x2] ss:$4 sm:$0xff] %v11326_v62 }
 0x5ef   : > { %2199 = vst [vmem:[#allocation1 + $0x3] ss:$4 sm:$0xff] %v11327_v44  ;;  %v2611_v44 = vld [vmem:[%s10086_s1 + $0x420] sm:$0xff] }
 0x5f0   : > { %3322 = vmatpush.msrb.mxu0 %v2611_v44  ;;  %v11340_v44 = vld [vmem:[#allocation377_spill] sm:$0xff] }
 0x5f1   : > { %v2209_v41 = vld.sshfl [vmem:[#allocation1 + $0x20] sm:$0xff pattern:$0x73625140] }
 0x5f2   : > { %2214 = vst [vmem:[#allocation1 + $0x20] ss:$4 sm:$0xff] %v11092_v21  ;;  %v11335_v21 = vld [vmem:[#allocation366_spill] sm:$0xff] }
 0x5f3   : > { %2215 = vst [vmem:[#allocation1 + $0x21] ss:$4 sm:$0xff] %v11329_v34  ;;  %v8311_v34 = vpop.f32.mrf.mxu3 }
 0x5f4   : > { %2216 = vst [vmem:[#allocation1 + $0x22] ss:$4 sm:$0xff] %v11330_v26  ;;  %3203 = vmatmul.f32.gmra.mxu2 %v2145_v60  ;;  %v8313_v60 = vpop.f32.mrf.mxu2 }
 0x5f5   : > { %2217 = vst [vmem:[#allocation1 + $0x23] ss:$4 sm:$0xff] %v11331_v24  ;;  %v11338_v24 = vld [vmem:[#allocation375_spill] sm:$0xff] }
 0x5f6   : > { %v2208_v62 = vld.sshfl [vmem:[#allocation1] sm:$0xff pattern:$0x73625140]  ;;  %11336 = vst [vmem:[#allocation85_spill] sm:$0xff] %v8313_v60 }
 0x5f7   : > { %3241 = vmatmul.f32.vlgmr.msrb.gmra.mxu3 %v2208_v62  ;;  %2210 = vst [vmem:[#allocation1] ss:$4 sm:$0xff] %v11332_v58  ;;  %v11337_v62 = vld [vmem:[#allocation374_spill] sm:$0xff]  ;;  %v11339_v58 = vld [vmem:[#allocation376_spill] sm:$0xff] }
 0x5f8   : > { %2211 = vst [vmem:[#allocation1 + $0x1] ss:$4 sm:$0xff] %v11333_v22 }
 0x5f9   : > { %2212 = vst [vmem:[#allocation1 + $0x2] ss:$4 sm:$0xff] %v11334_v31  ;;  %v11341_v31 = vld [vmem:[#allocation371_spill] sm:$0xff] }
 0x5fa   : > { %2213 = vst [vmem:[#allocation1 + $0x3] ss:$4 sm:$0xff] %v11335_v21  ;;  %v11342_v21 = vld [vmem:[#allocation32_spill] sm:$0xff] }
 0x5fc   : > { %v2219_v26 = vld.sshfl [vmem:[#allocation1 + $0x20] sm:$0xff pattern:$0x73625140]  ;;  %3206 = vmatmul.f32.gmra.mxu2 %v8229_v61  ;;  %v8325_v61 = vpop.f32.mrf.mxu3 }
 0x5fd   : > { %2224 = vst [vmem:[#allocation1 + $0x20] ss:$4 sm:$0xff] %v11337_v62  ;;  %v2610_v62 = vld [vmem:[%s10086_s1 + $0x418] sm:$0xff] }
 0x5fe   : > { %2225 = vst [vmem:[#allocation1 + $0x21] ss:$4 sm:$0xff] %v11338_v24  ;;  %v8332_v24 = vpop.f32.mrf.mxu0  ;;  %3323 = vmatpush.msrb.mxu0 %v2610_v62  ;;  %v2609_v62 = vld [vmem:[%s10086_s1 + $0x410] sm:$0xff] }
 0x5ff   : > { %3244 = vmatmul.f32.gmra.mxu3 %v2209_v41  ;;  %2226 = vst [vmem:[#allocation1 + $0x22] ss:$4 sm:$0xff] %v11339_v58  ;;  %v8327_v41 = vpop.f32.mrf.mxu2 }
 0x600   : > { %2227 = vst [vmem:[#allocation1 + $0x23] ss:$4 sm:$0xff] %v11340_v44  ;;  %v11346_v44 = vld [vmem:[#allocation381_spill] sm:$0xff]  ;;  %3324 = vmatpush.msrb.mxu0 %v2609_v62 }
 0x601   : > { %v2218_v22 = vld.sshfl [vmem:[#allocation1] sm:$0xff pattern:$0x73625140]  ;;  %11345 = vst [vmem:[#allocation63_spill] sm:$0xff] %v8327_v41 }
 0x602   : > { %2220 = vst [vmem:[#allocation1] ss:$4 sm:$0xff] %v11341_v31  ;;  %v11349_v31 = vld [vmem:[#allocation384_spill] sm:$0xff]  ;;  %v11359_v62 = vld [vmem:[#allocation385_spill] sm:$0xff] }
 0x603   : > { %2221 = vst [vmem:[#allocation1 + $0x1] ss:$4 sm:$0xff] %v11342_v21  ;;  %v11350_v21 = vld [vmem:[#allocation378_spill] sm:$0xff] }
 0x604   : > { %2222 = vst [vmem:[#allocation1 + $0x2] ss:$4 sm:$0xff] %v11343_v50  ;;  %3209 = vmatmul.f32.gmra.mxu2 %v8241_v42  ;;  %v11347_v50 = vld [vmem:[#allocation382_spill] sm:$0xff] }
 0x605   : > { %2223 = vst [vmem:[#allocation1 + $0x3] ss:$4 sm:$0xff] %v11344_v48  ;;  %v11348_v48 = vld [vmem:[#allocation383_spill] sm:$0xff] }
 0x607   : > { %3247 = vmatmul.f32.gmra.mxu3 %v2218_v22  ;;  %v2229_v58 = vld.sshfl [vmem:[#allocation1 + $0x20] sm:$0xff pattern:$0x73625140]  ;;  %v11351_v22 = vld [vmem:[#allocation379_spill] sm:$0xff] }
 0x608   : > { %2234 = vst [vmem:[#allocation1 + $0x20] ss:$4 sm:$0xff] %v11346_v44  ;;  %v11353_v44 = vld [vmem:[#allocation380_spill] sm:$0xff] }
 0x609   : > { %2235 = vst [vmem:[#allocation1 + $0x21] ss:$4 sm:$0xff] %v11347_v50  ;;  %v8346_v50 = vpop.f32.mrf.mxu3 }
 0x60a   : > { %2236 = vst [vmem:[#allocation1 + $0x22] ss:$4 sm:$0xff] %v11348_v48  ;;  %v8348_v48 = vpop.f32.mrf.mxu2 }
 0x60b   : > { %2237 = vst [vmem:[#allocation1 + $0x23] ss:$4 sm:$0xff] %v11349_v31  ;;  %v8350_v31 = vpop.f32.mrf.mxu0 }
 0x60c   : > { %v2228_v42 = vld.sshfl [vmem:[#allocation1] sm:$0xff pattern:$0x73625140]  ;;  %3212 = vmatmul.f32.gmra.mxu2 %v8255_v17  ;;  %11354 = vst [vmem:[#allocation64_spill] sm:$0xff] %v8348_v48 }
 0x60d   : > { %2230 = vst [vmem:[#allocation1] ss:$4 sm:$0xff] %v11350_v21  ;;  %v11355_v17 = vld [vmem:[#allocation389_spill] sm:$0xff] }
 0x60e   : > { %2231 = vst [vmem:[#allocation1 + $0x1] ss:$4 sm:$0xff] %v11351_v22  ;;  %v11356_v22 = vld [vmem:[#allocation390_spill] sm:$0xff] }
 0x60f   : > { %3250 = vmatmul.f32.gmra.mxu3 %v2219_v26  ;;  %2232 = vst [vmem:[#allocation1 + $0x2] ss:$4 sm:$0xff] %v11352_v35  ;;  %v11357_v35 = vld [vmem:[#allocation391_spill] sm:$0xff] }
 0x610   : > { %2233 = vst [vmem:[#allocation1 + $0x3] ss:$4 sm:$0xff] %v11353_v44  ;;  %v11360_v44 = vld [vmem:[#allocation386_spill] sm:$0xff] }
 0x611   : > { %v8360_v32 = vpop.f32.mrf.mxu3 }
 0x612   : > { %v2239_v21 = vld.sshfl [vmem:[#allocation1 + $0x20] sm:$0xff pattern:$0x73625140]  ;;  %v8362_v53 = vpop.f32.mrf.mxu2 }
 0x613   : > { %2244 = vst [vmem:[#allocation1 + $0x20] ss:$4 sm:$0xff] %v11355_v17  ;;  %v11363_v17 = vld [vmem:[#allocation388_spill] sm:$0xff] }
 0x614   : > { %2245 = vst [vmem:[#allocation1 + $0x21] ss:$4 sm:$0xff] %v11356_v22  ;;  %3215 = vmatmul.f32.gmra.mxu2 %v8269_v63  ;;  %v8365_v22 = vpop.f32.mrf.mxu0 }
 0x615   : > { %2246 = vst [vmem:[#allocation1 + $0x22] ss:$4 sm:$0xff] %v11357_v35  ;;  %v11365_v35 = vld [vmem:[#allocation398_spill] sm:$0xff] }
 0x616   : > { %2247 = vst [vmem:[#allocation1 + $0x23] ss:$4 sm:$0xff] %v11358_v54  ;;  %v2608_v54 = vld [vmem:[%s10086_s1 + $0x408] sm:$0xff] }
 0x617   : > { %3253 = vmatmul.f32.gmra.mxu3 %v2228_v42  ;;  %v2238_v26 = vld.sshfl [vmem:[#allocation1] sm:$0xff pattern:$0x73625140]  ;;  %11362 = vst [vmem:[#allocation65_spill] sm:$0xff] %v8362_v53  ;;  %3325 = vmatpush.msrb.mxu0 %v2608_v54  ;;  %v11373_v54 = vld [vmem:[#allocation396_spill] sm:$0xff] }
 0x618   : > { %2240 = vst [vmem:[#allocation1] ss:$4 sm:$0xff] %v11359_v62  ;;  %v11364_v42 = vld [vmem:[#allocation397_spill] sm:$0xff] }
 0x619   : > { %2241 = vst [vmem:[#allocation1 + $0x1] ss:$4 sm:$0xff] %v11360_v44  ;;  %v11367_v44 = vld [vmem:[#allocation400_spill] sm:$0xff]  ;;  %v11393_v53 = vld [vmem:[#allocation417_spill] sm:$0xff] }
 0x61a   : > { %2242 = vst [vmem:[#allocation1 + $0x2] ss:$4 sm:$0xff] %v11361_v2  ;;  %v11366_v2 = vld [vmem:[#allocation399_spill] sm:$0xff] }
 0x61b   : > { %2243 = vst [vmem:[#allocation1 + $0x3] ss:$4 sm:$0xff] %v11363_v17  ;;  %v11368_v17 = vld [vmem:[#allocation393_spill] sm:$0xff] }
 0x61c   : > { %3218 = vmatmul.f32.gmra.mxu2 %v8274_v55  ;;  %v8377_v55 = vpop.f32.mrf.mxu3  ;;  %v8383_v5 = vpop.f32.mrf.mxu0 }
 0x61d   : > { %v2249_v63 = vld.sshfl [vmem:[#allocation1 + $0x20] sm:$0xff pattern:$0x73625140]  ;;  %11370 = vst [vmem:[#allocation91_spill] sm:$0xff] %v8377_v55  ;;  %v11524_v55 = vld [vmem:[#allocation292_spill] sm:$0xff] }
 0x61e   : > { %2254 = vst [vmem:[#allocation1 + $0x20] ss:$4 sm:$0xff] %v11364_v42  ;;  %v11372_v42 = vld [vmem:[#allocation395_spill] sm:$0xff] }
 0x61f   : > { %3256 = vmatmul.f32.gmra.mxu3 %v2229_v58  ;;  %2255 = vst [vmem:[#allocation1 + $0x21] ss:$4 sm:$0xff] %v11365_v35  ;;  %v8379_v58 = vpop.f32.mrf.mxu2  ;;  %v4068_v35 = vld [vmem:[#allocation2 + $0xf8] sm:$0xff] }
 0x620   : > { %2256 = vst [vmem:[#allocation1 + $0x22] ss:$4 sm:$0xff] %v11366_v2  ;;  %v2607_v2 = vld [vmem:[%s10086_s1 + $0x400] sm:$0xff]  ;;  %4246 = vmatpush.msra.mxu2 %v4068_v35 }
 0x621   : > { %2257 = vst [vmem:[#allocation1 + $0x23] ss:$4 sm:$0xff] %v11367_v44  ;;  %3326 = vmatpush.msrb.mxu0 %v2607_v2  ;;  %v11374_v44 = vld [vmem:[#allocation405_spill] sm:$0xff]  ;;  %v11381_v2 = vld [vmem:[#allocation403_spill] sm:$0xff] }
 0x622   : > { %v2248_v62 = vld.sshfl [vmem:[#allocation1] sm:$0xff pattern:$0x73625140]  ;;  %11371 = vst [vmem:[#allocation92_spill] sm:$0xff] %v8379_v58  ;;  %v11387_v58 = vld [vmem:[#allocation412_spill] sm:$0xff] }
 0x623   : > { %2250 = vst [vmem:[#allocation1] ss:$4 sm:$0xff] %v11368_v17  ;;  %v11375_v17 = vld [vmem:[#allocation406_spill] sm:$0xff] }
 0x624   : > { %2251 = vst [vmem:[#allocation1 + $0x1] ss:$4 sm:$0xff] %v11369_v30  ;;  %3221 = vmatmul.f32.gmra.mxu2 %v8286_v28  ;;  %v8397_v35 = vpop.f32.mrf.mxu0 }
 0x625   : > { %2252 = vst [vmem:[#allocation1 + $0x2] ss:$4 sm:$0xff] %v11372_v42  ;;  %v11376_v42 = vld [vmem:[#allocation407_spill] sm:$0xff] }
 0x626   : > { %2253 = vst [vmem:[#allocation1 + $0x3] ss:$4 sm:$0xff] %v11373_v54  ;;  %v11380_v54 = vld [vmem:[#allocation402_spill] sm:$0xff] }
 0x627   : > { %3259 = vmatmul.f32.gmra.mxu3 %v2238_v26  ;;  %v8394_v26 = vpop.f32.mrf.mxu3 }
 0x628   : > { %v2259_v30 = vld.sshfl [vmem:[#allocation1 + $0x20] sm:$0xff pattern:$0x73625140]  ;;  %11379 = vst [vmem:[#allocation93_spill] sm:$0xff] %v8394_v26 }
 0x629   : > { %2264 = vst [vmem:[#allocation1 + $0x20] ss:$4 sm:$0xff] %v11374_v44  ;;  %v11382_v44 = vld [vmem:[#allocation404_spill] sm:$0xff]  ;;  %v4040_v26 = vld [vmem:[#allocation2 + $0x18] sm:$0xff] }
 0x62a   : > { %2265 = vst [vmem:[#allocation1 + $0x21] ss:$4 sm:$0xff] %v11375_v17 }
 0x62b   : > { %2266 = vst [vmem:[#allocation1 + $0x22] ss:$4 sm:$0xff] %v11376_v42 }
 0x62c   : > { %2267 = vst [vmem:[#allocation1 + $0x23] ss:$4 sm:$0xff] %v11377_v52  ;;  %v11384_v52 = vld [vmem:[#allocation409_spill] sm:$0xff] }
 0x62d   : > { %v2258_v28 = vld.sshfl [vmem:[#allocation1] sm:$0xff pattern:$0x73625140] }
 0x62e   : > { %2260 = vst [vmem:[#allocation1] ss:$4 sm:$0xff] %v11378_v3  ;;  %v8404_v3 = vpop.f32.mrf.mxu0 }
 0x62f   : > { %3262 = vmatmul.f32.gmra.mxu3 %v2239_v21  ;;  %2261 = vst [vmem:[#allocation1 + $0x1] ss:$4 sm:$0xff] %v11380_v54  ;;  %v8401_v42 = vpop.f32.mrf.mxu3  ;;  %v11386_v54 = vld [vmem:[#allocation411_spill] sm:$0xff] }
 0x630   : > { %2262 = vst [vmem:[#allocation1 + $0x2] ss:$4 sm:$0xff] %v11381_v2  ;;  %v11388_v2 = vld [vmem:[#allocation413_spill] sm:$0xff] }
 0x631   : > { %2263 = vst [vmem:[#allocation1 + $0x3] ss:$4 sm:$0xff] %v11382_v44  ;;  %v11391_v44 = vld [vmem:[#allocation416_spill] sm:$0xff] }
 0x632   : > { %11383 = vst [vmem:[#allocation94_spill] sm:$0xff] %v8401_v42  ;;  %v1060_v42 = vrot.slane %v11319_v7, 7 }
 0x633   : > { %v8407_v21 = vld.sshfl [vmem:[#allocation1 + $0x20] sm:$0xff pattern:$0x73625140] }
 0x634   : > { %2274 = vst [vmem:[#allocation1 + $0x20] ss:$4 sm:$0xff] %v11388_v2  ;;  %v11396_v2 = vld [vmem:[#allocation420_spill] sm:$0xff] }
 0x635   : > { %2275 = vst [vmem:[#allocation1 + $0x21] ss:$4 sm:$0xff] %v11389_v27  ;;  %v11397_v27 = vld [vmem:[#allocation421_spill] sm:$0xff] }
 0x636   : > { %2277 = vst [vmem:[#allocation1 + $0x23] ss:$4 sm:$0xff] %v11391_v44  ;;  %v11399_v44 = vld [vmem:[#allocation423_spill] sm:$0xff] }
 0x637   : > { %3265 = vmatmul.f32.gmra.mxu3 %v2248_v62  ;;  %v11390_v62 = vld [vmem:[#allocation415_spill] sm:$0xff] }
 0x638   : > { %v2268_v17 = vld.sshfl [vmem:[#allocation1] sm:$0xff pattern:$0x73625140]  ;;  %2276 = vst [vmem:[#allocation1 + $0x22] ss:$4 sm:$0xff] %v11390_v62  ;;  %v11398_v62 = vld [vmem:[#allocation422_spill] sm:$0xff] }
 0x639   : > { %2270 = vst [vmem:[#allocation1] ss:$4 sm:$0xff] %v11384_v52  ;;  %v8415_v52 = vpop.f32.mrf.mxu3 }
 0x63a   : > { %2271 = vst [vmem:[#allocation1 + $0x1] ss:$4 sm:$0xff] %v11385_v33  ;;  %v8419_v33 = vpop.f32.mrf.mxu0 }
 0x63b   : > { %2272 = vst [vmem:[#allocation1 + $0x2] ss:$4 sm:$0xff] %v11386_v54  ;;  %v11394_v54 = vld [vmem:[#allocation418_spill] sm:$0xff] }
 0x63c   : > { %2273 = vst [vmem:[#allocation1 + $0x3] ss:$4 sm:$0xff] %v11387_v58  ;;  %v11395_v58 = vld [vmem:[#allocation419_spill] sm:$0xff] }
 0x63d   : > { %11392 = vst [vmem:[#allocation72_spill] sm:$0xff] %v8415_v52 }
 0x63f   : > { %3268 = vmatmul.f32.gmra.mxu3 %v2249_v63  ;;  %v8425_v63 = vld.sshfl [vmem:[#allocation1 + $0x20] sm:$0xff pattern:$0x73625140] }
 0x640   : > { %2284 = vst [vmem:[#allocation1 + $0x20] ss:$4 sm:$0xff] %v11397_v27 }
 0x641   : > { %2285 = vst [vmem:[#allocation1 + $0x21] ss:$4 sm:$0xff] %v11398_v62  ;;  %v8431_v48 = vpop.f32.mrf.mxu3  ;;  %v11406_v62 = vrot.slane %v11317_v0, 4 }
 0x642   : > { %2286 = vst [vmem:[#allocation1 + $0x22] ss:$4 sm:$0xff] %v11399_v44 }
 0x643   : > { %v8417_v12 = vld.sshfl [vmem:[#allocation1] sm:$0xff pattern:$0x73625140]  ;;  %2287 = vst [vmem:[#allocation1 + $0x23] ss:$4 sm:$0xff] %v11400_v59  ;;  %v1042_v44 = vrot.slane %v11406_v62, 7 }
 0x644   : > { %2280 = vst [vmem:[#allocation1] ss:$4 sm:$0xff] %v11393_v53  ;;  %v8433_v53 = vpop.f32.mrf.mxu0  ;;  %v11409_v62 = vrot.slane %v11318_v36, 4 }
 0x645   : > { %2281 = vst [vmem:[#allocation1 + $0x1] ss:$4 sm:$0xff] %v11394_v54 }
 0x646   : > { %2282 = vst [vmem:[#allocation1 + $0x2] ss:$4 sm:$0xff] %v11395_v58  ;;  %v11403_v58 = vld [vmem:[#allocation28_spill] sm:$0xff]  ;;  %v1054_v52 = vrot.slane %v11409_v62, 7 }
 0x647   : > { %3271 = vmatmul.f32.gmra.mxu3 %v2258_v28  ;;  %2283 = vst [vmem:[#allocation1 + $0x3] ss:$4 sm:$0xff] %v11396_v2  ;;  %v11402_v28 = vld [vmem:[#allocation27_spill] sm:$0xff]  ;;  %v11404_v2 = vrot.slane %v11317_v0, 2 }
 0x648   : > { %11401 = vst [vmem:[#allocation73_spill] sm:$0xff] %v8431_v48 }
 0x649   : > { %v1039_v27 = vrot.slane %v11404_v2, 7  ;;  %v11407_v2 = vrot.slane %v11317_v0, 6 }
 0x64a   : > { %v8445_v59 = vld.sshfl [vmem:[#allocation1 + $0x20] sm:$0xff pattern:$0x73625140] }
 0x64b   : > { %2294 = vst [vmem:[#allocation1 + $0x20] ss:$4 sm:$0xff] %v7826_v18  ;;  %v1045_v48 = vrot.slane %v11407_v2, 7  ;;  %v8459_v18 = vpop.f32.mrf.mxu3 }
 0x64c   : > { %2295 = vst [vmem:[#allocation1 + $0x21] ss:$4 sm:$0xff] %v7830_v57  ;;  %v8461_v57 = vpop.f32.mrf.mxu0 }
 0x64d   : > { %2296 = vst [vmem:[#allocation1 + $0x22] ss:$4 sm:$0xff] %v7836_v37  ;;  %v1047_v47 = vrot.slane %v1045_v48, 2 }
 0x64e   : > { %v8435_v54 = vld.sshfl [vmem:[#allocation1] sm:$0xff pattern:$0x73625140]  ;;  %2297 = vst [vmem:[#allocation1 + $0x23] ss:$4 sm:$0xff] %v7841_v10  ;;  %v11411_v10 = vrot.slane %v11318_v36, 6 }
 0x64f   : > { %3274 = vmatmul.f32.gmra.mxu3 %v2259_v30  ;;  %2290 = vst [vmem:[#allocation1] ss:$4 sm:$0xff] %v11402_v28  ;;  %v5020_v30 = vrot.slane %v11317_v0, 9  ;;  %v1048_v28 = vrot.slane %v11318_v36, 7 }
 0x650   : > { %2291 = vst [vmem:[#allocation1 + $0x1] ss:$4 sm:$0xff] %v11403_v58  ;;  %v1041_v58 = vrot.slane %v1039_v27, 2 }
 0x651   : > { %2292 = vst [vmem:[#allocation1 + $0x2] ss:$4 sm:$0xff] %v11405_v43  ;;  %v11408_v43 = vrot.slane %v11318_v36, 2  ;;  %v1040_v0 = vsel %vm6516_vm6, %v5020_v30, %v1039_v27  ;;  %v1050_v2 = vrot.slane %v1048_v28, 2  ;;  %v1049_v27 = vsel %vm6516_vm6, %v1047_v47, %v1048_v28  ;;  %v4051_v30 = vld [vmem:[#allocation2 + $0x70] sm:$0xff] }
 0x652   : > { %2293 = vst [vmem:[#allocation1 + $0x3] ss:$4 sm:$0xff] %v7821_v56  ;;  %v1044_v56 = vrot.slane %v1042_v44, 2  ;;  %4182 = vmatpush.msra.mxu1 %v4051_v30  ;;  %v1062_v47 = vrot.slane %v1060_v42, 2  ;;  %v5021_v28 = vrot.slane %v11319_v7, 9  ;;  %v11420_v30 = vld [vmem:[#allocation202_spill] sm:$0xff] }
 0x653   : > { %v1051_v41 = vrot.slane %v11408_v43, 7  ;;  %11410 = vst [vmem:[#allocation99_spill] sm:$0xff] %v8459_v18  ;;  %v1043_v43 = vsel %vm6516_vm6, %v1041_v58, %v1042_v44  ;;  %v1057_v18 = vrot.slane %v11411_v10, 7  ;;  %v4067_v44 = vld [vmem:[#allocation2 + $0xf0] sm:$0xff]  ;;  %v11415_v10 = vld [vmem:[#allocation227_spill] sm:$0xff] }
 0x654   : > { %v1046_v62 = vsel %vm6516_vm6, %v1044_v56, %v1045_v48  ;;  %4247 = vmatpush.msra.mxu2 %v4067_v44 }
 0x655   : > { %v1053_v60 = vrot.slane %v1051_v41, 2  ;;  %v1052_v58 = vsel %vm6516_vm6, %v1050_v2, %v1051_v41  ;;  %v1059_v48 = vrot.slane %v1057_v18, 2  ;;  %v8487_v41 = vpop.f32.mrf.mxu3  ;;  %v4050_v2 = vld [vmem:[#allocation2 + $0x68] sm:$0xff] }
 0x656   : > { %11412 = vst [vmem:[#allocation100_spill] sm:$0xff] %v8487_v41  ;;  %4183 = vmatpush.msra.mxu1 %v4050_v2  ;;  %v11503_v41 = vld [vmem:[#allocation273_spill] sm:$0xff] }
 0x657   : > { %3277 = vmatmul.f32.gmra.mxu3 %v2268_v17  ;;  %v1056_v17 = vrot.slane %v1054_v52, 2  ;;  %v1055_v36 = vsel %vm6516_vm6, %v1053_v60, %v1054_v52  ;;  %v8489_v60 = vpop.f32.mrf.mxu0  ;;  %v1061_v52 = vsel %vm6516_vm6, %v1059_v48, %v1060_v42  ;;  %v4049_v48 = vld [vmem:[#allocation2 + $0x60] sm:$0xff] }
 0x658   : > { %11413 = vst [vmem:[#allocation101_spill] sm:$0xff] %v8489_v60  ;;  %4184 = vmatpush.msra.mxu1 %v4049_v48  ;;  %v11437_v48 = vld [vmem:[#allocation243_spill] sm:$0xff] }
 0x659   : > { %v8467_v37 = vld.sshfl [vmem:[#allocation1] sm:$0xff pattern:$0x73625140]  ;;  %v1058_v56 = vsel %vm6516_vm6, %v1056_v17, %v1057_v18  ;;  %v1064_v18 = vsel %vm6516_vm6, %v1062_v47, %v5021_v28  ;;  %v11417_v17 = vld [vmem:[#allocation228_spill] sm:$0xff] }
 0x65a   : > { %2300 = vst [vmem:[#allocation1] ss:$4 sm:$0xff] %v7846_v15  ;;  %v8481_v15 = vld.sshfl [vmem:[#allocation1 + $0x20] sm:$0xff pattern:$0x73625140]  ;;  %v11424_v47 = vld [vmem:[#allocation216_spill] sm:$0xff] }
 0x65b   : > { %2301 = vst [vmem:[#allocation1 + $0x1] ss:$4 sm:$0xff] %v1040_v0  ;;  %v4066_v0 = vld [vmem:[#allocation2 + $0xe8] sm:$0xff] }
 0x65c   : > { %2302 = vst [vmem:[#allocation1 + $0x2] ss:$4 sm:$0xff] %v1043_v43  ;;  %4248 = vmatpush.msra.mxu2 %v4066_v0  ;;  %v11414_v43 = vld [vmem:[#allocation226_spill] sm:$0xff]  ;;  %v11426_v0 = vld [vmem:[#allocation217_spill] sm:$0xff] }
 0x65d   : > { %2303 = vst [vmem:[#allocation1 + $0x3] ss:$4 sm:$0xff] %v1046_v62  ;;  %v4065_v62 = vld [vmem:[#allocation2 + $0xe0] sm:$0xff]  ;;  %v8502_v42 = vpop.f32.mrf.mxu3 }
 0x65e   : > { %2304 = vst [vmem:[#allocation1 + $0x20] ss:$4 sm:$0xff] %v1049_v27  ;;  %4249 = vmatpush.msra.mxu2 %v4065_v62  ;;  %v11419_v27 = vld [vmem:[#allocation210_spill] sm:$0xff]  ;;  %v4064_v62 = vld [vmem:[#allocation2 + $0xd8] sm:$0xff] }
 0x65f   : > { %3280 = vmatmul.f32.gmra.mxu3 %v8407_v21  ;;  %2305 = vst [vmem:[#allocation1 + $0x21] ss:$4 sm:$0xff] %v1052_v58  ;;  %v8505_v23 = vpop.f32.mrf.mxu0  ;;  %v11422_v58 = vld [vmem:[#allocation204_spill] sm:$0xff] }
 0x660   : > { %2306 = vst [vmem:[#allocation1 + $0x22] ss:$4 sm:$0xff] %v1055_v36  ;;  %v11423_v36 = vld [vmem:[#allocation225_spill] sm:$0xff]  ;;  %4250 = vmatpush.msra.mxu2 %v4064_v62  ;;  %v11442_v62 = vld [vmem:[#allocation222_spill] sm:$0xff] }
 0x661   : > { %2307 = vst [vmem:[#allocation1 + $0x23] ss:$4 sm:$0xff] %v1058_v56 }
 0x662   : > { %11416 = vst [vmem:[#allocation79_spill] sm:$0xff] %v8502_v42 }
 0x663   : > { %11418 = vst [vmem:[#allocation80_spill] sm:$0xff] %v8505_v23  ;;  %v4080_v23 = vld [vmem:[#allocation2 + $0x158] sm:$0xff] }
 0x664   : > { %v8495_v7 = vld.sshfl [vmem:[#allocation1] sm:$0xff pattern:$0x73625140] }
 0x665   : > { %2310 = vst [vmem:[#allocation1] ss:$4 sm:$0xff] %v1061_v52  ;;  %v8516_v28 = vpop.f32.mrf.mxu3  ;;  %v11428_v52 = vld [vmem:[#allocation218_spill] sm:$0xff] }
 0x666   : > { %2311 = vst [vmem:[#allocation1 + $0x1] ss:$4 sm:$0xff] %v1064_v18  ;;  %v11429_v18 = vld [vmem:[#allocation219_spill] sm:$0xff] }
 0x667   : > { %3283 = vmatmul.f32.gmra.mxu3 %v8417_v12  ;;  %v11421_v12 = vld [vmem:[#allocation203_spill] sm:$0xff]  ;;  %11425 = vst [vmem:[#allocation81_spill] sm:$0xff] %v8516_v28  ;;  %v8519_v2 = vpop.f32.mrf.mxu0  ;;  %v11493_v28 = vld [vmem:[#allocation281_spill] sm:$0xff] }
 0x668   : > { %v8498_v21 = vld.sshfl [vmem:[#allocation1 + $0x20] sm:$0xff pattern:$0x73625140]  ;;  %11427 = vst [vmem:[#allocation83_spill] sm:$0xff] %v8519_v2  ;;  %v11512_v2 = vld [vmem:[#allocation298_spill] sm:$0xff] }
 0x669   : > { %2344 = vst [vmem:[#allocation1 + $0x20] ss:$4 sm:$0xff] %v11414_v43  ;;  %v11430_v43 = vld [vmem:[#allocation211_spill] sm:$0xff] }
 0x66a   : > { %2346 = vst [vmem:[#allocation1 + $0x21] ss:$4 sm:$0xff] %v11415_v10  ;;  %v4048_v10 = vld [vmem:[#allocation2 + $0x58] sm:$0xff] }
 0x66b   : > { %2348 = vst [vmem:[#allocation1 + $0x22] ss:$4 sm:$0xff] %v11417_v17  ;;  %v11431_v17 = vld [vmem:[#allocation231_spill] sm:$0xff]  ;;  %4185 = vmatpush.msra.mxu1 %v4048_v10 }
 0x66c   : > { %2350 = vst [vmem:[#allocation1 + $0x23] ss:$4 sm:$0xff] %v11419_v27  ;;  %v11432_v27 = vld [vmem:[#allocation232_spill] sm:$0xff]  ;;  %v11443_v10 = vld [vmem:[#allocation223_spill] sm:$0xff] }
 0x66d   : > { %v8508_v44 = vld.sshfl [vmem:[#allocation1] sm:$0xff pattern:$0x73625140] }
 0x66e   : > { %2336 = vst [vmem:[#allocation1] ss:$4 sm:$0xff] %v11420_v30  ;;  %v11433_v30 = vld [vmem:[#allocation233_spill] sm:$0xff] }
 0x66f   : > { %2338 = vst [vmem:[#allocation1 + $0x1] ss:$4 sm:$0xff] %v11421_v12  ;;  %3286 = vmatmul.f32.gmra.mxu3 %v8425_v63 }
 0x670   : > { %2340 = vst [vmem:[#allocation1 + $0x2] ss:$4 sm:$0xff] %v11422_v58  ;;  %v8528_v58 = vpop.f32.mrf.mxu3 }
 0x671   : > { %2342 = vst [vmem:[#allocation1 + $0x3] ss:$4 sm:$0xff] %v11423_v36  ;;  %v11435_v36 = vld [vmem:[#allocation224_spill] sm:$0xff] }
 0x672   : > { %11434 = vst [vmem:[#allocation107_spill] sm:$0xff] %v8528_v58  ;;  %v4058_v58 = vld [vmem:[#allocation2 + $0xa8] sm:$0xff] }
 0x673   : > { %v2352_v56 = vld.sshfl [vmem:[#allocation1 + $0x20] sm:$0xff pattern:$0x73625140] }
 0x674   : > { %2357 = vst [vmem:[#allocation1 + $0x20] ss:$4 sm:$0xff] %v11424_v47  ;;  %v11438_v47 = vld [vmem:[#allocation244_spill] sm:$0xff] }
 0x675   : > { %2358 = vst [vmem:[#allocation1 + $0x21] ss:$4 sm:$0xff] %v11426_v0  ;;  %v4063_v0 = vld [vmem:[#allocation2 + $0xd0] sm:$0xff] }
 0x676   : > { %2359 = vst [vmem:[#allocation1 + $0x22] ss:$4 sm:$0xff] %v11428_v52  ;;  %v11439_v52 = vld [vmem:[#allocation245_spill] sm:$0xff]  ;;  %4251 = vmatpush.msra.mxu2 %v4063_v0 }
 0x677   : > { %2360 = vst [vmem:[#allocation1 + $0x23] ss:$4 sm:$0xff] %v11429_v18  ;;  %3289 = vmatmul.f32.gmra.mxu3 %v8435_v54  ;;  %v8532_v54 = vpop.f32.mrf.mxu0 }
 0x678   : > { %v2351_v63 = vld.sshfl [vmem:[#allocation1] sm:$0xff pattern:$0x73625140]  ;;  %11436 = vst [vmem:[#allocation108_spill] sm:$0xff] %v8532_v54 }
 0x679   : > { %3327 = vmatmul.f32.vlgmr.msrb.gmra.mxu0 %v2351_v63  ;;  %2353 = vst [vmem:[#allocation1] ss:$4 sm:$0xff] %v11430_v43  ;;  %v11440_v63 = vld [vmem:[#allocation238_spill] sm:$0xff]  ;;  %v11441_v43 = vld [vmem:[#allocation239_spill] sm:$0xff]  ;;  %v11511_v54 = vld [vmem:[#allocation297_spill] sm:$0xff] }
 0x67a   : > { %2354 = vst [vmem:[#allocation1 + $0x1] ss:$4 sm:$0xff] %v11431_v17  ;;  %v4047_v17 = vld [vmem:[#allocation2 + $0x50] sm:$0xff] }
 0x67b   : > { %2355 = vst [vmem:[#allocation1 + $0x2] ss:$4 sm:$0xff] %v11432_v27  ;;  %4186 = vmatpush.msra.mxu1 %v4047_v17 }
 0x67c   : > { %2356 = vst [vmem:[#allocation1 + $0x3] ss:$4 sm:$0xff] %v11433_v30  ;;  %v11446_v30 = vld [vmem:[#allocation250_spill] sm:$0xff] }
 0x67e   : > { %v2362_v12 = vld.sshfl [vmem:[#allocation1 + $0x20] sm:$0xff pattern:$0x73625140] }
 0x67f   : > { %2367 = vst [vmem:[#allocation1 + $0x20] ss:$4 sm:$0xff] %v11435_v36  ;;  %3292 = vmatmul.f32.gmra.mxu3 %v8445_v59  ;;  %v8542_v59 = vpop.f32.mrf.mxu3  ;;  %v8544_v27 = vpop.f32.mrf.mxu0  ;;  %v11447_v36 = vld [vmem:[#allocation251_spill] sm:$0xff] }
 0x680   : > { %2368 = vst [vmem:[#allocation1 + $0x21] ss:$4 sm:$0xff] %v11437_v48  ;;  %v11448_v48 = vld [vmem:[#allocation234_spill] sm:$0xff] }
 0x681   : > { %3330 = vmatmul.f32.gmra.mxu0 %v2352_v56  ;;  %2369 = vst [vmem:[#allocation1 + $0x22] ss:$4 sm:$0xff] %v11438_v47  ;;  %v11449_v47 = vld [vmem:[#allocation235_spill] sm:$0xff] }
 0x682   : > { %2370 = vst [vmem:[#allocation1 + $0x23] ss:$4 sm:$0xff] %v11439_v52  ;;  %v11450_v52 = vld [vmem:[#allocation246_spill] sm:$0xff] }
 0x683   : > { %v2361_v18 = vld.sshfl [vmem:[#allocation1] sm:$0xff pattern:$0x73625140]  ;;  %11444 = vst [vmem:[#allocation87_spill] sm:$0xff] %v8542_v59 }
 0x684   : > { %2363 = vst [vmem:[#allocation1] ss:$4 sm:$0xff] %v11440_v63  ;;  %v4062_v63 = vld [vmem:[#allocation2 + $0xc8] sm:$0xff] }
 0x685   : > { %2364 = vst [vmem:[#allocation1 + $0x1] ss:$4 sm:$0xff] %v11441_v43  ;;  %v4046_v43 = vld [vmem:[#allocation2 + $0x48] sm:$0xff]  ;;  %4252 = vmatpush.msra.mxu2 %v4062_v63  ;;  %v11462_v63 = vld [vmem:[#allocation256_spill] sm:$0xff] }
 0x686   : > { %2365 = vst [vmem:[#allocation1 + $0x2] ss:$4 sm:$0xff] %v11442_v62  ;;  %v11453_v62 = vld [vmem:[#allocation249_spill] sm:$0xff]  ;;  %4187 = vmatpush.msra.mxu1 %v4046_v43  ;;  %v8567_v43 = vpop.f32.mrf.mxu1 }
 0x687   : > { %2366 = vst [vmem:[#allocation1 + $0x3] ss:$4 sm:$0xff] %v11443_v10  ;;  %3295 = vmatmul.f32.gmra.mxu3 %v8467_v37  ;;  %v11451_v37 = vld [vmem:[#allocation229_spill] sm:$0xff]  ;;  %v8555_v10 = vpop.f32.mrf.mxu3  ;;  %v8557_v17 = vpop.f32.mrf.mxu0 }
 0x688   : > { %11445 = vst [vmem:[#allocation88_spill] sm:$0xff] %v8544_v27 }
 0x689   : > { %3333 = vmatmul.f32.gmra.mxu0 %v2361_v18  ;;  %v2372_v56 = vld.sshfl [vmem:[#allocation1 + $0x20] sm:$0xff pattern:$0x73625140]  ;;  %v11452_v18 = vld [vmem:[#allocation230_spill] sm:$0xff]  ;;  %11454 = vst [vmem:[#allocation89_spill] sm:$0xff] %v8555_v10  ;;  %v11474_v10 = vld [vmem:[#allocation264_spill] sm:$0xff] }
 0x68a   : > { %2377 = vst [vmem:[#allocation1 + $0x20] ss:$4 sm:$0xff] %v11446_v30 }
 0x68b   : > { %2378 = vst [vmem:[#allocation1 + $0x21] ss:$4 sm:$0xff] %v11447_v36  ;;  %v11456_v36 = vld [vmem:[#allocation240_spill] sm:$0xff] }
 0x68c   : > { %2379 = vst [vmem:[#allocation1 + $0x22] ss:$4 sm:$0xff] %v11448_v48  ;;  %v11457_v48 = vld [vmem:[#allocation241_spill] sm:$0xff] }
 0x68d   : > { %2380 = vst [vmem:[#allocation1 + $0x23] ss:$4 sm:$0xff] %v11449_v47 }
 0x68e   : > { %v2371_v0 = vld.sshfl [vmem:[#allocation1] sm:$0xff pattern:$0x73625140]  ;;  %11455 = vst [vmem:[#allocation113_spill] sm:$0xff] %v8557_v17  ;;  %v11509_v17 = vld [vmem:[#allocation278_spill] sm:$0xff] }
 0x68f   : > { %2373 = vst [vmem:[#allocation1] ss:$4 sm:$0xff] %v11450_v52  ;;  %3298 = vmatmul.f32.gmra.mxu3 %v8481_v15  ;;  %v11458_v15 = vld [vmem:[#allocation242_spill] sm:$0xff] }
 0x690   : > { %2374 = vst [vmem:[#allocation1 + $0x1] ss:$4 sm:$0xff] %v11451_v37  ;;  %v4061_v52 = vld [vmem:[#allocation2 + $0xc0] sm:$0xff]  ;;  %v11460_v37 = vld [vmem:[#allocation236_spill] sm:$0xff] }
 0x691   : > { %3336 = vmatmul.f32.gmra.mxu0 %v2362_v12  ;;  %2375 = vst [vmem:[#allocation1 + $0x2] ss:$4 sm:$0xff] %v11452_v18  ;;  %v11459_v12 = vld [vmem:[#allocation261_spill] sm:$0xff]  ;;  %4253 = vmatpush.msra.mxu2 %v4061_v52  ;;  %v11469_v52 = vld [vmem:[#allocation268_spill] sm:$0xff] }
 0x692   : > { %2376 = vst [vmem:[#allocation1 + $0x3] ss:$4 sm:$0xff] %v11453_v62  ;;  %v11461_v18 = vld [vmem:[#allocation237_spill] sm:$0xff]  ;;  %v8569_v62 = vpop.f32.mrf.mxu3 }
 0x693   : > { %11463 = vst [vmem:[#allocation114_spill] sm:$0xff] %v8567_v43 }
 0x694   : > { %v2382_v30 = vld.sshfl [vmem:[#allocation1 + $0x20] sm:$0xff pattern:$0x73625140]  ;;  %11464 = vst [vmem:[#allocation115_spill] sm:$0xff] %v8569_v62  ;;  %v8581_v62 = vpop.f32.mrf.mxu1 }
 0x695   : > { %2387 = vst [vmem:[#allocation1 + $0x20] ss:$4 sm:$0xff] %v11456_v36  ;;  %v11465_v36 = vld [vmem:[#allocation257_spill] sm:$0xff] }
 0x696   : > { %2388 = vst [vmem:[#allocation1 + $0x21] ss:$4 sm:$0xff] %v11457_v48  ;;  %v8572_v48 = vpop.f32.mrf.mxu0 }
 0x697   : > { %2389 = vst [vmem:[#allocation1 + $0x22] ss:$4 sm:$0xff] %v11458_v15  ;;  %3301 = vmatmul.f32.gmra.mxu3 %v8495_v7  ;;  %v11468_v15 = vld [vmem:[#allocation267_spill] sm:$0xff] }
 0x698   : > { %2390 = vst [vmem:[#allocation1 + $0x23] ss:$4 sm:$0xff] %v11459_v12  ;;  %v4045_v12 = vld [vmem:[#allocation2 + $0x40] sm:$0xff] }
 0x699   : > { %3339 = vmatmul.f32.gmra.mxu0 %v2371_v0  ;;  %v2381_v47 = vld.sshfl [vmem:[#allocation1] sm:$0xff pattern:$0x73625140]  ;;  %11466 = vst [vmem:[#allocation116_spill] sm:$0xff] %v8572_v48  ;;  %v11467_v0 = vld [vmem:[#allocation248_spill] sm:$0xff]  ;;  %4188 = vmatpush.msra.mxu1 %v4045_v12 }
 0x69a   : > { %2383 = vst [vmem:[#allocation1] ss:$4 sm:$0xff] %v11460_v37  ;;  %v11470_v37 = vld [vmem:[#allocation269_spill] sm:$0xff]  ;;  %v11502_v48 = vld [vmem:[#allocation272_spill] sm:$0xff] }
 0x69b   : > { %2384 = vst [vmem:[#allocation1 + $0x1] ss:$4 sm:$0xff] %v11461_v18  ;;  %v4044_v12 = vld [vmem:[#allocation2 + $0x38] sm:$0xff] }
 0x69c   : > { %2385 = vst [vmem:[#allocation1 + $0x2] ss:$4 sm:$0xff] %v11462_v63  ;;  %v11471_v63 = vld [vmem:[#allocation262_spill] sm:$0xff]  ;;  %4189 = vmatpush.msra.mxu1 %v4044_v12  ;;  %v8597_v59 = vpop.f32.mrf.mxu1 }
 0x69d   : > { %2386 = vst [vmem:[#allocation1 + $0x3] ss:$4 sm:$0xff] %v11465_v36  ;;  %v11472_v36 = vld [vmem:[#allocation263_spill] sm:$0xff] }
 0x69f   : > { %3304 = vmatmul.f32.gmra.mxu3 %v8498_v21  ;;  %v2392_v7 = vld.sshfl [vmem:[#allocation1 + $0x20] sm:$0xff pattern:$0x73625140]  ;;  %v8583_v21 = vpop.f32.mrf.mxu3 }
 0x6a0   : > { %2397 = vst [vmem:[#allocation1 + $0x20] ss:$4 sm:$0xff] %v11467_v0  ;;  %v11476_v0 = vld [vmem:[#allocation247_spill] sm:$0xff] }
 0x6a1   : > { %3342 = vmatmul.f32.gmra.mxu0 %v2372_v56  ;;  %2398 = vst [vmem:[#allocation1 + $0x21] ss:$4 sm:$0xff] %v11468_v15  ;;  %v8587_v56 = vpop.f32.mrf.mxu0  ;;  %v4060_v15 = vld [vmem:[#allocation2 + $0xb8] sm:$0xff] }
 0x6a2   : > { %2399 = vst [vmem:[#allocation1 + $0x22] ss:$4 sm:$0xff] %v11469_v52  ;;  %4254 = vmatpush.msra.mxu2 %v4060_v15  ;;  %v4059_v15 = vld [vmem:[#allocation2 + $0xb0] sm:$0xff] }
 0x6a3   : > { %2400 = vst [vmem:[#allocation1 + $0x23] ss:$4 sm:$0xff] %v11470_v37  ;;  %v11477_v37 = vld [vmem:[#allocation274_spill] sm:$0xff] }
 0x6a4   : > { %v2391_v18 = vld.sshfl [vmem:[#allocation1] sm:$0xff pattern:$0x73625140]  ;;  %11473 = vst [vmem:[#allocation96_spill] sm:$0xff] %v8583_v21  ;;  %v11481_v21 = vld [vmem:[#allocation252_spill] sm:$0xff]  ;;  %4255 = vmatpush.msra.mxu2 %v4059_v15 }
 0x6a5   : > { %2393 = vst [vmem:[#allocation1] ss:$4 sm:$0xff] %v11471_v63  ;;  %v11478_v63 = vld [vmem:[#allocation275_spill] sm:$0xff] }
 0x6a6   : > { %2394 = vst [vmem:[#allocation1 + $0x1] ss:$4 sm:$0xff] %v11472_v36  ;;  %v11479_v36 = vld [vmem:[#allocation258_spill] sm:$0xff]  ;;  %4256 = vmatpush.msra.mxu2 %v4058_v58 }
 0x6a7   : > { %2395 = vst [vmem:[#allocation1 + $0x2] ss:$4 sm:$0xff] %v11474_v10  ;;  %3307 = vmatmul.f32.gmra.mxu3 %v8508_v44  ;;  %v11480_v10 = vld [vmem:[#allocation259_spill] sm:$0xff]  ;;  %v11496_v58 = vld [vmem:[#allocation286_spill] sm:$0xff] }
 0x6a8   : > { %11475 = vst [vmem:[#allocation97_spill] sm:$0xff] %v8587_v56  ;;  %v11494_v56 = vld [vmem:[#allocation265_spill] sm:$0xff] }
 0x6a9   : > { %2396 = vst [vmem:[#allocation1 + $0x3] ss:$4 sm:$0xff] %v11476_v0  ;;  %3345 = vmatmul.f32.gmra.mxu0 %v2381_v47  ;;  %v8599_v47 = vpop.f32.mrf.mxu2  ;;  %v11483_v0 = vld [vmem:[#allocation253_spill] sm:$0xff]  ;;  %v8602_v12 = vpop.f32.mrf.mxu0 }
 0x6aa   : > { %v8590_v52 = vld.sshfl [vmem:[#allocation1 + $0x20] sm:$0xff pattern:$0x73625140]  ;;  %11482 = vst [vmem:[#allocation120_spill] sm:$0xff] %v8599_v47  ;;  %v11495_v47 = vld [vmem:[#allocation266_spill] sm:$0xff] }
 0x6ab   : > { %2407 = vst [vmem:[#allocation1 + $0x20] ss:$4 sm:$0xff] %v11477_v37  ;;  %v8604_v37 = vpop.f32.mrf.mxu3 }
 0x6ac   : > { %2408 = vst [vmem:[#allocation1 + $0x21] ss:$4 sm:$0xff] %v11478_v63  ;;  %v11486_v63 = vld [vmem:[#allocation254_spill] sm:$0xff] }
 0x6ad   : > { %2409 = vst [vmem:[#allocation1 + $0x22] ss:$4 sm:$0xff] %v11479_v36  ;;  %v11487_v36 = vld [vmem:[#allocation255_spill] sm:$0xff] }
 0x6ae   : > { %2410 = vst [vmem:[#allocation1 + $0x23] ss:$4 sm:$0xff] %v11480_v10 }
 0x6af   : > { %11484 = vst [vmem:[#allocation121_spill] sm:$0xff] %v8602_v12  ;;  %v11488_v12 = vld [vmem:[#allocation282_spill] sm:$0xff] }
 0x6b0   : > { %v2401_v44 = vld.sshfl [vmem:[#allocation1] sm:$0xff pattern:$0x73625140]  ;;  %11485 = vst [vmem:[#allocation122_spill] sm:$0xff] %v8604_v37  ;;  %v8615_v37 = vpop.f32.mrf.mxu1 }
 0x6b1   : > { %2403 = vst [vmem:[#allocation1] ss:$4 sm:$0xff] %v11481_v21  ;;  %3348 = vmatmul.f32.gmra.mxu0 %v2382_v30  ;;  %v8608_v10 = vpop.f32.mrf.mxu2  ;;  %v4043_v21 = vld [vmem:[#allocation2 + $0x30] sm:$0xff]  ;;  %v8618_v15 = vpop.f32.mrf.mxu0 }
 0x6b2   : > { %2404 = vst [vmem:[#allocation1 + $0x1] ss:$4 sm:$0xff] %v11483_v0  ;;  %4190 = vmatpush.msra.mxu1 %v4043_v21  ;;  %v4084_v21 = vld [vmem:[#allocation2 + $0x178] sm:$0xff] }
 0x6b3   : > { %2405 = vst [vmem:[#allocation1 + $0x2] ss:$4 sm:$0xff] %v11486_v63  ;;  %v8612_v30 = vpop.f32.mrf.mxu3  ;;  %v11489_v63 = vld [vmem:[#allocation260_spill] sm:$0xff]  ;;  %4311 = vmatpush.msra.mxu3 %v4084_v21  ;;  %v4041_v21 = vld [vmem:[#allocation2 + $0x20] sm:$0xff] }
 0x6b4   : > { %2406 = vst [vmem:[#allocation1 + $0x3] ss:$4 sm:$0xff] %v11487_v36  ;;  %v11491_v36 = vld [vmem:[#allocation279_spill] sm:$0xff] }
 0x6b5   : > { %v8610_v43 = vld.sshfl [vmem:[#allocation1 + $0x20] sm:$0xff pattern:$0x73625140]  ;;  %11490 = vst [vmem:[#allocation102_spill] sm:$0xff] %v8618_v15 }
 0x6b6   : > { %2417 = vst [vmem:[#allocation1 + $0x20] ss:$4 sm:$0xff] %v11488_v12  ;;  %v4042_v12 = vld [vmem:[#allocation2 + $0x28] sm:$0xff] }
 0x6b7   : > { %2418 = vst [vmem:[#allocation1 + $0x21] ss:$4 sm:$0xff] %v11494_v56  ;;  %4191 = vmatpush.msra.mxu1 %v4042_v12  ;;  %v11498_v56 = vld [vmem:[#allocation287_spill] sm:$0xff]  ;;  %v4057_v12 = vld [vmem:[#allocation2 + $0xa0] sm:$0xff] }
 0x6b8   : > { %2419 = vst [vmem:[#allocation1 + $0x22] ss:$4 sm:$0xff] %v11495_v47  ;;  %v11499_v47 = vld [vmem:[#allocation288_spill] sm:$0xff]  ;;  %4257 = vmatpush.msra.mxu2 %v4057_v12 }
 0x6b9   : > { %3351 = vmatmul.f32.gmra.mxu0 %v2391_v18  ;;  %v11492_v18 = vld [vmem:[#allocation280_spill] sm:$0xff]  ;;  %2420 = vst [vmem:[#allocation1 + $0x23] ss:$4 sm:$0xff] %v11496_v58  ;;  %v11501_v58 = vld [vmem:[#allocation271_spill] sm:$0xff]  ;;  %4192 = vmatpush.msra.mxu1 %v4041_v21 }
 0x6ba   : > { %v4083_v21 = vld [vmem:[#allocation2 + $0x170] sm:$0xff] }
 0x6bb   : > { %v2411_v0 = vld.sshfl [vmem:[#allocation1] sm:$0xff pattern:$0x73625140]  ;;  %v8628_v15 = vpop.f32.mrf.mxu3  ;;  %4312 = vmatpush.msra.mxu3 %v4083_v21  ;;  %v4082_v21 = vld [vmem:[#allocation2 + $0x168] sm:$0xff]  ;;  %4193 = vmatpush.msra.mxu1 %v4040_v26  ;;  %v4077_v26 = vld [vmem:[#allocation2 + $0x140] sm:$0xff] }
 0x6bc   : > { %2413 = vst [vmem:[#allocation1] ss:$4 sm:$0xff] %v11489_v63  ;;  %v8626_v63 = vpop.f32.mrf.mxu2 }
 0x6bd   : > { %2414 = vst [vmem:[#allocation1 + $0x1] ss:$4 sm:$0xff] %v11491_v36  ;;  %v8630_v36 = vpop.f32.mrf.mxu1  ;;  %4313 = vmatpush.msra.mxu3 %v4082_v21 }
 0x6be   : > { %2415 = vst [vmem:[#allocation1 + $0x2] ss:$4 sm:$0xff] %v11492_v18 }
 0x6bf   : > { %2416 = vst [vmem:[#allocation1 + $0x3] ss:$4 sm:$0xff] %v11493_v28  ;;  %v8634_v28 = vpop.f32.mrf.mxu0 }
 0x6c0   : > { %11497 = vst [vmem:[#allocation103_spill] sm:$0xff] %v8634_v28  ;;  %v8640_v42 = vld.sshfl [vmem:[#allocation1 + $0x20] sm:$0xff pattern:$0x73625140] }
 0x6c1   : > { %3354 = vmatmul.f32.gmra.mxu0 %v2392_v7  ;;  %v11500_v7 = vld [vmem:[#allocation270_spill] sm:$0xff]  ;;  %2427 = vst [vmem:[#allocation1 + $0x20] ss:$4 sm:$0xff] %v11502_v48  ;;  %v11507_v48 = vld [vmem:[#allocation276_spill] sm:$0xff] }
 0x6c2   : > { %2428 = vst [vmem:[#allocation1 + $0x21] ss:$4 sm:$0xff] %v11503_v41  ;;  %v11508_v41 = vld [vmem:[#allocation277_spill] sm:$0xff] }
 0x6c4   : > { %v8644_v28 = vpop.f32.mrf.mxu2 }
 0x6c6   : > { %v8632_v18 = vld.sshfl [vmem:[#allocation1] sm:$0xff pattern:$0x73625140] }
 0x6c7   : > { %2423 = vst [vmem:[#allocation1] ss:$4 sm:$0xff] %v11498_v56  ;;  %v11504_v56 = vld [vmem:[#allocation293_spill] sm:$0xff] }
 0x6c8   : > { %2424 = vst [vmem:[#allocation1 + $0x1] ss:$4 sm:$0xff] %v11499_v47  ;;  %v8647_v47 = vpop.f32.mrf.mxu3 }
 0x6c9   : > { %2425 = vst [vmem:[#allocation1 + $0x2] ss:$4 sm:$0xff] %v11500_v7  ;;  %3357 = vmatmul.f32.gmra.mxu0 %v2401_v44  ;;  %v11505_v7 = vld [vmem:[#allocation294_spill] sm:$0xff]  ;;  %v8650_v44 = vpop.f32.mrf.mxu1 }
 0x6ca   : > { %2426 = vst [vmem:[#allocation1 + $0x3] ss:$4 sm:$0xff] %v11501_v58  ;;  %v8652_v58 = vpop.f32.mrf.mxu0 }
 0x6cb   : > { %2429 = vst [vmem:[#allocation1 + $0x22] ss:$4 sm:$0xff] %v11504_v56  ;;  %v11510_v56 = vld [vmem:[#allocation296_spill] sm:$0xff] }
 0x6cc   : > { %2430 = vst [vmem:[#allocation1 + $0x23] ss:$4 sm:$0xff] %v11505_v7  ;;  %v8663_v7 = vpop.f32.mrf.mxu2 }
 0x6cd   : > { %11506 = vst [vmem:[#allocation104_spill] sm:$0xff] %v8652_v58 }
 0x6d0   : > { %v8666_v58 = vpop.f32.mrf.mxu3 }
 0x6d1   : > { %v8654_v12 = vld.sshfl [vmem:[#allocation1] sm:$0xff pattern:$0x73625140]  ;;  %3360 = vmatmul.f32.gmra.mxu0 %v8590_v52  ;;  %v8669_v52 = vpop.f32.mrf.mxu1 }
 0x6d2   : > { %2433 = vst [vmem:[#allocation1] ss:$4 sm:$0xff] %v11507_v48  ;;  %v11513_v48 = vld [vmem:[#allocation299_spill] sm:$0xff] }
 0x6d3   : > { %2434 = vst [vmem:[#allocation1 + $0x1] ss:$4 sm:$0xff] %v11508_v41  ;;  %v8661_v27 = vld.sshfl [vmem:[#allocation1 + $0x20] sm:$0xff pattern:$0x73625140]  ;;  %v8672_v41 = vpop.f32.mrf.mxu0 }
 0x6d4   : > { %2435 = vst [vmem:[#allocation1 + $0x2] ss:$4 sm:$0xff] %v11509_v17  ;;  %v11515_v17 = vld [vmem:[#allocation284_spill] sm:$0xff]  ;;  %v8681_v21 = vpop.f32.mrf.mxu2 }
 0x6d5   : > { %2436 = vst [vmem:[#allocation1 + $0x3] ss:$4 sm:$0xff] %v11510_v56  ;;  %v4081_v56 = vld [vmem:[#allocation2 + $0x160] sm:$0xff] }
 0x6d6   : > { %2437 = vst [vmem:[#allocation1 + $0x20] ss:$4 sm:$0xff] %v11511_v54  ;;  %4314 = vmatpush.msra.mxu3 %v4081_v56  ;;  %v11516_v54 = vld [vmem:[#allocation285_spill] sm:$0xff] }
 0x6d7   : > { %2438 = vst [vmem:[#allocation1 + $0x21] ss:$4 sm:$0xff] %v11512_v2  ;;  %v11518_v2 = vld [vmem:[#allocation302_spill] sm:$0xff] }
 0x6d8   : > { %2439 = vst [vmem:[#allocation1 + $0x22] ss:$4 sm:$0xff] %v11513_v48  ;;  %4315 = vmatpush.msra.mxu3 %v4080_v23  ;;  %v4079_v48 = vld [vmem:[#allocation2 + $0x150] sm:$0xff] }
 0x6d9   : > { %3363 = vmatmul.f32.gmra.mxu0 %v2411_v0  ;;  %11514 = vst [vmem:[#allocation106_spill] sm:$0xff] %v8672_v41  ;;  %v4056_v0 = vld [vmem:[#allocation2 + $0x98] sm:$0xff]  ;;  %v11521_v23 = vld [vmem:[#allocation24_spill] sm:$0xff]  ;;  %v8691_v41 = vpop.f32.mrf.mxu1 }
 0x6da   : > { %2440 = vst [vmem:[#allocation1 + $0x23] ss:$4 sm:$0xff] %v11515_v17  ;;  %4258 = vmatpush.msra.mxu2 %v4056_v0  ;;  %4316 = vmatpush.msra.mxu3 %v4079_v48  ;;  %v4078_v17 = vld [vmem:[#allocation2 + $0x148] sm:$0xff]  ;;  %v11522_v0 = vld [vmem:[#allocation290_spill] sm:$0xff] }
 0x6db   : > { %v8694_v60 = vpop.f32.mrf.mxu0  ;;  %v4038_v48 = vld [vmem:[#allocation2 + $0x8] sm:$0xff] }
 0x6dc   : > { %v8675_v40 = vld.sshfl [vmem:[#allocation1] sm:$0xff pattern:$0x73625140]  ;;  %4317 = vmatpush.msra.mxu3 %v4078_v17  ;;  %v4055_v17 = vld [vmem:[#allocation2 + $0x90] sm:$0xff] }
 0x6dd   : > { %2443 = vst [vmem:[#allocation1] ss:$4 sm:$0xff] %v11516_v54  ;;  %v8686_v54 = vpop.f32.mrf.mxu3  ;;  %4259 = vmatpush.msra.mxu2 %v4055_v17  ;;  %v4073_v17 = vld [vmem:[#allocation2 + $0x120] sm:$0xff] }
 0x6de   : > { %2444 = vst [vmem:[#allocation1 + $0x1] ss:$4 sm:$0xff] %v11517_v39  ;;  %v11520_v39 = vld [vmem:[#allocation289_spill] sm:$0xff]  ;;  %4318 = vmatpush.msra.mxu3 %v4077_v26 }
 0x6df   : > { %2445 = vst [vmem:[#allocation1 + $0x2] ss:$4 sm:$0xff] %v11518_v2  ;;  %v2727_v2 = vadd.f32 %v7946_v20, %v11521_v23  ;;  %v4037_v23 = vld [vmem:[#allocation2] sm:$0xff]  ;;  %v11527_v26 = vld [vmem:[#allocation25_spill] sm:$0xff] }
 0x6e0   : > { %2446 = vst [vmem:[#allocation1 + $0x3] ss:$4 sm:$0xff] %v11519_v38  ;;  %v4039_v38 = vld [vmem:[#allocation2 + $0x10] sm:$0xff]  ;;  %4319 = vmatpush.msra.mxu3 %v4076_v1 }
 0x6e1   : > { %3366 = vmatmul.f32.gmra.mxu0 %v8610_v43  ;;  %v8684_v56 = vld.sshfl [vmem:[#allocation1 + $0x20] sm:$0xff pattern:$0x73625140]  ;;  %4194 = vmatpush.msra.mxu1 %v4039_v38  ;;  %v11523_v43 = vld [vmem:[#allocation291_spill] sm:$0xff]  ;;  %v2813_v20 = vadd.f32 %v8121_v4, %v2727_v2  ;;  %v11526_v38 = vld [vmem:[#allocation306_spill] sm:$0xff]  ;;  %v8711_v2 = vpop.f32.mrf.mxu1 }
 0x6e2   : > { %2447 = vst [vmem:[#allocation1 + $0x20] ss:$4 sm:$0xff] %v11520_v39  ;;  %4320 = vmatpush.msra.mxu3 %v4075_v14  ;;  %v4074_v4 = vld [vmem:[#allocation2 + $0x128] sm:$0xff] }
 0x6e3   : > { %2448 = vst [vmem:[#allocation1 + $0x21] ss:$4 sm:$0xff] %v11522_v0  ;;  %4195 = vmatpush.msra.mxu1 %v4038_v48  ;;  %v11525_v0 = vld [vmem:[#allocation305_spill] sm:$0xff]  ;;  %v8707_v48 = vpop.f32.mrf.mxu2 }
 0x6e4   : > { %2449 = vst [vmem:[#allocation1 + $0x22] ss:$4 sm:$0xff] %v11523_v43  ;;  %v2899_v43 = vadd.f32 %v8234_v9, %v2813_v20  ;;  %4321 = vmatpush.msra.mxu3 %v4074_v4  ;;  %v11528_v20 = vld [vmem:[#allocation26_spill] sm:$0xff] }
 0x6e5   : > { %2450 = vst [vmem:[#allocation1 + $0x23] ss:$4 sm:$0xff] %v11524_v55  ;;  %4196 = vmatpush.msra.mxu1 %v4037_v23  ;;  %v2730_v55 = vadd.f32 %v8332_v24, %v11527_v26  ;;  %v8709_v1 = vpop.f32.mrf.mxu3  ;;  %v8713_v23 = vpop.f32.mrf.mxu0  ;;  %v4071_v24 = vld [vmem:[#allocation2 + $0x110] sm:$0xff] }
 0x6e6   : > { %4322 = vmatpush.msra.mxu3 %v4073_v17  ;;  %v2985_v14 = vadd.f32 %v8350_v31, %v2899_v43  ;;  %v4054_v17 = vld [vmem:[#allocation2 + $0x88] sm:$0xff] }
 0x6e7   : > { %v8698_v39 = vld.sshfl [vmem:[#allocation1] sm:$0xff pattern:$0x73625140]  ;;  %4260 = vmatpush.msra.mxu2 %v4054_v17  ;;  %v11529_v17 = vld [vmem:[#allocation12_spill] sm:$0xff] }
 0x6e8   : > { %2453 = vst [vmem:[#allocation1] ss:$4 sm:$0xff] %v11525_v0  ;;  %v4072_v0 = vld [vmem:[#allocation2 + $0x118] sm:$0xff]  ;;  %v3071_v9 = vadd.f32 %v8581_v62, %v2985_v14  ;;  %v4070_v62 = vld [vmem:[#allocation2 + $0x108] sm:$0xff] }
 0x6e9   : > { %2454 = vst [vmem:[#allocation1 + $0x1] ss:$4 sm:$0xff] %v11526_v38  ;;  %3369 = vmatmul.f32.gmra.mxu0 %v8632_v18  ;;  %v2816_v18 = vadd.f32 %v8139_v29, %v2730_v55  ;;  %4323 = vmatpush.msra.mxu3 %v4072_v0  ;;  %v2733_v38 = vadd.f32 %v7897_v13, %v11528_v20  ;;  %v4148_v55 = vld [vmem:[#allocation2 + $0x378] sm:$0xff]  ;;  %v4053_v0 = vld [vmem:[#allocation2 + $0x80] sm:$0xff] }
 0x6ea   : > { %v3157_v4 = vadd.f32 %v8608_v10, %v3071_v9  ;;  %v8737_v10 = vld [vmem:[%s10088_s3] ss:$0 sm:$0xff]  ;;  %4571 = vmatpush.msra.mxu0 %v4148_v55  ;;  %v4069_v9 = vld [vmem:[#allocation2 + $0x100] sm:$0xff]  ;;  %4261 = vmatpush.msra.mxu2 %v4053_v0 }
 0x6eb   : > { %4324 = vmatpush.msra.mxu3 %v4071_v24  ;;  %v2902_v26 = vadd.f32 %v8260_v49, %v2816_v18  ;;  %v8723_v29 = vpop.f32.mrf.mxu2  ;;  %v2819_v13 = vadd.f32 %v8157_v6, %v2733_v38  ;;  %v8740_v18 = vpop.f32.mrf.mxu1  ;;  %v4147_v24 = vld [vmem:[#allocation2 + $0x370] sm:$0xff]  ;;  %v3575_v38 = vlaneseq }
 0x6ec   : > { %v3243_v31 = vadd.f32 %v8612_v30, %v3157_v4  ;;  %v4146_v4 = vld [vmem:[#allocation2 + $0x368] sm:$0xff]  ;;  %4572 = vmatpush.msra.mxu0 %v4147_v24  ;;  %v8758_v24 = vstv %s5022_s21  ;;  %s5077_s21 = sshll.u32 %s5339_s28, 5 }
 0x6ed   : > { %v8732_v43 = vpop.f32.mrf.mxu3  ;;  %4325 = vmatpush.msra.mxu3 %v4070_v62  ;;  %v2988_v30 = vadd.f32 %v8365_v22, %v2902_v26  ;;  %v11530_v62 = vld [vmem:[#allocation60_spill] sm:$0xff]  ;;  %v2905_v26 = vadd.f32 %v8280_v16, %v2819_v13  ;;  %vm3582_vm7 = vcmp.ge.s32.totalorder %v8758_v24, 0  ;;  %vm3592_vm8 = vcmp.lt.s32.totalorder %v8758_v24, 16  ;;  %s4899_s14 = sadd.s32 %s5081_s18, %s5077_s21  ;;  %s5273_s21 = scalar_lea.hbm %s10092_s7, 512 }
 0x6ee   : > { %v2736_v22 = vadd.f32 %v11530_v62, %v11529_v17  ;;  %4573 = vmatpush.msra.mxu0 %v4146_v4  ;;  %vm8782_vm9 = vmand %vm3582_vm7, %vm3592_vm8  ;;  %s5078_s27 = sshll.u32 %s4899_s14, 3 }
 0x6ef   : > { %4326 = vmatpush.msra.mxu3 %v4069_v9  ;;  %v3074_v6 = vadd.f32 %v8597_v59, %v2988_v30  ;;  %v8754_v30 = vshrl.u32 %v3575_v38, 7  ;;  %v2991_v16 = vadd.f32 %v8383_v5, %v2905_v26  ;;  %v4142_v26 = vld [vmem:[#allocation2 + $0x348] sm:$0xff]  ;;  %s4901_s19 = scalar_lea.hbm %s10092_s7, %s5078_s27 }
 0x6f0   : > { %v8751_v0 = vld.sshfl [vmem:[#allocation1] sm:$0xff pattern:$0x73625140]  ;;  %v2822_v9 = vadd.f32 %v8181_v8, %v2736_v22  ;;  %s4904_s17 = sshll.u32 %s4901_s19, 4  ;;  %s4905_s17 = int_to_ptr.hbm [resolvable:$true] %s4904_s17 }
 0x6f1   : > { %3372 = vmatmul.f32.gmra.mxu0 %v8640_v42  ;;  %v8729_v42 = vld [vmem:[%s10087_s2] ss:$0 sm:$0xff]  ;;  %v3077_v38 = vadd.f32 %v8615_v37, %v2991_v16  ;;  %v8770_v22 = vadd.s32 4294967295, %v8754_v30  ;;  %s5267_s12 = sshra.s32 %s4905_s17, 4  ;;  %s5268_s12 = int_to_ptr.hbm [resolvable:$true] %s5267_s12 }
 0x6f2   : > { %s5269_s20 = scalar_lea.hbm %s5268_s12, 128  ;;  %p5274_p6 = scmp.lt.s32.totalorder %s5268_s12, %s10092_s7 }
 0x6f3   : > { %v8765_v8 = vpop.f32.mrf.mxu1  ;;  %v3163_v37 = vadd.f32 %v8644_v28, %v3077_v38  ;;  %vm10411_vm10 = vcmp.ge.s32.totalorder %v8770_v22, 0  ;;  %p5270_p2 = scmp.ne.s32.totalorder %s5268_s12, %s5269_s20  ;;  %p5275_p7 = scmp.lt.s32.totalorder %s5273_s21, %s5269_s20 }
 0x6f4   : > { %vm8793_vm11 = vmand %vm8782_vm9, %vm10411_vm10 }
 0x6f5   : > { %v8762_v62 = vpop.f32.mrf.mxu3  ;;  %v3249_v16 = vadd.f32 %v8647_v47, %v3163_v37  ;;  %v4139_v47 = vld [vmem:[#allocation2 + $0x330] sm:$0xff]  ;;  %v4138_v37 = vld [vmem:[#allocation2 + $0x328] sm:$0xff]  ;;  %p5271_p4 = pnand %p5270_p2, %p5450_p3  ;;  %p5276_p9 = por %p5275_p7, %p5274_p6 }
 0x6f6   : > { %v3328_v49 = vpop.f32.mrf.mxu0 }
 0x6f7   : > { %v3329_v14 = vadd.f32 %v3328_v49, %v3243_v31  ;;  %v3160_v31 = vadd.f32 %v8626_v63, %v3074_v6  ;;  %v4145_v49 = vld [vmem:[#allocation2 + $0x360] sm:$0xff]  ;;  %v8760_v63 = vpop.f32.mrf.mxu2  ;;  %p5272_p5 = pneg %p5271_p4 }
 0x6f8   : > { %4574 = vmatpush.msra.mxu0 %v4145_v49 }
 0x6f9   : > { %v3401_v20 = vmul.f32 %v8729_v42, %v3329_v14  ;;  %3375 = vmatmul.f32.gmra.mxu0 %v8654_v12  ;;  %v3246_v59 = vadd.f32 %v8628_v15, %v3160_v31  ;;  %v4144_v14 = vld [vmem:[#allocation2 + $0x358] sm:$0xff]  ;;  %v4143_v15 = vld [vmem:[#allocation2 + $0x350] sm:$0xff]  ;;  %v11531_v31 = vld [vmem:[#allocation10_spill] sm:$0xff]  ;;  %p5277_p10 = pnand %p5276_p9, %p5272_p5 }
 0x6fa   : > { %4575 = vmatpush.msra.mxu0 %v4144_v14  ;;  %v8779_v14 = vld.sshfl [vmem:[#allocation1 + $0x20] sm:$0xff pattern:$0x73625140] }
 0x6fb   : > { %v3428_v55 = vadd.f32 %v8737_v10, %v3401_v20 }
 0x6fc   : > { %4576 = vmatpush.msra.mxu0 %v4143_v15 }
 0x6fd   : > { %v3451_v12 = vmax.f32 %v3428_v55, 0.0  ;;  %v11532_v55 = vld [vmem:[#allocation40_spill] sm:$0xff] }
 0x6fe   : > { %v3331_v13 = vpop.f32.mrf.mxu0  ;;  %v2739_v49 = vadd.f32 %v11532_v55, %v11531_v31  ;;  %4577 = vmatpush.msra.mxu0 %v4142_v26  ;;  %v11537_v26 = vld [vmem:[#allocation13_spill] sm:$0xff] }
 0x6ff   : > { %v3497_v6 = vrot.slane %v3451_v12, 2  ;;  %v3498_v20 = vrot.slane %v3451_v12, 4  ;;  %v3499_v17 = vrot.slane %v3451_v12, 6  ;;  %v3332_v4 = vadd.f32 %v3331_v13, %v3246_v59  ;;  %3678 = vst [vmem:[#allocation1] ss:$4 sm:$0xff] %v3451_v12  ;;  %v4141_v12 = vld [vmem:[#allocation2 + $0x340] sm:$0xff] }
 0x700   : > { %v2908_v59 = vadd.f32 %v8296_v45, %v2822_v9  ;;  %v4140_v9 = vld [vmem:[#allocation2 + $0x338] sm:$0xff]  ;;  %4578 = vmatpush.msra.mxu0 %v4141_v12  ;;  %v8805_v12 = vpop.f32.mrf.mxu3 }
 0x701   : > { %v3402_v5 = vmul.f32 %v8729_v42, %v3332_v4  ;;  %3378 = vmatmul.f32.gmra.mxu0 %v8661_v27  ;;  %3680 = vst [vmem:[#allocation1 + $0x1] ss:$4 sm:$0xff] %v3497_v6  ;;  %v2825_v6 = vadd.f32 %v8201_v46, %v2739_v49  ;;  %v4116_v46 = vld [vmem:[#allocation2 + $0x278] sm:$0xff]  ;;  %v8800_v49 = vpop.f32.mrf.mxu2 }
 0x702   : > { %3682 = vst [vmem:[#allocation1 + $0x2] ss:$4 sm:$0xff] %v3498_v20  ;;  %v2994_v28 = vadd.f32 %v8397_v35, %v2908_v59  ;;  %4579 = vmatpush.msra.mxu0 %v4140_v9  ;;  %v11538_v35 = vld [vmem:[#allocation41_spill] sm:$0xff]  ;;  %4441 = vmatpush.msrb.mxu2 %v4116_v46  ;;  %v8808_v9 = vpop.f32.mrf.mxu1 }
 0x703   : > { %v3429_v27 = vadd.f32 %v8737_v10, %v3402_v5  ;;  %3684 = vst [vmem:[#allocation1 + $0x3] ss:$4 sm:$0xff] %v3499_v17  ;;  %v2742_v31 = vadd.f32 %v11538_v35, %v11537_v26  ;;  %v4100_v46 = vld [vmem:[#allocation2 + $0x1f8] sm:$0xff] }
 0x704   : > { %v3080_v55 = vadd.f32 %v8630_v36, %v2994_v28  ;;  %4580 = vmatpush.msra.mxu0 %v4139_v47  ;;  %v11539_v26 = vld [vmem:[#allocation29_spill] sm:$0xff]  ;;  %4376 = vmatpush.msrb.mxu1 %v4100_v46 }
 0x705   : > { %v3452_v13 = vmax.f32 %v3429_v27, 0.0  ;;  %v2911_v27 = vadd.f32 %v8311_v34, %v2825_v6  ;;  %v2828_v34 = vadd.f32 %v8211_v19, %v2742_v31  ;;  %v4115_v31 = vld [vmem:[#allocation2 + $0x270] sm:$0xff] }
 0x706   : > { %v3334_v20 = vpop.f32.mrf.mxu0  ;;  %v3166_v36 = vadd.f32 %v8663_v7, %v3080_v55  ;;  %4581 = vmatpush.msra.mxu0 %v4138_v37  ;;  %4442 = vmatpush.msrb.mxu2 %v4115_v31  ;;  %v4114_v31 = vld [vmem:[#allocation2 + $0x268] sm:$0xff] }
 0x707   : > { %v3500_v17 = vrot.slane %v3452_v13, 2  ;;  %v3501_v4 = vrot.slane %v3452_v13, 4  ;;  %v3502_v15 = vrot.slane %v3452_v13, 6  ;;  %v3335_v38 = vadd.f32 %v3334_v20, %v3249_v16  ;;  %3686 = vst [vmem:[#allocation1 + $0x20] ss:$4 sm:$0xff] %v3452_v13 }
 0x708   : > { %v3578_v13 = vadd.s32 16, %v8754_v30  ;;  %v3252_v6 = vadd.f32 %v8666_v58, %v3166_v36  ;;  %v2997_v30 = vadd.f32 %v8404_v3, %v2911_v27  ;;  %v4135_v58 = vld [vmem:[#allocation2 + $0x310] sm:$0xff]  ;;  %v2914_v3 = vadd.f32 %v8325_v61, %v2828_v34  ;;  %v8837_v5 = vpop.f32.mrf.mxu3  ;;  %4443 = vmatpush.msrb.mxu2 %v4114_v31 }
 0x709   : > { %v3403_v59 = vmul.f32 %v8729_v42, %v3335_v38  ;;  %3381 = vmatmul.f32.gmra.mxu0 %v8675_v40  ;;  %3688 = vst [vmem:[#allocation1 + $0x21] ss:$4 sm:$0xff] %v3500_v17  ;;  %v4137_v40 = vld [vmem:[#allocation2 + $0x320] sm:$0xff]  ;;  %v4136_v17 = vld [vmem:[#allocation2 + $0x318] sm:$0xff] }
 0x70a   : > { %v3693_v16 = vld.sshfl [vmem:[#allocation1] sm:$0xff pattern:$0x73625140]  ;;  %3690 = vst [vmem:[#allocation1 + $0x22] ss:$4 sm:$0xff] %v3501_v4  ;;  %v8817_v38 = vadd.s32 4294967295, %v3578_v13  ;;  %4582 = vmatpush.msra.mxu0 %v4137_v40  ;;  %v3083_v55 = vadd.f32 %v8650_v44, %v2997_v30  ;;  %v8830_v40 = vpop.f32.mrf.mxu2  ;;  %v3000_v30 = vadd.f32 %v8419_v33, %v2914_v3 }
 0x70b   : > { %v3430_v28 = vadd.f32 %v8737_v10, %v3403_v59  ;;  %5026 = vmatmul.msk.f32.vlgmr.msra.gmra.mxu1 %vm8793_vm11, %v3693_v16  ;;  %3692 = vst [vmem:[#allocation1 + $0x23] ss:$4 sm:$0xff] %v3502_v15  ;;  %v11540_v15 = vld [vmem:[#allocation42_spill] sm:$0xff]  ;;  %v3835_v37 = vsel %vm8793_vm11, %v3693_v16, 0.0  ;;  %v4134_v13 = vld [vmem:[#allocation2 + $0x308] sm:$0xff] }
 0x70c   : > { %v2745_v35 = vadd.f32 %v11540_v15, %v11539_v26  ;;  %4583 = vmatpush.msra.mxu0 %v4136_v17  ;;  %v3169_v36 = vadd.f32 %v8681_v21, %v3083_v55  ;;  %vm10420_vm12 = vcmp.lt.s32.totalorder %v8817_v38, 16  ;;  %v4133_v21 = vld [vmem:[#allocation2 + $0x300] sm:$0xff]  ;;  %v3890_v16 = vrot.slane %v3835_v37, 1 }
 0x70d   : > { %v3453_v20 = vmax.f32 %v3430_v28, 0.0  ;;  %v3566_v28 = vadd.s32 1, %v8758_v24  ;;  %vm8848_vm15 = vmand %vm8782_vm9, %vm10420_vm12  ;;  %v3086_v3 = vadd.f32 %v8669_v52, %v3000_v30 }
 0x70e   : > { %v3337_v4 = vpop.f32.mrf.mxu0  ;;  %4584 = vmatpush.msra.mxu0 %v4135_v58  ;;  %v2831_v17 = vadd.f32 %v8223_v51, %v2745_v35 }
 0x70f   : > { %v3503_v7 = vrot.slane %v3453_v20, 2  ;;  %3695 = vst [vmem:[#allocation1] ss:$4 sm:$0xff] %v3453_v20  ;;  %v3338_v47 = vadd.f32 %v3337_v4, %v3252_v6  ;;  %v3504_v19 = vrot.slane %v3453_v20, 4  ;;  %v3505_v59 = vrot.slane %v3453_v20, 6  ;;  %v8841_v4 = vpop.f32.mrf.mxu1 }
 0x710   : > { %v3947_v6 = vrot.slane %v3835_v37, 2  ;;  %4585 = vmatpush.msra.mxu0 %v4134_v13  ;;  %vm3583_vm0 = vcmp.ge.s32.totalorder %v3566_v28, 0  ;;  %vm3593_vm1 = vcmp.lt.s32.totalorder %v3566_v28, 16  ;;  %v11543_v37 = vld [vmem:[#allocation31_spill] sm:$0xff]  ;;  %v2917_v52 = vadd.f32 %v8346_v50, %v2831_v17  ;;  %v8882_v17 = vpop.f32.mrf.mxu3 }
 0x711   : > { %v3404_v27 = vmul.f32 %v8729_v42, %v3338_v47  ;;  %3384 = vmatmul.f32.gmra.mxu0 %v8684_v56  ;;  %vm8863_vm2 = vmand %vm3583_vm0, %vm3593_vm1 }
 0x712   : > { %v3694_v44 = vld.sshfl [vmem:[#allocation1 + $0x20] sm:$0xff pattern:$0x73625140]  ;;  %4586 = vmatpush.msra.mxu0 %v4133_v21  ;;  %v8870_v21 = vpop.f32.mrf.mxu2  ;;  %vm8877_vm3 = vmand %vm8863_vm2, %vm10411_vm10 }
 0x713   : > { %v3431_v61 = vadd.f32 %v8737_v10, %v3404_v27  ;;  %5027 = vmatmul.msk.f32.gmra.mxu1 %vm8782_vm9, %v3694_v44  ;;  %3697 = vst [vmem:[#allocation1 + $0x20] ss:$4 sm:$0xff] %v3503_v7  ;;  %v3836_v56 = vsel %vm8782_vm9, %v3694_v44, 0.0  ;;  %v3255_v7 = vadd.f32 %v8686_v54, %v3169_v36  ;;  %v11544_v27 = vld [vmem:[#allocation67_spill] sm:$0xff]  ;;  %vm8926_vm6 = vmand %vm8863_vm2, %vm10420_vm12 }
 0x714   : > { %3698 = vst [vmem:[#allocation1 + $0x21] ss:$4 sm:$0xff] %v3504_v19  ;;  %v3891_v34 = vrot.slane %v3836_v56, 1  ;;  %v3948_v20 = vrot.slane %v3836_v56, 2  ;;  %v4099_v19 = vld [vmem:[#allocation2 + $0x1f0] sm:$0xff]  ;;  %v2748_v13 = vadd.f32 %v11544_v27, %v11543_v37  ;;  %v3172_v56 = vadd.f32 %v8707_v48, %v3086_v3 }
 0x715   : > { %v3454_v47 = vmax.f32 %v3431_v61, 0.0  ;;  %3699 = vst [vmem:[#allocation1 + $0x22] ss:$4 sm:$0xff] %v3505_v59  ;;  %4377 = vmatpush.msrb.mxu1 %v4099_v19 }
 0x716   : > { %v3892_v26 = vsel %vm10424_vm13, %v3890_v16, %v3891_v34  ;;  %v3949_v51 = vsel %vm10423_vm14, %v3947_v6, %v3948_v20  ;;  %v3340_v15 = vpop.f32.mrf.mxu0  ;;  %v3696_v33 = vld.sshfl [vmem:[#allocation1] sm:$0xff pattern:$0x73625140]  ;;  %v3258_v16 = vadd.f32 %v8709_v1, %v3172_v56  ;;  %v2834_v50 = vadd.f32 %v8236_v25, %v2748_v13  ;;  %v11549_v25 = vld [vmem:[#allocation15_spill] sm:$0xff] }
 0x717   : > { %v3506_v54 = vrot.slane %v3454_v47, 2  ;;  %v3507_v35 = vrot.slane %v3454_v47, 4  ;;  %v3508_v55 = vrot.slane %v3454_v47, 6  ;;  %3700 = vst [vmem:[#allocation1 + $0x23] ss:$4 sm:$0xff] %v3454_v47  ;;  %4262 = vmatmul.f32.vlgmr.msra.gmra.mxu2 %v3892_v26  ;;  %4327 = vmatmul.f32.vlgmr.msra.gmra.mxu3 %v3949_v51  ;;  %v3341_v45 = vadd.f32 %v3340_v15, %v3255_v7  ;;  %v8889_v46 = vpop.f32.mrf.mxu1  ;;  %v4098_v15 = vld [vmem:[#allocation2 + $0x1e8] sm:$0xff] }
 0x718   : > { %v3837_v58 = vsel %vm8848_vm15, %v3696_v33, 0.0  ;;  %v3003_v1 = vadd.f32 %v8433_v53, %v2917_v52  ;;  %v11550_v33 = vld [vmem:[#allocation68_spill] sm:$0xff]  ;;  %4378 = vmatpush.msrb.mxu1 %v4098_v15 }
 0x719   : > { %v3405_v59 = vmul.f32 %v8729_v42, %v3341_v45  ;;  %3387 = vmatmul.f32.gmra.mxu0 %v8698_v39  ;;  %3702 = vst [vmem:[#allocation1] ss:$4 sm:$0xff] %v3506_v54  ;;  %v3893_v36 = vrot.slane %v3837_v58, 1  ;;  %v3950_v44 = vrot.slane %v3837_v58, 2  ;;  %v2751_v54 = vadd.f32 %v11550_v33, %v11549_v25  ;;  %v11555_v25 = vld [vmem:[#allocation91_spill] sm:$0xff] }
 0x71a   : > { %3703 = vst [vmem:[#allocation1 + $0x1] ss:$4 sm:$0xff] %v3507_v35  ;;  %v3567_v35 = vadd.s32 2, %v8758_v24  ;;  %v8911_v13 = vpop.f32.mrf.mxu2 }
 0x71b   : > { %v3432_v39 = vadd.f32 %v8737_v10, %v3405_v59  ;;  %3704 = vst [vmem:[#allocation1 + $0x2] ss:$4 sm:$0xff] %v3508_v55  ;;  %v3894_v48 = vsel %vm10424_vm13, %v3891_v34, %v3893_v36  ;;  %v3951_v30 = vsel %vm10423_vm14, %v3948_v20, %v3950_v44  ;;  %v4113_v34 = vld [vmem:[#allocation2 + $0x260] sm:$0xff]  ;;  %v3089_v20 = vadd.f32 %v8691_v41, %v3003_v1  ;;  %v4112_v1 = vld [vmem:[#allocation2 + $0x258] sm:$0xff] }
 0x71c   : > { %v2920_v55 = vadd.f32 %v8360_v32, %v2834_v50  ;;  %4444 = vmatpush.msrb.mxu2 %v4113_v34  ;;  %v2837_v41 = vadd.f32 %v8262_v11, %v2751_v54  ;;  %vm3584_vm4 = vcmp.ge.s32.totalorder %v3567_v35, 0  ;;  %vm3594_vm5 = vcmp.lt.s32.totalorder %v3567_v35, 16  ;;  %v4097_v11 = vld [vmem:[#allocation2 + $0x1e0] sm:$0xff] }
 0x71d   : > { %v3455_v6 = vmax.f32 %v3432_v39, 0.0  ;;  %v3175_v45 = vadd.f32 %v8723_v29, %v3089_v20  ;;  %v8914_v39 = vpop.f32.mrf.mxu3  ;;  %4379 = vmatpush.msrb.mxu1 %v4097_v11  ;;  %vm8951_vm7 = vmand %vm3584_vm4, %vm3594_vm5 }
 0x71e   : > { %v3343_v7 = vpop.f32.mrf.mxu0  ;;  %v8886_v47 = vld.sshfl [vmem:[#allocation1 + $0x20] sm:$0xff pattern:$0x73625140]  ;;  %v3006_v59 = vadd.f32 %v8461_v57, %v2920_v55  ;;  %v2923_v33 = vadd.f32 %v11555_v25, %v2837_v41  ;;  %4445 = vmatpush.msrb.mxu2 %v4112_v1  ;;  %vm8962_vm8 = vmand %vm8951_vm7, %vm10411_vm10  ;;  %v11565_v25 = vld [vmem:[#allocation84_spill] sm:$0xff] }
 0x71f   : > { %v3509_v26 = vrot.slane %v3455_v6, 2  ;;  %4265 = vmatmul.f32.gmra.mxu2 %v3894_v48  ;;  %3705 = vst [vmem:[#allocation1 + $0x3] ss:$4 sm:$0xff] %v3455_v6  ;;  %4330 = vmatmul.f32.gmra.mxu3 %v3951_v30  ;;  %v3344_v51 = vadd.f32 %v3343_v7, %v3258_v16  ;;  %v3838_v58 = vsel %vm8877_vm3, %v8886_v47, 0.0  ;;  %v3261_v31 = vadd.f32 %v8732_v43, %v3175_v45  ;;  %v11559_v41 = vld [vmem:[#allocation101_spill] sm:$0xff]  ;;  %vm9022_vm9 = vmand %vm8951_vm7, %vm10420_vm12 }
 0x720   : > { %5028 = vmatmul.msk.f32.gmra.mxu1 %vm8877_vm3, %v8886_v47  ;;  %v3510_v3 = vrot.slane %v3455_v6, 4  ;;  %v3511_v37 = vrot.slane %v3455_v6, 6  ;;  %v3895_v29 = vrot.slane %v3838_v58, 1  ;;  %v3092_v43 = vadd.f32 %v8711_v2, %v3006_v59  ;;  %v8930_v6 = vpop.f32.mrf.mxu1 }
 0x721   : > { %v3406_v53 = vmul.f32 %v8729_v42, %v3344_v51  ;;  %3706 = vst [vmem:[#allocation1 + $0x20] ss:$4 sm:$0xff] %v3509_v26  ;;  %3390 = vmatmul.f32.gmra.mxu0 %v8779_v14  ;;  %v3952_v30 = vrot.slane %v3838_v58, 2  ;;  %v11553_v26 = vld [vmem:[#allocation18_spill] sm:$0xff]  ;;  %v11554_v51 = vld [vmem:[#allocation69_spill] sm:$0xff] }
 0x722   : > { %v2754_v15 = vadd.f32 %v11554_v51, %v11553_v26  ;;  %v3178_v54 = vadd.f32 %v8760_v63, %v3092_v43  ;;  %v8969_v43 = vpop.f32.mrf.mxu2 }
 0x723   : > { %v3433_v19 = vadd.f32 %v8737_v10, %v3406_v53 }
 0x724   : > { %v3264_v55 = vadd.f32 %v8762_v62, %v3178_v54 }
 0x725   : > { %v3456_v14 = vmax.f32 %v3433_v19, 0.0  ;;  %v11558_v19 = vld [vmem:[#allocation59_spill] sm:$0xff] }
 0x726   : > { %v3346_v32 = vpop.f32.mrf.mxu0  ;;  %v8909_v27 = vld.sshfl [vmem:[#allocation1] sm:$0xff pattern:$0x73625140]  ;;  %v2840_v58 = vadd.f32 %v11558_v19, %v2754_v15  ;;  %v3568_v19 = vadd.s32 3, %v8758_v24 }
 0x727   : > { %v3512_v36 = vrot.slane %v3456_v14, 2  ;;  %v3513_v44 = vrot.slane %v3456_v14, 4  ;;  %v3514_v52 = vrot.slane %v3456_v14, 6  ;;  %v3347_v56 = vadd.f32 %v3346_v32, %v3261_v31  ;;  %3709 = vst [vmem:[#allocation1] ss:$4 sm:$0xff] %v3510_v3 }
 0x728   : > { %5029 = vmatmul.msk.f32.gmra.mxu1 %vm8863_vm2, %v8909_v27  ;;  %3710 = vst [vmem:[#allocation1 + $0x1] ss:$4 sm:$0xff] %v3511_v37  ;;  %v3839_v57 = vsel %vm8863_vm2, %v8909_v27, 0.0  ;;  %v3708_v2 = vld.sshfl [vmem:[#allocation1 + $0x20] sm:$0xff pattern:$0x73625140]  ;;  %v3009_v31 = vadd.f32 %v11559_v41, %v2923_v33 }
 0x729   : > { %v3407_v50 = vmul.f32 %v8729_v42, %v3347_v56  ;;  %3711 = vst [vmem:[#allocation1 + $0x2] ss:$4 sm:$0xff] %v3456_v14  ;;  %3393 = vmatmul.f32.gmra.mxu0 %v8751_v0  ;;  %v3896_v48 = vrot.slane %v3839_v57, 1  ;;  %v3953_v7 = vrot.slane %v3839_v57, 2  ;;  %v3840_v53 = vsel %vm8926_vm6, %v3708_v2, 0.0  ;;  %v11564_v2 = vld [vmem:[#allocation93_spill] sm:$0xff] }
 0x72a   : > { %3712 = vst [vmem:[#allocation1 + $0x3] ss:$4 sm:$0xff] %v3512_v36  ;;  %v3898_v14 = vrot.slane %v3840_v53, 1  ;;  %v3955_v62 = vrot.slane %v3840_v53, 2  ;;  %v4111_v36 = vld [vmem:[#allocation2 + $0x250] sm:$0xff]  ;;  %v3095_v11 = vadd.f32 %v8740_v18, %v3009_v31  ;;  %v8983_v18 = vpop.f32.mrf.mxu1  ;;  %vm3585_vm11 = vcmp.ge.s32.totalorder %v3568_v19, 0 }
 0x72b   : > { %v3434_v34 = vadd.f32 %v8737_v10, %v3407_v50  ;;  %v8940_v20 = vsel %vm10424_vm13, %v3895_v29, %v3896_v48  ;;  %v8943_v0 = vsel %vm10423_vm14, %v3952_v30, %v3953_v7  ;;  %3713 = vst [vmem:[#allocation1 + $0x20] ss:$4 sm:$0xff] %v3513_v44  ;;  %v4096_v29 = vld [vmem:[#allocation2 + $0x1d8] sm:$0xff]  ;;  %4446 = vmatpush.msrb.mxu2 %v4111_v36  ;;  %v8975_v30 = vpop.f32.mrf.mxu3  ;;  %v11566_v53 = vld [vmem:[#allocation80_spill] sm:$0xff]  ;;  %vm3595_vm15 = vcmp.lt.s32.totalorder %v3568_v19, 16 }
 0x72c   : > { %4268 = vmatmul.f32.gmra.mxu2 %v8940_v20  ;;  %4333 = vmatmul.f32.gmra.mxu3 %v8943_v0  ;;  %3714 = vst [vmem:[#allocation1 + $0x21] ss:$4 sm:$0xff] %v3514_v52  ;;  %v11562_v44 = vld [vmem:[#allocation37_spill] sm:$0xff]  ;;  %v11563_v52 = vld [vmem:[#allocation70_spill] sm:$0xff]  ;;  %v2926_v50 = vadd.f32 %v11564_v2, %v2840_v58  ;;  %v3181_v1 = vadd.f32 %v8800_v49, %v3095_v11  ;;  %v4095_v31 = vld [vmem:[#allocation2 + $0x1d0] sm:$0xff] }
 0x72d   : > { %v3457_v45 = vmax.f32 %v3434_v34, 0.0  ;;  %4380 = vmatpush.msrb.mxu1 %v4096_v29  ;;  %v2757_v56 = vadd.f32 %v11563_v52, %v11562_v44  ;;  %v8988_v51 = vsel %vm10424_vm13, %v3896_v48, %v3898_v14  ;;  %v8991_v15 = vsel %vm10423_vm14, %v3953_v7, %v3955_v62  ;;  %v11567_v14 = vld [vmem:[#allocation21_spill] sm:$0xff]  ;;  %v11569_v29 = vld [vmem:[#allocation94_spill] sm:$0xff]  ;;  %vm9047_vm0 = vmand %vm3585_vm11, %vm3595_vm15 }
 0x72e   : > { %v3349_v3 = vpop.f32.mrf.mxu0  ;;  %v3267_v54 = vadd.f32 %v8805_v12, %v3181_v1  ;;  %vm9060_vm1 = vmand %vm9047_vm0, %vm10411_vm10 }
 0x72f   : > { %v3515_v59 = vrot.slane %v3457_v45, 2  ;;  %v3516_v37 = vrot.slane %v3457_v45, 4  ;;  %v3350_v32 = vadd.f32 %v3349_v3, %v3264_v55  ;;  %3715 = vst [vmem:[#allocation1 + $0x22] ss:$4 sm:$0xff] %v3457_v45  ;;  %v2843_v33 = vadd.f32 %v11565_v25, %v2757_v56  ;;  %v4110_v3 = vld [vmem:[#allocation2 + $0x248] sm:$0xff]  ;;  %4381 = vmatpush.msrb.mxu1 %v4095_v31  ;;  %vm9112_vm5 = vmand %vm9047_vm0, %vm10420_vm12 }
 0x730   : > { %v3012_v55 = vadd.f32 %v11566_v53, %v2926_v50  ;;  %v3517_v58 = vrot.slane %v3457_v45, 6  ;;  %4447 = vmatpush.msrb.mxu2 %v4110_v3  ;;  %v11575_v31 = vld [vmem:[#allocation83_spill] sm:$0xff] }
 0x731   : > { %v3408_v57 = vmul.f32 %v8729_v42, %v3350_v32  ;;  %v8972_v16 = vld.sshfl [vmem:[#allocation1] sm:$0xff pattern:$0x73625140]  ;;  %3716 = vst [vmem:[#allocation1 + $0x23] ss:$4 sm:$0xff] %v3515_v59  ;;  %v11568_v59 = vld [vmem:[#allocation48_spill] sm:$0xff]  ;;  %v2929_v36 = vadd.f32 %v11569_v29, %v2843_v33 }
 0x732   : > { %5030 = vmatmul.msk.f32.gmra.mxu1 %vm8962_vm8, %v8972_v16  ;;  %3719 = vst [vmem:[#allocation1] ss:$4 sm:$0xff] %v3516_v37  ;;  %5058 = vmatmul.msk.f32.vlgmr.msra.gmra.mxu0 %vm8962_vm8, %v8972_v16  ;;  %v3841_v7 = vsel %vm8962_vm8, %v8972_v16, 0.0  ;;  %v2760_v37 = vadd.f32 %v11568_v59, %v11567_v14  ;;  %v3098_v45 = vadd.f32 %v8765_v8, %v3012_v55  ;;  %v9038_v53 = vpop.f32.mrf.mxu1 }
 0x733   : > { %v3435_v26 = vadd.f32 %v8737_v10, %v3408_v57  ;;  %v3900_v11 = vrot.slane %v3841_v7, 1  ;;  %v3957_v8 = vrot.slane %v3841_v7, 2  ;;  %v9030_v33 = vpop.f32.mrf.mxu3  ;;  %v3015_v3 = vadd.f32 %v11575_v31, %v2929_v36  ;;  %v11582_v31 = vld [vmem:[#allocation108_spill] sm:$0xff]  ;;  %v4156_v7 = vld [vmem:[#allocation2 + $0x3b8] sm:$0xff] }
 0x734   : > { %4271 = vmatmul.f32.gmra.mxu2 %v8988_v51  ;;  %4336 = vmatmul.f32.gmra.mxu3 %v8991_v15  ;;  %v3184_v1 = vadd.f32 %v8830_v40, %v3098_v45 }
 0x735   : > { %v3458_v34 = vmax.f32 %v3435_v26, 0.0  ;;  %v9027_v26 = vpop.f32.mrf.mxu2  ;;  %v3101_v19 = vadd.f32 %v8808_v9, %v3015_v3 }
 0x736   : > { %v3352_v49 = vpop.f32.mrf.mxu0  ;;  %v3270_v40 = vadd.f32 %v8837_v5, %v3184_v1 }
 0x737   : > { %v3518_v48 = vrot.slane %v3458_v34, 2  ;;  %v3353_v41 = vadd.f32 %v3352_v49, %v3267_v54  ;;  %v3519_v32 = vrot.slane %v3458_v34, 4  ;;  %v3520_v12 = vrot.slane %v3458_v34, 6 }
 0x738   : > { %v9004_v62 = vld.sshfl [vmem:[#allocation1 + $0x20] sm:$0xff pattern:$0x73625140]  ;;  %v3187_v1 = vadd.f32 %v8870_v21, %v3101_v19  ;;  %v11581_v21 = vld [vmem:[#allocation63_spill] sm:$0xff] }
 0x739   : > { %v3409_v44 = vmul.f32 %v8729_v42, %v3353_v41  ;;  %3721 = vst [vmem:[#allocation1 + $0x20] ss:$4 sm:$0xff] %v3517_v58  ;;  %v3842_v52 = vsel %vm8951_vm7, %v9004_v62, 0.0  ;;  %v3720_v56 = vld.sshfl [vmem:[#allocation1] sm:$0xff pattern:$0x73625140] }
 0x73a   : > { %5031 = vmatmul.msk.f32.gmra.mxu1 %vm8951_vm7, %v9004_v62  ;;  %3722 = vst [vmem:[#allocation1 + $0x21] ss:$4 sm:$0xff] %v3458_v34  ;;  %5059 = vmatmul.msk.f32.gmra.mxu0 %vm8951_vm7, %v9004_v62  ;;  %v3901_v57 = vrot.slane %v3842_v52, 1  ;;  %v3958_v2 = vrot.slane %v3842_v52, 2  ;;  %v3843_v49 = vsel %vm9022_vm9, %v3720_v56, 0.0  ;;  %v11572_v58 = vld [vmem:[#allocation85_spill] sm:$0xff] }
 0x73b   : > { %v3436_v25 = vadd.f32 %v8737_v10, %v3409_v44  ;;  %3723 = vst [vmem:[#allocation1 + $0x22] ss:$4 sm:$0xff] %v3518_v48  ;;  %v2846_v48 = vadd.f32 %v11572_v58, %v2760_v37  ;;  %v3903_v45 = vrot.slane %v3843_v49, 1  ;;  %v3960_v44 = vrot.slane %v3843_v49, 2  ;;  %v11576_v52 = vld [vmem:[#allocation43_spill] sm:$0xff]  ;;  %v11577_v37 = vld [vmem:[#allocation49_spill] sm:$0xff] }
 0x73c   : > { %3724 = vst [vmem:[#allocation1 + $0x23] ss:$4 sm:$0xff] %v3519_v32  ;;  %v9033_v54 = vsel %vm10424_vm13, %v3900_v11, %v3901_v57  ;;  %v9036_v34 = vsel %vm10423_vm14, %v3957_v8, %v3958_v2  ;;  %v4094_v32 = vld [vmem:[#allocation2 + $0x1c8] sm:$0xff]  ;;  %v2763_v56 = vadd.f32 %v11577_v37, %v11576_v52  ;;  %v11580_v8 = vld [vmem:[#allocation72_spill] sm:$0xff]  ;;  %v11585_v19 = vld [vmem:[#allocation73_spill] sm:$0xff] }
 0x73d   : > { %v3459_v55 = vmax.f32 %v3436_v25, 0.0  ;;  %4274 = vmatmul.f32.gmra.mxu2 %v9033_v54  ;;  %4339 = vmatmul.f32.gmra.mxu3 %v9036_v34  ;;  %3726 = vst [vmem:[#allocation1] ss:$4 sm:$0xff] %v3520_v12  ;;  %v4109_v12 = vld [vmem:[#allocation2 + $0x240] sm:$0xff]  ;;  %v2932_v50 = vadd.f32 %v11580_v8, %v2846_v48  ;;  %v9082_v58 = vpop.f32.mrf.mxu2  ;;  %v3273_v48 = vadd.f32 %v8882_v17, %v3187_v1  ;;  %v11583_v52 = vld [vmem:[#allocation44_spill] sm:$0xff]  ;;  %v11584_v37 = vld [vmem:[#allocation75_spill] sm:$0xff] }
 0x73e   : > { %v3355_v41 = vpop.f32.mrf.mxu0  ;;  %4382 = vmatpush.msrb.mxu1 %v4094_v32  ;;  %4448 = vmatpush.msrb.mxu2 %v4109_v12  ;;  %v2849_v49 = vadd.f32 %v11581_v21, %v2763_v56  ;;  %v2766_v56 = vadd.f32 %v11584_v37, %v11583_v52 }
 0x73f   : > { %v3521_v5 = vrot.slane %v3459_v55, 2  ;;  %v3522_v14 = vrot.slane %v3459_v55, 4  ;;  %v3356_v59 = vadd.f32 %v3355_v41, %v3270_v40  ;;  %3727 = vst [vmem:[#allocation1 + $0x1] ss:$4 sm:$0xff] %v3459_v55  ;;  %v3523_v29 = vrot.slane %v3459_v55, 6 }
 0x740   : > { %v9076_v40 = vsel %vm10424_vm13, %v3901_v57, %v3903_v45  ;;  %v9079_v55 = vsel %vm10423_vm14, %v3958_v2, %v3960_v44  ;;  %v3018_v3 = vadd.f32 %v11582_v31, %v2932_v50  ;;  %v9091_v2 = vpop.f32.mrf.mxu1  ;;  %v4108_v45 = vld [vmem:[#allocation2 + $0x238] sm:$0xff] }
 0x741   : > { %v3410_v11 = vmul.f32 %v8729_v42, %v3356_v59  ;;  %3728 = vst [vmem:[#allocation1 + $0x2] ss:$4 sm:$0xff] %v3521_v5  ;;  %v9088_v5 = vpop.f32.mrf.mxu3  ;;  %4449 = vmatpush.msrb.mxu2 %v4108_v45 }
 0x742   : > { %3729 = vst [vmem:[#allocation1 + $0x3] ss:$4 sm:$0xff] %v3522_v14  ;;  %v3569_v14 = vadd.s32 4, %v8758_v24  ;;  %v3104_v44 = vadd.f32 %v8841_v4, %v3018_v3 }
 0x743   : > { %v3437_v25 = vadd.f32 %v8737_v10, %v3410_v11  ;;  %v9067_v9 = vld.sshfl [vmem:[#allocation1 + $0x20] sm:$0xff pattern:$0x73625140]  ;;  %v2935_v11 = vadd.f32 %v11585_v19, %v2849_v49 }
 0x744   : > { %5032 = vmatmul.msk.f32.gmra.mxu1 %vm9060_vm1, %v9067_v9  ;;  %3730 = vst [vmem:[#allocation1 + $0x20] ss:$4 sm:$0xff] %v3523_v29  ;;  %5060 = vmatmul.msk.f32.gmra.mxu0 %vm9060_vm1, %v9067_v9  ;;  %v3844_v17 = vsel %vm9060_vm1, %v9067_v9, 0.0  ;;  %v4093_v29 = vld [vmem:[#allocation2 + $0x1c0] sm:$0xff]  ;;  %vm3586_vm4 = vcmp.ge.s32.totalorder %v3569_v14, 0  ;;  %vm3596_vm6 = vcmp.lt.s32.totalorder %v3569_v14, 16 }
 0x745   : > { %v3460_v41 = vmax.f32 %v3437_v25, 0.0  ;;  %4277 = vmatmul.f32.gmra.mxu2 %v9076_v40  ;;  %4342 = vmatmul.f32.gmra.mxu3 %v9079_v55  ;;  %v3190_v25 = vadd.f32 %v8911_v13, %v3104_v44  ;;  %v3905_v21 = vrot.slane %v3844_v17, 1  ;;  %v3962_v3 = vrot.slane %v3844_v17, 2  ;;  %v11591_v44 = vld [vmem:[#allocation88_spill] sm:$0xff]  ;;  %v9135_v37 = vpop.f32.mrf.mxu2  ;;  %vm9139_vm9 = vmand %vm3586_vm4, %vm3596_vm6 }
 0x746   : > { %v3358_v57 = vpop.f32.mrf.mxu0  ;;  %4383 = vmatpush.msrb.mxu1 %v4093_v29  ;;  %v11590_v29 = vld [vmem:[#allocation64_spill] sm:$0xff]  ;;  %vm9155_vm11 = vmand %vm9139_vm9, %vm10411_vm10 }
 0x747   : > { %v3524_v59 = vrot.slane %v3460_v41, 2  ;;  %v3359_v32 = vadd.f32 %v3358_v57, %v3273_v48  ;;  %v3525_v12 = vrot.slane %v3460_v41, 4  ;;  %v3526_v8 = vrot.slane %v3460_v41, 6  ;;  %v4107_v57 = vld [vmem:[#allocation2 + $0x230] sm:$0xff]  ;;  %vm3662_vm15 = vmand %vm9139_vm9, %vm10420_vm12 }
 0x748   : > { %v2852_v45 = vadd.f32 %v11590_v29, %v2766_v56  ;;  %v11592_v56 = vmov 0  ;;  %v9148_v29 = vpop.f32.mrf.mxu1  ;;  %4450 = vmatpush.msrb.mxu2 %v4107_v57  ;;  %v11607_v57 = vld [vmem:[#allocation113_spill] sm:$0xff] }
 0x749   : > { %v3411_v50 = vmul.f32 %v8729_v42, %v3359_v32  ;;  %v9101_v1 = vld.sshfl [vmem:[#allocation1] sm:$0xff pattern:$0x73625140]  ;;  %v11593_v56 = vsel %vm9139_vm9, 4294967295, %v11592_v56 }
 0x74a   : > { %3733 = vst [vmem:[#allocation1] ss:$4 sm:$0xff] %v3460_v41  ;;  %v3845_v4 = vsel %vm9047_vm0, %v9101_v1, 0.0  ;;  %v3276_v41 = vadd.f32 %v8914_v39, %v3190_v25 }
 0x74b   : > { %v3438_v48 = vadd.f32 %v8737_v10, %v3411_v50  ;;  %3734 = vst [vmem:[#allocation1 + $0x1] ss:$4 sm:$0xff] %v3524_v59  ;;  %v3906_v31 = vrot.slane %v3845_v4, 1  ;;  %v3963_v49 = vrot.slane %v3845_v4, 2  ;;  %v11595_v4 = vld [vmem:[#allocation45_spill] sm:$0xff] }
 0x74c   : > { %5033 = vmatmul.msk.f32.gmra.mxu1 %vm9047_vm0, %v9101_v1  ;;  %3735 = vst [vmem:[#allocation1 + $0x2] ss:$4 sm:$0xff] %v3525_v12  ;;  %5061 = vmatmul.msk.f32.gmra.mxu0 %vm9047_vm0, %v9101_v1  ;;  %v3732_v13 = vld.sshfl [vmem:[#allocation1 + $0x20] sm:$0xff pattern:$0x73625140]  ;;  %v3021_v12 = vadd.f32 %v11591_v44, %v2935_v11 }
 0x74d   : > { %v3461_v59 = vmax.f32 %v3438_v48, 0.0  ;;  %3736 = vst [vmem:[#allocation1 + $0x3] ss:$4 sm:$0xff] %v3526_v8  ;;  %v9124_v32 = vsel %vm10424_vm13, %v3905_v21, %v3906_v31  ;;  %v9127_v17 = vsel %vm10423_vm14, %v3962_v3, %v3963_v49  ;;  %v3846_v39 = vsel %vm9112_vm5, %v3732_v13, 0.0  ;;  %v4092_v11 = vld [vmem:[#allocation2 + $0x1b8] sm:$0xff]  ;;  %v11596_v21 = vld [vmem:[#allocation76_spill] sm:$0xff]  ;;  %v9145_v3 = vpop.f32.mrf.mxu3 }
 0x74e   : > { %11588 = vst [vmem:[#allocation127_spill] sm:$0xff] %v9124_v32  ;;  %4280 = vmatmul.f32.gmra.mxu2 %v9124_v32  ;;  %4345 = vmatmul.f32.gmra.mxu3 %v9127_v17  ;;  %v3361_v52 = vpop.f32.mrf.mxu0  ;;  %v2769_v48 = vadd.f32 %v11596_v21, %v11595_v4  ;;  %v3107_v13 = vadd.f32 %v8889_v46, %v3021_v12  ;;  %v3908_v14 = vrot.slane %v3846_v39, 1  ;;  %v3965_v44 = vrot.slane %v3846_v39, 2  ;;  %v4128_v32 = vld [vmem:[#allocation2 + $0x2d8] sm:$0xff] }
 0x74f   : > { %11589 = vst [vmem:[#allocation128_spill] sm:$0xff] %v9127_v17  ;;  %v3527_v19 = vrot.slane %v3461_v59, 2  ;;  %v3528_v8 = vrot.slane %v3461_v59, 4  ;;  %v3529_v50 = vrot.slane %v3461_v59, 6  ;;  %v3362_v25 = vadd.f32 %v3361_v52, %v3276_v41  ;;  %4384 = vmatpush.msrb.mxu1 %v4092_v11  ;;  %v11600_v52 = vld [vmem:[#allocation99_spill] sm:$0xff]  ;;  %v4103_v17 = vld [vmem:[#allocation2 + $0x210] sm:$0xff] }
 0x750   : > { %11594 = vst [vmem:[#allocation314_spill] sm:$0xff] %v11593_v56  ;;  %v2938_v11 = vadd.f32 %v11600_v52, %v2852_v45  ;;  %v3193_v46 = vadd.f32 %v8969_v43, %v3107_v13  ;;  %v9173_v43 = vsel %vm10424_vm13, %v3906_v31, %v3908_v14  ;;  %v9176_v45 = vsel %vm10423_vm14, %v3963_v49, %v3965_v44  ;;  %v4106_v49 = vld [vmem:[#allocation2 + $0x228] sm:$0xff] }
 0x751   : > { %3737 = vst [vmem:[#allocation1 + $0x20] ss:$4 sm:$0xff] %v3461_v59  ;;  %v3412_v41 = vmul.f32 %v8729_v42, %v3362_v25  ;;  %v11597_v59 = vmov 0  ;;  %v11601_v25 = vld [vmem:[#allocation65_spill] sm:$0xff]  ;;  %4451 = vmatpush.msrb.mxu2 %v4106_v49  ;;  %v11611_v49 = vld [vmem:[#allocation116_spill] sm:$0xff] }
 0x752   : > { %3738 = vst [vmem:[#allocation1 + $0x21] ss:$4 sm:$0xff] %v3527_v19  ;;  %v11598_v59 = vsel %vm9155_vm11, 4294967295, %v11597_v59  ;;  %v2855_v19 = vadd.f32 %v11601_v25, %v2769_v48  ;;  %v3279_v4 = vadd.f32 %v8975_v30, %v3193_v46  ;;  %v3024_v13 = vadd.f32 %v11607_v57, %v2938_v11  ;;  %v4091_v46 = vld [vmem:[#allocation2 + $0x1b0] sm:$0xff]  ;;  %v9185_v25 = vpop.f32.mrf.mxu2  ;;  %v9197_v57 = vpop.f32.mrf.mxu1 }
 0x753   : > { %11599 = vst [vmem:[#allocation315_spill] sm:$0xff] %v11598_v59  ;;  %v3439_v12 = vadd.f32 %v8737_v10, %v3412_v41  ;;  %4385 = vmatpush.msrb.mxu1 %v4091_v46 }
 0x754   : > { %3739 = vst [vmem:[#allocation1 + $0x22] ss:$4 sm:$0xff] %v3528_v8  ;;  %v9163_v39 = vld.sshfl [vmem:[#allocation1] sm:$0xff pattern:$0x73625140]  ;;  %v11605_v8 = vld [vmem:[#allocation46_spill] sm:$0xff]  ;;  %v3110_v44 = vadd.f32 %v8930_v6, %v3024_v13 }
 0x755   : > { %3740 = vst [vmem:[#allocation1 + $0x23] ss:$4 sm:$0xff] %v3529_v50  ;;  %v3462_v21 = vmax.f32 %v3439_v12, 0.0  ;;  %5034 = vmatmul.msk.f32.gmra.mxu1 %vm9155_vm11, %v9163_v39  ;;  %5062 = vmatmul.msk.f32.gmra.mxu0 %vm9155_vm11, %v9163_v39  ;;  %v11606_v50 = vld [vmem:[#allocation77_spill] sm:$0xff]  ;;  %v11608_v12 = vld [vmem:[#allocation100_spill] sm:$0xff]  ;;  %v3847_v11 = vsel %vm9155_vm11, %v9163_v39, 0.0 }
 0x756   : > { %11602 = vst [vmem:[#allocation58_spill] sm:$0xff] %v9163_v39  ;;  %4283 = vmatmul.f32.gmra.mxu2 %v9173_v43  ;;  %4348 = vmatmul.f32.gmra.mxu3 %v9176_v45  ;;  %v3364_v30 = vpop.f32.mrf.mxu0  ;;  %v2772_v48 = vadd.f32 %v11606_v50, %v11605_v8  ;;  %v2941_v31 = vadd.f32 %v11608_v12, %v2855_v19  ;;  %v9191_v8 = vpop.f32.mrf.mxu3  ;;  %v3570_v19 = vadd.s32 5, %v8758_v24  ;;  %v3910_v13 = vrot.slane %v3847_v11, 1 }
 0x757   : > { %11603 = vst [vmem:[#allocation320_spill] sm:$0xff] %v9173_v43  ;;  %v3530_v41 = vrot.slane %v3462_v21, 2  ;;  %v3365_v52 = vadd.f32 %v3364_v30, %v3279_v4  ;;  %v3531_v14 = vrot.slane %v3462_v21, 4  ;;  %v11610_v30 = vld [vmem:[#allocation92_spill] sm:$0xff]  ;;  %v3196_v6 = vadd.f32 %v9027_v26, %v3110_v44  ;;  %v4090_v44 = vld [vmem:[#allocation2 + $0x1a8] sm:$0xff] }
 0x758   : > { %11604 = vst [vmem:[#allocation316_spill] sm:$0xff] %v9176_v45  ;;  %v3532_v45 = vrot.slane %v3462_v21, 6  ;;  %v2858_v50 = vadd.f32 %v11610_v30, %v2772_v48  ;;  %v3967_v46 = vrot.slane %v3847_v11, 2  ;;  %v3027_v59 = vadd.f32 %v11611_v49, %v2941_v31  ;;  %4386 = vmatpush.msrb.mxu1 %v4090_v44  ;;  %v11615_v49 = vld [vmem:[#allocation55_spill] sm:$0xff] }
 0x759   : > { %3743 = vst [vmem:[#allocation1] ss:$4 sm:$0xff] %v3462_v21  ;;  %v3413_v43 = vmul.f32 %v8729_v42, %v3365_v52  ;;  %v3282_v48 = vadd.f32 %v9030_v33, %v3196_v6  ;;  %vm3587_vm4 = vcmp.ge.s32.totalorder %v3570_v19, 0  ;;  %vm3597_vm5 = vcmp.lt.s32.totalorder %v3570_v19, 16  ;;  %v4105_v6 = vld [vmem:[#allocation2 + $0x220] sm:$0xff] }
 0x75a   : > { %4452 = vmatpush.msrb.mxu2 %v4105_v6  ;;  %vm9235_vm6 = vmand %vm3587_vm4, %vm3597_vm5  ;;  %v9241_v44 = vpop.f32.mrf.mxu2  ;;  %v9251_v19 = vpop.f32.mrf.mxu1 }
 0x75b   : > { %v3440_v21 = vadd.f32 %v8737_v10, %v3413_v43 }
 0x75c   : > { %v9193_v4 = vld.sshfl [vmem:[#allocation1 + $0x20] sm:$0xff pattern:$0x73625140] }
 0x75d   : > { %11609 = vst [vmem:[#allocation205_spill] sm:$0xff] %v9193_v4  ;;  %v3848_v42 = vsel %vm9139_vm9, %v9193_v4, 0.0  ;;  %v3463_v30 = vmax.f32 %v3440_v21, 0.0  ;;  %5035 = vmatmul.msk.f32.gmra.mxu1 %vm9139_vm9, %v9193_v4  ;;  %5063 = vmatmul.msk.f32.gmra.mxu0 %vm9139_vm9, %v9193_v4  ;;  %v3113_v21 = vadd.f32 %v8983_v18, %v3027_v59  ;;  %v11619_v18 = vld [vmem:[#allocation79_spill] sm:$0xff] }
 0x75e   : > { %3745 = vst [vmem:[#allocation1 + $0x20] ss:$4 sm:$0xff] %v3530_v41  ;;  %v3911_v52 = vrot.slane %v3848_v42, 1  ;;  %v3968_v12 = vrot.slane %v3848_v42, 2  ;;  %v3367_v33 = vpop.f32.mrf.mxu0  ;;  %v9228_v42 = vld [vmem:[%s10087_s2] ss:$0 sm:$0xff]  ;;  %v2944_v59 = vadd.f32 %v11619_v18, %v2858_v50 }
 0x75f   : > { %3746 = vst [vmem:[#allocation1 + $0x21] ss:$4 sm:$0xff] %v3531_v14  ;;  %v3534_v41 = vrot.slane %v3463_v30, 4  ;;  %v3535_v31 = vrot.slane %v3463_v30, 6  ;;  %v3368_v14 = vadd.f32 %v3367_v33, %v3282_v48  ;;  %v11616_v33 = vmov 0  ;;  %v11623_v50 = vld [vmem:[#allocation120_spill] sm:$0xff] }
 0x760   : > { %3747 = vst [vmem:[#allocation1 + $0x22] ss:$4 sm:$0xff] %v3532_v45  ;;  %v9217_v10 = vsel %vm10424_vm13, %v3910_v13, %v3911_v52  ;;  %v9220_v26 = vsel %vm10423_vm14, %v3967_v46, %v3968_v12  ;;  %v3744_v43 = vld.sshfl [vmem:[#allocation1] sm:$0xff pattern:$0x73625140]  ;;  %v3533_v45 = vrot.slane %v3463_v30, 2 }
 0x761   : > { %11612 = vst [vmem:[#allocation190_spill] sm:$0xff] %v9217_v10  ;;  %4286 = vmatmul.f32.gmra.mxu2 %v9217_v10  ;;  %4351 = vmatmul.f32.gmra.mxu3 %v9220_v26  ;;  %v3849_v11 = vsel %vm3662_vm15, %v3744_v43, 0.0  ;;  %v3414_v13 = vmul.f32 %v9228_v42, %v3368_v14  ;;  %v11614_v46 = vld [vmem:[#allocation52_spill] sm:$0xff]  ;;  %v11617_v33 = vsel %vm9235_vm6, 4294967295, %v11616_v33  ;;  %v3199_v43 = vadd.f32 %v9082_v58, %v3113_v21  ;;  %v9249_v14 = vpop.f32.mrf.mxu3  ;;  %vm9258_vm15 = vmand %vm9235_vm6, %vm10411_vm10  ;;  %v4089_v10 = vld [vmem:[#allocation2 + $0x1a0] sm:$0xff] }
 0x762   : > { %11613 = vst [vmem:[#allocation212_spill] sm:$0xff] %v9220_v26  ;;  %v3913_v26 = vrot.slane %v3849_v11, 1  ;;  %v3970_v48 = vrot.slane %v3849_v11, 2  ;;  %v11620_v58 = vmov 0  ;;  %4387 = vmatpush.msrb.mxu1 %v4089_v10  ;;  %vm9318_vm10 = vmand %vm9235_vm6, %vm10420_vm12  ;;  %v11638_v4 = vld [vmem:[#allocation107_spill] sm:$0xff] }
 0x763   : > { %3748 = vst [vmem:[#allocation1 + $0x23] ss:$4 sm:$0xff] %v3463_v30  ;;  %v2775_v30 = vadd.f32 %v11615_v49, %v11614_v46  ;;  %v3285_v11 = vadd.f32 %v9088_v5, %v3199_v43  ;;  %v11621_v58 = vsel %vm9258_vm15, 4294967295, %v11620_v58  ;;  %v11627_v5 = vld [vmem:[#allocation97_spill] sm:$0xff] }
 0x764   : > { %3750 = vst [vmem:[#allocation1] ss:$4 sm:$0xff] %v3533_v45  ;;  %v9246_v45 = vld [vmem:[%s10088_s3] ss:$0 sm:$0xff]  ;;  %v3030_v18 = vadd.f32 %v11627_v5, %v2944_v59  ;;  %v3571_v59 = vadd.s32 6, %v8758_v24 }
 0x765   : > { %3751 = vst [vmem:[#allocation1 + $0x1] ss:$4 sm:$0xff] %v3534_v41  ;;  %v3441_v41 = vadd.f32 %v9246_v45, %v3414_v13  ;;  %v2861_v21 = vadd.f32 %v11623_v50, %v2775_v30  ;;  %v9264_v13 = vsel %vm10424_vm13, %v3911_v52, %v3913_v26  ;;  %v11628_v30 = vld [vmem:[#allocation53_spill] sm:$0xff]  ;;  %v11629_v50 = vld [vmem:[#allocation56_spill] sm:$0xff] }
 0x766   : > { %11618 = vst [vmem:[#allocation346_spill] sm:$0xff] %v11617_v33  ;;  %v3370_v46 = vpop.f32.mrf.mxu0  ;;  %v2778_v52 = vadd.f32 %v11629_v50, %v11628_v30  ;;  %v3116_v26 = vadd.f32 %v9038_v53, %v3030_v18  ;;  %v4131_v53 = vld [vmem:[#allocation2 + $0x2f0] sm:$0xff]  ;;  %vm3588_vm4 = vcmp.ge.s32.totalorder %v3571_v59, 0  ;;  %vm3598_vm5 = vcmp.lt.s32.totalorder %v3571_v59, 16 }
 0x767   : > { %3752 = vst [vmem:[#allocation1 + $0x2] ss:$4 sm:$0xff] %v3535_v31  ;;  %v3464_v6 = vmax.f32 %v3441_v41, 0.0  ;;  %v9267_v31 = vsel %vm10423_vm14, %v3968_v12, %v3970_v48  ;;  %v3371_v41 = vadd.f32 %v3370_v46, %v3285_v11  ;;  %v4104_v12 = vld [vmem:[#allocation2 + $0x218] sm:$0xff]  ;;  %v11631_v18 = vld [vmem:[#allocation16_spill] sm:$0xff]  ;;  %vm9342_vm12 = vmand %vm3588_vm4, %vm3598_vm5  ;;  %vm11658_vm5 = vcmp.lt.s32.totalorder %v8817_v38, 16 }
 0x768   : > { %11622 = vst [vmem:[#allocation347_spill] sm:$0xff] %v11621_v58  ;;  %4453 = vmatpush.msrb.mxu2 %v4104_v12  ;;  %v4132_v11 = vld [vmem:[#allocation2 + $0x2f8] sm:$0xff]  ;;  %v3202_v30 = vadd.f32 %v9135_v37, %v3116_v26 }
 0x769   : > { %11624 = vst [vmem:[#allocation348_spill] sm:$0xff] %v9264_v13  ;;  %v3536_v43 = vrot.slane %v3464_v6, 2  ;;  %4289 = vmatmul.f32.gmra.mxu2 %v9264_v13  ;;  %4354 = vmatmul.f32.gmra.mxu3 %v9267_v31  ;;  %v3415_v48 = vmul.f32 %v9228_v42, %v3371_v41  ;;  %v11630_v46 = vld [vmem:[#allocation81_spill] sm:$0xff]  ;;  %v2864_v41 = vadd.f32 %v11631_v18, %v2778_v52  ;;  %v3537_v12 = vrot.slane %v3464_v6, 4  ;;  %v9296_v26 = vpop.f32.mrf.mxu3  ;;  %v9300_v52 = vpop.f32.mrf.mxu1 }
 0x76a   : > { %11625 = vst [vmem:[#allocation349_spill] sm:$0xff] %v9267_v31  ;;  %v9269_v49 = vld.sshfl [vmem:[#allocation1 + $0x20] sm:$0xff pattern:$0x73625140]  ;;  %v2947_v5 = vadd.f32 %v11630_v46, %v2861_v21  ;;  %4506 = vmatpush.msrb.mxu3 %v4132_v11  ;;  %v3288_v10 = vadd.f32 %v9145_v3, %v3202_v30  ;;  %v4130_v21 = vld [vmem:[#allocation2 + $0x2e8] sm:$0xff]  ;;  %4454 = vmatpush.msrb.mxu2 %v4103_v17  ;;  %v11643_v17 = vld [vmem:[#allocation102_spill] sm:$0xff] }
 0x76b   : > { %11626 = vst [vmem:[#allocation350_spill] sm:$0xff] %v9269_v49  ;;  %5036 = vmatmul.msk.f32.gmra.mxu1 %vm9258_vm15, %v9269_v49  ;;  %5064 = vmatmul.msk.f32.gmra.mxu0 %vm9258_vm15, %v9269_v49  ;;  %v3442_v50 = vadd.f32 %v9246_v45, %v3415_v48  ;;  %v3850_v31 = vsel %vm9258_vm15, %v9269_v49, 0.0  ;;  %v11632_v11 = vld [vmem:[#allocation121_spill] sm:$0xff]  ;;  %v3538_v48 = vrot.slane %v3464_v6, 6  ;;  %v2950_v33 = vadd.f32 %v11638_v4, %v2864_v41 }
 0x76c   : > { %3753 = vst [vmem:[#allocation1 + $0x3] ss:$4 sm:$0xff] %v3464_v6  ;;  %4507 = vmatpush.msrb.mxu3 %v4131_v53  ;;  %v3033_v37 = vadd.f32 %v11632_v11, %v2947_v5  ;;  %v3915_v49 = vrot.slane %v3850_v31, 1  ;;  %v11642_v41 = vld [vmem:[#allocation17_spill] sm:$0xff] }
 0x76d   : > { %3754 = vst [vmem:[#allocation1 + $0x20] ss:$4 sm:$0xff] %v3536_v43  ;;  %v9292_v43 = vpop.f32.mrf.mxu2  ;;  %v3465_v13 = vmax.f32 %v3442_v50, 0.0  ;;  %v4088_v50 = vld [vmem:[#allocation2 + $0x198] sm:$0xff] }
 0x76e   : > { %v3373_v46 = vpop.f32.mrf.mxu0  ;;  %4508 = vmatpush.msrb.mxu3 %v4130_v21  ;;  %v3119_v56 = vadd.f32 %v9091_v2, %v3033_v37  ;;  %v3972_v21 = vrot.slane %v3850_v31, 2  ;;  %4388 = vmatpush.msrb.mxu1 %v4088_v50  ;;  %v4129_v37 = vld [vmem:[#allocation2 + $0x2e0] sm:$0xff] }
 0x76f   : > { %v3539_v53 = vrot.slane %v3465_v13, 2  ;;  %v3540_v18 = vrot.slane %v3465_v13, 4  ;;  %v3541_v3 = vrot.slane %v3465_v13, 6  ;;  %v3374_v30 = vadd.f32 %v3373_v46, %v3288_v10  ;;  %v11637_v46 = vld [vmem:[#allocation114_spill] sm:$0xff] }
 0x770   : > { %v3205_v39 = vadd.f32 %v9185_v25, %v3119_v56  ;;  %4509 = vmatpush.msrb.mxu3 %v4129_v37  ;;  %v11639_v56 = vmov 0  ;;  %v4127_v25 = vld [vmem:[#allocation2 + $0x2d0] sm:$0xff]  ;;  %v4125_v37 = vld [vmem:[#allocation2 + $0x2c0] sm:$0xff] }
 0x771   : > { %v3416_v10 = vmul.f32 %v9228_v42, %v3374_v30  ;;  %v11640_v56 = vsel %vm9342_vm12, 4294967295, %v11639_v56 }
 0x772   : > { %11641 = vst [vmem:[#allocation352_spill] sm:$0xff] %v11640_v56  ;;  %v3291_v4 = vadd.f32 %v9191_v8, %v3205_v39  ;;  %4510 = vmatpush.msrb.mxu3 %v4128_v32  ;;  %v11645_v32 = vmov 0  ;;  %v4087_v8 = vld [vmem:[#allocation2 + $0x190] sm:$0xff]  ;;  %v11663_v56 = vld [vmem:[#allocation89_spill] sm:$0xff] }
 0x773   : > { %v9298_v58 = vld.sshfl [vmem:[#allocation1] sm:$0xff pattern:$0x73625140]  ;;  %4389 = vmatpush.msrb.mxu1 %v4087_v8 }
 0x774   : > { %11633 = vst [vmem:[#allocation351_spill] sm:$0xff] %v9298_v58  ;;  %5037 = vmatmul.msk.f32.gmra.mxu1 %vm9235_vm6, %v9298_v58  ;;  %5065 = vmatmul.msk.f32.gmra.mxu0 %vm9235_vm6, %v9298_v58  ;;  %v9312_v6 = vsel %vm9235_vm6, %v9298_v58, 0.0  ;;  %v3756_v5 = vld.sshfl [vmem:[#allocation1 + $0x20] sm:$0xff pattern:$0x73625140]  ;;  %vm11662_vm6 = vcmask 1045504  }
 0x775   : > { %3757 = vst [vmem:[#allocation1] ss:$4 sm:$0xff] %v3537_v12  ;;  %v3916_v12 = vrot.slane %v9312_v6, 1  ;;  %v3973_v11 = vrot.slane %v9312_v6, 2  ;;  %v3852_v50 = vsel %vm9318_vm10, %v3756_v5, 0.0  ;;  %v4126_v5 = vld [vmem:[#allocation2 + $0x2c8] sm:$0xff]  ;;  %4511 = vmatpush.msrb.mxu3 %v4127_v25 }
 0x776   : > { %3758 = vst [vmem:[#allocation1 + $0x1] ss:$4 sm:$0xff] %v3538_v48  ;;  %v11636_v48 = vld [vmem:[#allocation33_spill] sm:$0xff]  ;;  %v3376_v6 = vpop.f32.mrf.mxu0  ;;  %v3918_v2 = vrot.slane %v3852_v50, 1  ;;  %vm11644_vm10 = vcmp.ge.s32.totalorder %v8770_v22, 0  ;;  %v3975_v39 = vrot.slane %v3852_v50, 2 }
 0x777   : > { %3759 = vst [vmem:[#allocation1 + $0x2] ss:$4 sm:$0xff] %v3465_v13  ;;  %v2781_v58 = vadd.f32 %v11637_v46, %v11636_v48  ;;  %v3443_v13 = vadd.f32 %v9246_v45, %v3416_v10  ;;  %v9331_v30 = vsel %vm10424_vm13, %v3915_v49, %v3916_v12  ;;  %v9334_v31 = vsel %vm10423_vm14, %v3972_v21, %v3973_v11  ;;  %v9351_v10 = vpop.f32.mrf.mxu2  ;;  %vm9359_vm4 = vmand %vm9342_vm12, %vm11644_vm10  ;;  %v4102_v48 = vld [vmem:[#allocation2 + $0x208] sm:$0xff]  ;;  %v9367_v46 = vpop.f32.mrf.mxu1 }
 0x778   : > { %3760 = vst [vmem:[#allocation1 + $0x3] ss:$4 sm:$0xff] %v3539_v53  ;;  %4292 = vmatmul.f32.gmra.mxu2 %v9331_v30  ;;  %4357 = vmatmul.f32.gmra.mxu3 %v9334_v31  ;;  %v11646_v32 = vsel %vm9359_vm4, 4294967295, %v11645_v32  ;;  %v11648_v50 = vld [vmem:[#allocation87_spill] sm:$0xff]  ;;  %vm9426_vm10 = vmand %vm9342_vm12, %vm11658_vm5  ;;  %vm11675_vm5 = vcmask 1045504  }
 0x779   : > { %3761 = vst [vmem:[#allocation1 + $0x20] ss:$4 sm:$0xff] %v3540_v18  ;;  %v9347_v49 = vmax.f32 %v3443_v13, 0.0  ;;  %v2867_v53 = vadd.f32 %v11642_v41, %v2781_v58  ;;  %v3036_v18 = vadd.f32 %v11643_v17, %v2950_v33  ;;  %v9365_v58 = vpop.f32.mrf.mxu3  ;;  %4512 = vmatpush.msrb.mxu3 %v4126_v5  ;;  %4455 = vmatpush.msrb.mxu2 %v4102_v48  ;;  %v4086_v41 = vld [vmem:[#allocation2 + $0x188] sm:$0xff] }
 0x77a   : > { %3762 = vst [vmem:[#allocation1 + $0x21] ss:$4 sm:$0xff] %v3541_v3  ;;  %v3377_v3 = vadd.f32 %v3376_v6, %v3291_v4  ;;  %v9382_v6 = vsel %vm10424_vm13, %v3916_v12, %v3918_v2  ;;  %v9385_v5 = vsel %vm10423_vm14, %v3973_v11, %v3975_v39  ;;  %4390 = vmatpush.msrb.mxu1 %v4086_v41  ;;  %v11653_v12 = vld [vmem:[#allocation103_spill] sm:$0xff]  ;;  %v3572_v39 = vadd.s32 7, %v8758_v24 }
 0x77b   : > { %v3542_v59 = vrot.slane %v9347_v49, 2  ;;  %v3543_v21 = vrot.slane %v9347_v49, 4  ;;  %11647 = vst [vmem:[#allocation353_spill] sm:$0xff] %v11646_v32  ;;  %v3122_v33 = vadd.f32 %v9148_v29, %v3036_v18  ;;  %v2953_v25 = vadd.f32 %v11648_v50, %v2867_v53  ;;  %v4124_v29 = vld [vmem:[#allocation2 + $0x2b8] sm:$0xff]  ;;  %4513 = vmatpush.msrb.mxu3 %v4125_v37  ;;  %v4123_v53 = vld [vmem:[#allocation2 + $0x2b0] sm:$0xff]  ;;  %v4122_v37 = vld [vmem:[#allocation2 + $0x2a8] sm:$0xff] }
 0x77c   : > { %3763 = vst [vmem:[#allocation1 + $0x22] ss:$4 sm:$0xff] %v9347_v49  ;;  %v3417_v13 = vmul.f32 %v9228_v42, %v3377_v3  ;;  %v3544_v48 = vrot.slane %v9347_v49, 6  ;;  %vm3589_vm14 = vcmp.ge.s32.totalorder %v3572_v39, 0  ;;  %vm3599_vm13 = vcmp.lt.s32.totalorder %v3572_v39, 16 }
 0x77d   : > { %3764 = vst [vmem:[#allocation1 + $0x23] ss:$4 sm:$0xff] %v3542_v59  ;;  %v3208_v17 = vadd.f32 %v9241_v44, %v3122_v33  ;;  %v4085_v44 = vld [vmem:[#allocation2 + $0x180] sm:$0xff]  ;;  %4514 = vmatpush.msrb.mxu3 %v4124_v29  ;;  %v3039_v2 = vadd.f32 %v11653_v12, %v2953_v25 }
 0x77e   : > { %v3444_v18 = vadd.f32 %v9246_v45, %v3417_v13  ;;  %11649 = vst [vmem:[#allocation354_spill] sm:$0xff] %v9382_v6  ;;  %v11651_v59 = vld [vmem:[#allocation34_spill] sm:$0xff]  ;;  %4391 = vmatpush.msrb.mxu1 %v4085_v44  ;;  %v3379_v11 = vpop.f32.mrf.mxu0 }
 0x77f   : > { %v9370_v4 = vld.sshfl [vmem:[#allocation1] sm:$0xff pattern:$0x73625140]  ;;  %11650 = vst [vmem:[#allocation359_spill] sm:$0xff] %v9385_v5  ;;  %v3294_v8 = vadd.f32 %v9249_v14, %v3208_v17  ;;  %4515 = vmatpush.msrb.mxu3 %v4123_v53  ;;  %v11655_v14 = vld [vmem:[#allocation11_spill] sm:$0xff]  ;;  %v4121_v25 = vld [vmem:[#allocation2 + $0x2a0] sm:$0xff]  ;;  %v9404_v49 = vpop.f32.mrf.mxu2 }
 0x780   : > { %5038 = vmatmul.msk.f32.gmra.mxu1 %vm9359_vm4, %v9370_v4  ;;  %3767 = vst [vmem:[#allocation1] ss:$4 sm:$0xff] %v3543_v21  ;;  %5066 = vmatmul.msk.f32.gmra.mxu0 %vm9359_vm4, %v9370_v4  ;;  %v11652_v21 = vld [vmem:[#allocation23_spill] sm:$0xff]  ;;  %v3467_v33 = vmax.f32 %v3444_v18, 0.0  ;;  %v3853_v50 = vsel %vm9359_vm4, %v9370_v4, 0.0  ;;  %vm11661_vm4 = vcmask 1046528  }
 0x781   : > { %4295 = vmatmul.f32.gmra.mxu2 %v9382_v6  ;;  %4360 = vmatmul.f32.gmra.mxu3 %v9385_v5  ;;  %v2784_v3 = vadd.f32 %v11652_v21, %v11651_v59  ;;  %v3380_v41 = vadd.f32 %v3379_v11, %v3294_v8  ;;  %v11654_v59 = vld [vmem:[#allocation35_spill] sm:$0xff]  ;;  %v11657_v21 = vld [vmem:[#allocation38_spill] sm:$0xff]  ;;  %v3125_v5 = vadd.f32 %v9197_v57, %v3039_v2  ;;  %v3920_v57 = vrot.slane %v3853_v50, 1 }
 0x782   : > { %v3545_v13 = vrot.slane %v3467_v33, 2  ;;  %v2787_v17 = vadd.f32 %v11655_v14, %v11654_v59  ;;  %v3546_v29 = vrot.slane %v3467_v33, 4  ;;  %v3547_v18 = vrot.slane %v3467_v33, 6  ;;  %4516 = vmatpush.msrb.mxu3 %v4122_v37  ;;  %v9412_v59 = vpop.f32.mrf.mxu3 }
 0x783   : > { %v2870_v12 = vadd.f32 %v11657_v21, %v2784_v3  ;;  %v3418_v8 = vmul.f32 %v9228_v42, %v3380_v41  ;;  %v3977_v2 = vrot.slane %v3853_v50, 2  ;;  %v9430_v41 = vpop.f32.mrf.mxu1  ;;  %v4120_v50 = vld [vmem:[#allocation2 + $0x298] sm:$0xff] }
 0x784   : > { %v9400_v44 = vld.sshfl [vmem:[#allocation1 + $0x20] sm:$0xff pattern:$0x73625140]  ;;  %4517 = vmatpush.msrb.mxu3 %v4121_v25 }
 0x785   : > { %11656 = vst [vmem:[#allocation367_spill] sm:$0xff] %v9400_v44  ;;  %v9410_v53 = vsel %vm9342_vm12, %v9400_v44, 0.0  ;;  %v3445_v14 = vadd.f32 %v9246_v45, %v3418_v8  ;;  %v11665_v8 = vmov 0 }
 0x786   : > { %3769 = vst [vmem:[#allocation1 + $0x20] ss:$4 sm:$0xff] %v3544_v48  ;;  %v3921_v3 = vrot.slane %v9410_v53, 1  ;;  %v3978_v48 = vrot.slane %v9410_v53, 2  ;;  %v3382_v25 = vpop.f32.mrf.mxu0  ;;  %4518 = vmatpush.msrb.mxu3 %v4120_v50 }
 0x787   : > { %v3768_v11 = vld.sshfl [vmem:[#allocation1] sm:$0xff pattern:$0x73625140]  ;;  %3770 = vst [vmem:[#allocation1 + $0x21] ss:$4 sm:$0xff] %v3467_v33  ;;  %v3211_v33 = vadd.f32 %v9292_v43, %v3125_v5  ;;  %v3468_v32 = vmax.f32 %v3445_v14, 0.0 }
 0x788   : > { %5039 = vmatmul.msk.f32.gmra.mxu1 %vm9342_vm12, %v9400_v44  ;;  %5067 = vmatmul.msk.f32.gmra.mxu0 %vm9342_vm12, %v9400_v44  ;;  %3771 = vst [vmem:[#allocation1 + $0x22] ss:$4 sm:$0xff] %v3545_v13  ;;  %v9435_v21 = vsel %vm11661_vm4, %v3920_v57, %v3921_v3  ;;  %v9438_v53 = vsel %vm11662_vm6, %v3977_v2, %v3978_v48  ;;  %v3855_v43 = vsel %vm9426_vm10, %v3768_v11, 0.0  ;;  %v4119_v5 = vld [vmem:[#allocation2 + $0x290] sm:$0xff]  ;;  %vm9449_vm6 = vmand %vm3589_vm14, %vm3599_vm13  ;;  %vm11668_vm13 = vcmp.ge.s32.totalorder %v8770_v22, 0 }
 0x789   : > { %3772 = vst [vmem:[#allocation1 + $0x23] ss:$4 sm:$0xff] %v3546_v29  ;;  %v2956_v44 = vadd.f32 %v11663_v56, %v2870_v12  ;;  %v3297_v6 = vadd.f32 %v9296_v26, %v3211_v33  ;;  %4298 = vmatmul.f32.gmra.mxu2 %v9435_v21  ;;  %4363 = vmatmul.f32.gmra.mxu3 %v9438_v53  ;;  %v11664_v13 = vld [vmem:[#allocation20_spill] sm:$0xff]  ;;  %v11666_v8 = vsel %vm9449_vm6, 4294967295, %v11665_v8  ;;  %v4101_v26 = vld [vmem:[#allocation2 + $0x200] sm:$0xff]  ;;  %v3548_v57 = vrot.slane %v3468_v32, 2  ;;  %vm9460_vm14 = vmand %vm9449_vm6, %vm11668_vm13 }
 0x78a   : > { %3774 = vst [vmem:[#allocation1] ss:$4 sm:$0xff] %v3547_v18  ;;  %v2873_v29 = vadd.f32 %v11664_v13, %v2787_v17  ;;  %v11667_v56 = vld [vmem:[#allocation104_spill] sm:$0xff]  ;;  %v3549_v2 = vrot.slane %v3468_v32, 4  ;;  %4456 = vmatpush.msrb.mxu2 %v4101_v26  ;;  %v4118_v18 = vld [vmem:[#allocation2 + $0x288] sm:$0xff]  ;;  %v3550_v11 = vrot.slane %v3468_v32, 6  ;;  %4519 = vmatpush.msrb.mxu3 %v4119_v5 }
 0x78b   : > { %v3042_v12 = vadd.f32 %v11667_v56, %v2956_v44  ;;  %v3383_v33 = vadd.f32 %v3382_v25, %v3297_v6  ;;  %3775 = vst [vmem:[#allocation1 + $0x1] ss:$4 sm:$0xff] %v3468_v32  ;;  %v3923_v37 = vrot.slane %v3855_v43, 1  ;;  %v3980_v17 = vrot.slane %v3855_v43, 2  ;;  %v11671_v6 = vld [vmem:[#allocation115_spill] sm:$0xff]  ;;  %v9466_v43 = vpop.f32.mrf.mxu2  ;;  %v9469_v5 = vpop.f32.mrf.mxu1  ;;  %v4117_v25 = vld [vmem:[#allocation2 + $0x280] sm:$0xff] }
 0x78c   : > { %3776 = vst [vmem:[#allocation1 + $0x2] ss:$4 sm:$0xff] %v3548_v57  ;;  %4520 = vmatpush.msrb.mxu3 %v4118_v18  ;;  %v2959_v32 = vadd.f32 %v11671_v6, %v2873_v29  ;;  %v4180_v26 = vld [vmem:[#allocation2 + $0x478] sm:$0xff]  ;;  %v11673_v56 = vld [vmem:[#allocation36_spill] sm:$0xff]  ;;  %v9475_v57 = vpop.f32.mrf.mxu3  ;;  %v3573_v6 = vadd.s32 8, %v8758_v24  ;;  %vm11687_vm10 = vcmask 1045504  }
 0x78d   : > { %v3128_v39 = vadd.f32 %v9251_v19, %v3042_v12  ;;  %v3419_v14 = vmul.f32 %v9228_v42, %v3383_v33  ;;  %3777 = vst [vmem:[#allocation1 + $0x3] ss:$4 sm:$0xff] %v3549_v2  ;;  %v11674_v12 = vld [vmem:[#allocation14_spill] sm:$0xff]  ;;  %v9487_v29 = vsel %vm11675_vm5, %v3978_v48, %v3980_v17  ;;  %4701 = vmatpush.msra.mxu2 %v4180_v26  ;;  %v4164_v17 = vld [vmem:[#allocation2 + $0x3f8] sm:$0xff] }
 0x78e   : > { %11672 = vst [vmem:[#allocation133_spill] sm:$0xff] %v9469_v5  ;;  %v2790_v33 = vadd.f32 %v11674_v12, %v11673_v56  ;;  %v11677_v2 = vld [vmem:[#allocation106_spill] sm:$0xff]  ;;  %4521 = vmatpush.msrb.mxu3 %v4117_v25  ;;  %4636 = vmatpush.msra.mxu1 %v4164_v17  ;;  %vm3600_vm13 = vcmp.lt.s32.totalorder %v3573_v6, 16 }
 0x78f   : > { %v3214_v50 = vadd.f32 %v9351_v10, %v3128_v39  ;;  %v3446_v19 = vadd.f32 %v9246_v45, %v3419_v14  ;;  %v9484_v10 = vsel %vm11661_vm4, %v3921_v3, %v3923_v37  ;;  %11676 = vst [vmem:[#allocation134_spill] sm:$0xff] %v9487_v29  ;;  %v3045_v18 = vadd.f32 %v11677_v2, %v2959_v32  ;;  %v11678_v32 = vld [vmem:[#allocation22_spill] sm:$0xff] }
 0x790   : > { %v9471_v13 = vld.sshfl [vmem:[#allocation1 + $0x20] sm:$0xff pattern:$0x73625140]  ;;  %vm11679_vm4 = vcmp.lt.s32.totalorder %v8817_v38, 16 }
 0x791   : > { %5040 = vmatmul.msk.f32.gmra.mxu1 %vm9460_vm14, %v9471_v13  ;;  %3778 = vst [vmem:[#allocation1 + $0x20] ss:$4 sm:$0xff] %v3550_v11  ;;  %5068 = vmatmul.msk.f32.gmra.mxu0 %vm9460_vm14, %v9471_v13  ;;  %v3300_v39 = vadd.f32 %v9365_v58, %v3214_v50  ;;  %v3469_v14 = vmax.f32 %v3446_v19, 0.0  ;;  %v3385_v11 = vpop.f32.mrf.mxu0  ;;  %v3131_v3 = vadd.f32 %v9300_v52, %v3045_v18  ;;  %v3856_v48 = vsel %vm9460_vm14, %v9471_v13, 0.0  ;;  %v4179_v58 = vld [vmem:[#allocation2 + $0x470] sm:$0xff]  ;;  %vm9511_vm5 = vmand %vm9449_vm6, %vm11679_vm4 }
 0x792   : > { %4301 = vmatmul.f32.gmra.mxu2 %v9484_v10  ;;  %4366 = vmatmul.f32.gmra.mxu3 %v9487_v29  ;;  %v2876_v50 = vadd.f32 %v11678_v32, %v2790_v33  ;;  %v3925_v18 = vrot.slane %v3856_v48, 1  ;;  %vm11686_vm4 = vcmask 1046528  }
 0x793   : > { %v3551_v37 = vrot.slane %v3469_v14, 2  ;;  %v3386_v56 = vadd.f32 %v3385_v11, %v3300_v39  ;;  %v3552_v19 = vrot.slane %v3469_v14, 4  ;;  %4702 = vmatpush.msra.mxu2 %v4179_v58  ;;  %v3217_v12 = vadd.f32 %v9404_v49, %v3131_v3  ;;  %v11683_v3 = vld [vmem:[#allocation30_spill] sm:$0xff]  ;;  %v11684_v58 = vld [vmem:[#allocation96_spill] sm:$0xff]  ;;  %v9525_v29 = vpop.f32.mrf.mxu1 }
 0x794   : > { %v3553_v2 = vrot.slane %v3469_v14, 6  ;;  %v9501_v26 = vld.sshfl [vmem:[#allocation1] sm:$0xff pattern:$0x73625140]  ;;  %v3982_v11 = vrot.slane %v3856_v48, 2  ;;  %v2962_v32 = vadd.f32 %v11684_v58, %v2876_v50  ;;  %v4163_v48 = vld [vmem:[#allocation2 + $0x3f0] sm:$0xff] }
 0x795   : > { %v3420_v25 = vmul.f32 %v9228_v42, %v3386_v56  ;;  %3781 = vst [vmem:[#allocation1] ss:$4 sm:$0xff] %v3469_v14  ;;  %v3857_v52 = vsel %vm9449_vm6, %v9501_v26, 0.0  ;;  %v11682_v14 = vld [vmem:[#allocation61_spill] sm:$0xff]  ;;  %4637 = vmatpush.msra.mxu1 %v4163_v48 }
 0x796   : > { %3782 = vst [vmem:[#allocation1 + $0x1] ss:$4 sm:$0xff] %v3551_v37  ;;  %v3926_v39 = vrot.slane %v3857_v52, 1  ;;  %v3983_v17 = vrot.slane %v3857_v52, 2  ;;  %v2793_v56 = vadd.f32 %v11683_v3, %v11682_v14  ;;  %v3303_v52 = vadd.f32 %v9412_v59, %v3217_v12  ;;  %v3308_v3 = vpop.f32.mrf.mxu3  ;;  %v4178_v12 = vld [vmem:[#allocation2 + $0x468] sm:$0xff] }
 0x797   : > { %v3447_v33 = vadd.f32 %v9246_v45, %v3420_v25  ;;  %3783 = vst [vmem:[#allocation1 + $0x2] ss:$4 sm:$0xff] %v3552_v19  ;;  %v3222_v25 = vpop.f32.mrf.mxu2  ;;  %v3048_v19 = vadd.f32 %v8694_v60, %v2962_v32  ;;  %4703 = vmatpush.msra.mxu2 %v4178_v12  ;;  %v11692_v60 = vld [vmem:[#allocation57_spill] sm:$0xff] }
 0x798   : > { %v3780_v37 = vld.sshfl [vmem:[#allocation1 + $0x20] sm:$0xff pattern:$0x73625140]  ;;  %11685 = vst [vmem:[#allocation109_spill] sm:$0xff] %v9525_v29  ;;  %v9528_v50 = vsel %vm11686_vm4, %v3925_v18, %v3926_v39  ;;  %v9531_v14 = vsel %vm11687_vm10, %v3982_v11, %v3983_v17  ;;  %vm11689_vm10 = vcmp.ge.s32.totalorder %v3573_v6, 0  ;;  %v2879_v32 = vadd.f32 %v11692_v60, %v2793_v56 }
 0x799   : > { %5041 = vmatmul.msk.f32.gmra.mxu1 %vm9449_vm6, %v9501_v26  ;;  %5069 = vmatmul.msk.f32.gmra.mxu0 %vm9449_vm6, %v9501_v26  ;;  %v3470_v5 = vmax.f32 %v3447_v33, 0.0  ;;  %3784 = vst [vmem:[#allocation1 + $0x3] ss:$4 sm:$0xff] %v3553_v2  ;;  %v3388_v58 = vpop.f32.mrf.mxu0  ;;  %v3858_v59 = vsel %vm9511_vm5, %v3780_v37, 0.0  ;;  %vm9540_vm4 = vmand %vm11689_vm10, %vm3600_vm13  ;;  %v3134_v48 = vadd.f32 %v9367_v46, %v3048_v19  ;;  %vm11693_vm5 = vcmp.ge.s32.totalorder %v8770_v22, 0  ;;  %v11696_v46 = vld [vmem:[#allocation122_spill] sm:$0xff] }
 0x79a   : > { %11688 = vst [vmem:[#allocation110_spill] sm:$0xff] %v9531_v14  ;;  %4304 = vmatmul.f32.gmra.mxu2 %v9528_v50  ;;  %4369 = vmatmul.f32.gmra.mxu3 %v9531_v14  ;;  %v3389_v29 = vadd.f32 %v3388_v58, %v3303_v52  ;;  %v3928_v37 = vrot.slane %v3858_v59, 1  ;;  %v3985_v14 = vrot.slane %v3858_v59, 2  ;;  %vm9551_vm6 = vmand %vm9540_vm4, %vm11693_vm5  ;;  %v2965_v52 = vadd.f32 %v11696_v46, %v2879_v32  ;;  %v4162_v19 = vld [vmem:[#allocation2 + $0x3e8] sm:$0xff] }
 0x79b   : > { %v3554_v2 = vrot.slane %v3470_v5, 2  ;;  %v3555_v33 = vrot.slane %v3470_v5, 4  ;;  %v3556_v18 = vrot.slane %v3470_v5, 6  ;;  %3785 = vst [vmem:[#allocation1 + $0x20] ss:$4 sm:$0xff] %v3470_v5  ;;  %v3220_v5 = vadd.f32 %v9466_v43, %v3134_v48  ;;  %4638 = vmatpush.msra.mxu1 %v4162_v19 }
 0x79c   : > { %v3421_v49 = vmul.f32 %v9228_v42, %v3389_v29  ;;  %vm11697_vm13 = vcmask 1046528   ;;  %vm11698_vm10 = vcmask 1045504  }
 0x79d   : > { %3786 = vst [vmem:[#allocation1 + $0x21] ss:$4 sm:$0xff] %v3554_v2  ;;  %v3306_v58 = vadd.f32 %v9475_v57, %v3220_v5  ;;  %v9569_v43 = vpop.f32.mrf.mxu1  ;;  %v9572_v2 = vsel %vm11697_vm13, %v3926_v39, %v3928_v37  ;;  %v9575_v28 = vsel %vm11698_vm10, %v3983_v17, %v3985_v14  ;;  %v3574_v37 = vadd.s32 9, %v8758_v24 }
 0x79e   : > { %3787 = vst [vmem:[#allocation1 + $0x22] ss:$4 sm:$0xff] %v3555_v33  ;;  %v3448_v56 = vadd.f32 %v9246_v45, %v3421_v49  ;;  %v4177_v33 = vld [vmem:[#allocation2 + $0x460] sm:$0xff]  ;;  %vm11701_vm13 = vcmp.ge.s32.totalorder %v8770_v22, 0 }
 0x79f   : > { %3788 = vst [vmem:[#allocation1 + $0x23] ss:$4 sm:$0xff] %v3556_v18  ;;  %v9564_v12 = vpop.f32.mrf.mxu2  ;;  %v3051_v18 = vadd.f32 %v8713_v23, %v2965_v52  ;;  %4704 = vmatpush.msra.mxu2 %v4177_v33  ;;  %v4161_v23 = vld [vmem:[#allocation2 + $0x3e0] sm:$0xff]  ;;  %vm3601_vm5 = vcmp.lt.s32.totalorder %v3574_v37, 16 }
 0x7a0   : > { %v9561_v29 = vld.sshfl [vmem:[#allocation1] sm:$0xff pattern:$0x73625140]  ;;  %v3471_v59 = vmax.f32 %v3448_v56, 0.0  ;;  %4639 = vmatpush.msra.mxu1 %v4161_v23 }
 0x7a1   : > { %5042 = vmatmul.msk.f32.vlgmr.msrb.gmra.mxu1 %vm8877_vm3, %v8886_v47  ;;  %5070 = vmatmul.msk.f32.gmra.mxu0 %vm9551_vm6, %v9561_v29  ;;  %v9577_v47 = vpop.f32.mrf.mxu3  ;;  %v3391_v57 = vpop.f32.mrf.mxu0  ;;  %v3137_v48 = vadd.f32 %v9430_v41, %v3051_v18  ;;  %vm3591_vm3 = vcmp.ge.s32.totalorder %v3574_v37, 0  ;;  %v4176_v41 = vld [vmem:[#allocation2 + $0x458] sm:$0xff]  ;;  %v11744_v44 = vld [vmem:[#allocation110_spill] sm:$0xff] }
 0x7a2   : > { %4307 = vmatmul.f32.gmra.mxu2 %v9572_v2  ;;  %4372 = vmatmul.f32.gmra.mxu3 %v9575_v28  ;;  %v3557_v60 = vrot.slane %v3471_v59, 2  ;;  %3791 = vst [vmem:[#allocation1] ss:$4 sm:$0xff] %v3471_v59  ;;  %v3392_v32 = vadd.f32 %v3391_v57, %v3306_v58  ;;  %v3558_v39 = vrot.slane %v3471_v59, 4  ;;  %v3559_v17 = vrot.slane %v3471_v59, 6  ;;  %v4160_v18 = vld [vmem:[#allocation2 + $0x3d8] sm:$0xff] }
 0x7a3   : > { %v3223_v5 = vadd.f32 %v3222_v25, %v3137_v48  ;;  %4705 = vmatpush.msra.mxu2 %v4176_v41  ;;  %4640 = vmatpush.msra.mxu1 %v4160_v18  ;;  %v4174_v48 = vld [vmem:[#allocation2 + $0x448] sm:$0xff] }
 0x7a4   : > { %v3422_v14 = vmul.f32 %v9228_v42, %v3392_v32  ;;  %v4175_v32 = vld [vmem:[#allocation2 + $0x450] sm:$0xff] }
 0x7a5   : > { %v3309_v46 = vadd.f32 %v3308_v3, %v3223_v5  ;;  %v9598_v3 = vpop.f32.mrf.mxu1  ;;  %4706 = vmatpush.msra.mxu2 %v4175_v32  ;;  %v4172_v32 = vld [vmem:[#allocation2 + $0x438] sm:$0xff] }
 0x7a6   : > { %v9584_v49 = vld.sshfl [vmem:[#allocation1 + $0x20] sm:$0xff pattern:$0x73625140]  ;;  %v3449_v56 = vadd.f32 %v9246_v45, %v3422_v14 }
 0x7a7   : > { %3793 = vst [vmem:[#allocation1 + $0x20] ss:$4 sm:$0xff] %v3557_v60  ;;  %v9596_v19 = vpop.f32.mrf.mxu2  ;;  %4707 = vmatpush.msra.mxu2 %v4174_v48 }
 0x7a8   : > { %3794 = vst [vmem:[#allocation1 + $0x21] ss:$4 sm:$0xff] %v3558_v39  ;;  %v3472_v52 = vmax.f32 %v3449_v56, 0.0 }
 0x7a9   : > { %5043 = vmatmul.msk.f32.gmra.mxu1 %vm8863_vm2, %v8909_v27  ;;  %5071 = vmatmul.msk.f32.gmra.mxu0 %vm9540_vm4, %v9584_v49  ;;  %3795 = vst [vmem:[#allocation1 + $0x22] ss:$4 sm:$0xff] %v3559_v17  ;;  %v3394_v24 = vpop.f32.mrf.mxu0  ;;  %v9600_v59 = vld.sshfl [vmem:[#allocation1] sm:$0xff pattern:$0x73625140]  ;;  %v9602_v57 = vpop.f32.mrf.mxu3  ;;  %vm9606_vm2 = vmand %vm3591_vm3, %vm3601_vm5  ;;  %vm11706_vm5 = vcmask 1045504  }
 0x7aa   : > { %4457 = vmatmul.f32.vlgmr.msrb.gmra.mxu2 %v8940_v20  ;;  %4522 = vmatmul.f32.vlgmr.msrb.gmra.mxu3 %v8943_v0  ;;  %v3560_v61 = vrot.slane %v3472_v52, 2  ;;  %v3561_v27 = vrot.slane %v3472_v52, 4  ;;  %v3562_v25 = vrot.slane %v3472_v52, 6  ;;  %3796 = vst [vmem:[#allocation1 + $0x23] ss:$4 sm:$0xff] %v3472_v52  ;;  %v3395_v58 = vadd.f32 %v3394_v24, %v3309_v46  ;;  %vm3642_vm10 = vmand %vm9606_vm2, %vm11701_vm13  ;;  %v4173_v0 = vld [vmem:[#allocation2 + $0x440] sm:$0xff] }
 0x7ab   : > { %vm11708_vm13 = vmmov %vm11706_vm5  ;;  %4708 = vmatpush.msra.mxu2 %v4173_v0  ;;  %v4170_v0 = vld [vmem:[#allocation2 + $0x428] sm:$0xff] }
 0x7ac   : > { %3798 = vst [vmem:[#allocation1] ss:$4 sm:$0xff] %v3560_v61  ;;  %v3423_v20 = vmul.f32 %v9228_v42, %v3395_v58 }
 0x7ad   : > { %3799 = vst [vmem:[#allocation1 + $0x1] ss:$4 sm:$0xff] %v3561_v27  ;;  %4709 = vmatpush.msra.mxu2 %v4172_v32 }
 0x7ae   : > { %3800 = vst [vmem:[#allocation1 + $0x2] ss:$4 sm:$0xff] %v3562_v25  ;;  %v3450_v33 = vadd.f32 %v9246_v45, %v3423_v20  ;;  %v4158_v25 = vld [vmem:[#allocation2 + $0x3c8] sm:$0xff] }
 0x7af   : > { %v9620_v45 = vpop.f32.mrf.mxu1  ;;  %v9622_v35 = vpop.f32.mrf.mxu2 }
 0x7b0   : > { %v3473_v42 = vmax.f32 %v3450_v33, 0.0  ;;  %11702 = vst [vmem:[#allocation111_spill] sm:$0xff] %v9620_v45 }
 0x7b1   : > { %5044 = vmatmul.msk.f32.gmra.mxu1 %vm8962_vm8, %v8972_v16  ;;  %v3797_v60 = vld.sshfl [vmem:[#allocation1 + $0x20] sm:$0xff pattern:$0x73625140]  ;;  %v9624_v22 = vpop.f32.mrf.mxu3  ;;  %vm11703_vm8 = vcmp.lt.s32.totalorder %v8817_v38, 16 }
 0x7b2   : > { %4460 = vmatmul.f32.gmra.mxu2 %v8988_v51  ;;  %4525 = vmatmul.f32.gmra.mxu3 %v8991_v15  ;;  %v3563_v39 = vrot.slane %v3473_v42, 2  ;;  %3801 = vst [vmem:[#allocation1 + $0x3] ss:$4 sm:$0xff] %v3473_v42  ;;  %v3862_v16 = vsel %vm3642_vm10, %v3797_v60, 0.0  ;;  %v4159_v51 = vld [vmem:[#allocation2 + $0x3d0] sm:$0xff]  ;;  %vm3677_vm3 = vmand %vm9606_vm2, %vm11703_vm8  ;;  %v11712_v42 = vld [vmem:[#allocation127_spill] sm:$0xff] }
 0x7b3   : > { %5072 = vmatmul.msk.f32.gmra.mxu0 %vm3642_vm10, %v3797_v60  ;;  %4641 = vmatpush.msra.mxu1 %v4159_v51  ;;  %v4023_v17 = vrot.slane %v3862_v16, 1  ;;  %v11713_v60 = vld [vmem:[#allocation128_spill] sm:$0xff] }
 0x7b4   : > { %3802 = vst [vmem:[#allocation1 + $0x20] ss:$4 sm:$0xff] %v3563_v39 }
 0x7b5   : > { %4642 = vmatpush.msra.mxu1 %v4158_v25  ;;  %v11726_v25 = vld [vmem:[#allocation212_spill] sm:$0xff] }
 0x7b7   : > { %v9635_v14 = vpop.f32.mrf.mxu1  ;;  %v9641_v37 = vpop.f32.mrf.mxu2 }
 0x7b8   : > { %11704 = vst [vmem:[#allocation132_spill] sm:$0xff] %v9635_v14 }
 0x7b9   : > { %5045 = vmatmul.msk.f32.gmra.mxu1 %vm8951_vm7, %v9004_v62  ;;  %v3803_v15 = vld.sshfl [vmem:[#allocation1] sm:$0xff pattern:$0x73625140]  ;;  %v4030_v62 = vrot.slane %v3862_v16, 2  ;;  %v9643_v5 = vpop.f32.mrf.mxu3  ;;  %vm11705_vm7 = vcmask 1046528  }
 0x7ba   : > { %4463 = vmatmul.f32.gmra.mxu2 %v9033_v54  ;;  %4528 = vmatmul.f32.gmra.mxu3 %v9036_v34  ;;  %v3863_v63 = vsel %vm9606_vm2, %v3803_v15, 0.0 }
 0x7bb   : > { %5073 = vmatmul.msk.f32.gmra.mxu0 %vm9606_vm2, %v3803_v15  ;;  %v4024_v56 = vrot.slane %v3863_v63, 1  ;;  %v4031_v23 = vrot.slane %v3863_v63, 2  ;;  %v3804_v46 = vld.sshfl [vmem:[#allocation1 + $0x20] sm:$0xff pattern:$0x73625140]  ;;  %vm11707_vm2 = vmmov %vm11705_vm7  ;;  %v11717_v15 = vld [vmem:[#allocation58_spill] sm:$0xff] }
 0x7bc   : > { %v3864_v52 = vsel %vm3677_vm3, %v3804_v46, 0.0  ;;  %v4171_v63 = vld [vmem:[#allocation2 + $0x430] sm:$0xff]  ;;  %v11723_v46 = vld [vmem:[#allocation205_spill] sm:$0xff] }
 0x7bd   : > { %v9646_v24 = vsel %vm11705_vm7, %v4023_v17, %v4024_v56  ;;  %v4026_v41 = vrot.slane %v3864_v52, 1  ;;  %v9649_v61 = vsel %vm11706_vm5, %v4030_v62, %v4031_v23  ;;  %v4033_v27 = vrot.slane %v3864_v52, 2  ;;  %v11720_v17 = vld [vmem:[#allocation316_spill] sm:$0xff]  ;;  %4710 = vmatpush.msra.mxu2 %v4171_v63  ;;  %v11732_v52 = vld [vmem:[#allocation349_spill] sm:$0xff] }
 0x7bf   : > { %v9655_v58 = vsel %vm11707_vm2, %v4024_v56, %v4026_v41  ;;  %v9658_v20 = vsel %vm11708_vm13, %v4031_v23, %v4033_v27  ;;  %v4155_v41 = vld [vmem:[#allocation2 + $0x3b0] sm:$0xff]  ;;  %v11725_v27 = vld [vmem:[#allocation190_spill] sm:$0xff]  ;;  %4711 = vmatpush.msra.mxu2 %v4170_v0 }
 0x7c0   : > { %v9662_v33 = vpop.f32.mrf.mxu2 }
 0x7c1   : > { %5046 = vmatmul.msk.f32.gmra.mxu1 %vm9060_vm1, %v9067_v9  ;;  %11709 = vst [vmem:[#allocation135_spill] sm:$0xff] %v9662_v33  ;;  %v9664_v18 = vpop.f32.mrf.mxu3  ;;  %v9666_v36 = vpop.f32.mrf.mxu1  ;;  %v4157_v9 = vld [vmem:[#allocation2 + $0x3c0] sm:$0xff] }
 0x7c2   : > { %4466 = vmatmul.f32.gmra.mxu2 %v9076_v40  ;;  %4531 = vmatmul.f32.gmra.mxu3 %v9079_v55  ;;  %11710 = vst [vmem:[#allocation117_spill] sm:$0xff] %v9664_v18  ;;  %v11740_v18 = vld [vmem:[#allocation367_spill] sm:$0xff] }
 0x7c3   : > { %11711 = vst [vmem:[#allocation118_spill] sm:$0xff] %v9666_v36  ;;  %4643 = vmatpush.msra.mxu1 %v4157_v9  ;;  %v11736_v36 = vld [vmem:[#allocation353_spill] sm:$0xff] }
 0x7c4   : > { %vm11737_vm1 = vnez %v11736_v36 }
 0x7c5   : > { %4644 = vmatpush.msra.mxu1 %v4156_v7  ;;  %v4154_v7 = vld [vmem:[#allocation2 + $0x3a8] sm:$0xff] }
 0x7c7   : > { %4645 = vmatpush.msra.mxu1 %v4155_v41  ;;  %v4169_v41 = vld [vmem:[#allocation2 + $0x420] sm:$0xff] }
 0x7c8   : > { %v9673_v39 = vpop.f32.mrf.mxu2  ;;  %4712 = vmatpush.msra.mxu2 %v4169_v41 }
 0x7c9   : > { %5047 = vmatmul.msk.f32.gmra.mxu1 %vm9047_vm0, %v9101_v1  ;;  %11714 = vst [vmem:[#allocation138_spill] sm:$0xff] %v9673_v39  ;;  %v9675_v16 = vpop.f32.mrf.mxu3  ;;  %v9677_v51 = vpop.f32.mrf.mxu1  ;;  %v11719_v1 = vld [vmem:[#allocation320_spill] sm:$0xff] }
 0x7ca   : > { %4469 = vmatmul.f32.gmra.mxu2 %v11712_v42  ;;  %4534 = vmatmul.f32.gmra.mxu3 %v11713_v60  ;;  %11715 = vst [vmem:[#allocation139_spill] sm:$0xff] %v9675_v16  ;;  %v4152_v16 = vld [vmem:[#allocation2 + $0x398] sm:$0xff] }
 0x7cb   : > { %11716 = vst [vmem:[#allocation140_spill] sm:$0xff] %v9677_v51  ;;  %4646 = vmatpush.msra.mxu1 %v4154_v7 }
 0x7d1   : > { %5048 = vmatmul.msk.f32.gmra.mxu1 %vm9155_vm11, %v11717_v15  ;;  %v9684_v62 = vpop.f32.mrf.mxu2  ;;  %v9686_v56 = vpop.f32.mrf.mxu3  ;;  %v11729_v15 = vld [vmem:[#allocation350_spill] sm:$0xff] }
 0x7d2   : > { %4472 = vmatmul.f32.gmra.mxu2 %v11719_v1  ;;  %4537 = vmatmul.f32.gmra.mxu3 %v11720_v17  ;;  %11721 = vst [vmem:[#allocation123_spill] sm:$0xff] %v9684_v62  ;;  %v9688_v23 = vpop.f32.mrf.mxu1 }
 0x7d3   : > { %11722 = vst [vmem:[#allocation124_spill] sm:$0xff] %v9686_v56  ;;  %v11734_v56 = vld [vmem:[#allocation346_spill] sm:$0xff] }
 0x7d4   : > { %vm11735_vm0 = vnez %v11734_v56  ;;  %v11738_v56 = vld [vmem:[#allocation354_spill] sm:$0xff] }
 0x7d9   : > { %5049 = vmatmul.msk.f32.gmra.mxu1 %vm9139_vm9, %v11723_v46  ;;  %v9695_v9 = vpop.f32.mrf.mxu2  ;;  %v9697_v32 = vpop.f32.mrf.mxu3  ;;  %v11731_v46 = vld [vmem:[#allocation348_spill] sm:$0xff]  ;;  %vm11745_vm9 = vmmov %vm11703_vm8 }
 0x7da   : > { %4475 = vmatmul.f32.gmra.mxu2 %v11725_v27  ;;  %4540 = vmatmul.f32.gmra.mxu3 %v11726_v25  ;;  %11727 = vst [vmem:[#allocation125_spill] sm:$0xff] %v9695_v9  ;;  %v4225_v63 = vpop.f32.mrf.mxu1  ;;  %v11733_v9 = vld [vmem:[#allocation351_spill] sm:$0xff]  ;;  %vm3674_vm11 = vmand %vm9540_vm4, %vm11745_vm9 }
 0x7db   : > { %11728 = vst [vmem:[#allocation126_spill] sm:$0xff] %v9697_v32  ;;  %v4153_v32 = vld [vmem:[#allocation2 + $0x3a0] sm:$0xff] }
 0x7dc   : > { %4647 = vmatpush.msra.mxu1 %v4153_v32  ;;  %v4167_v32 = vld [vmem:[#allocation2 + $0x410] sm:$0xff] }
 0x7de   : > { %4648 = vmatpush.msra.mxu1 %v4152_v16 }
 0x7e1   : > { %5050 = vmatmul.msk.f32.gmra.mxu1 %vm9258_vm15, %v11729_v15  ;;  %v4168_v15 = vld [vmem:[#allocation2 + $0x418] sm:$0xff]  ;;  %vm11746_vm15 = vmmov %vm11707_vm2 }
 0x7e2   : > { %4478 = vmatmul.f32.gmra.mxu2 %v11731_v46  ;;  %4543 = vmatmul.f32.gmra.mxu3 %v11732_v52 }
 0x7e3   : > { %4713 = vmatpush.msra.mxu2 %v4168_v15  ;;  %v4165_v15 = vld [vmem:[#allocation2 + $0x400] sm:$0xff] }
 0x7e4   : > { %v9704_v51 = vpop.f32.mrf.mxu2  ;;  %v9706_v0 = vpop.f32.mrf.mxu3 }
 0x7e5   : > { %4714 = vmatpush.msra.mxu2 %v4167_v32  ;;  %v4149_v32 = vld [vmem:[#allocation2 + $0x380] sm:$0xff] }
 0x7e8   : > { %v4228_v48 = vpop.f32.mrf.mxu1 }
 0x7e9   : > { %5051 = vmatmul.msk.f32.gmra.mxu1 %vm11735_vm0, %v11733_v9  ;;  %v11739_v9 = vld [vmem:[#allocation359_spill] sm:$0xff] }
 0x7ea   : > { %4481 = vmatmul.f32.gmra.mxu2 %v9331_v30  ;;  %4546 = vmatmul.f32.gmra.mxu3 %v9334_v31 }
 0x7ec   : > { %v4290_v7 = vpop.f32.mrf.mxu2  ;;  %v4355_v41 = vpop.f32.mrf.mxu3 }
 0x7ed   : > { %v4291_v62 = vadd.f32 %v4290_v7, %v4225_v63  ;;  %v4151_v63 = vld [vmem:[#allocation2 + $0x390] sm:$0xff] }
 0x7ee   : > { %4649 = vmatpush.msra.mxu1 %v4151_v63 }
 0x7ef   : > { %v9716_v39 = vadd.f32 %v4355_v41, %v4291_v62  ;;  %v4150_v41 = vld [vmem:[#allocation2 + $0x388] sm:$0xff] }
 0x7f0   : > { %4650 = vmatpush.msra.mxu1 %v4150_v41 }
 0x7f1   : > { %5052 = vmatmul.msk.f32.gmra.mxu1 %vm11737_vm1, %v9370_v4  ;;  %v4231_v14 = vpop.f32.mrf.mxu1  ;;  %v4166_v4 = vld [vmem:[#allocation2 + $0x408] sm:$0xff] }
 0x7f2   : > { %4484 = vmatmul.f32.gmra.mxu2 %v11738_v56  ;;  %4549 = vmatmul.f32.gmra.mxu3 %v11739_v9 }
 0x7f3   : > { %4715 = vmatpush.msra.mxu2 %v4166_v4  ;;  %4651 = vmatpush.msra.mxu1 %v4149_v32 }
 0x7f5   : > { %4716 = vmatpush.msra.mxu2 %v4165_v15 }
 0x7f9   : > { %5053 = vmatmul.msk.f32.gmra.mxu1 %vm9342_vm12, %v11740_v18  ;;  %v11742_v18 = vld [vmem:[#allocation134_spill] sm:$0xff]  ;;  %vm11743_vm12 = vnez %v11666_v8  ;;  %v3860_v8 = vsel %vm9540_vm4, %v9584_v49, 0.0 }
 0x7fa   : > { %4487 = vmatmul.f32.gmra.mxu2 %v9435_v21  ;;  %4552 = vmatmul.f32.gmra.mxu3 %v9438_v53 }
 0x7fb   : > { %v4293_v16 = vpop.f32.mrf.mxu2  ;;  %v4358_v7 = vpop.f32.mrf.mxu3 }
 0x7fc   : > { %v4294_v62 = vadd.f32 %v4293_v16, %v4228_v48 }
 0x7fd   : > { %v4234_v36 = vpop.f32.mrf.mxu1 }
 0x7fe   : > { %v9725_v33 = vadd.f32 %v4358_v7, %v4294_v62 }
 0x801   : > { %5054 = vmatmul.msk.f32.gmra.mxu1 %vm9460_vm14, %v9471_v13  ;;  %vm11748_vm14 = vmmov %vm11707_vm2 }
 0x802   : > { %4490 = vmatmul.f32.gmra.mxu2 %v9484_v10  ;;  %4555 = vmatmul.f32.gmra.mxu3 %v11742_v18 }
 0x804   : > { %v4296_v45 = vpop.f32.mrf.mxu2  ;;  %v4361_v4 = vpop.f32.mrf.mxu3 }
 0x805   : > { %v4237_v63 = vpop.f32.mrf.mxu1  ;;  %v4297_v48 = vadd.f32 %v4296_v45, %v4231_v14 }
 0x807   : > { %v9732_v16 = vadd.f32 %v4361_v4, %v4297_v48  ;;  %v4007_v48 = vrot.slane %v3860_v8, 1  ;;  %v4014_v4 = vrot.slane %v3860_v8, 2 }
 0x809   : > { %5055 = vmatmul.msk.f32.gmra.mxu1 %vm11743_vm12, %v9501_v26  ;;  %v3859_v26 = vsel %vm9551_vm6, %v9561_v29, 0.0 }
 0x80a   : > { %4493 = vmatmul.f32.gmra.mxu2 %v9528_v50  ;;  %4558 = vmatmul.f32.gmra.mxu3 %v11744_v44 }
 0x80c   : > { %v4299_v13 = vpop.f32.mrf.mxu2  ;;  %v4364_v62 = vpop.f32.mrf.mxu3 }
 0x80d   : > { %v4300_v41 = vadd.f32 %v4299_v13, %v4234_v36 }
 0x80e   : > { %v4240_v7 = vpop.f32.mrf.mxu1 }
 0x80f   : > { %v9739_v32 = vadd.f32 %v4364_v62, %v4300_v41  ;;  %v4006_v62 = vrot.slane %v3859_v26, 1  ;;  %v4013_v41 = vrot.slane %v3859_v26, 2 }
 0x811   : > { %5056 = vmatmul.msk.f32.gmra.mxu1 %vm9551_vm6, %v9561_v29  ;;  %v9762_v6 = vsel %vm11746_vm15, %v4006_v62, %v4007_v48  ;;  %vm11747_vm6 = vmmov %vm11706_vm5 }
 0x812   : > { %4496 = vmatmul.f32.gmra.mxu2 %v9572_v2  ;;  %4561 = vmatmul.f32.gmra.mxu3 %v9575_v28  ;;  %v9765_v29 = vsel %vm11747_vm6, %v4013_v41, %v4014_v4 }
 0x815   : > { %v4302_v45 = vpop.f32.mrf.mxu2  ;;  %v4367_v14 = vpop.f32.mrf.mxu3 }
 0x816   : > { %v4243_v36 = vpop.f32.mrf.mxu1  ;;  %v4303_v15 = vadd.f32 %v4302_v45, %v4237_v63  ;;  %v3861_v63 = vsel %vm3674_vm11, %v9600_v59, 0.0 }
 0x817   : > { %v4009_v26 = vrot.slane %v3861_v63, 1  ;;  %v4016_v45 = vrot.slane %v3861_v63, 2 }
 0x818   : > { %v9752_v13 = vadd.f32 %v4367_v14, %v4303_v15 }
 0x819   : > { %5057 = vmatmul.msk.f32.gmra.mxu1 %vm9540_vm4, %v9584_v49  ;;  %v9776_v15 = vsel %vm11748_vm14, %v4007_v48, %v4009_v26  ;;  %vm11749_vm4 = vmmov %vm11706_vm5 }
 0x81a   : > { %4499 = vmatmul.f32.gmra.mxu2 %v9762_v6  ;;  %4564 = vmatmul.f32.gmra.mxu3 %v9765_v29  ;;  %v9779_v62 = vsel %vm11749_vm4, %v4014_v4, %v4016_v45  ;;  %vm11754_vm10 = vmmov %vm11749_vm4 }
 0x81b   : > { %vm11757_vm8 = vmmov %vm11749_vm4 }
 0x81c   : > { %vm11763_vm3 = vmmov %vm11749_vm4 }
 0x81d   : > { %v4305_v8 = vpop.f32.mrf.mxu2  ;;  %v4370_v11 = vpop.f32.mrf.mxu3  ;;  %vm11769_vm7 = vmmov %vm11763_vm3 }
 0x81e   : > { %v9770_v38 = vpop.f32.mrf.mxu1  ;;  %v4306_v14 = vadd.f32 %v4305_v8, %v4240_v7  ;;  %vm11775_vm5 = vmmov %vm11763_vm3 }
 0x81f   : > { %vm11781_vm2 = vmmov %vm11763_vm3 }
 0x820   : > { %v9772_v49 = vadd.f32 %v4370_v11, %v4306_v14  ;;  %vm11784_vm13 = vmmov %vm11781_vm2 }
 0x821   : > { %4652 = vmatmul.f32.vlgmr.msra.gmra.mxu1 %v9033_v54  ;;  %vm11787_vm0 = vmmov %vm11781_vm2 }
 0x822   : > { %4502 = vmatmul.f32.gmra.mxu2 %v9776_v15  ;;  %4567 = vmatmul.f32.gmra.mxu3 %v9779_v62  ;;  %vm11790_vm1 = vmmov %vm11787_vm0 }
 0x823   : > { %vm11793_vm12 = vmmov %vm11787_vm0 }
 0x824   : > { %vm11796_vm9 = vmmov %vm11787_vm0 }
 0x825   : > { %v4308_v41 = vpop.f32.mrf.mxu2  ;;  %v4373_v7 = vpop.f32.mrf.mxu3  ;;  %vm11799_vm11 = vmmov %vm11787_vm0 }
 0x826   : > { %v9783_v59 = vpop.f32.mrf.mxu1  ;;  %v4309_v63 = vadd.f32 %v4308_v41, %v4243_v36  ;;  %vm11802_vm15 = vmmov %vm11787_vm0 }
 0x827   : > { %vm11805_vm6 = vmmov %vm11787_vm0 }
 0x828   : > { %v9785_v8 = vadd.f32 %v4373_v7, %v4309_v63  ;;  %vm11808_vm14 = vmmov %vm11787_vm0 }
 0x829   : > { %4655 = vmatmul.f32.gmra.mxu1 %v9076_v40  ;;  %vm11811_vm4 = vmmov %vm11787_vm0 }
 0x82a   : > { %4717 = vmatmul.f32.vlgmr.msra.gmra.mxu2 %v9036_v34 }
 0x82d   : > { %v9791_v48 = vpop.f32.mrf.mxu2  ;;  %v4523_v63 = vpop.f32.mrf.mxu3 }
 0x82e   : > { %v9789_v54 = vpop.f32.mrf.mxu1 }
 0x831   : > { %4658 = vmatmul.f32.gmra.mxu1 %v11712_v42 }
 0x832   : > { %4720 = vmatmul.f32.gmra.mxu2 %v9079_v55 }
 0x835   : > { %v9797_v26 = vpop.f32.mrf.mxu2 }
 0x836   : > { %v9795_v4 = vpop.f32.mrf.mxu1 }
 0x839   : > { %4661 = vmatmul.f32.gmra.mxu1 %v11719_v1 }
 0x83a   : > { %4723 = vmatmul.f32.gmra.mxu2 %v11713_v60 }
 0x83d   : > { %v9803_v40 = vpop.f32.mrf.mxu2 }
 0x83e   : > { %v9801_v36 = vpop.f32.mrf.mxu1 }
 0x841   : > { %4664 = vmatmul.f32.gmra.mxu1 %v11725_v27 }
 0x842   : > { %4726 = vmatmul.f32.gmra.mxu2 %v11720_v17  ;;  %v4288_v17 = vadd.f32 %v9704_v51, %v9688_v23 }
 0x845   : > { %v9809_v42 = vpop.f32.mrf.mxu2 }
 0x846   : > { %v9807_v34 = vpop.f32.mrf.mxu1 }
 0x849   : > { %4667 = vmatmul.f32.gmra.mxu1 %v11731_v46 }
 0x84a   : > { %4729 = vmatmul.f32.gmra.mxu2 %v11726_v25  ;;  %v4353_v25 = vadd.f32 %v9706_v0, %v4288_v17 }
 0x84d   : > { %v9815_v1 = vpop.f32.mrf.mxu2 }
 0x84e   : > { %v9813_v55 = vpop.f32.mrf.mxu1 }
 0x851   : > { %4670 = vmatmul.f32.gmra.mxu1 %v9331_v30 }
 0x852   : > { %4732 = vmatmul.f32.gmra.mxu2 %v11732_v52 }
 0x855   : > { %v9821_v27 = vpop.f32.mrf.mxu2 }
 0x856   : > { %v9819_v60 = vpop.f32.mrf.mxu1 }
 0x859   : > { %4673 = vmatmul.f32.gmra.mxu1 %v11738_v56 }
 0x85a   : > { %4735 = vmatmul.f32.gmra.mxu2 %v9334_v31 }
 0x85d   : > { %v9828_v45 = vpop.f32.mrf.mxu2 }
 0x85e   : > { %v4417_v46 = vpop.f32.mrf.mxu1 }
 0x85f   : > { %v4418_v14 = vadd.f32 %v4417_v46, %v4353_v25  ;;  %v4526_v25 = vpop.f32.mrf.mxu3 }
 0x861   : > { %4676 = vmatmul.f32.gmra.mxu1 %v9435_v21 }
 0x862   : > { %4738 = vmatmul.f32.gmra.mxu2 %v11739_v9 }
 0x865   : > { %v9832_v52 = vpop.f32.mrf.mxu2 }
 0x866   : > { %v4420_v30 = vpop.f32.mrf.mxu1 }
 0x867   : > { %v4421_v11 = vadd.f32 %v4420_v30, %v9716_v39  ;;  %v4529_v30 = vpop.f32.mrf.mxu3 }
 0x869   : > { %4679 = vmatmul.f32.gmra.mxu1 %v9484_v10 }
 0x86a   : > { %4741 = vmatmul.f32.gmra.mxu2 %v9438_v53 }
 0x86d   : > { %v4482_v51 = vpop.f32.mrf.mxu2 }
 0x86e   : > { %v4423_v31 = vpop.f32.mrf.mxu1  ;;  %v9838_v0 = vadd.f32 %v4482_v51, %v4418_v14 }
 0x86f   : > { %v4424_v23 = vadd.f32 %v4423_v31, %v9725_v33 }
 0x871   : > { %4682 = vmatmul.f32.gmra.mxu1 %v9528_v50 }
 0x872   : > { %4744 = vmatmul.f32.gmra.mxu2 %v11742_v18 }
 0x875   : > { %v4485_v56 = vpop.f32.mrf.mxu2 }
 0x876   : > { %v4426_v21 = vpop.f32.mrf.mxu1  ;;  %v9843_v41 = vadd.f32 %v4485_v56, %v4421_v11 }
 0x877   : > { %v4427_v9 = vadd.f32 %v4426_v21, %v9732_v16  ;;  %v4532_v21 = vpop.f32.mrf.mxu3 }
 0x879   : > { %4685 = vmatmul.f32.gmra.mxu1 %v9572_v2 }
 0x87a   : > { %4747 = vmatmul.f32.gmra.mxu2 %v11744_v44 }
 0x87d   : > { %v4488_v10 = vpop.f32.mrf.mxu2 }
 0x87e   : > { %v4429_v53 = vpop.f32.mrf.mxu1  ;;  %v9848_v39 = vadd.f32 %v4488_v10, %v4424_v23 }
 0x87f   : > { %v4430_v33 = vadd.f32 %v4429_v53, %v9739_v32 }
 0x881   : > { %4688 = vmatmul.f32.gmra.mxu1 %v9762_v6  ;;  %v4588_v6 = vpop.f32.mrf.mxu0 }
 0x882   : > { %4750 = vmatmul.f32.gmra.mxu2 %v9575_v28 }
 0x885   : > { %v4491_v18 = vpop.f32.mrf.mxu2 }
 0x886   : > { %v4432_v50 = vpop.f32.mrf.mxu1  ;;  %v9853_v7 = vadd.f32 %v4491_v18, %v4427_v9 }
 0x887   : > { %v4433_v16 = vadd.f32 %v4432_v50, %v9752_v13 }
 0x889   : > { %4691 = vmatmul.f32.gmra.mxu1 %v9776_v15 }
 0x88a   : > { %4753 = vmatmul.f32.gmra.mxu2 %v9765_v29  ;;  %v11750_v29 = vld [vmem:[#allocation133_spill] sm:$0xff] }
 0x88b   : > { %v4264_v15 = vadd.f32 %v9564_v12, %v11750_v29 }
 0x88d   : > { %v4494_v44 = vpop.f32.mrf.mxu2 }
 0x88e   : > { %v4435_v2 = vpop.f32.mrf.mxu1  ;;  %v9858_v17 = vadd.f32 %v4494_v44, %v4430_v33  ;;  %v11752_v44 = vld [vmem:[#allocation307_spill] sm:$0xff] }
 0x88f   : > { %v4436_v32 = vadd.f32 %v4435_v2, %v9772_v49  ;;  %v4591_v49 = vpop.f32.mrf.mxu0 }
 0x891   : > { %4694 = vmatmul.f32.gmra.mxu1 %v9646_v24  ;;  %v4329_v24 = vadd.f32 %v9577_v47, %v4264_v15 }
 0x892   : > { %4756 = vmatmul.f32.gmra.mxu2 %v9779_v62 }
 0x893   : > { %v4394_v51 = vadd.f32 %v9770_v38, %v4329_v24  ;;  %v4270_v38 = vadd.f32 %v9622_v35, %v9569_v43  ;;  %v9893_v43 = vld [vmem:[%s10091_s6] ss:$0 sm:$0xff] }
 0x895   : > { %v4497_v13 = vpop.f32.mrf.mxu2  ;;  %v4335_v18 = vadd.f32 %v9624_v22, %v4270_v38  ;;  %v4273_v22 = vadd.f32 %v9641_v37, %v9598_v3 }
 0x896   : > { %v4438_v28 = vpop.f32.mrf.mxu1  ;;  %v9863_v14 = vadd.f32 %v4497_v13, %v4433_v16 }
 0x897   : > { %v4439_v46 = vadd.f32 %v4438_v28, %v9785_v8  ;;  %v11751_v8 = vld [vmem:[#allocation109_spill] sm:$0xff]  ;;  %v4594_v12 = vpop.f32.mrf.mxu0  ;;  %v4400_v35 = vadd.f32 %v9789_v54, %v4335_v18 }
 0x898   : > { %v4267_v23 = vadd.f32 %v9596_v19, %v11751_v8 }
 0x899   : > { %4697 = vmatmul.f32.gmra.mxu1 %v9655_v58  ;;  %v4459_v58 = vadd.f32 %v9791_v48, %v4394_v51 }
 0x89a   : > { %4759 = vmatmul.f32.gmra.mxu2 %v9649_v61  ;;  %v4332_v61 = vadd.f32 %v9602_v57, %v4267_v23 }
 0x89b   : > { %v4524_v53 = vadd.f32 %v4523_v63, %v4459_v58 }
 0x89c   : > { %v4397_v10 = vadd.f32 %v9783_v59, %v4332_v61  ;;  %v4535_v59 = vpop.f32.mrf.mxu3 }
 0x89d   : > { %v4500_v31 = vpop.f32.mrf.mxu2  ;;  %v4589_v48 = vadd.f32 %v4588_v6, %v4524_v53 }
 0x89e   : > { %v4653_v11 = vpop.f32.mrf.mxu1  ;;  %v9870_v62 = vadd.f32 %v4500_v31, %v4436_v32  ;;  %v4462_v19 = vadd.f32 %v9797_v26, %v4397_v10  ;;  %v11753_v32 = vld [vmem:[#allocation304_spill] sm:$0xff] }
 0x89f   : > { %v4654_v33 = vadd.f32 %v4653_v11, %v4589_v48  ;;  %v4597_v63 = vpop.f32.mrf.mxu0  ;;  %v4806_v6 = vsel %vm11754_vm10, %v11753_v32, %v11752_v44  ;;  %v4338_v11 = vadd.f32 %v9643_v5, %v4273_v22  ;;  %v11758_v5 = vld [vmem:[#allocation111_spill] sm:$0xff]  ;;  %v11760_v48 = vld [vmem:[#allocation117_spill] sm:$0xff]  ;;  %v11765_v32 = vld [vmem:[#allocation138_spill] sm:$0xff] }
 0x8a0   : > { %v4527_v16 = vadd.f32 %v4526_v25, %v4462_v19  ;;  %v4465_v25 = vadd.f32 %v9803_v40, %v4400_v35  ;;  %v11755_v40 = vld [vmem:[#allocation19_spill] sm:$0xff] }
 0x8a1   : > { %v4403_v23 = vadd.f32 %v9795_v4, %v4338_v11 }
 0x8a2   : > { %4762 = vmatmul.f32.gmra.mxu2 %v9658_v20  ;;  %v9887_v20 = vld [vmem:[%s10090_s5] ss:$0 sm:$0xff]  ;;  %v4592_v28 = vadd.f32 %v4591_v49, %v4527_v16  ;;  %v4530_v31 = vadd.f32 %v4529_v30, %v4465_v25  ;;  %v11756_v49 = vrot.slane %v11755_v40, 2  ;;  %v11759_v30 = vld [vmem:[#allocation135_spill] sm:$0xff]  ;;  %v11767_v40 = vld [vmem:[#allocation50_spill] sm:$0xff] }
 0x8a4   : > { %v4538_v3 = vpop.f32.mrf.mxu3  ;;  %v4807_v58 = vsel %vm11757_vm8, %v11752_v44, %v11756_v49  ;;  %v4595_v61 = vadd.f32 %v4594_v12, %v4530_v31  ;;  %v11762_v44 = vld [vmem:[#allocation309_spill] sm:$0xff]  ;;  %v11764_v12 = vld [vmem:[#allocation132_spill] sm:$0xff]  ;;  %v11770_v49 = vld [vmem:[#allocation118_spill] sm:$0xff] }
 0x8a5   : > { %v4503_v9 = vpop.f32.mrf.mxu2 }
 0x8a6   : > { %v4656_v56 = vpop.f32.mrf.mxu1  ;;  %v9878_v47 = vadd.f32 %v4503_v9, %v4439_v46  ;;  %v4468_v9 = vadd.f32 %v9809_v42, %v4403_v23 }
 0x8a7   : > { %v4657_v46 = vadd.f32 %v4656_v56, %v4592_v28  ;;  %v4600_v8 = vpop.f32.mrf.mxu0  ;;  %v4276_v56 = vadd.f32 %v11759_v30, %v11758_v5 }
 0x8ac   : > { %v4541_v25 = vpop.f32.mrf.mxu3 }
 0x8ad   : > { %v4718_v50 = vpop.f32.mrf.mxu2 }
 0x8ae   : > { %v4659_v57 = vpop.f32.mrf.mxu1  ;;  %v4719_v2 = vadd.f32 %v4718_v50, %v4654_v33  ;;  %v4341_v33 = vadd.f32 %v11760_v48, %v4276_v56  ;;  %v4533_v50 = vadd.f32 %v4532_v21, %v4468_v9 }
 0x8af   : > { %v4660_v53 = vadd.f32 %v4659_v57, %v4595_v61  ;;  %v4279_v57 = vadd.f32 %v11765_v32, %v11764_v12 }
 0x8b0   : > { %v4770_v26 = vmul.f32 %v9887_v20, %v4719_v2  ;;  %v4406_v2 = vadd.f32 %v9801_v36, %v4341_v33  ;;  %v4598_v21 = vadd.f32 %v4597_v63, %v4533_v50 }
 0x8b2   : > { %v4790_v13 = vadd.f32 %v9893_v43, %v4770_v26  ;;  %v11761_v26 = vld [vmem:[#allocation308_spill] sm:$0xff]  ;;  %v4471_v22 = vadd.f32 %v9815_v1, %v4406_v2  ;;  %v11768_v1 = vrot.slane %v11767_v40, 2  ;;  %v11773_v2 = vld [vmem:[#allocation310_spill] sm:$0xff] }
 0x8b3   : > { %v4808_v42 = vsel %vm11763_vm3, %v11762_v44, %v11761_v26 }
 0x8b4   : > { %v4838_v29 = vadd.f32 %v4806_v6, %v4790_v13  ;;  %v4603_v6 = vpop.f32.mrf.mxu0  ;;  %v4536_v31 = vadd.f32 %v4535_v59, %v4471_v22  ;;  %v4809_v63 = vsel %vm11769_vm7, %v11761_v26, %v11768_v1  ;;  %v4544_v9 = vpop.f32.mrf.mxu3  ;;  %v11777_v26 = vld [vmem:[#allocation125_spill] sm:$0xff] }
 0x8b5   : > { %v4721_v54 = vpop.f32.mrf.mxu2 }
 0x8b6   : > { %v4662_v15 = vpop.f32.mrf.mxu1  ;;  %v4854_v24 = vmax.f32 %v4838_v29, 0.0  ;;  %v4722_v51 = vadd.f32 %v4721_v54, %v4657_v46  ;;  %v11766_v54 = vld [vmem:[#allocation139_spill] sm:$0xff]  ;;  %v4601_v59 = vadd.f32 %v4600_v8, %v4536_v31 }
 0x8b7   : > { %v4663_v13 = vadd.f32 %v4662_v15, %v4598_v21  ;;  %v4344_v11 = vadd.f32 %v11766_v54, %v4279_v57  ;;  %v11771_v15 = vld [vmem:[#allocation123_spill] sm:$0xff]  ;;  %v11778_v21 = vld [vmem:[#allocation126_spill] sm:$0xff] }
 0x8b8   : > { %4870 = vst [vmem:[%s9909_s22] sm:$0xff] %v4854_v24  ;;  %v4771_v37 = vmul.f32 %v9887_v20, %v4722_v51 }
 0x8b9   : > { %v4409_v23 = vadd.f32 %v9807_v34, %v4344_v11 }
 0x8ba   : > { %v4791_v4 = vadd.f32 %v9893_v43, %v4771_v37 }
 0x8bb   : > { %v4474_v30 = vadd.f32 %v9821_v27, %v4409_v23  ;;  %v11774_v27 = vld [vmem:[#allocation313_spill] sm:$0xff] }
 0x8bc   : > { %v4839_v10 = vadd.f32 %v4807_v58, %v4791_v4  ;;  %v4282_v58 = vadd.f32 %v11771_v15, %v11770_v49  ;;  %v4606_v5 = vpop.f32.mrf.mxu0  ;;  %v4810_v8 = vsel %vm11775_vm5, %v11774_v27, %v11773_v2  ;;  %v4547_v54 = vpop.f32.mrf.mxu3 }
 0x8bd   : > { %v4724_v19 = vpop.f32.mrf.mxu2  ;;  %v4539_v48 = vadd.f32 %v4538_v3, %v4474_v30 }
 0x8be   : > { %v4665_v38 = vpop.f32.mrf.mxu1  ;;  %v4855_v18 = vmax.f32 %v4839_v10, 0.0  ;;  %v4725_v16 = vadd.f32 %v4724_v19, %v4660_v53  ;;  %v11772_v10 = vld [vmem:[#allocation124_spill] sm:$0xff] }
 0x8bf   : > { %v4666_v34 = vadd.f32 %v4665_v38, %v4601_v59  ;;  %v4347_v19 = vadd.f32 %v11772_v10, %v4282_v58  ;;  %v11782_v59 = vld [vmem:[#allocation317_spill] sm:$0xff] }
 0x8c0   : > { %4871 = vst [vmem:[%s9909_s22 + $0x8] sm:$0xff] %v4855_v18  ;;  %v4772_v35 = vmul.f32 %v9887_v20, %v4725_v16 }
 0x8c1   : > { %v4412_v18 = vadd.f32 %v9813_v55, %v4347_v19 }
 0x8c2   : > { %v4792_v28 = vadd.f32 %v9893_v43, %v4772_v35  ;;  %v11776_v35 = vld [vmem:[#allocation140_spill] sm:$0xff] }
 0x8c3   : > { %v4285_v38 = vadd.f32 %v11777_v26, %v11776_v35  ;;  %v4477_v44 = vadd.f32 %v9828_v45, %v4412_v18  ;;  %v11785_v18 = vld [vmem:[#allocation74_spill] sm:$0xff] }
 0x8c4   : > { %v4840_v36 = vadd.f32 %v4808_v42, %v4792_v28  ;;  %v4604_v42 = vadd.f32 %v4603_v6, %v4539_v48  ;;  %v4609_v12 = vpop.f32.mrf.mxu0  ;;  %v11779_v6 = vld [vmem:[#allocation39_spill] sm:$0xff]  ;;  %v4550_v30 = vpop.f32.mrf.mxu3 }
 0x8c5   : > { %v4727_v29 = vpop.f32.mrf.mxu2  ;;  %v4350_v28 = vadd.f32 %v11778_v21, %v4285_v38  ;;  %v11780_v31 = vrot.slane %v11779_v6, 2 }
 0x8c6   : > { %v4668_v46 = vpop.f32.mrf.mxu1  ;;  %v4856_v24 = vmax.f32 %v4840_v36, 0.0  ;;  %v4728_v51 = vadd.f32 %v4727_v29, %v4663_v13  ;;  %v4542_v13 = vadd.f32 %v4541_v25, %v4477_v44 }
 0x8c7   : > { %v4669_v32 = vadd.f32 %v4668_v46, %v4604_v42  ;;  %v4415_v11 = vadd.f32 %v9819_v60, %v4350_v28  ;;  %v4811_v46 = vsel %vm11781_vm2, %v11773_v2, %v11780_v31 }
 0x8c8   : > { %4872 = vst [vmem:[%s9909_s22 + $0x10] sm:$0xff] %v4856_v24  ;;  %v4773_v37 = vmul.f32 %v9887_v20, %v4728_v51  ;;  %v4607_v51 = vadd.f32 %v4606_v5, %v4542_v13 }
 0x8c9   : > { %v4480_v24 = vadd.f32 %v9832_v52, %v4415_v11 }
 0x8ca   : > { %v4793_v56 = vadd.f32 %v9893_v43, %v4773_v37 }
 0x8cb   : > { %v4545_v49 = vadd.f32 %v4544_v9, %v4480_v24  ;;  %v4548_v9 = vadd.f32 %v4547_v54, %v9838_v0  ;;  %v4551_v0 = vadd.f32 %v4550_v30, %v9843_v41  ;;  %v11791_v24 = vld [vmem:[#allocation62_spill] sm:$0xff] }
 0x8cc   : > { %v4841_v61 = vadd.f32 %v4809_v63, %v4793_v56  ;;  %v4612_v25 = vpop.f32.mrf.mxu0  ;;  %v11783_v56 = vld [vmem:[#allocation319_spill] sm:$0xff]  ;;  %v4553_v35 = vpop.f32.mrf.mxu3 }
 0x8cd   : > { %v4730_v53 = vpop.f32.mrf.mxu2  ;;  %v4812_v52 = vsel %vm11784_vm13, %v11783_v56, %v11782_v59  ;;  %v4610_v5 = vadd.f32 %v4609_v12, %v4545_v49  ;;  %v4613_v27 = vadd.f32 %v4612_v25, %v4548_v9  ;;  %v4554_v41 = vadd.f32 %v4553_v35, %v9848_v39  ;;  %v11795_v56 = vld [vmem:[#allocation326_spill] sm:$0xff] }
 0x8ce   : > { %v4671_v4 = vpop.f32.mrf.mxu1  ;;  %v4857_v33 = vmax.f32 %v4841_v61, 0.0  ;;  %v4731_v50 = vadd.f32 %v4730_v53, %v4666_v34 }
 0x8cf   : > { %v4672_v37 = vadd.f32 %v4671_v4, %v4607_v51  ;;  %v11792_v51 = vrot.slane %v11791_v24, 2 }
 0x8d0   : > { %4873 = vst [vmem:[%s9909_s22 + $0x18] sm:$0xff] %v4857_v33  ;;  %v4774_v16 = vmul.f32 %v9887_v20, %v4731_v50 }
 0x8d2   : > { %v4794_v3 = vadd.f32 %v9893_v43, %v4774_v16  ;;  %v11786_v16 = vrot.slane %v11785_v18, 2  ;;  %v11797_v18 = vld [vmem:[#allocation98_spill] sm:$0xff] }
 0x8d4   : > { %v4842_v57 = vadd.f32 %v4810_v8, %v4794_v3  ;;  %v4615_v33 = vpop.f32.mrf.mxu0  ;;  %v4813_v2 = vsel %vm11787_vm0, %v11782_v59, %v11786_v16  ;;  %v4556_v54 = vpop.f32.mrf.mxu3  ;;  %v11794_v59 = vld [vmem:[#allocation334_spill] sm:$0xff]  ;;  %v11798_v16 = vrot.slane %v11797_v18, 2 }
 0x8d5   : > { %v4733_v22 = vpop.f32.mrf.mxu2  ;;  %v4616_v28 = vadd.f32 %v4615_v33, %v4551_v0  ;;  %v4557_v39 = vadd.f32 %v4556_v54, %v9853_v7 }
 0x8d6   : > { %v4674_v55 = vpop.f32.mrf.mxu1  ;;  %v4858_v36 = vmax.f32 %v4842_v57, 0.0  ;;  %v4734_v29 = vadd.f32 %v4733_v22, %v4669_v32  ;;  %v11789_v22 = vld [vmem:[#allocation325_spill] sm:$0xff] }
 0x8d7   : > { %v4675_v61 = vadd.f32 %v4674_v55, %v4610_v5  ;;  %v11788_v55 = vld [vmem:[#allocation323_spill] sm:$0xff] }
 0x8d8   : > { %4874 = vst [vmem:[%s9909_s22 + $0x20] sm:$0xff] %v4858_v36  ;;  %v4775_v45 = vmul.f32 %v9887_v20, %v4734_v29  ;;  %v4814_v21 = vsel %vm11790_vm1, %v11789_v22, %v11788_v55 }
 0x8da   : > { %v4795_v23 = vadd.f32 %v9893_v43, %v4775_v45 }
 0x8dc   : > { %v4843_v40 = vadd.f32 %v4811_v46, %v4795_v23  ;;  %v4618_v57 = vpop.f32.mrf.mxu0  ;;  %v4815_v23 = vsel %vm11793_vm12, %v11788_v55, %v11792_v51 }
 0x8dd   : > { %v4736_v63 = vpop.f32.mrf.mxu2  ;;  %v4619_v25 = vadd.f32 %v4618_v57, %v4554_v41  ;;  %v11801_v57 = vld [vmem:[#allocation331_spill] sm:$0xff] }
 0x8de   : > { %v4677_v1 = vpop.f32.mrf.mxu1  ;;  %v4859_v60 = vmax.f32 %v4843_v40, 0.0  ;;  %v4737_v15 = vadd.f32 %v4736_v63, %v4672_v37 }
 0x8df   : > { %v4678_v26 = vadd.f32 %v4677_v1, %v4613_v27 }
 0x8e0   : > { %4875 = vst [vmem:[%s9909_s22 + $0x28] sm:$0xff] %v4859_v60  ;;  %v4776_v58 = vmul.f32 %v9887_v20, %v4737_v15 }
 0x8e2   : > { %v4796_v34 = vadd.f32 %v9893_v43, %v4776_v58  ;;  %v4559_v58 = vpop.f32.mrf.mxu3 }
 0x8e3   : > { %v4560_v7 = vadd.f32 %v4559_v58, %v9858_v17  ;;  %v11806_v58 = vld [vmem:[#allocation344_spill] sm:$0xff] }
 0x8e4   : > { %v4844_v4 = vadd.f32 %v4812_v52, %v4796_v34  ;;  %v4621_v40 = vpop.f32.mrf.mxu0  ;;  %v4816_v52 = vsel %vm11796_vm9, %v11795_v56, %v11794_v59 }
 0x8e5   : > { %v4739_v10 = vpop.f32.mrf.mxu2  ;;  %v4622_v5 = vadd.f32 %v4621_v40, %v4557_v39 }
 0x8e6   : > { %v4680_v53 = vpop.f32.mrf.mxu1  ;;  %v4860_v19 = vmax.f32 %v4844_v4, 0.0  ;;  %v4740_v48 = vadd.f32 %v4739_v10, %v4675_v61 }
 0x8e7   : > { %v4681_v36 = vadd.f32 %v4680_v53, %v4616_v28 }
 0x8e8   : > { %4876 = vst [vmem:[%s9909_s22 + $0x30] sm:$0xff] %v4860_v19  ;;  %v4777_v50 = vmul.f32 %v9887_v20, %v4740_v48 }
 0x8ea   : > { %v4797_v8 = vadd.f32 %v9893_v43, %v4777_v50  ;;  %v4562_v50 = vpop.f32.mrf.mxu3 }
 0x8eb   : > { %v4563_v17 = vadd.f32 %v4562_v50, %v9863_v14 }
 0x8ec   : > { %v4845_v38 = vadd.f32 %v4813_v2, %v4797_v8  ;;  %v4624_v10 = vpop.f32.mrf.mxu0  ;;  %v4817_v2 = vsel %vm11799_vm11, %v11794_v59, %v11798_v16 }
 0x8ed   : > { %v4742_v44 = vpop.f32.mrf.mxu2  ;;  %v4625_v27 = vadd.f32 %v4624_v10, %v4560_v7  ;;  %v11809_v10 = vld [vmem:[#allocation119_spill] sm:$0xff] }
 0x8ee   : > { %v4861_v42 = vmax.f32 %v4845_v38, 0.0  ;;  %v4743_v3 = vadd.f32 %v4742_v44, %v4678_v26  ;;  %v4683_v12 = vpop.f32.mrf.mxu1 }
 0x8ef   : > { %v4684_v1 = vadd.f32 %v4683_v12, %v4619_v25 }
 0x8f0   : > { %4877 = vst [vmem:[%s9909_s22 + $0x38] sm:$0xff] %v4861_v42  ;;  %v4778_v32 = vmul.f32 %v9887_v20, %v4743_v3 }
 0x8f2   : > { %v4798_v13 = vadd.f32 %v9893_v43, %v4778_v32  ;;  %v11800_v32 = vld [vmem:[#allocation339_spill] sm:$0xff]  ;;  %v4565_v28 = vpop.f32.mrf.mxu3 }
 0x8f3   : > { %v4818_v55 = vsel %vm11802_vm15, %v11801_v57, %v11800_v32  ;;  %v4566_v14 = vadd.f32 %v4565_v28, %v9870_v62 }
 0x8f4   : > { %v4846_v29 = vadd.f32 %v4814_v21, %v4798_v13  ;;  %v4627_v3 = vpop.f32.mrf.mxu0 }
 0x8f5   : > { %v4745_v11 = vpop.f32.mrf.mxu2  ;;  %v4628_v22 = vadd.f32 %v4627_v3, %v4563_v17 }
 0x8f6   : > { %v4862_v45 = vmax.f32 %v4846_v29, 0.0  ;;  %v4746_v6 = vadd.f32 %v4745_v11, %v4681_v36  ;;  %v4686_v46 = vpop.f32.mrf.mxu1 }
 0x8f7   : > { %v4687_v4 = vadd.f32 %v4686_v46, %v4622_v5 }
 0x8f8   : > { %4878 = vst [vmem:[%s9909_s22 + $0x40] sm:$0xff] %v4862_v45  ;;  %v4779_v31 = vmul.f32 %v9887_v20, %v4746_v6 }
 0x8fa   : > { %v4799_v37 = vadd.f32 %v9893_v43, %v4779_v31  ;;  %v11803_v31 = vld [vmem:[#allocation86_spill] sm:$0xff] }
 0x8fb   : > { %v11804_v46 = vrot.slane %v11803_v31, 2 }
 0x8fc   : > { %v4847_v63 = vadd.f32 %v4815_v23, %v4799_v37  ;;  %v4630_v41 = vpop.f32.mrf.mxu0  ;;  %v4568_v37 = vpop.f32.mrf.mxu3 }
 0x8fd   : > { %v4748_v49 = vpop.f32.mrf.mxu2  ;;  %v4819_v24 = vsel %vm11805_vm6, %v11800_v32, %v11804_v46  ;;  %v4631_v51 = vadd.f32 %v4630_v41, %v4566_v14 }
 0x8fe   : > { %v4863_v60 = vmax.f32 %v4847_v63, 0.0  ;;  %v4749_v15 = vadd.f32 %v4748_v49, %v4684_v1  ;;  %v4689_v61 = vpop.f32.mrf.mxu1  ;;  %v4569_v1 = vadd.f32 %v4568_v37, %v9878_v47 }
 0x8ff   : > { %v4690_v35 = vadd.f32 %v4689_v61, %v4625_v27 }
 0x900   : > { %4879 = vst [vmem:[%s9909_s22 + $0x48] sm:$0xff] %v4863_v60  ;;  %v4780_v30 = vmul.f32 %v9887_v20, %v4749_v15 }
 0x902   : > { %v4800_v34 = vadd.f32 %v9893_v43, %v4780_v30  ;;  %v11807_v30 = vld [vmem:[#allocation337_spill] sm:$0xff] }
 0x903   : > { %v4820_v59 = vsel %vm11808_vm14, %v11807_v30, %v11806_v58 }
 0x904   : > { %v4848_v53 = vadd.f32 %v4816_v52, %v4800_v34  ;;  %v4633_v60 = vpop.f32.mrf.mxu0 }
 0x905   : > { %v4751_v9 = vpop.f32.mrf.mxu2  ;;  %v4634_v56 = vadd.f32 %v4633_v60, %v4569_v1 }
 0x906   : > { %v4864_v19 = vmax.f32 %v4848_v53, 0.0  ;;  %v4752_v48 = vadd.f32 %v4751_v9, %v4687_v4  ;;  %v4692_v38 = vpop.f32.mrf.mxu1  ;;  %v11810_v9 = vrot.slane %v11809_v10, 2 }
 0x907   : > { %v4693_v13 = vadd.f32 %v4692_v38, %v4628_v22 }
 0x908   : > { %4880 = vst [vmem:[%s9909_s22 + $0x50] sm:$0xff] %v4864_v19  ;;  %v4781_v33 = vmul.f32 %v9887_v20, %v4752_v48  ;;  %v4821_v7 = vsel %vm11811_vm4, %v11806_v58, %v11810_v9 }
 0x90a   : > { %v4801_v8 = vadd.f32 %v9893_v43, %v4781_v33 }
 0x90c   : > { %v4849_v26 = vadd.f32 %v4817_v2, %v4801_v8 }
 0x90d   : > { %v4754_v44 = vpop.f32.mrf.mxu2 }
 0x90e   : > { %v4865_v0 = vmax.f32 %v4849_v26, 0.0  ;;  %v4755_v42 = vadd.f32 %v4754_v44, %v4690_v35  ;;  %v4695_v45 = vpop.f32.mrf.mxu1 }
 0x90f   : > { %v4696_v25 = vadd.f32 %v4695_v45, %v4631_v51 }
 0x910   : > { %4881 = vst [vmem:[%s9909_s22 + $0x58] sm:$0xff] %v4865_v0  ;;  %v4782_v12 = vmul.f32 %v9887_v20, %v4755_v42 }
 0x912   : > { %v4802_v21 = vadd.f32 %v9893_v43, %v4782_v12 }
 0x914   : > { %v4850_v36 = vadd.f32 %v4818_v55, %v4802_v21 }
 0x915   : > { %v4757_v29 = vpop.f32.mrf.mxu2 }
 0x916   : > { %v4866_v54 = vmax.f32 %v4850_v36, 0.0  ;;  %v4758_v11 = vadd.f32 %v4757_v29, %v4693_v13  ;;  %v4698_v15 = vpop.f32.mrf.mxu1 }
 0x917   : > { %v4699_v47 = vadd.f32 %v4698_v15, %v4634_v56 }
 0x918   : > { %4882 = vst [vmem:[%s9909_s22 + $0x60] sm:$0xff] %v4866_v54  ;;  %v4783_v6 = vmul.f32 %v9887_v20, %v4758_v11 }
 0x91a   : > { %v4803_v23 = vadd.f32 %v9893_v43, %v4783_v6 }
 0x91c   : > { %v4851_v62 = vadd.f32 %v4819_v24, %v4803_v23 }
 0x91d   : > { %v4760_v40 = vpop.f32.mrf.mxu2 }
 0x91e   : > { %v4867_v63 = vmax.f32 %v4851_v62, 0.0  ;;  %v4761_v49 = vadd.f32 %v4760_v40, %v4696_v25 }
 0x920   : > { %4883 = vst [vmem:[%s9909_s22 + $0x68] sm:$0xff] %v4867_v63  ;;  %v4784_v39 = vmul.f32 %v9887_v20, %v4761_v49 }
 0x922   : > { %v4804_v52 = vadd.f32 %v9893_v43, %v4784_v39 }
 0x924   : > { %v4852_v5 = vadd.f32 %v4820_v59, %v4804_v52 }
 0x925   : > { %v4763_v34 = vpop.f32.mrf.mxu2 }
 0x926   : > { %v4868_v61 = vmax.f32 %v4852_v5, 0.0  ;;  %v4764_v4 = vadd.f32 %v4763_v34, %v4699_v47 }
 0x928   : > { %4884 = vst [vmem:[%s9909_s22 + $0x70] sm:$0xff] %v4868_v61  ;;  %v4785_v53 = vmul.f32 %v9887_v20, %v4764_v4 }
 0x92a   : > { %v4805_v19 = vadd.f32 %v9893_v43, %v4785_v53 }
 0x92c   : > { %v4853_v48 = vadd.f32 %v4821_v7, %v4805_v19 }
 0x92e   : > { %v4869_v33 = vmax.f32 %v4853_v48, 0.0 }
 0x930   : > { %4885 = vst [vmem:[%s9909_s22 + $0x78] sm:$0xff] %v4869_v33 }
 0x931   : > { %5280 = shalt.err (!%p5277_p10)
}
 0x932   : > { %s5356_s11 = smov 128   ;;  %s5357_s22 = smov 8  }
 0x933   : > { %5135 = dma.vmem_to_hbm [thread:$0]  (%p5450_p3), %s4903_s13, 2048, %s4905_s17, %s4887_s4, %s5356_s11, %s5356_s11, %s5357_s22  }
 0x934 PF: > { %p5147_p11 = scmp.ge.s32.totalorder %s5351_s8, 2  ;;  %s4919_s28 = sand.u32 1, %s5323_s24  }
 0x935   : > { %s4920_s23 = scalar_lea.sflag [#allocation4], %s4919_s28 }
 0x936   : > { %p5142_p12 = pnand %p5147_p11, %p5459_p8 }
 0x938   : > { %p5143_p13 = pneg %p5142_p12 }
 0x93a   : > { %5318 = dma.done.wait (%p5143_p13), %s4920_s23, 2048  }
 0x93b   : > { %5320 = vsyncadd (%p5143_p13), %s4920_s23, 4294965248  ;;  %s21_s8 = sadd.s32 1, %s5351_s8   ;;  %s11812_s15 = sld [smem:[#allocation8_spill]] }
 0x93c   : > { %p18_p0 = scmp.ge.s32.totalorder %s21_s8, 6   ;;  %s11813_s19 = sld [smem:[#allocation9_spill]] }
 0x93d   : > { %s11814_s24 = smov %s5327_s25  ;;  %s11815_s25 = smov %s5331_s26 }
 0x93e   : > { %s11816_s26 = smov %s5480_s10  ;;  %s11817_s27 = smov %s5343_s29 }
 0x93f   : > { %s11818_s28 = smov %s5347_s30  ;;  %20 = sbr.rel (!%p18_p0) target bundleno = 8 (0x8), region = 180 }
 0x941   : > { %s11819_s29 = smov %s11812_s15 }
 0x942   : > { %s11820_s30 = smov %s11813_s19 }
 0x944   :  { %4926 = vsyncpa [#allocation3], 1 }
 0x945   :  { %4928 = vsyncpa [#allocation3 + $0x1], 1 }
 0x946   :  { %4929 = vsyncpa [#allocation4], 1 }
 0x947   :  { %4931 = vsyncpa [#allocation4 + $0x1], 1 }

</bundles_post_ra>
